<compile_context>
chip_gen: v6e
topology: v6e:2x2x1
jax: 0.10.0
libtpu: 0.0.40
codegen_flags: <defaults>
</compile_context>

<pallas_src>
import math
import numpy as np
import jax
import jax.numpy as jnp
from jax import lax
from jax.experimental import pallas as pl
from jax.experimental.pallas import tpu as pltpu

NEG_SLOPE = 0.01


def _leaky(x):
    return jnp.where(x >= 0, x, NEG_SLOPE * x)


def _pair(v):
    return (v, v) if isinstance(v, int) else tuple(v)


# ------------------------------ Pallas kernel ------------------------------ #

def _make_tconv_kernel(kh, kw, dil_h, dil_w, th, Wo, Cout):
    """Fused stride-1 conv (in-kernel tap accumulation) + bias + LeakyReLU."""

    def kernel(x_ref, w_ref, b_ref, o_ref):
        # x_ref: (th + dil_h*(kh-1), Wp, Cin)  halo'd row window (dilated+padded input)
        # w_ref: (kh, kw, Cin, Cout)           VMEM-resident across the whole grid
        # b_ref: (1, Cout)                     VMEM-resident
        # o_ref: (th, Wo, Cout)
        x = x_ref[...]
        w = w_ref[...]
        cin = x.shape[-1]
        acc = jnp.zeros((th * Wo, Cout), jnp.float32)
        # kh*kw shifted taps accumulated in VMEM -> no HBM im2col blow-up.
        for dy in range(kh):
            for dx in range(kw):
                xs = x[dy * dil_h:dy * dil_h + th,
                       dx * dil_w:dx * dil_w + Wo, :].reshape(th * Wo, cin)
                acc = acc + jnp.dot(xs, w[dy, dx],
                                    preferred_element_type=jnp.float32)
        acc = acc + b_ref[...]                      # (1, Cout) broadcasts over rows
        o_ref[...] = _leaky(acc).astype(o_ref.dtype).reshape(th, Wo, Cout)

    return kernel


# --------------------------------- wrapper ---------------------------------- #

def tconv_leaky_forward(x_nchw, w_torch, b, *, stride=1, padding=0,
                        output_padding=0, dilation=1):
    """LeakyReLU(ConvTranspose2d(x)).  x: NCHW, w_torch: (Cin, Cout, kH, kW), groups=1."""
    N, Cin, H, W = x_nchw.shape
    _, Cout, kh, kw = w_torch.shape
    sh, sw = _pair(stride)
    ph, pw = _pair(padding)
    oph, opw = _pair(output_padding)
    dh, dw = _pair(dilation)

    # Equivalent regular-conv weight (HWIO): swap in/out channels + spatial flip.
    w_hwio = jnp.transpose(w_torch, (2, 3, 0, 1))[::-1, ::-1, :, :]

    x = jnp.transpose(x_nchw, (0, 2, 3, 1))                      # -> NHWC

    # 1) zero-dilate the input by the stride ("fractional stride")
    Hu, Wu = (H - 1) * sh + 1, (W - 1) * sw + 1
    x_up = jnp.zeros((N, Hu, Wu, Cin), x.dtype).at[:, ::sh, ::sw, :].set(x)

    # 2) pad so a stride-1 conv with the flipped kernel reproduces ConvTranspose2d
    pt = dh * (kh - 1) - ph
    pb = pt + oph
    pleft = dw * (kw - 1) - pw
    pright = pleft + opw
    x_pad = jnp.pad(x_up, ((0, 0),
                           (max(pt, 0), max(pb, 0)),
                           (max(pleft, 0), max(pright, 0)),
                           (0, 0)))
    x_pad = x_pad[:, -min(pt, 0):x_pad.shape[1] + min(pb, 0),
                  -min(pleft, 0):x_pad.shape[2] + min(pright, 0), :]

    halo_h, halo_w = dh * (kh - 1), dw * (kw - 1)
    Ho = x_pad.shape[1] - halo_h
    Wo = x_pad.shape[2] - halo_w
    assert Ho == (H - 1) * sh - 2 * ph + dh * (kh - 1) + oph + 1
    assert Wo == (W - 1) * sw - 2 * pw + dw * (kw - 1) + opw + 1

    # 3) row-tile size from a VMEM budget (2 pipeline buffers + resident weights)
    bytes_per_row = (x_pad.shape[2] * Cin + Wo * Cout) * 4
    th = int(max(1, min(Ho, (4 * 1024 * 1024) // max(bytes_per_row, 1))))
    n_tiles = -(-Ho // th)                                        # cdiv
    Ho_pad = n_tiles * th

    # make sure the last (possibly overhanging) tile still has a full halo'd window
    rows_needed = Ho_pad + halo_h
    if rows_needed > x_pad.shape[1]:
        x_pad = jnp.pad(x_pad,
                        ((0, 0), (0, rows_needed - x_pad.shape[1]), (0, 0), (0, 0)))
    Wp = x_pad.shape[2]

    # 4) overlapping row windows -> plain Blocked BlockSpecs (auto double-buffering).
    #    Halo duplication is only halo_h/th extra bytes (not a k^2 im2col blow-up).
    wins = [x_pad[:, i * th:i * th + th + halo_h, :, :] for i in range(n_tiles)]
    x_win = jnp.stack(wins, axis=1)          # [N, n_tiles, th+halo_h, Wp, Cin]

    kernel = _make_tconv_kernel(kh, kw, dh, dw, th, Wo, Cout)

    out = pl.pallas_call(
        kernel,
        out_shape=jax.ShapeDtypeStruct((N, Ho_pad, Wo, Cout), x.dtype),
        grid=(N, n_tiles),
        in_specs=[
            pl.BlockSpec((None, None, th + halo_h, Wp, Cin),
                         lambda n, i: (n, i, 0, 0, 0)),
            pl.BlockSpec((kh, kw, Cin, Cout), lambda n, i: (0, 0, 0, 0)),  # resident
            pl.BlockSpec((1, Cout), lambda n, i: (0, 0)),                  # resident
        ],
        out_specs=pl.BlockSpec((None, th, Wo, Cout), lambda n, i: (n, i, 0, 0)),
        compiler_params=pltpu.CompilerParams(
            dimension_semantics=("parallel", "parallel"),
            vmem_limit_bytes=48 * 1024 * 1024),
    )(x_win, w_hwio, b.reshape(1, Cout))

    out = out[:, :Ho]                                            # drop row-tile padding
    return jnp.transpose(out, (0, 3, 1, 2))                      # -> NCHW


# ------------------------------- reference ---------------------------------- #

def tconv_leaky_reference(x_nchw, w_torch, b, *, stride=1, padding=0,
                          output_padding=0, dilation=1):
    sh, sw = _pair(stride)
    ph, pw = _pair(padding)
    oph, opw = _pair(output_padding)
    dh, dw = _pair(dilation)
    _, _, kh, kw = w_torch.shape
    w_hwio = jnp.transpose(w_torch, (2, 3, 0, 1))[::-1, ::-1, :, :]
    x = jnp.transpose(x_nchw, (0, 2, 3, 1))
    y = lax.conv_general_dilated(
        x, w_hwio, window_strides=(1, 1),
        padding=[(dh * (kh - 1) - ph, dh * (kh - 1) - ph + oph),
                 (dw * (kw - 1) - pw, dw * (kw - 1) - pw + opw)],
        lhs_dilation=(sh, sw), rhs_dilation=(dh, dw),
        dimension_numbers=("NHWC", "HWIO", "NHWC"))
    y = _leaky(y + b.reshape(1, 1, 1, -1))
    return jnp.transpose(y, (0, 3, 1, 2))


# ---------------------------------- main ------------------------------------ #

if __name__ == "__main__":
    N, Cin, H, W = 2, 4, 16, 16
    Cout, k = 8, 3
    stride, padding, output_padding, dilation = 2, 1, 1, 1

    key = jax.random.PRNGKey(0)
    kx, kw_, kb = jax.random.split(key, 3)
    x = jax.random.normal(kx, (N, Cin, H, W), dtype=jnp.float32)     # NCHW, as in PyTorch
    bound = 1.0 / math.sqrt(Cin * k * k)
    w = jax.random.uniform(kw_, (Cin, Cout, k, k), jnp.float32, -bound, bound)
    b = jax.random.uniform(kb, (Cout,), jnp.float32, -bound, bound)

    fwd = jax.jit(lambda x_, w_, b_: tconv_leaky_forward(
        x_, w_, b_, stride=stride, padding=padding,
        output_padding=output_padding, dilation=dilation))

    out = jax.block_until_ready(fwd(x, w, b))
    ref = jax.block_until_ready(tconv_leaky_reference(
        x, w, b, stride=stride, padding=padding,
        output_padding=output_padding, dilation=dilation))

    Ho = (H - 1) * stride - 2 * padding + dilation * (k - 1) + output_padding + 1
    Wo = (W - 1) * stride - 2 * padding + dilation * (k - 1) + output_padding + 1
    assert out.shape == (N, Cout, Ho, Wo), out.shape
    np.testing.assert_allclose(np.asarray(out), np.asarray(ref), atol=1e-4, rtol=1e-4)

    print("KERNEL_OK")
</pallas_src>

<mosaic_0001>
module attributes {stable_mosaic.version = 11 : i64} {
  func.func @kernel(%arg0: i32, %arg1: i32, %arg2: memref<1x1x34x34x4xf32, #tpu.memory_space<vmem>>, %arg3: memref<3x3x4x8xf32, #tpu.memory_space<vmem>>, %arg4: memref<1x8xf32, #tpu.memory_space<vmem>>, %arg5: memref<1x32x32x8xf32, #tpu.memory_space<vmem>>) attributes {dimension_semantics = [#tpu.dimension_semantics<parallel>, #tpu.dimension_semantics<parallel>], iteration_bounds = array<i64: 2, 1>, scalar_prefetch = 0 : i64, scratch_operands = 0 : i64, tpu.core_type = #tpu.core_type<tc>, window_params = [{transform_indices = @transform_0, window_bounds = array<i64: 1, 1, 34, 34, 4>}, {pipeline_mode = #tpu.pipeline_mode<synchronous>, transform_indices = @transform_1, window_bounds = array<i64: 3, 3, 4, 8>}, {pipeline_mode = #tpu.pipeline_mode<synchronous>, transform_indices = @transform_2, window_bounds = array<i64: 1, 8>}, {transform_indices = @transform_3, window_bounds = array<i64: 1, 32, 32, 8>}]} {
    %c0 = arith.constant 0 : index
    %c0_0 = arith.constant 0 : index
    %c0_1 = arith.constant 0 : index
    %c0_2 = arith.constant 0 : index
    %c0_3 = arith.constant 0 : index
    %0 = vector.load %arg2[%c0, %c0_0, %c0_1, %c0_2, %c0_3] : memref<1x1x34x34x4xf32, #tpu.memory_space<vmem>>, vector<1x1x34x34x4xf32>
    %1 = vector.shape_cast %0 : vector<1x1x34x34x4xf32> to vector<34x34x4xf32>
    %c0_4 = arith.constant 0 : index
    %c0_5 = arith.constant 0 : index
    %c0_6 = arith.constant 0 : index
    %c0_7 = arith.constant 0 : index
    %2 = vector.load %arg3[%c0_4, %c0_5, %c0_6, %c0_7] : memref<3x3x4x8xf32, #tpu.memory_space<vmem>>, vector<3x3x4x8xf32>
    %cst = arith.constant 0.000000e+00 : f32
    %3 = vector.broadcast %cst : f32 to vector<1024x8xf32>
    %4 = vector.extract_strided_slice %1 {offsets = [0, 0, 0], sizes = [32, 32, 4], strides = [1, 1, 1]} : vector<34x34x4xf32> to vector<32x32x4xf32>
    %5 = vector.shape_cast %4 : vector<32x32x4xf32> to vector<1024x4xf32>
    %6 = vector.extract_strided_slice %2 {offsets = [0, 0, 0, 0], sizes = [1, 1, 4, 8], strides = [1, 1, 1, 1]} : vector<3x3x4x8xf32> to vector<1x1x4x8xf32>
    %7 = vector.shape_cast %6 : vector<1x1x4x8xf32> to vector<4x8xf32>
    %cst_8 = arith.constant dense<0.000000e+00> : vector<1024x8xf32>
    %8 = tpu.matmul %5, %7, %cst_8 {dimension_numbers = #tpu.dot_dimension_numbers<[1], [0], [0], [1], [0, 0, 1, 1], [], []>} : vector<1024x4xf32>, vector<4x8xf32>, vector<1024x8xf32> -> vector<1024x8xf32>
    %9 = arith.addf %3, %8 : vector<1024x8xf32>
    %10 = vector.extract_strided_slice %1 {offsets = [0, 1, 0], sizes = [32, 32, 4], strides = [1, 1, 1]} : vector<34x34x4xf32> to vector<32x32x4xf32>
    %11 = vector.shape_cast %10 : vector<32x32x4xf32> to vector<1024x4xf32>
    %12 = vector.extract_strided_slice %2 {offsets = [0, 1, 0, 0], sizes = [1, 1, 4, 8], strides = [1, 1, 1, 1]} : vector<3x3x4x8xf32> to vector<1x1x4x8xf32>
    %13 = vector.shape_cast %12 : vector<1x1x4x8xf32> to vector<4x8xf32>
    %cst_9 = arith.constant dense<0.000000e+00> : vector<1024x8xf32>
    %14 = tpu.matmul %11, %13, %cst_9 {dimension_numbers = #tpu.dot_dimension_numbers<[1], [0], [0], [1], [0, 0, 1, 1], [], []>} : vector<1024x4xf32>, vector<4x8xf32>, vector<1024x8xf32> -> vector<1024x8xf32>
    %15 = arith.addf %9, %14 : vector<1024x8xf32>
    %16 = vector.extract_strided_slice %1 {offsets = [0, 2, 0], sizes = [32, 32, 4], strides = [1, 1, 1]} : vector<34x34x4xf32> to vector<32x32x4xf32>
    %17 = vector.shape_cast %16 : vector<32x32x4xf32> to vector<1024x4xf32>
    %18 = vector.extract_strided_slice %2 {offsets = [0, 2, 0, 0], sizes = [1, 1, 4, 8], strides = [1, 1, 1, 1]} : vector<3x3x4x8xf32> to vector<1x1x4x8xf32>
    %19 = vector.shape_cast %18 : vector<1x1x4x8xf32> to vector<4x8xf32>
    %cst_10 = arith.constant dense<0.000000e+00> : vector<1024x8xf32>
    %20 = tpu.matmul %17, %19, %cst_10 {dimension_numbers = #tpu.dot_dimension_numbers<[1], [0], [0], [1], [0, 0, 1, 1], [], []>} : vector<1024x4xf32>, vector<4x8xf32>, vector<1024x8xf32> -> vector<1024x8xf32>
    %21 = arith.addf %15, %20 : vector<1024x8xf32>
    %22 = vector.extract_strided_slice %1 {offsets = [1, 0, 0], sizes = [32, 32, 4], strides = [1, 1, 1]} : vector<34x34x4xf32> to vector<32x32x4xf32>
    %23 = vector.shape_cast %22 : vector<32x32x4xf32> to vector<1024x4xf32>
    %24 = vector.extract_strided_slice %2 {offsets = [1, 0, 0, 0], sizes = [1, 1, 4, 8], strides = [1, 1, 1, 1]} : vector<3x3x4x8xf32> to vector<1x1x4x8xf32>
    %25 = vector.shape_cast %24 : vector<1x1x4x8xf32> to vector<4x8xf32>
    %cst_11 = arith.constant dense<0.000000e+00> : vector<1024x8xf32>
    %26 = tpu.matmul %23, %25, %cst_11 {dimension_numbers = #tpu.dot_dimension_numbers<[1], [0], [0], [1], [0, 0, 1, 1], [], []>} : vector<1024x4xf32>, vector<4x8xf32>, vector<1024x8xf32> -> vector<1024x8xf32>
    %27 = arith.addf %21, %26 : vector<1024x8xf32>
    %28 = vector.extract_strided_slice %1 {offsets = [1, 1, 0], sizes = [32, 32, 4], strides = [1, 1, 1]} : vector<34x34x4xf32> to vector<32x32x4xf32>
    %29 = vector.shape_cast %28 : vector<32x32x4xf32> to vector<1024x4xf32>
    %30 = vector.extract_strided_slice %2 {offsets = [1, 1, 0, 0], sizes = [1, 1, 4, 8], strides = [1, 1, 1, 1]} : vector<3x3x4x8xf32> to vector<1x1x4x8xf32>
    %31 = vector.shape_cast %30 : vector<1x1x4x8xf32> to vector<4x8xf32>
    %cst_12 = arith.constant dense<0.000000e+00> : vector<1024x8xf32>
    %32 = tpu.matmul %29, %31, %cst_12 {dimension_numbers = #tpu.dot_dimension_numbers<[1], [0], [0], [1], [0, 0, 1, 1], [], []>} : vector<1024x4xf32>, vector<4x8xf32>, vector<1024x8xf32> -> vector<1024x8xf32>
    %33 = arith.addf %27, %32 : vector<1024x8xf32>
    %34 = vector.extract_strided_slice %1 {offsets = [1, 2, 0], sizes = [32, 32, 4], strides = [1, 1, 1]} : vector<34x34x4xf32> to vector<32x32x4xf32>
    %35 = vector.shape_cast %34 : vector<32x32x4xf32> to vector<1024x4xf32>
    %36 = vector.extract_strided_slice %2 {offsets = [1, 2, 0, 0], sizes = [1, 1, 4, 8], strides = [1, 1, 1, 1]} : vector<3x3x4x8xf32> to vector<1x1x4x8xf32>
    %37 = vector.shape_cast %36 : vector<1x1x4x8xf32> to vector<4x8xf32>
    %cst_13 = arith.constant dense<0.000000e+00> : vector<1024x8xf32>
    %38 = tpu.matmul %35, %37, %cst_13 {dimension_numbers = #tpu.dot_dimension_numbers<[1], [0], [0], [1], [0, 0, 1, 1], [], []>} : vector<1024x4xf32>, vector<4x8xf32>, vector<1024x8xf32> -> vector<1024x8xf32>
    %39 = arith.addf %33, %38 : vector<1024x8xf32>
    %40 = vector.extract_strided_slice %1 {offsets = [2, 0, 0], sizes = [32, 32, 4], strides = [1, 1, 1]} : vector<34x34x4xf32> to vector<32x32x4xf32>
    %41 = vector.shape_cast %40 : vector<32x32x4xf32> to vector<1024x4xf32>
    %42 = vector.extract_strided_slice %2 {offsets = [2, 0, 0, 0], sizes = [1, 1, 4, 8], strides = [1, 1, 1, 1]} : vector<3x3x4x8xf32> to vector<1x1x4x8xf32>
    %43 = vector.shape_cast %42 : vector<1x1x4x8xf32> to vector<4x8xf32>
    %cst_14 = arith.constant dense<0.000000e+00> : vector<1024x8xf32>
    %44 = tpu.matmul %41, %43, %cst_14 {dimension_numbers = #tpu.dot_dimension_numbers<[1], [0], [0], [1], [0, 0, 1, 1], [], []>} : vector<1024x4xf32>, vector<4x8xf32>, vector<1024x8xf32> -> vector<1024x8xf32>
    %45 = arith.addf %39, %44 : vector<1024x8xf32>
    %46 = vector.extract_strided_slice %1 {offsets = [2, 1, 0], sizes = [32, 32, 4], strides = [1, 1, 1]} : vector<34x34x4xf32> to vector<32x32x4xf32>
    %47 = vector.shape_cast %46 : vector<32x32x4xf32> to vector<1024x4xf32>
    %48 = vector.extract_strided_slice %2 {offsets = [2, 1, 0, 0], sizes = [1, 1, 4, 8], strides = [1, 1, 1, 1]} : vector<3x3x4x8xf32> to vector<1x1x4x8xf32>
    %49 = vector.shape_cast %48 : vector<1x1x4x8xf32> to vector<4x8xf32>
    %cst_15 = arith.constant dense<0.000000e+00> : vector<1024x8xf32>
    %50 = tpu.matmul %47, %49, %cst_15 {dimension_numbers = #tpu.dot_dimension_numbers<[1], [0], [0], [1], [0, 0, 1, 1], [], []>} : vector<1024x4xf32>, vector<4x8xf32>, vector<1024x8xf32> -> vector<1024x8xf32>
    %51 = arith.addf %45, %50 : vector<1024x8xf32>
    %52 = vector.extract_strided_slice %1 {offsets = [2, 2, 0], sizes = [32, 32, 4], strides = [1, 1, 1]} : vector<34x34x4xf32> to vector<32x32x4xf32>
    %53 = vector.shape_cast %52 : vector<32x32x4xf32> to vector<1024x4xf32>
    %54 = vector.extract_strided_slice %2 {offsets = [2, 2, 0, 0], sizes = [1, 1, 4, 8], strides = [1, 1, 1, 1]} : vector<3x3x4x8xf32> to vector<1x1x4x8xf32>
    %55 = vector.shape_cast %54 : vector<1x1x4x8xf32> to vector<4x8xf32>
    %cst_16 = arith.constant dense<0.000000e+00> : vector<1024x8xf32>
    %56 = tpu.matmul %53, %55, %cst_16 {dimension_numbers = #tpu.dot_dimension_numbers<[1], [0], [0], [1], [0, 0, 1, 1], [], []>} : vector<1024x4xf32>, vector<4x8xf32>, vector<1024x8xf32> -> vector<1024x8xf32>
    %57 = arith.addf %51, %56 : vector<1024x8xf32>
    %c0_17 = arith.constant 0 : index
    %c0_18 = arith.constant 0 : index
    %58 = vector.load %arg4[%c0_17, %c0_18] : memref<1x8xf32, #tpu.memory_space<vmem>>, vector<1x8xf32>
    %59 = vector.broadcast %58 : vector<1x8xf32> to vector<1024x8xf32>
    %60 = arith.addf %57, %59 : vector<1024x8xf32>
    %cst_19 = arith.constant 0.000000e+00 : f32
    %61 = vector.broadcast %cst_19 : f32 to vector<1024x8xf32>
    %62 = arith.cmpf oge, %60, %61 : vector<1024x8xf32>
    %cst_20 = arith.constant 0.00999999977 : f32
    %63 = vector.broadcast %cst_20 : f32 to vector<1024x8xf32>
    %64 = arith.mulf %63, %60 : vector<1024x8xf32>
    %65 = arith.select %62, %60, %64 : vector<1024x8xi1>, vector<1024x8xf32>
    %66 = vector.shape_cast %65 : vector<1024x8xf32> to vector<32x32x8xf32>
    %c0_21 = arith.constant 0 : index
    %c0_22 = arith.constant 0 : index
    %c0_23 = arith.constant 0 : index
    %c0_24 = arith.constant 0 : index
    %67 = vector.load %arg5[%c0_21, %c0_22, %c0_23, %c0_24] : memref<1x32x32x8xf32, #tpu.memory_space<vmem>>, vector<1x32x32x8xf32>
    %68 = vector.shape_cast %67 : vector<1x32x32x8xf32> to vector<32x32x8xf32>
    %69 = vector.shape_cast %66 : vector<32x32x8xf32> to vector<1x32x32x8xf32>
    tpu.vector_store %arg5[%c0_21, %c0_22, %c0_23, %c0_24], %69 {strides = array<i32>} : memref<1x32x32x8xf32, #tpu.memory_space<vmem>>, vector<1x32x32x8xf32>,
    return
  }
  func.func @transform_0(%arg0: i32, %arg1: i32) -> (i32, i32, i32, i32, i32) {
    %c0_i32 = arith.constant 0 : i32
    %c0_i32_0 = arith.constant 0 : i32
    %c0_i32_1 = arith.constant 0 : i32
    %c0_i32_2 = arith.constant 0 : i32
    return %arg0, %arg1, %c0_i32, %c0_i32_0, %c0_i32_1 : i32, i32, i32, i32, i32
  }
  func.func @transform_1(%arg0: i32, %arg1: i32) -> (i32, i32, i32, i32) {
    %c0_i32 = arith.constant 0 : i32
    %c0_i32_0 = arith.constant 0 : i32
    %c0_i32_1 = arith.constant 0 : i32
    %c0_i32_2 = arith.constant 0 : i32
    %c0_i32_3 = arith.constant 0 : i32
    return %c0_i32, %c0_i32_0, %c0_i32_1, %c0_i32_2 : i32, i32, i32, i32
  }
  func.func @transform_2(%arg0: i32, %arg1: i32) -> (i32, i32) {
    %c0_i32 = arith.constant 0 : i32
    %c0_i32_0 = arith.constant 0 : i32
    %c0_i32_1 = arith.constant 0 : i32
    return %c0_i32, %c0_i32_0 : i32, i32
  }
  func.func @transform_3(%arg0: i32, %arg1: i32) -> (i32, i32, i32, i32) {
    %c0_i32 = arith.constant 0 : i32
    %c0_i32_0 = arith.constant 0 : i32
    %c0_i32_1 = arith.constant 0 : i32
    return %arg0, %arg1, %c0_i32, %c0_i32_0 : i32, i32, i32, i32
  }
}

</mosaic_0001>

<bundles_post_ra>
// kernel: _lambda_.1
= control target key start
LH: loop header
LB: loop body
LE: loop exit
PB: predicated region body
PF: predicated region fallthrough
CT: control target
= control target key end

     0   :  { %s14515_s12 = smov 0   ;;  %s14517_s13 = smov 0   ;;  %s20074_s0 = inlined_call_operand.vmem [shape: f32[2,1,34,34,4], index: 0, kind: input, shape index: {}]   ;;  %s20075_s1 = inlined_call_operand.vmem [shape: f32[3,3,4,8], index: 1, kind: input, shape index: {}]   ;;  %s20076_s2 = inlined_call_operand.vmem [shape: f32[1,8], index: 2, kind: input, shape index: {}]   ;;  %s20077_s3 = inlined_call_operand.vmem [shape: f32[2,32,32,8], index: 3, kind: output, shape index: {}]  }
   0x1   :  { %s14519_s14 = smov 0  }
   0x2 LB: > { %s25_s15 = sadd.s32 1, %s14489_s13  ;;  %p10007_p0 = scmp.ge.s32.totalorder %s14493_s14, 1  ;;  %s14493_s14 = sphi %s14519_s14, %s13_s14   ;;  %s14489_s13 = sphi %s14517_s13, %s22060_s13   ;;  %s14485_s12 = sphi %s14515_s12, %s22059_s12  }
   0x3   : > { %p27_p1 = scmp.ge.s32.totalorder %s25_s15, 2  ;;  %p157_p2 = scmp.lt.s32.totalorder %s14493_s14, 3 }
   0x5   : > { %s22062_s15 = smov (%p27_p1, %s25_s15), 0  ;;  %p158_p3 = pnand %p10007_p0, %p157_p2 }
   0x7   : > { %161 = sbr.rel (%p158_p3) target bundleno = 1377 (0x561), region = 32 }
   0xc   : > { %v381_v0 = vld [vmem:[%s20075_s1 + $0x4] sm:$0xf]  ;;  %vm1095_vm0 = vcmask 1043456   ;;  %p190_p4 = scmp.lt.s32.totalorder %s14485_s12, 1  ;;  %v380_v1 = vld [vmem:[%s20075_s1] sm:$0xf] }
   0xd   : > { %14083 = vmatprep.subr.msk.mxu1 %vm1095_vm0, %v381_v0  ;;  %12337 = vmatprep.subr.msk.mxu0 %vm1095_vm0, %v381_v0  ;;  %v382_v2 = vld [vmem:[%s20075_s1 + $0x8] sm:$0xf]  ;;  %vm549_vm1 = vcmask 1046528   ;;  %vm838_vm2 = vcmask 31744   ;;  %vm2768_vm3 = vcmask 1045504   ;;  %vm9778_vm4 = vcmask 64512  }
   0xe   : > { %14084 = vmatpush3.msk.msra.mxu1 %vm1095_vm0, %v381_v0  ;;  %12338 = vmatpush3.msk.msra.mxu0 %vm1095_vm0, %v381_v0  ;;  %s22064_s12 = smov (!%p190_p4, %s14485_s12), 1 }
   0xf   : > { %12531 = vmatprep.subr.msk.mxu1 %vm1095_vm0, %v380_v1  ;;  %12725 = vmatprep.subr.msk.mxu0 %vm1095_vm0, %v382_v2  ;;  %s14085_s22 = smul.u32 1360, %s22064_s12  ;;  %s11175_s17 = sshll.u32 %s22064_s12, 10 }
  0x10   : > { %s19411_s19 = scalar_lea.vmem %s20077_s3, %s11175_s17 }
  0x11   : > { %s14554_s25 = scalar_lea.vmem %s20074_s0, %s14085_s22 }
  0x12   : > { %v210_v3 = vld [vmem:[%s14554_s25] sm:$0xff]  ;;  %v211_v4 = vld [vmem:[%s14554_s25 + $0x8] sm:$0xff]  ;;  %v212_v10 = vld [vmem:[%s14554_s25 + $0x10] sm:$0xff] }
  0x13   : > { %v290_v5 = vld [vmem:[%s14554_s25 + $0x280] sm:$0xff]  ;;  %v550_v6 = vrot.slane %v210_v3, 1  ;;  %v551_v7 = vrot.slane %v211_v4, 1  ;;  %v291_v8 = vld [vmem:[%s14554_s25 + $0x288] sm:$0xff]  ;;  %v292_v11 = vld [vmem:[%s14554_s25 + $0x290] sm:$0xff]  ;;  %v553_v13 = vrot.slane %v212_v10, 1 }
  0x14   : > { %v694_v9 = vrot.slane %v290_v5, 1  ;;  %v695_v12 = vrot.slane %v291_v8, 1  ;;  %v697_v14 = vrot.slane %v292_v11, 1  ;;  %v213_v15 = vld [vmem:[%s14554_s25 + $0x18] sm:$0xff]  ;;  %v214_v20 = vld [vmem:[%s14554_s25 + $0x20] sm:$0x3] }
  0x15   : > { %v293_v16 = vld [vmem:[%s14554_s25 + $0x298] sm:$0xff]  ;;  %v552_v17 = vsel %vm549_vm1, %v550_v6, %v551_v7  ;;  %v555_v18 = vrot.slane %v213_v15, 1  ;;  %v294_v21 = vld [vmem:[%s14554_s25 + $0x2a0] sm:$0x3]  ;;  %v554_v23 = vsel %vm549_vm1, %v551_v7, %v553_v13  ;;  %v557_v25 = vrot.slane %v214_v20, 1  ;;  %v215_v26 = vld [vmem:[%s14554_s25 + $0x28] sm:$0xff] }
  0x16   : > { %v699_v19 = vrot.slane %v293_v16, 1  ;;  %12339 = vmatprep.mubr.msk.f32.mxu0 %vm838_vm2, %v552_v17  ;;  %v14569_v22 = vsel %vm549_vm1, %v694_v9, %v695_v12  ;;  %v14573_v24 = vsel %vm549_vm1, %v695_v12, %v697_v14  ;;  %v216_v27 = vld [vmem:[%s14554_s25 + $0x30] sm:$0xff]  ;;  %v295_v28 = vld [vmem:[%s14554_s25 + $0x2a8] sm:$0xff]  ;;  %v701_v31 = vrot.slane %v294_v21, 1  ;;  %v217_v33 = vld [vmem:[%s14554_s25 + $0x38] sm:$0xff] }
  0x17   : > { %20597 = vst [vmem:[#allocation2_spill] sm:$0xff] %v14569_v22  ;;  %20598 = vst [vmem:[#allocation3_spill] sm:$0xff] %v14573_v24  ;;  %12435 = vmatprep.mubr.msk.f32.mxu1 %vm838_vm2, %v14569_v22  ;;  %12340 = vmatmul.mubr.msk.f32.vlgmr.msra.gmra.mxu0 %vm838_vm2, %v554_v23  ;;  %v556_v29 = vsel %vm549_vm1, %v553_v13, %v555_v18  ;;  %v296_v32 = vld [vmem:[%s14554_s25 + $0x2b0] sm:$0xff]  ;;  %v297_v34 = vld [vmem:[%s14554_s25 + $0x2b8] sm:$0xff]  ;;  %v558_v35 = vsel %vm549_vm1, %v555_v18, %v557_v25  ;;  %v559_v36 = vrot.slane %v215_v26, 1 }
  0x18   : > { %v14583_v30 = vsel %vm549_vm1, %v697_v14, %v699_v19  ;;  %12436 = vmatmul.mubr.msk.f32.vlgmr.msra.gmra.mxu1 %vm838_vm2, %v14573_v24  ;;  %12726 = vmatpush3.msk.msra.mxu0 %vm1095_vm0, %v382_v2  ;;  %v560_v37 = vrot.slane %v216_v27, 1  ;;  %v703_v38 = vrot.slane %v295_v28, 1  ;;  %v218_v39 = vld [vmem:[%s14554_s25 + $0x40] sm:$0xff]  ;;  %v14597_v41 = vsel %vm549_vm1, %v699_v19, %v701_v31  ;;  %v219_v45 = vld [vmem:[%s14554_s25 + $0x48] sm:$0x3]  ;;  %v220_v50 = vld [vmem:[%s14554_s25 + $0x50] sm:$0xff] }
  0x19   : > { %20599 = vst [vmem:[#allocation4_spill] sm:$0xff] %v14583_v30  ;;  %v298_v40 = vld [vmem:[%s14554_s25 + $0x2c0] sm:$0xff]  ;;  %12532 = vmatpush3.msk.msra.mxu1 %vm1095_vm0, %v380_v1  ;;  %12342 = vmatprep.mubr.msk.f32.mxu0 %vm838_vm2, %v556_v29  ;;  %20600 = vst [vmem:[#allocation5_spill] sm:$0xff] %v14597_v41  ;;  %v704_v42 = vrot.slane %v296_v32, 1  ;;  %v562_v43 = vrot.slane %v217_v33, 1  ;;  %v706_v44 = vrot.slane %v297_v34, 1 }
  0x1a   : > { %12438 = vmatprep.mubr.msk.f32.mxu1 %vm838_vm2, %v14583_v30  ;;  %v14603_v46 = vsel %vm549_vm1, %v559_v36, %v560_v37  ;;  %v564_v47 = vrot.slane %v218_v39, 1  ;;  %v708_v48 = vrot.slane %v298_v40, 1  ;;  %v299_v49 = vld [vmem:[%s14554_s25 + $0x2c8] sm:$0x3]  ;;  %v221_v51 = vld [vmem:[%s14554_s25 + $0x58] sm:$0xff]  ;;  %v300_v53 = vld [vmem:[%s14554_s25 + $0x2d0] sm:$0xff] }
  0x1b   : > { %20601 = vst [vmem:[#allocation6_spill] sm:$0xff] %v14603_v46  ;;  %12343 = vmatmul.mubr.msk.f32.gmra.mxu0 %vm838_vm2, %v558_v35  ;;  %v14610_v52 = vsel %vm549_vm1, %v703_v38, %v704_v42  ;;  %v301_v54 = vld [vmem:[%s14554_s25 + $0x2d8] sm:$0xff]  ;;  %v14619_v55 = vsel %vm549_vm1, %v560_v37, %v562_v43  ;;  %v14622_v56 = vsel %vm549_vm1, %v704_v42, %v706_v44  ;;  %v566_v57 = vrot.slane %v219_v45, 1  ;;  %v222_v62 = vld [vmem:[%s14554_s25 + $0x60] sm:$0xff]  ;;  %v223_v3 = vld [vmem:[%s14554_s25 + $0x68] sm:$0xff] }
  0x1c   : > { %20602 = vst [vmem:[#allocation7_spill] sm:$0xff] %v14610_v52  ;;  %12439 = vmatmul.mubr.msk.f32.gmra.mxu1 %vm838_vm2, %v14597_v41  ;;  %12345 = vmatprep.mubr.msk.f32.mxu0 %vm838_vm2, %v14603_v46  ;;  %20603 = vst [vmem:[#allocation8_spill] sm:$0xff] %v14619_v55  ;;  %v14627_v58 = vsel %vm549_vm1, %v562_v43, %v564_v47  ;;  %v710_v59 = vrot.slane %v299_v49, 1  ;;  %v568_v60 = vrot.slane %v220_v50, 1  ;;  %v569_v61 = vrot.slane %v221_v51, 1  ;;  %v302_v2 = vld [vmem:[%s14554_s25 + $0x2e0] sm:$0xff] }
  0x1d   : > { %20604 = vst [vmem:[#allocation9_spill] sm:$0xff] %v14622_v56  ;;  %12441 = vmatprep.mubr.msk.f32.mxu1 %vm838_vm2, %v14610_v52  ;;  %20605 = vst [vmem:[#allocation10_spill] sm:$0xff] %v14627_v58  ;;  %v14631_v63 = vsel %vm549_vm1, %v706_v44, %v708_v48  ;;  %v712_v0 = vrot.slane %v300_v53, 1  ;;  %v713_v1 = vrot.slane %v301_v54, 1  ;;  %v303_v4 = vld [vmem:[%s14554_s25 + $0x2e8] sm:$0xff]  ;;  %v14643_v5 = vsel %vm549_vm1, %v564_v47, %v566_v57  ;;  %v225_v15 = vld [vmem:[%s14554_s25 + $0x78] sm:$0xff] }
  0x1e   : > { %20606 = vst [vmem:[#allocation11_spill] sm:$0xff] %v14631_v63  ;;  %20607 = vst [vmem:[#allocation12_spill] sm:$0xff] %v14643_v5  ;;  %v571_v6 = vrot.slane %v222_v62, 1  ;;  %v14648_v7 = vsel %vm549_vm1, %v708_v48, %v710_v59  ;;  %v14651_v8 = vsel %vm549_vm1, %v568_v60, %v569_v61  ;;  %v715_v9 = vrot.slane %v302_v2, 1  ;;  %v224_v11 = vld [vmem:[%s14554_s25 + $0x70] sm:$0x3] }
  0x1f   : > { %12346 = vmatmul.mubr.msk.f32.gmra.mxu0 %vm838_vm2, %v14619_v55  ;;  %20608 = vst [vmem:[#allocation13_spill] sm:$0xff] %v14648_v7  ;;  %20609 = vst [vmem:[#allocation14_spill] sm:$0xff] %v14651_v8  ;;  %v573_v10 = vrot.slane %v223_v3, 1  ;;  %v304_v12 = vld [vmem:[%s14554_s25 + $0x2f0] sm:$0x3]  ;;  %v14656_v13 = vsel %vm549_vm1, %v712_v0, %v713_v1  ;;  %v717_v14 = vrot.slane %v303_v4, 1 }
  0x20   : > { %12442 = vmatmul.mubr.msk.f32.gmra.mxu1 %vm838_vm2, %v14622_v56  ;;  %12348 = vmatprep.mubr.msk.f32.mxu0 %vm838_vm2, %v14627_v58  ;;  %20610 = vst [vmem:[#allocation15_spill] sm:$0xff] %v14656_v13  ;;  %v226_v16 = vld [vmem:[%s14554_s25 + $0x80] sm:$0xff]  ;;  %v305_v17 = vld [vmem:[%s14554_s25 + $0x2f8] sm:$0xff]  ;;  %v14669_v19 = vsel %vm549_vm1, %v569_v61, %v571_v6  ;;  %v575_v20 = vrot.slane %v224_v11, 1  ;;  %v719_v21 = vrot.slane %v304_v12, 1  ;;  %v14674_v23 = vsel %vm549_vm1, %v713_v1, %v715_v9  ;;  %v227_v28 = vld [vmem:[%s14554_s25 + $0x88] sm:$0xff] }
  0x21   : > { %12444 = vmatprep.mubr.msk.f32.mxu1 %vm838_vm2, %v14631_v63  ;;  %v306_v18 = vld [vmem:[%s14554_s25 + $0x300] sm:$0xff]  ;;  %20611 = vst [vmem:[#allocation16_spill] sm:$0xff] %v14669_v19  ;;  %20612 = vst [vmem:[#allocation17_spill] sm:$0xff] %v14674_v23  ;;  %v14677_v25 = vsel %vm549_vm1, %v571_v6, %v573_v10  ;;  %v577_v26 = vrot.slane %v225_v15, 1  ;;  %v578_v27 = vrot.slane %v226_v16, 1  ;;  %v14681_v29 = vsel %vm549_vm1, %v715_v9, %v717_v14  ;;  %v307_v33 = vld [vmem:[%s14554_s25 + $0x308] sm:$0xff] }
  0x22   : > { %20613 = vst [vmem:[#allocation18_spill] sm:$0xff] %v14677_v25  ;;  %20614 = vst [vmem:[#allocation19_spill] sm:$0xff] %v14681_v29  ;;  %v721_v31 = vrot.slane %v305_v17, 1  ;;  %v722_v32 = vrot.slane %v306_v18, 1  ;;  %v228_v34 = vld [vmem:[%s14554_s25 + $0x90] sm:$0xff]  ;;  %v14693_v36 = vsel %vm549_vm1, %v573_v10, %v575_v20  ;;  %v580_v37 = vrot.slane %v227_v28, 1 }
  0x23   : > { %12349 = vmatmul.mubr.msk.f32.gmra.mxu0 %vm838_vm2, %v14643_v5  ;;  %v308_v35 = vld [vmem:[%s14554_s25 + $0x310] sm:$0xff]  ;;  %20615 = vst [vmem:[#allocation20_spill] sm:$0xff] %v14693_v36  ;;  %v14698_v38 = vsel %vm549_vm1, %v717_v14, %v719_v21  ;;  %v14701_v39 = vsel %vm549_vm1, %v577_v26, %v578_v27  ;;  %v724_v40 = vrot.slane %v307_v33, 1  ;;  %v582_v42 = vrot.slane %v228_v34, 1  ;;  %v229_v43 = vld [vmem:[%s14554_s25 + $0x98] sm:$0x3] }
  0x24   : > { %12445 = vmatmul.mubr.msk.f32.gmra.mxu1 %vm838_vm2, %v14648_v7  ;;  %12351 = vmatprep.mubr.msk.f32.mxu0 %vm838_vm2, %v14651_v8  ;;  %20616 = vst [vmem:[#allocation21_spill] sm:$0xff] %v14698_v38  ;;  %20617 = vst [vmem:[#allocation22_spill] sm:$0xff] %v14701_v39  ;;  %v309_v44 = vld [vmem:[%s14554_s25 + $0x318] sm:$0x3]  ;;  %v14706_v45 = vsel %vm549_vm1, %v721_v31, %v722_v32  ;;  %v726_v47 = vrot.slane %v308_v35, 1  ;;  %v230_v48 = vld [vmem:[%s14554_s25 + $0xa0] sm:$0xff]  ;;  %v14719_v53 = vsel %vm549_vm1, %v578_v27, %v580_v37 }
  0x25   : > { %12447 = vmatprep.mubr.msk.f32.mxu1 %vm838_vm2, %v14656_v13  ;;  %20618 = vst [vmem:[#allocation23_spill] sm:$0xff] %v14706_v45  ;;  %v231_v49 = vld [vmem:[%s14554_s25 + $0xa8] sm:$0xff]  ;;  %v310_v50 = vld [vmem:[%s14554_s25 + $0x320] sm:$0xff]  ;;  %20619 = vst [vmem:[#allocation24_spill] sm:$0xff] %v14719_v53  ;;  %v584_v54 = vrot.slane %v229_v43, 1  ;;  %v728_v57 = vrot.slane %v309_v44, 1  ;;  %v14724_v59 = vsel %vm549_vm1, %v722_v32, %v724_v40  ;;  %v14727_v60 = vsel %vm549_vm1, %v580_v37, %v582_v42 }
  0x26   : > { %v311_v51 = vld [vmem:[%s14554_s25 + $0x328] sm:$0xff]  ;;  %20620 = vst [vmem:[#allocation25_spill] sm:$0xff] %v14724_v59  ;;  %20621 = vst [vmem:[#allocation26_spill] sm:$0xff] %v14727_v60  ;;  %v586_v61 = vrot.slane %v230_v48, 1  ;;  %v587_v62 = vrot.slane %v231_v49, 1  ;;  %v14730_v0 = vld [vmem:[%s14554_s25 + $0xb0] sm:$0xff]  ;;  %v14733_v1 = vsel %vm549_vm1, %v724_v40, %v726_v47 }
  0x27   : > { %12352 = vmatmul.mubr.msk.f32.gmra.mxu0 %vm838_vm2, %v14669_v19  ;;  %20622 = vst [vmem:[#allocation27_spill] sm:$0xff] %v14733_v1  ;;  %v730_v2 = vrot.slane %v310_v50, 1  ;;  %v731_v3 = vrot.slane %v311_v51, 1  ;;  %v312_v4 = vld [vmem:[%s14554_s25 + $0x330] sm:$0xff]  ;;  %v14737_v6 = vld [vmem:[%s14554_s25 + $0xb8] sm:$0xff]  ;;  %v14747_v10 = vsel %vm549_vm1, %v582_v42, %v584_v54  ;;  %v589_v11 = vrot.slane %v14730_v0, 1 }
  0x28   : > { %12448 = vmatmul.mubr.msk.f32.gmra.mxu1 %vm838_vm2, %v14674_v23  ;;  %12354 = vmatprep.mubr.msk.f32.mxu0 %vm838_vm2, %v14677_v25  ;;  %v313_v9 = vld [vmem:[%s14554_s25 + $0x338] sm:$0xff]  ;;  %20623 = vst [vmem:[#allocation28_spill] sm:$0xff] %v14747_v10  ;;  %v14753_v12 = vsel %vm549_vm1, %v726_v47, %v728_v57  ;;  %v14756_v14 = vsel %vm549_vm1, %v586_v61, %v587_v62  ;;  %v733_v15 = vrot.slane %v312_v4, 1  ;;  %v591_v16 = vrot.slane %v14737_v6, 1  ;;  %v14760_v17 = vld [vmem:[%s14554_s25 + $0xc0] sm:$0x3] }
  0x29   : > { %12450 = vmatprep.mubr.msk.f32.mxu1 %vm838_vm2, %v14681_v29  ;;  %20624 = vst [vmem:[#allocation29_spill] sm:$0xff] %v14753_v12  ;;  %20625 = vst [vmem:[#allocation30_spill] sm:$0xff] %v14756_v14  ;;  %v314_v18 = vld [vmem:[%s14554_s25 + $0x340] sm:$0x3]  ;;  %v14764_v20 = vsel %vm549_vm1, %v730_v2, %v731_v3  ;;  %v735_v21 = vrot.slane %v313_v9, 1  ;;  %v14767_v26 = vld [vmem:[%s14554_s25 + $0xc8] sm:$0xff]  ;;  %v14781_v32 = vsel %vm549_vm1, %v587_v62, %v589_v11 }
  0x2a   : > { %20626 = vst [vmem:[#allocation31_spill] sm:$0xff] %v14764_v20  ;;  %v14770_v27 = vld [vmem:[%s14554_s25 + $0xd0] sm:$0xff]  ;;  %v315_v28 = vld [vmem:[%s14554_s25 + $0x348] sm:$0xff]  ;;  %20627 = vst [vmem:[#allocation32_spill] sm:$0xff] %v14781_v32  ;;  %v593_v33 = vrot.slane %v14760_v17, 1  ;;  %v737_v34 = vrot.slane %v314_v18, 1  ;;  %v14787_v35 = vsel %vm549_vm1, %v731_v3, %v733_v15  ;;  %v14790_v37 = vsel %vm549_vm1, %v589_v11, %v591_v16 }
  0x2b   : > { %12355 = vmatmul.mubr.msk.f32.gmra.mxu0 %vm838_vm2, %v14693_v36  ;;  %v316_v31 = vld [vmem:[%s14554_s25 + $0x350] sm:$0xff]  ;;  %20628 = vst [vmem:[#allocation33_spill] sm:$0xff] %v14787_v35  ;;  %20629 = vst [vmem:[#allocation34_spill] sm:$0xff] %v14790_v37  ;;  %v595_v40 = vrot.slane %v14767_v26, 1  ;;  %v596_v42 = vrot.slane %v14770_v27, 1  ;;  %v14795_v43 = vld [vmem:[%s14554_s25 + $0xd8] sm:$0xff]  ;;  %v14799_v47 = vsel %vm549_vm1, %v733_v15, %v735_v21 }
  0x2c   : > { %12451 = vmatmul.mubr.msk.f32.gmra.mxu1 %vm838_vm2, %v14698_v38  ;;  %12357 = vmatprep.mubr.msk.f32.mxu0 %vm838_vm2, %v14701_v39  ;;  %v317_v44 = vld [vmem:[%s14554_s25 + $0x358] sm:$0xff]  ;;  %20630 = vst [vmem:[#allocation35_spill] sm:$0xff] %v14799_v47  ;;  %v739_v48 = vrot.slane %v315_v28, 1  ;;  %v740_v49 = vrot.slane %v316_v31, 1  ;;  %v14802_v50 = vld [vmem:[%s14554_s25 + $0xe0] sm:$0xff]  ;;  %v14812_v54 = vsel %vm549_vm1, %v591_v16, %v593_v33  ;;  %v598_v57 = vrot.slane %v14795_v43, 1 }
  0x2d   : > { %12453 = vmatprep.mubr.msk.f32.mxu1 %vm838_vm2, %v14706_v45  ;;  %v318_v51 = vld [vmem:[%s14554_s25 + $0x360] sm:$0xff]  ;;  %20631 = vst [vmem:[#allocation36_spill] sm:$0xff] %v14812_v54  ;;  %v742_v61 = vrot.slane %v317_v44, 1  ;;  %v14818_v62 = vsel %vm549_vm1, %v735_v21, %v737_v34  ;;  %v14821_v2 = vsel %vm549_vm1, %v595_v40, %v596_v42  ;;  %v600_v3 = vrot.slane %v14802_v50, 1  ;;  %v14825_v4 = vld [vmem:[%s14554_s25 + $0xe8] sm:$0x3] }
  0x2e   : > { %20632 = vst [vmem:[#allocation37_spill] sm:$0xff] %v14818_v62  ;;  %20633 = vst [vmem:[#allocation38_spill] sm:$0xff] %v14821_v2  ;;  %v14828_v9 = vsel %vm549_vm1, %v739_v48, %v740_v49  ;;  %v744_v11 = vrot.slane %v318_v51, 1  ;;  %v319_v15 = vld [vmem:[%s14554_s25 + $0x368] sm:$0x3]  ;;  %v14832_v16 = vld [vmem:[%s14554_s25 + $0xf0] sm:$0xff]  ;;  %v14846_v31 = vsel %vm549_vm1, %v596_v42, %v598_v57 }
  0x2f   : > { %12358 = vmatmul.mubr.msk.f32.gmra.mxu0 %vm838_vm2, %v14719_v53  ;;  %20634 = vst [vmem:[#allocation39_spill] sm:$0xff] %v14828_v9  ;;  %v14835_v18 = vld [vmem:[%s14554_s25 + $0xf8] sm:$0xff]  ;;  %v320_v21 = vld [vmem:[%s14554_s25 + $0x370] sm:$0xff]  ;;  %20635 = vst [vmem:[#allocation40_spill] sm:$0xff] %v14846_v31  ;;  %v14849_v33 = vsel %vm549_vm1, %v740_v49, %v742_v61  ;;  %v602_v34 = vrot.slane %v14825_v4, 1  ;;  %v14855_v40 = vsel %vm549_vm1, %v598_v57, %v600_v3  ;;  %v746_v44 = vrot.slane %v319_v15, 1 }
  0x30   : > { %12454 = vmatmul.mubr.msk.f32.gmra.mxu1 %vm838_vm2, %v14724_v59  ;;  %12360 = vmatprep.mubr.msk.f32.mxu0 %vm838_vm2, %v14727_v60  ;;  %v321_v28 = vld [vmem:[%s14554_s25 + $0x378] sm:$0xff]  ;;  %20636 = vst [vmem:[#allocation41_spill] sm:$0xff] %v14849_v33  ;;  %20637 = vst [vmem:[#allocation42_spill] sm:$0xff] %v14855_v40  ;;  %v604_v48 = vrot.slane %v14832_v16, 1  ;;  %v605_v51 = vrot.slane %v14835_v18, 1  ;;  %v14863_v42 = vsel %vm549_vm1, %v742_v61, %v744_v11  ;;  %v748_v49 = vrot.slane %v320_v21, 1 }
  0x31   : > { %12456 = vmatprep.mubr.msk.f32.mxu1 %vm838_vm2, %v14733_v1  ;;  %20638 = vst [vmem:[#allocation43_spill] sm:$0xff] %v14863_v42  ;;  %v323_v57 = vld [vmem:[%s14554_s25 + $0x388] sm:$0xff]  ;;  %v14877_v61 = vsel %vm549_vm1, %v600_v3, %v602_v34  ;;  %v14883_v21 = vsel %vm549_vm1, %v744_v11, %v746_v44  ;;  %v324_v1 = vld [vmem:[%s14554_s25 + $0x390] sm:$0x3]  ;;  %v14897_v59 = vld [vmem:[%s14554_s25 + $0x118] sm:$0xff] }
  0x32   : > { %20639 = vst [vmem:[#allocation44_spill] sm:$0xff] %v14877_v61  ;;  %20640 = vst [vmem:[#allocation45_spill] sm:$0xff] %v14883_v21  ;;  %v753_v34 = vrot.slane %v323_v57, 1  ;;  %v325_v11 = vld [vmem:[%s14554_s25 + $0x398] sm:$0xff]  ;;  %v14925_v29 = vld [vmem:[%s14554_s25 + $0x128] sm:$0xff] }
  0x33   : > { %12361 = vmatmul.mubr.msk.f32.gmra.mxu0 %vm838_vm2, %v14747_v10  ;;  %v14932_v13 = vld [vmem:[%s14554_s25 + $0x130] sm:$0xff]  ;;  %v14955_v63 = vld [vmem:[%s14554_s25 + $0x138] sm:$0x3]  ;;  %v14962_v52 = vld [vmem:[%s14554_s25 + $0x140] sm:$0xff] }
  0x34   : > { %12457 = vmatmul.mubr.msk.f32.gmra.mxu1 %vm838_vm2, %v14753_v12  ;;  %12363 = vmatprep.mubr.msk.f32.mxu0 %vm838_vm2, %v14756_v14  ;;  %v14890_v12 = vld [vmem:[%s14554_s25 + $0x110] sm:$0x3]  ;;  %v618_v7 = vrot.slane %v14932_v13, 1  ;;  %v329_v56 = vld [vmem:[%s14554_s25 + $0x3b8] sm:$0x3]  ;;  %v342_v14 = vld [vmem:[%s14554_s25 + $0x420] sm:$0xff] }
  0x35   : > { %12459 = vmatprep.mubr.msk.f32.mxu1 %vm838_vm2, %v14764_v20  ;;  %v14867_v20 = vld [vmem:[%s14554_s25 + $0x108] sm:$0xff]  ;;  %v14990_v24 = vld [vmem:[%s14554_s25 + $0x150] sm:$0xff]  ;;  %v15171_v60 = vld [vmem:[%s14554_s25 + $0x1b8] sm:$0xff] }
  0x36   : > { %v15141_v10 = vld [vmem:[%s14554_s25 + $0x1a8] sm:$0xff]  ;;  %v15206_v36 = vld [vmem:[%s14554_s25 + $0x1d0] sm:$0xff]  ;;  %v15229_v25 = vld [vmem:[%s14554_s25 + $0x1d8] sm:$0x3] }
  0x37   : > { %12364 = vmatmul.mubr.msk.f32.gmra.mxu0 %vm838_vm2, %v14781_v32  ;;  %v15199_v53 = vld [vmem:[%s14554_s25 + $0x1c8] sm:$0xff]  ;;  %v15236_v19 = vld [vmem:[%s14554_s25 + $0x1e0] sm:$0xff]  ;;  %v15264_v8 = vld [vmem:[%s14554_s25 + $0x1f0] sm:$0xff] }
  0x38   : > { %12460 = vmatmul.mubr.msk.f32.gmra.mxu1 %vm838_vm2, %v14787_v35  ;;  %12366 = vmatprep.mubr.msk.f32.mxu0 %vm838_vm2, %v14790_v37  ;;  %v322_v35 = vld [vmem:[%s14554_s25 + $0x380] sm:$0xff]  ;;  %20687 = vst [vmem:[#allocation92_spill] sm:$0xff] %v15264_v8 }
  0x39   : > { %12462 = vmatprep.mubr.msk.f32.mxu1 %vm838_vm2, %v14799_v47  ;;  %v749_v47 = vrot.slane %v321_v28, 1  ;;  %v14886_v28 = vsel %vm549_vm1, %v604_v48, %v605_v51  ;;  %v611_v48 = vrot.slane %v14890_v12, 1  ;;  %v15134_v37 = vld [vmem:[%s14554_s25 + $0x1a0] sm:$0xff] }
  0x3a   : > { %20641 = vst [vmem:[#allocation46_spill] sm:$0xff] %v14886_v28  ;;  %v15294_v55 = vld [vmem:[%s14554_s25 + $0x200] sm:$0x3] }
  0x3b   : > { %12367 = vmatmul.mubr.msk.f32.gmra.mxu0 %vm838_vm2, %v14812_v54  ;;  %v14894_v3 = vsel %vm549_vm1, %v748_v49, %v749_v47  ;;  %v755_v49 = vrot.slane %v324_v1, 1  ;;  %v757_v1 = vrot.slane %v325_v11, 1  ;;  %v15109_v54 = vld [vmem:[%s14554_s25 + $0x198] sm:$0xff]  ;;  %20693 = vst [vmem:[#allocation98_spill] sm:$0xff] %v15294_v55 }
  0x3c   : > { %12463 = vmatmul.mubr.msk.f32.gmra.mxu1 %vm838_vm2, %v14818_v62  ;;  %12369 = vmatprep.mubr.msk.f32.mxu0 %vm838_vm2, %v14821_v2  ;;  %v14860_v62 = vld [vmem:[%s14554_s25 + $0x100] sm:$0xff]  ;;  %20642 = vst [vmem:[#allocation47_spill] sm:$0xff] %v14894_v3  ;;  %v15099_v2 = vld [vmem:[%s14554_s25 + $0x188] sm:$0x3] }
  0x3d   : > { %12465 = vmatprep.mubr.msk.f32.mxu1 %vm838_vm2, %v14828_v9  ;;  %v607_v15 = vrot.slane %v14860_v62, 1  ;;  %v609_v9 = vrot.slane %v14867_v20, 1  ;;  %v14948_v11 = vsel %vm549_vm1, %v753_v34, %v755_v49  ;;  %v620_v49 = vrot.slane %v14955_v63, 1 }
  0x3e   : > { %20648 = vst [vmem:[#allocation53_spill] sm:$0xff] %v14948_v11 }
  0x3f   : > { %12370 = vmatmul.mubr.msk.f32.gmra.mxu0 %vm838_vm2, %v14846_v31  ;;  %v14911_v44 = vsel %vm549_vm1, %v605_v51, %v607_v15  ;;  %v14920_v45 = vsel %vm549_vm1, %v607_v15, %v609_v9  ;;  %v616_v15 = vrot.slane %v14925_v29, 1 }
  0x40   : > { %12466 = vmatmul.mubr.msk.f32.gmra.mxu1 %vm838_vm2, %v14849_v33  ;;  %12372 = vmatprep.mubr.msk.f32.mxu0 %vm838_vm2, %v14855_v40  ;;  %v751_v33 = vrot.slane %v322_v35, 1  ;;  %v326_v35 = vld [vmem:[%s14554_s25 + $0x3a0] sm:$0xff]  ;;  %20643 = vst [vmem:[#allocation48_spill] sm:$0xff] %v14911_v44  ;;  %20645 = vst [vmem:[#allocation50_spill] sm:$0xff] %v14920_v45 }
  0x41   : > { %12468 = vmatprep.mubr.msk.f32.mxu1 %vm838_vm2, %v14863_v42  ;;  %v14900_v42 = vld [vmem:[%s14554_s25 + $0x120] sm:$0xff]  ;;  %v758_v23 = vrot.slane %v326_v35, 1  ;;  %v14985_v41 = vsel %vm549_vm1, %v616_v15, %v618_v7 }
  0x42   : > { %v14917_v57 = vsel %vm549_vm1, %v749_v47, %v751_v33  ;;  %v614_v38 = vrot.slane %v14900_v42, 1  ;;  %v14928_v51 = vsel %vm549_vm1, %v751_v33, %v753_v34  ;;  %v328_v47 = vld [vmem:[%s14554_s25 + $0x3b0] sm:$0xff]  ;;  %v14942_v33 = vsel %vm549_vm1, %v609_v9, %v611_v48  ;;  %20653 = vst [vmem:[#allocation58_spill] sm:$0xff] %v14985_v41  ;;  %v15074_v40 = vld [vmem:[%s14554_s25 + $0x180] sm:$0xff] }
  0x43   : > { %12373 = vmatmul.mubr.msk.f32.gmra.mxu0 %vm838_vm2, %v14877_v61  ;;  %20644 = vst [vmem:[#allocation49_spill] sm:$0xff] %v14917_v57  ;;  %20646 = vst [vmem:[#allocation51_spill] sm:$0xff] %v14928_v51  ;;  %v14959_v9 = vsel %vm549_vm1, %v757_v1, %v758_v23  ;;  %v762_v48 = vrot.slane %v328_v47, 1  ;;  %v764_v1 = vrot.slane %v329_v56, 1 }
  0x44   : > { %12469 = vmatmul.mubr.msk.f32.gmra.mxu1 %vm838_vm2, %v14883_v21  ;;  %12375 = vmatprep.mubr.msk.f32.mxu0 %vm838_vm2, %v14886_v28  ;;  %v613_v21 = vrot.slane %v14897_v59, 1  ;;  %20647 = vst [vmem:[#allocation52_spill] sm:$0xff] %v14942_v33  ;;  %20650 = vst [vmem:[#allocation55_spill] sm:$0xff] %v14959_v9  ;;  %v14976_v34 = vsel %vm549_vm1, %v614_v38, %v616_v15  ;;  %v625_v15 = vrot.slane %v14990_v24, 1  ;;  %v337_v28 = vld [vmem:[%s14554_s25 + $0x3f8] sm:$0xff] }
  0x45   : > { %12471 = vmatprep.mubr.msk.f32.mxu1 %vm838_vm2, %v14894_v3  ;;  %v327_v3 = vld [vmem:[%s14554_s25 + $0x3a8] sm:$0xff]  ;;  %20651 = vst [vmem:[#allocation56_spill] sm:$0xff] %v14976_v34 }
  0x46   : > { %v14951_v35 = vsel %vm549_vm1, %v613_v21, %v614_v38  ;;  %v330_v21 = vld [vmem:[%s14554_s25 + $0x3c0] sm:$0xff] }
  0x47   : > { %12376 = vmatmul.mubr.msk.f32.gmra.mxu0 %vm838_vm2, %v14911_v44  ;;  %20649 = vst [vmem:[#allocation54_spill] sm:$0xff] %v14951_v35  ;;  %v766_v56 = vrot.slane %v330_v21, 1  ;;  %v15013_v21 = vsel %vm549_vm1, %v762_v48, %v764_v1  ;;  %v15030_v44 = vld [vmem:[%s14554_s25 + $0x170] sm:$0xff] }
  0x48   : > { %12472 = vmatmul.mubr.msk.f32.gmra.mxu1 %vm838_vm2, %v14917_v57  ;;  %12378 = vmatprep.mubr.msk.f32.mxu0 %vm838_vm2, %v14920_v45  ;;  %v760_v57 = vrot.slane %v327_v3, 1  ;;  %v331_v3 = vld [vmem:[%s14554_s25 + $0x3c8] sm:$0xff]  ;;  %20656 = vst [vmem:[#allocation61_spill] sm:$0xff] %v15013_v21 }
  0x49   : > { %12474 = vmatprep.mubr.msk.f32.mxu1 %vm838_vm2, %v14928_v51  ;;  %v14965_v51 = vld [vmem:[%s14554_s25 + $0x148] sm:$0xff]  ;;  %v767_v22 = vrot.slane %v331_v3, 1 }
  0x4a   : > { %v14982_v47 = vsel %vm549_vm1, %v758_v23, %v760_v57  ;;  %v623_v30 = vrot.slane %v14965_v51, 1  ;;  %v14993_v38 = vsel %vm549_vm1, %v760_v57, %v762_v48  ;;  %v333_v23 = vld [vmem:[%s14554_s25 + $0x3d8] sm:$0xff]  ;;  %v15007_v57 = vsel %vm549_vm1, %v618_v7, %v620_v49  ;;  %v15027_v45 = vld [vmem:[%s14554_s25 + $0x168] sm:$0xff] }
  0x4b   : > { %12379 = vmatmul.mubr.msk.f32.gmra.mxu0 %vm838_vm2, %v14942_v33  ;;  %20652 = vst [vmem:[#allocation57_spill] sm:$0xff] %v14982_v47  ;;  %20654 = vst [vmem:[#allocation59_spill] sm:$0xff] %v14993_v38  ;;  %v15020_v33 = vld [vmem:[%s14554_s25 + $0x160] sm:$0x3]  ;;  %v15024_v7 = vsel %vm549_vm1, %v766_v56, %v767_v22  ;;  %v771_v49 = vrot.slane %v333_v23, 1 }
  0x4c   : > { %12475 = vmatmul.mubr.msk.f32.gmra.mxu1 %vm838_vm2, %v14948_v11  ;;  %12381 = vmatprep.mubr.msk.f32.mxu0 %vm838_vm2, %v14951_v35  ;;  %v622_v11 = vrot.slane %v14962_v52, 1  ;;  %v14997_v35 = vld [vmem:[%s14554_s25 + $0x158] sm:$0xff]  ;;  %20655 = vst [vmem:[#allocation60_spill] sm:$0xff] %v15007_v57  ;;  %20658 = vst [vmem:[#allocation63_spill] sm:$0xff] %v15024_v7  ;;  %v15039_v48 = vld [vmem:[%s20075_s1 + $0xc] sm:$0xf]  ;;  %v15046_v1 = vsel %vm549_vm1, %v623_v30, %v625_v15 }
  0x4d   : > { %12477 = vmatprep.mubr.msk.f32.mxu1 %vm838_vm2, %v14959_v9  ;;  %v332_v9 = vld [vmem:[%s14554_s25 + $0x3d0] sm:$0xff]  ;;  %20659 = vst [vmem:[#allocation64_spill] sm:$0xff] %v15046_v1  ;;  %v629_v56 = vrot.slane %v15020_v33, 1  ;;  %12919 = vmatprep.subr.msk.mxu1 %vm1095_vm0, %v15039_v48 }
  0x4e   : > { %v15016_v3 = vsel %vm549_vm1, %v622_v11, %v623_v30  ;;  %v335_v11 = vld [vmem:[%s14554_s25 + $0x3e8] sm:$0xff]  ;;  %v631_v30 = vrot.slane %v15027_v45, 1 }
  0x4f   : > { %12382 = vmatmul.mubr.msk.f32.gmra.mxu0 %vm838_vm2, %v14976_v34  ;;  %20657 = vst [vmem:[#allocation62_spill] sm:$0xff] %v15016_v3  ;;  %v627_v34 = vrot.slane %v14997_v35, 1 }
  0x50   : > { %12478 = vmatmul.mubr.msk.f32.gmra.mxu1 %vm838_vm2, %v14982_v47  ;;  %12384 = vmatprep.mubr.msk.f32.mxu0 %vm838_vm2, %v14985_v41  ;;  %v769_v47 = vrot.slane %v332_v9, 1  ;;  %v334_v41 = vld [vmem:[%s14554_s25 + $0x3e0] sm:$0x3]  ;;  %v336_v9 = vld [vmem:[%s14554_s25 + $0x3f0] sm:$0xff] }
  0x51   : > { %12480 = vmatprep.mubr.msk.f32.mxu1 %vm838_vm2, %v14993_v38  ;;  %v773_v23 = vrot.slane %v334_v41, 1  ;;  %v15052_v38 = vld [vmem:[%s20075_s1 + $0x10] sm:$0xf]  ;;  %v15065_v41 = vld [vmem:[%s14554_s25 + $0x178] sm:$0xff] }
  0x52   : > { %v15071_v61 = vsel %vm549_vm1, %v769_v47, %v771_v49  ;;  %13113 = vmatprep.subr.msk.mxu0 %vm1095_vm0, %v15052_v38 }
  0x53   : > { %12385 = vmatmul.mubr.msk.f32.gmra.mxu0 %vm838_vm2, %v15007_v57  ;;  %v632_v57 = vrot.slane %v15030_v44, 1  ;;  %20662 = vst [vmem:[#allocation67_spill] sm:$0xff] %v15071_v61 }
  0x54   : > { %12481 = vmatmul.mubr.msk.f32.gmra.mxu1 %vm838_vm2, %v15013_v21  ;;  %12387 = vmatprep.mubr.msk.f32.mxu0 %vm838_vm2, %v15016_v3  ;;  %v15057_v21 = vsel %vm549_vm1, %v767_v22, %v769_v47  ;;  %v15060_v3 = vsel %vm549_vm1, %v625_v15, %v627_v34  ;;  %v776_v22 = vrot.slane %v336_v9, 1  ;;  %v338_v15 = vld [vmem:[%s14554_s25 + $0x400] sm:$0xff]  ;;  %v15086_v47 = vsel %vm549_vm1, %v627_v34, %v629_v56  ;;  %v339_v56 = vld [vmem:[%s14554_s25 + $0x408] sm:$0x3] }
  0x55   : > { %12483 = vmatprep.mubr.msk.f32.mxu1 %vm838_vm2, %v15024_v7  ;;  %20660 = vst [vmem:[#allocation65_spill] sm:$0xff] %v15057_v21  ;;  %20661 = vst [vmem:[#allocation66_spill] sm:$0xff] %v15060_v3  ;;  %v775_v7 = vrot.slane %v335_v11, 1  ;;  %v634_v11 = vrot.slane %v15065_v41, 1  ;;  %v778_v9 = vrot.slane %v337_v28, 1  ;;  %v15095_v31 = vsel %vm549_vm1, %v631_v30, %v632_v57  ;;  %v15106_v28 = vld [vmem:[%s14554_s25 + $0x190] sm:$0xff] }
  0x56   : > { %20663 = vst [vmem:[#allocation68_spill] sm:$0xff] %v15086_v47  ;;  %20665 = vst [vmem:[#allocation70_spill] sm:$0xff] %v15095_v31  ;;  %v780_v34 = vrot.slane %v338_v15, 1  ;;  %v638_v15 = vrot.slane %v15099_v2, 1 }
  0x57   : > { %12388 = vmatmul.mubr.msk.f32.gmra.mxu0 %vm838_vm2, %v15046_v1  ;;  %v15092_v1 = vsel %vm549_vm1, %v771_v49, %v773_v23  ;;  %v340_v49 = vld [vmem:[%s14554_s25 + $0x410] sm:$0xff]  ;;  %v341_v23 = vld [vmem:[%s14554_s25 + $0x418] sm:$0xff]  ;;  %v15123_v30 = vsel %vm549_vm1, %v776_v22, %v778_v9 }
  0x58   : > { %12484 = vmatmul.mubr.msk.f32.gmra.mxu1 %vm838_vm2, %v15057_v21  ;;  %12390 = vmatprep.mubr.msk.f32.mxu0 %vm838_vm2, %v15060_v3  ;;  %20664 = vst [vmem:[#allocation69_spill] sm:$0xff] %v15092_v1  ;;  %v636_v21 = vrot.slane %v15074_v40, 1  ;;  %v15102_v3 = vsel %vm549_vm1, %v775_v7, %v776_v22  ;;  %v15120_v7 = vsel %vm549_vm1, %v632_v57, %v634_v11  ;;  %20668 = vst [vmem:[#allocation73_spill] sm:$0xff] %v15123_v30 }
  0x59   : > { %12486 = vmatprep.mubr.msk.f32.mxu1 %vm838_vm2, %v15071_v61  ;;  %20666 = vst [vmem:[#allocation71_spill] sm:$0xff] %v15102_v3  ;;  %20667 = vst [vmem:[#allocation72_spill] sm:$0xff] %v15120_v7  ;;  %v15137_v57 = vsel %vm549_vm1, %v778_v9, %v780_v34  ;;  %v784_v22 = vrot.slane %v340_v49, 1  ;;  %v785_v32 = vrot.slane %v341_v23, 1 }
  0x5a   : > { %v15129_v61 = vsel %vm549_vm1, %v634_v11, %v636_v21  ;;  %20670 = vst [vmem:[#allocation75_spill] sm:$0xff] %v15137_v57  ;;  %v343_v11 = vld [vmem:[%s14554_s25 + $0x428] sm:$0xff]  ;;  %v15151_v9 = vsel %vm549_vm1, %v636_v21, %v638_v15 }
  0x5b   : > { %12391 = vmatmul.mubr.msk.f32.gmra.mxu0 %vm838_vm2, %v15086_v47  ;;  %20669 = vst [vmem:[#allocation74_spill] sm:$0xff] %v15129_v61  ;;  %v782_v47 = vrot.slane %v339_v56, 1  ;;  %20671 = vst [vmem:[#allocation76_spill] sm:$0xff] %v15151_v9  ;;  %v643_v56 = vrot.slane %v15134_v37, 1  ;;  %v15168_v21 = vsel %vm549_vm1, %v784_v22, %v785_v32  ;;  %v789_v15 = vrot.slane %v343_v11, 1 }
  0x5c   : > { %12487 = vmatmul.mubr.msk.f32.gmra.mxu1 %vm838_vm2, %v15092_v1  ;;  %12393 = vmatprep.mubr.msk.f32.mxu0 %vm838_vm2, %v15095_v31  ;;  %v640_v1 = vrot.slane %v15106_v28, 1  ;;  %v641_v31 = vrot.slane %v15109_v54, 1  ;;  %20674 = vst [vmem:[#allocation79_spill] sm:$0xff] %v15168_v21 }
  0x5d   : > { %12489 = vmatprep.mubr.msk.f32.mxu1 %vm838_vm2, %v15102_v3  ;;  %v15157_v49 = vsel %vm549_vm1, %v780_v34, %v782_v47  ;;  %v645_v3 = vrot.slane %v15141_v10, 1 }
  0x5e   : > { %20672 = vst [vmem:[#allocation77_spill] sm:$0xff] %v15157_v49  ;;  %v15160_v23 = vsel %vm549_vm1, %v640_v1, %v641_v31  ;;  %v345_v1 = vld [vmem:[%s14554_s25 + $0x438] sm:$0xff]  ;;  %v15185_v47 = vsel %vm549_vm1, %v641_v31, %v643_v56 }
  0x5f   : > { %12394 = vmatmul.mubr.msk.f32.gmra.mxu0 %vm838_vm2, %v15120_v7  ;;  %20673 = vst [vmem:[#allocation78_spill] sm:$0xff] %v15160_v23  ;;  %v15164_v7 = vld [vmem:[%s14554_s25 + $0x1b0] sm:$0x3]  ;;  %20675 = vst [vmem:[#allocation80_spill] sm:$0xff] %v15185_v47 }
  0x60   : > { %12490 = vmatmul.mubr.msk.f32.gmra.mxu1 %vm838_vm2, %v15123_v30  ;;  %12396 = vmatprep.mubr.msk.f32.mxu0 %vm838_vm2, %v15129_v61  ;;  %v787_v30 = vrot.slane %v342_v14, 1  ;;  %v344_v61 = vld [vmem:[%s14554_s25 + $0x430] sm:$0x3]  ;;  %v346_v14 = vld [vmem:[%s14554_s25 + $0x440] sm:$0xff]  ;;  %v647_v34 = vrot.slane %v15164_v7, 1 }
  0x61   : > { %12492 = vmatprep.mubr.msk.f32.mxu1 %vm838_vm2, %v15137_v57  ;;  %v15174_v57 = vld [vmem:[%s14554_s25 + $0x1c0] sm:$0xff]  ;;  %v791_v22 = vrot.slane %v344_v61, 1  ;;  %v793_v61 = vrot.slane %v345_v1, 1  ;;  %v794_v39 = vrot.slane %v346_v14, 1 }
  0x62   : > { %v15191_v11 = vsel %vm549_vm1, %v785_v32, %v787_v30  ;;  %v15202_v31 = vsel %vm549_vm1, %v787_v30, %v789_v15  ;;  %v348_v32 = vld [vmem:[%s14554_s25 + $0x450] sm:$0xff]  ;;  %v15216_v30 = vsel %vm549_vm1, %v645_v3, %v647_v34 }
  0x63   : > { %12397 = vmatmul.mubr.msk.f32.gmra.mxu0 %vm838_vm2, %v15151_v9  ;;  %20676 = vst [vmem:[#allocation81_spill] sm:$0xff] %v15191_v11  ;;  %v15194_v9 = vsel %vm549_vm1, %v643_v56, %v645_v3  ;;  %20678 = vst [vmem:[#allocation83_spill] sm:$0xff] %v15202_v31  ;;  %v652_v56 = vrot.slane %v15199_v53, 1  ;;  %v15222_v1 = vsel %vm549_vm1, %v789_v15, %v791_v22  ;;  %v798_v34 = vrot.slane %v348_v32, 1 }
  0x64   : > { %12493 = vmatmul.mubr.msk.f32.gmra.mxu1 %vm838_vm2, %v15157_v49  ;;  %12399 = vmatprep.mubr.msk.f32.mxu0 %vm838_vm2, %v15160_v23  ;;  %20677 = vst [vmem:[#allocation82_spill] sm:$0xff] %v15194_v9  ;;  %v649_v49 = vrot.slane %v15171_v60, 1  ;;  %v650_v23 = vrot.slane %v15174_v57, 1  ;;  %20679 = vst [vmem:[#allocation84_spill] sm:$0xff] %v15216_v30  ;;  %v15233_v3 = vsel %vm549_vm1, %v793_v61, %v794_v39  ;;  %v656_v22 = vrot.slane %v15229_v25, 1 }
  0x65   : > { %12495 = vmatprep.mubr.msk.f32.mxu1 %vm838_vm2, %v15168_v21  ;;  %v347_v21 = vld [vmem:[%s14554_s25 + $0x448] sm:$0xff]  ;;  %20680 = vst [vmem:[#allocation85_spill] sm:$0xff] %v15222_v1  ;;  %20682 = vst [vmem:[#allocation87_spill] sm:$0xff] %v15233_v3 }
  0x66   : > { %v15225_v14 = vsel %vm549_vm1, %v649_v49, %v650_v23  ;;  %v350_v49 = vld [vmem:[%s14554_s25 + $0x460] sm:$0xff]  ;;  %v15250_v15 = vsel %vm549_vm1, %v650_v23, %v652_v56  ;;  %v352_v23 = vld [vmem:[%s14554_s25 + $0x470] sm:$0xff] }
  0x67   : > { %12400 = vmatmul.mubr.msk.f32.gmra.mxu0 %vm838_vm2, %v15185_v47  ;;  %20681 = vst [vmem:[#allocation86_spill] sm:$0xff] %v15225_v14  ;;  %v654_v47 = vrot.slane %v15206_v36, 1  ;;  %20684 = vst [vmem:[#allocation89_spill] sm:$0xff] %v15250_v15 }
  0x68   : > { %12496 = vmatmul.mubr.msk.f32.gmra.mxu1 %vm838_vm2, %v15191_v11  ;;  %12402 = vmatprep.mubr.msk.f32.mxu0 %vm838_vm2, %v15194_v9  ;;  %v796_v11 = vrot.slane %v347_v21, 1  ;;  %v349_v9 = vld [vmem:[%s14554_s25 + $0x458] sm:$0x3]  ;;  %v351_v21 = vld [vmem:[%s14554_s25 + $0x468] sm:$0xff] }
  0x69   : > { %12498 = vmatprep.mubr.msk.f32.mxu1 %vm838_vm2, %v15202_v31  ;;  %v15239_v31 = vld [vmem:[%s14554_s25 + $0x1e8] sm:$0xff]  ;;  %v800_v61 = vrot.slane %v349_v9, 1  ;;  %v802_v9 = vrot.slane %v350_v49, 1  ;;  %v803_v58 = vrot.slane %v351_v21, 1  ;;  %v805_v49 = vrot.slane %v352_v23, 1 }
  0x6a   : > { %20683 = vst [vmem:[#allocation88_spill] sm:$0xff] %v15239_v31  ;;  %v15256_v32 = vsel %vm549_vm1, %v794_v39, %v796_v11  ;;  %v15268_v5 = vsel %vm549_vm1, %v796_v11, %v798_v34  ;;  %v353_v39 = vld [vmem:[%s14554_s25 + $0x478] sm:$0xff]  ;;  %v15281_v11 = vsel %vm549_vm1, %v654_v47, %v656_v22  ;;  %v354_v22 = vld [vmem:[%s14554_s25 + $0x480] sm:$0x3]  ;;  %v15301_v23 = vld [vmem:[%s14554_s25 + $0x208] sm:$0xff] }
  0x6b   : > { %12403 = vmatmul.mubr.msk.f32.gmra.mxu0 %vm838_vm2, %v15216_v30  ;;  %20685 = vst [vmem:[#allocation90_spill] sm:$0xff] %v15256_v32  ;;  %v15259_v30 = vsel %vm549_vm1, %v652_v56, %v654_v47  ;;  %20688 = vst [vmem:[#allocation93_spill] sm:$0xff] %v15268_v5  ;;  %v661_v56 = vrot.slane %v15264_v8, 1  ;;  %v15287_v21 = vsel %vm549_vm1, %v798_v34, %v800_v61  ;;  %v807_v47 = vrot.slane %v353_v39, 1  ;;  %v356_v34 = vld [vmem:[%s14554_s25 + $0x490] sm:$0xff] }
  0x6c   : > { %12499 = vmatmul.mubr.msk.f32.gmra.mxu1 %vm838_vm2, %v15222_v1  ;;  %12405 = vmatprep.mubr.msk.f32.mxu0 %vm838_vm2, %v15225_v14  ;;  %20686 = vst [vmem:[#allocation91_spill] sm:$0xff] %v15259_v30  ;;  %v658_v1 = vrot.slane %v15236_v19, 1  ;;  %v659_v14 = vrot.slane %v15239_v31, 1  ;;  %20690 = vst [vmem:[#allocation95_spill] sm:$0xff] %v15281_v11  ;;  %v665_v39 = vrot.slane %v15294_v55, 1  ;;  %v809_v46 = vrot.slane %v354_v22, 1 }
  0x6d   : > { %12501 = vmatprep.mubr.msk.f32.mxu1 %vm838_vm2, %v15233_v3  ;;  %v15271_v3 = vld [vmem:[%s14554_s25 + $0x1f8] sm:$0xff]  ;;  %20691 = vst [vmem:[#allocation96_spill] sm:$0xff] %v15287_v21  ;;  %20695 = vst [vmem:[#allocation100_spill] sm:$0xff] %v15301_v23  ;;  %v812_v55 = vrot.slane %v356_v34, 1  ;;  %v15336_v31 = vld [vmem:[%s14554_s25 + $0x220] sm:$0xff] }
  0x6e   : > { %20689 = vst [vmem:[#allocation94_spill] sm:$0xff] %v15271_v3  ;;  %v15315_v61 = vsel %vm549_vm1, %v659_v14, %v661_v56  ;;  %20702 = vst [vmem:[#allocation107_spill] sm:$0xff] %v15336_v31  ;;  %v15352_v34 = vsel %vm549_vm1, %v807_v47, %v809_v46  ;;  %v360_v46 = vld [vmem:[%s14554_s25 + $0x4b0] sm:$0xff] }
  0x6f   : > { %12406 = vmatmul.mubr.msk.f32.gmra.mxu0 %vm838_vm2, %v15250_v15  ;;  %v15290_v15 = vsel %vm549_vm1, %v658_v1, %v659_v14  ;;  %v355_v1 = vld [vmem:[%s14554_s25 + $0x488] sm:$0xff]  ;;  %20697 = vst [vmem:[#allocation102_spill] sm:$0xff] %v15315_v61  ;;  %v357_v14 = vld [vmem:[%s14554_s25 + $0x498] sm:$0xff]  ;;  %20704 = vst [vmem:[#allocation109_spill] sm:$0xff] %v15352_v34 }
  0x70   : > { %12502 = vmatmul.mubr.msk.f32.gmra.mxu1 %vm838_vm2, %v15256_v32  ;;  %12408 = vmatprep.mubr.msk.f32.mxu0 %vm838_vm2, %v15259_v30  ;;  %20692 = vst [vmem:[#allocation97_spill] sm:$0xff] %v15290_v15  ;;  %v663_v32 = vrot.slane %v15271_v3, 1  ;;  %v15297_v30 = vsel %vm549_vm1, %v802_v9, %v803_v58  ;;  %v15318_v9 = vsel %vm549_vm1, %v803_v58, %v805_v49  ;;  %v15329_v3 = vld [vmem:[%s14554_s25 + $0x218] sm:$0xff]  ;;  %v811_v8 = vrot.slane %v355_v1, 1 }
  0x71   : > { %12504 = vmatprep.mubr.msk.f32.mxu1 %vm838_vm2, %v15268_v5  ;;  %20694 = vst [vmem:[#allocation99_spill] sm:$0xff] %v15297_v30  ;;  %v15304_v5 = vld [vmem:[%s14554_s25 + $0x210] sm:$0xff]  ;;  %20698 = vst [vmem:[#allocation103_spill] sm:$0xff] %v15318_v9  ;;  %v15333_v58 = vsel %vm549_vm1, %v805_v49, %v807_v47  ;;  %v670_v22 = vrot.slane %v15329_v3, 1  ;;  %v814_v1 = vrot.slane %v357_v14, 1 }
  0x72   : > { %20696 = vst [vmem:[#allocation101_spill] sm:$0xff] %v15304_v5  ;;  %20700 = vst [vmem:[#allocation105_spill] sm:$0xff] %v15329_v3  ;;  %v15346_v49 = vsel %vm549_vm1, %v663_v32, %v665_v39  ;;  %v359_v39 = vld [vmem:[%s14554_s25 + $0x4a8] sm:$0x3]  ;;  %v15366_v14 = vld [vmem:[%s14554_s25 + $0x230] sm:$0xff] }
  0x73   : > { %12409 = vmatmul.mubr.msk.f32.gmra.mxu0 %vm838_vm2, %v15281_v11  ;;  %v15324_v11 = vsel %vm549_vm1, %v661_v56, %v663_v32  ;;  %20701 = vst [vmem:[#allocation106_spill] sm:$0xff] %v15333_v58  ;;  %v358_v56 = vld [vmem:[%s14554_s25 + $0x4a0] sm:$0xff]  ;;  %20703 = vst [vmem:[#allocation108_spill] sm:$0xff] %v15346_v49  ;;  %v15383_v47 = vsel %vm549_vm1, %v812_v55, %v814_v1 }
  0x74   : > { %12505 = vmatmul.mubr.msk.f32.gmra.mxu1 %vm838_vm2, %v15287_v21  ;;  %12411 = vmatprep.mubr.msk.f32.mxu0 %vm838_vm2, %v15290_v15  ;;  %20699 = vst [vmem:[#allocation104_spill] sm:$0xff] %v15324_v11  ;;  %v667_v21 = vrot.slane %v15301_v23, 1  ;;  %v668_v15 = vrot.slane %v15304_v5, 1  ;;  %v816_v32 = vrot.slane %v358_v56, 1  ;;  %20708 = vst [vmem:[#allocation113_spill] sm:$0xff] %v15366_v14  ;;  %v15394_v3 = vld [vmem:[%s14554_s25 + $0x240] sm:$0xff] }
  0x75   : > { %12507 = vmatprep.mubr.msk.f32.mxu1 %vm838_vm2, %v15297_v30  ;;  %20711 = vst [vmem:[#allocation116_spill] sm:$0xff] %v15383_v47  ;;  %20713 = vst [vmem:[#allocation118_spill] sm:$0xff] %v15394_v3  ;;  %v820_v5 = vrot.slane %v360_v46, 1  ;;  %v15401_v23 = vld [vmem:[%s14554_s25 + $0x248] sm:$0xff] }
  0x76   : > { %v15355_v30 = vsel %vm549_vm1, %v667_v21, %v668_v15  ;;  %v361_v21 = vld [vmem:[%s14554_s25 + $0x4b8] sm:$0xff]  ;;  %20715 = vst [vmem:[#allocation120_spill] sm:$0xff] %v15401_v23 }
  0x77   : > { %12412 = vmatmul.mubr.msk.f32.gmra.mxu0 %vm838_vm2, %v15315_v61  ;;  %20705 = vst [vmem:[#allocation110_spill] sm:$0xff] %v15355_v30  ;;  %v15359_v61 = vld [vmem:[%s14554_s25 + $0x228] sm:$0x3] }
  0x78   : > { %12508 = vmatmul.mubr.msk.f32.gmra.mxu1 %vm838_vm2, %v15318_v9  ;;  %12414 = vmatprep.mubr.msk.f32.mxu0 %vm838_vm2, %v15324_v11  ;;  %v672_v9 = vrot.slane %v15336_v31, 1  ;;  %20706 = vst [vmem:[#allocation111_spill] sm:$0xff] %v15359_v61  ;;  %v15362_v11 = vsel %vm549_vm1, %v811_v8, %v812_v55  ;;  %v15380_v8 = vsel %vm549_vm1, %v668_v15, %v670_v22  ;;  %v674_v56 = vrot.slane %v15359_v61, 1  ;;  %v362_v15 = vld [vmem:[%s14554_s25 + $0x4c0] sm:$0xff] }
  0x79   : > { %12510 = vmatprep.mubr.msk.f32.mxu1 %vm838_vm2, %v15333_v58  ;;  %20707 = vst [vmem:[#allocation112_spill] sm:$0xff] %v15362_v11  ;;  %v15369_v58 = vld [vmem:[%s14554_s25 + $0x238] sm:$0xff]  ;;  %20710 = vst [vmem:[#allocation115_spill] sm:$0xff] %v15380_v8  ;;  %v818_v31 = vrot.slane %v359_v39, 1  ;;  %v15398_v55 = vsel %vm549_vm1, %v814_v1, %v816_v32  ;;  %v821_v61 = vrot.slane %v361_v21, 1  ;;  %v679_v39 = vrot.slane %v15394_v3, 1 }
  0x7a   : > { %20709 = vst [vmem:[#allocation114_spill] sm:$0xff] %v15369_v58  ;;  %20714 = vst [vmem:[#allocation119_spill] sm:$0xff] %v15398_v55  ;;  %v15411_v1 = vsel %vm549_vm1, %v672_v9, %v674_v56  ;;  %v823_v46 = vrot.slane %v362_v15, 1  ;;  %v364_v56 = vld [vmem:[%s14554_s25 + $0x4d0] sm:$0x3]  ;;  %v15431_v15 = vld [vmem:[%s14554_s25 + $0x258] sm:$0xff] }
  0x7b   : > { %12415 = vmatmul.mubr.msk.f32.gmra.mxu0 %vm838_vm2, %v15346_v49  ;;  %v15389_v49 = vsel %vm549_vm1, %v670_v22, %v672_v9  ;;  %v363_v22 = vld [vmem:[%s14554_s25 + $0x4c8] sm:$0xff]  ;;  %20716 = vst [vmem:[#allocation121_spill] sm:$0xff] %v15411_v1  ;;  %v15417_v21 = vsel %vm549_vm1, %v816_v32, %v818_v31  ;;  %v365_v31 = vld [vmem:[%s14554_s25 + $0x4d8] sm:$0xff] }
  0x7c   : > { %12511 = vmatmul.mubr.msk.f32.gmra.mxu1 %vm838_vm2, %v15352_v34  ;;  %12417 = vmatprep.mubr.msk.f32.mxu0 %vm838_vm2, %v15355_v30  ;;  %20712 = vst [vmem:[#allocation117_spill] sm:$0xff] %v15389_v49  ;;  %v676_v34 = vrot.slane %v15366_v14, 1  ;;  %v677_v30 = vrot.slane %v15369_v58, 1  ;;  %20717 = vst [vmem:[#allocation122_spill] sm:$0xff] %v15417_v21  ;;  %v825_v9 = vrot.slane %v363_v22, 1  ;;  %v15448_v32 = vsel %vm549_vm1, %v821_v61, %v823_v46  ;;  %v15459_v3 = vld [vmem:[%s14554_s25 + $0x268] sm:$0xff] }
  0x7d   : > { %12513 = vmatprep.mubr.msk.f32.mxu1 %vm838_vm2, %v15362_v11  ;;  %20722 = vst [vmem:[#allocation127_spill] sm:$0xff] %v15448_v32  ;;  %v829_v58 = vrot.slane %v365_v31, 1  ;;  %v15466_v14 = vld [vmem:[%s14554_s25 + $0x270] sm:$0xff] }
  0x7e   : > { %v15420_v11 = vsel %vm549_vm1, %v676_v34, %v677_v30  ;;  %v366_v34 = vld [vmem:[%s14554_s25 + $0x4e0] sm:$0xff] }
  0x7f   : > { %12418 = vmatmul.mubr.msk.f32.gmra.mxu0 %vm838_vm2, %v15380_v8  ;;  %20718 = vst [vmem:[#allocation123_spill] sm:$0xff] %v15420_v11  ;;  %v15424_v8 = vld [vmem:[%s14554_s25 + $0x250] sm:$0x3] }
  0x80   : > { %12514 = vmatmul.mubr.msk.f32.gmra.mxu1 %vm838_vm2, %v15383_v47  ;;  %12420 = vmatprep.mubr.msk.f32.mxu0 %vm838_vm2, %v15389_v49  ;;  %v681_v47 = vrot.slane %v15401_v23, 1  ;;  %20719 = vst [vmem:[#allocation124_spill] sm:$0xff] %v15424_v8  ;;  %v15427_v49 = vsel %vm549_vm1, %v820_v5, %v821_v61  ;;  %v15445_v5 = vsel %vm549_vm1, %v677_v30, %v679_v39  ;;  %v683_v22 = vrot.slane %v15424_v8, 1  ;;  %v367_v30 = vld [vmem:[%s14554_s25 + $0x4e8] sm:$0xff] }
  0x81   : > { %12516 = vmatprep.mubr.msk.f32.mxu1 %vm838_vm2, %v15398_v55  ;;  %20720 = vst [vmem:[#allocation125_spill] sm:$0xff] %v15427_v49  ;;  %v15434_v55 = vld [vmem:[%s14554_s25 + $0x260] sm:$0xff]  ;;  %20721 = vst [vmem:[#allocation126_spill] sm:$0xff] %v15445_v5  ;;  %v827_v23 = vrot.slane %v364_v56, 1  ;;  %v15463_v61 = vsel %vm549_vm1, %v823_v46, %v825_v9  ;;  %v830_v8 = vrot.slane %v366_v34, 1  ;;  %v688_v46 = vrot.slane %v15459_v3, 1 }
  0x82   : > { %20724 = vst [vmem:[#allocation129_spill] sm:$0xff] %v15463_v61  ;;  %v15476_v56 = vsel %vm549_vm1, %v681_v47, %v683_v22  ;;  %v832_v31 = vrot.slane %v367_v30, 1  ;;  %v369_v30 = vld [vmem:[%s14554_s25 + $0x4f8] sm:$0x3] }
  0x83   : > { %12421 = vmatmul.mubr.msk.f32.gmra.mxu0 %vm838_vm2, %v15411_v1  ;;  %v15454_v1 = vsel %vm549_vm1, %v679_v39, %v681_v47  ;;  %v368_v39 = vld [vmem:[%s14554_s25 + $0x4f0] sm:$0xff]  ;;  %20725 = vst [vmem:[#allocation130_spill] sm:$0xff] %v15476_v56  ;;  %v15482_v34 = vsel %vm549_vm1, %v825_v9, %v827_v23  ;;  %v15492_v47 = vsel %vm549_vm1, %v829_v58, %v830_v8 }
  0x84   : > { %12517 = vmatmul.mubr.msk.f32.gmra.mxu1 %vm838_vm2, %v15417_v21  ;;  %12423 = vmatprep.mubr.msk.f32.mxu0 %vm838_vm2, %v15420_v11  ;;  %20723 = vst [vmem:[#allocation128_spill] sm:$0xff] %v15454_v1  ;;  %v685_v21 = vrot.slane %v15431_v15, 1  ;;  %v686_v11 = vrot.slane %v15434_v55, 1  ;;  %20726 = vst [vmem:[#allocation131_spill] sm:$0xff] %v15482_v34  ;;  %v834_v22 = vrot.slane %v368_v39, 1  ;;  %v836_v39 = vrot.slane %v369_v30, 1 }
  0x85   : > { %12519 = vmatprep.mubr.msk.f32.mxu1 %vm838_vm2, %v15427_v49  ;;  %20728 = vst [vmem:[#allocation133_spill] sm:$0xff] %v15492_v47 }
  0x86   : > { %v15485_v49 = vsel %vm549_vm1, %v685_v21, %v686_v11  ;;  %v15502_v23 = vsel %vm549_vm1, %v686_v11, %v688_v46  ;;  %v15505_v21 = vsel %vm549_vm1, %v830_v8, %v832_v31  ;;  %v15516_v11 = vsel %vm549_vm1, %v832_v31, %v834_v22  ;;  %v14112_v8 = vld [vmem:[%s14554_s25 + $0x10] sm:$0xff] }
  0x87   : > { %12424 = vmatmul.mubr.msk.f32.gmra.mxu0 %vm838_vm2, %v15445_v5  ;;  %20727 = vst [vmem:[#allocation132_spill] sm:$0xff] %v15485_v49  ;;  %20729 = vst [vmem:[#allocation134_spill] sm:$0xff] %v15502_v23  ;;  %v2772_v5 = vrot.slane %v14112_v8, 2  ;;  %v15531_v31 = vsel %vm549_vm1, %v834_v22, %v836_v39  ;;  %v14115_v22 = vld [vmem:[%s14554_s25 + $0x28] sm:$0xff]  ;;  %v14116_v39 = vld [vmem:[%s14554_s25 + $0x30] sm:$0xff] }
  0x88   : > { %12520 = vmatmul.mubr.msk.f32.gmra.mxu1 %vm838_vm2, %v15448_v32  ;;  %12426 = vmatprep.mubr.msk.f32.mxu0 %vm838_vm2, %v15454_v1  ;;  %v690_v32 = vrot.slane %v15466_v14, 1  ;;  %v15489_v1 = vld [vmem:[%s14554_s25 + $0x278] sm:$0x3]  ;;  %20730 = vst [vmem:[#allocation135_spill] sm:$0xff] %v15505_v21  ;;  %20732 = vst [vmem:[#allocation137_spill] sm:$0xff] %v15516_v11 }
  0x89   : > { %12522 = vmatprep.mubr.msk.f32.mxu1 %vm838_vm2, %v15463_v61  ;;  %v692_v58 = vrot.slane %v15489_v1, 1  ;;  %v14110_v61 = vld [vmem:[%s14554_s25] sm:$0xff]  ;;  %20734 = vst [vmem:[#allocation139_spill] sm:$0xff] %v15531_v31 }
  0x8a   : > { %v15511_v9 = vsel %vm549_vm1, %v688_v46, %v690_v32 }
  0x8b   : > { %12427 = vmatmul.mubr.msk.f32.gmra.mxu0 %vm838_vm2, %v15476_v56  ;;  %20731 = vst [vmem:[#allocation136_spill] sm:$0xff] %v15511_v9  ;;  %v14111_v56 = vld [vmem:[%s14554_s25 + $0x8] sm:$0xff]  ;;  %v15526_v46 = vsel %vm549_vm1, %v690_v32, %v692_v58  ;;  %v14114_v58 = vld [vmem:[%s14554_s25 + $0x20] sm:$0x3] }
  0x8c   : > { %12523 = vmatmul.mubr.msk.f32.gmra.mxu1 %vm838_vm2, %v15482_v34  ;;  %12429 = vmatprep.mubr.msk.f32.mxu0 %vm838_vm2, %v15485_v49  ;;  %v2769_v34 = vrot.slane %v14110_v61, 2  ;;  %v2770_v49 = vrot.slane %v14111_v56, 2  ;;  %20733 = vst [vmem:[#allocation138_spill] sm:$0xff] %v15526_v46 }
  0x8d   : > { %12525 = vmatprep.mubr.msk.f32.mxu1 %vm838_vm2, %v15492_v47  ;;  %v14113_v47 = vld [vmem:[%s14554_s25 + $0x18] sm:$0xff] }
  0x8e   : > { %v2771_v30 = vsel %vm2768_vm3, %v2769_v34, %v2770_v49  ;;  %v2773_v32 = vsel %vm2768_vm3, %v2770_v49, %v2772_v5  ;;  %v2778_v34 = vrot.slane %v14115_v22, 2 }
  0x8f   : > { %12430 = vmatmul.mubr.msk.f32.gmra.mxu0 %vm838_vm2, %v15502_v23 }
  0x90   : > { %12526 = vmatmul.mubr.msk.f32.gmra.mxu1 %vm838_vm2, %v15505_v21  ;;  %12432 = vmatprep.mubr.msk.f32.mxu0 %vm838_vm2, %v15511_v9  ;;  %v2774_v21 = vrot.slane %v14113_v47, 2  ;;  %v2779_v9 = vrot.slane %v14116_v39, 2 }
  0x91   : > { %12528 = vmatprep.mubr.msk.f32.mxu1 %vm838_vm2, %v15516_v11  ;;  %v2776_v11 = vrot.slane %v14114_v58, 2 }
  0x93   : > { %12433 = vmatmul.mubr.msk.f32.gmra.mxu0 %vm838_vm2, %v15526_v46  ;;  %v2775_v46 = vsel %vm2768_vm3, %v2772_v5, %v2774_v21  ;;  %v2777_v49 = vsel %vm2768_vm3, %v2774_v21, %v2776_v11  ;;  %v14118_v5 = vld [vmem:[%s14554_s25 + $0x40] sm:$0xff]  ;;  %v14120_v11 = vld [vmem:[%s14554_s25 + $0x50] sm:$0xff] }
  0x94   : > { %12529 = vmatmul.mubr.msk.f32.gmra.mxu1 %vm838_vm2, %v15531_v31  ;;  %12727 = vmatprep.mubr.msk.f32.mxu0 %vm838_vm2, %v2771_v30  ;;  %v14117_v30 = vld [vmem:[%s14554_s25 + $0x38] sm:$0xff]  ;;  %v20821_v31 = vld [vmem:[#allocation120_spill] sm:$0xff] }
  0x95   : > { %12533 = vmatprep.mubr.msk.f32.mxu1 %vm838_vm2, %v14110_v61  ;;  %v2781_v58 = vrot.slane %v14117_v30, 2  ;;  %v15556_v61 = vsel %vm2768_vm3, %v2778_v34, %v2779_v9  ;;  %v2900_v23 = vrot.slane %v20821_v31, 2 }
  0x96   : > { %20735 = vst [vmem:[#allocation140_spill] sm:$0xff] %v15556_v61 }
  0x97   : > { %12728 = vmatmul.mubr.msk.f32.vlgmr.msra.gmra.mxu0 %vm838_vm2, %v2773_v32  ;;  %v2783_v32 = vrot.slane %v14118_v5, 2 }
  0x98   : > { %12534 = vmatmul.mubr.msk.f32.vlgmr.msra.gmra.mxu1 %vm838_vm2, %v14111_v56  ;;  %13114 = vmatpush3.msk.msra.mxu0 %vm1095_vm0, %v15052_v38  ;;  %v15565_v38 = vsel %vm2768_vm3, %v2779_v9, %v2781_v58  ;;  %v14122_v9 = vld [vmem:[%s14554_s25 + $0x60] sm:$0xff] }
  0x99   : > { %12920 = vmatpush3.msk.msra.mxu1 %vm1095_vm0, %v15039_v48  ;;  %12536 = vmatprep.mubr.msk.f32.mxu1 %vm838_vm2, %v14112_v8  ;;  %20736 = vst [vmem:[#allocation141_spill] sm:$0xff] %v15565_v38  ;;  %v14119_v48 = vld [vmem:[%s14554_s25 + $0x48] sm:$0x3]  ;;  %v15570_v21 = vsel %vm2768_vm3, %v2781_v58, %v2783_v32  ;;  %v2787_v8 = vrot.slane %v14120_v11, 2 }
  0x9a   : > { %12730 = vmatprep.mubr.msk.f32.mxu0 %vm838_vm2, %v2775_v46  ;;  %v2785_v56 = vrot.slane %v14119_v48, 2  ;;  %20737 = vst [vmem:[#allocation142_spill] sm:$0xff] %v15570_v21  ;;  %v14121_v46 = vld [vmem:[%s14554_s25 + $0x58] sm:$0xff]  ;;  %v14123_v58 = vld [vmem:[%s14554_s25 + $0x68] sm:$0xff] }
  0x9b   : > { %12731 = vmatmul.mubr.msk.f32.gmra.mxu0 %vm838_vm2, %v2777_v49  ;;  %v2788_v34 = vrot.slane %v14121_v46, 2  ;;  %v2792_v48 = vrot.slane %v14123_v58, 2 }
  0x9c   : > { %12537 = vmatmul.mubr.msk.f32.gmra.mxu1 %vm838_vm2, %v14113_v47  ;;  %12733 = vmatprep.mubr.msk.f32.mxu0 %vm838_vm2, %v15556_v61  ;;  %v15580_v47 = vsel %vm2768_vm3, %v2783_v32, %v2785_v56  ;;  %v14124_v32 = vld [vmem:[%s14554_s25 + $0x70] sm:$0x3] }
  0x9d   : > { %12539 = vmatprep.mubr.msk.f32.mxu1 %vm838_vm2, %v14115_v22  ;;  %20738 = vst [vmem:[#allocation143_spill] sm:$0xff] %v15580_v47  ;;  %v2790_v22 = vrot.slane %v14122_v9, 2  ;;  %v15585_v49 = vsel %vm2768_vm3, %v2787_v8, %v2788_v34  ;;  %v14125_v8 = vld [vmem:[%s14554_s25 + $0x78] sm:$0xff] }
  0x9e   : > { %20739 = vst [vmem:[#allocation144_spill] sm:$0xff] %v15585_v49 }
  0x9f   : > { %12734 = vmatmul.mubr.msk.f32.gmra.mxu0 %vm838_vm2, %v15565_v38  ;;  %v15599_v56 = vsel %vm2768_vm3, %v2790_v22, %v2792_v48 }
  0xa0   : > { %12540 = vmatmul.mubr.msk.f32.gmra.mxu1 %vm838_vm2, %v14116_v39  ;;  %12736 = vmatprep.mubr.msk.f32.mxu0 %vm838_vm2, %v15570_v21  ;;  %v15594_v39 = vsel %vm2768_vm3, %v2788_v34, %v2790_v22  ;;  %20741 = vst [vmem:[#allocation146_spill] sm:$0xff] %v15599_v56  ;;  %v2796_v21 = vrot.slane %v14125_v8, 2 }
  0xa1   : > { %12542 = vmatprep.mubr.msk.f32.mxu1 %vm838_vm2, %v14117_v30  ;;  %20740 = vst [vmem:[#allocation145_spill] sm:$0xff] %v15594_v39  ;;  %v2794_v30 = vrot.slane %v14124_v32, 2  ;;  %v14128_v32 = vld [vmem:[%s14554_s25 + $0x90] sm:$0xff] }
  0xa3   : > { %12737 = vmatmul.mubr.msk.f32.gmra.mxu0 %vm838_vm2, %v15580_v47  ;;  %v14126_v47 = vld [vmem:[%s14554_s25 + $0x80] sm:$0xff] }
  0xa4   : > { %12543 = vmatmul.mubr.msk.f32.gmra.mxu1 %vm838_vm2, %v14118_v5  ;;  %12739 = vmatprep.mubr.msk.f32.mxu0 %vm838_vm2, %v15585_v49  ;;  %v2797_v38 = vrot.slane %v14126_v47, 2  ;;  %v15609_v5 = vsel %vm2768_vm3, %v2792_v48, %v2794_v30  ;;  %v2801_v49 = vrot.slane %v14128_v32, 2  ;;  %v14129_v48 = vld [vmem:[%s14554_s25 + $0x98] sm:$0x3] }
  0xa5   : > { %12545 = vmatprep.mubr.msk.f32.mxu1 %vm838_vm2, %v14120_v11  ;;  %20742 = vst [vmem:[#allocation147_spill] sm:$0xff] %v15609_v5  ;;  %v14127_v11 = vld [vmem:[%s14554_s25 + $0x88] sm:$0xff]  ;;  %v2803_v30 = vrot.slane %v14129_v48, 2  ;;  %v2821_v48 = vrot.slane %v14825_v4, 2 }
  0xa6   : > { %v2799_v34 = vrot.slane %v14127_v11, 2  ;;  %v15614_v22 = vsel %vm2768_vm3, %v2796_v21, %v2797_v38 }
  0xa7   : > { %12740 = vmatmul.mubr.msk.f32.gmra.mxu0 %vm838_vm2, %v15594_v39  ;;  %20743 = vst [vmem:[#allocation148_spill] sm:$0xff] %v15614_v22  ;;  %v14131_v39 = vld [vmem:[%s14554_s25 + $0xa8] sm:$0xff] }
  0xa8   : > { %12546 = vmatmul.mubr.msk.f32.gmra.mxu1 %vm838_vm2, %v14121_v46  ;;  %12742 = vmatprep.mubr.msk.f32.mxu0 %vm838_vm2, %v15599_v56  ;;  %v15623_v46 = vsel %vm2768_vm3, %v2797_v38, %v2799_v34  ;;  %v15628_v21 = vsel %vm2768_vm3, %v2799_v34, %v2801_v49  ;;  %v2806_v61 = vrot.slane %v14131_v39, 2  ;;  %v15638_v38 = vsel %vm2768_vm3, %v2801_v49, %v2803_v30  ;;  %v14134_v30 = vld [vmem:[%s14554_s25 + $0xc8] sm:$0xff] }
  0xa9   : > { %12548 = vmatprep.mubr.msk.f32.mxu1 %vm838_vm2, %v14122_v9  ;;  %20744 = vst [vmem:[#allocation149_spill] sm:$0xff] %v15623_v46  ;;  %20745 = vst [vmem:[#allocation150_spill] sm:$0xff] %v15628_v21  ;;  %v14130_v9 = vld [vmem:[%s14554_s25 + $0xa0] sm:$0xff]  ;;  %v2810_v34 = vrot.slane %v14737_v6, 2  ;;  %v2814_v6 = vrot.slane %v14767_v26, 2 }
  0xaa   : > { %v2805_v56 = vrot.slane %v14130_v9, 2  ;;  %20746 = vst [vmem:[#allocation151_spill] sm:$0xff] %v15638_v38 }
  0xab   : > { %12743 = vmatmul.mubr.msk.f32.gmra.mxu0 %vm838_vm2, %v15609_v5 }
  0xac   : > { %12549 = vmatmul.mubr.msk.f32.gmra.mxu1 %vm838_vm2, %v14123_v58  ;;  %12745 = vmatprep.mubr.msk.f32.mxu0 %vm838_vm2, %v15614_v22  ;;  %v2808_v58 = vrot.slane %v14730_v0, 2  ;;  %v2812_v0 = vrot.slane %v14760_v17, 2 }
  0xad   : > { %12551 = vmatprep.mubr.msk.f32.mxu1 %vm838_vm2, %v14125_v8  ;;  %v15643_v8 = vsel %vm2768_vm3, %v2805_v56, %v2806_v61  ;;  %v2815_v56 = vrot.slane %v14770_v27, 2  ;;  %v2819_v27 = vrot.slane %v14802_v50, 2 }
  0xae   : > { %20747 = vst [vmem:[#allocation152_spill] sm:$0xff] %v15643_v8  ;;  %v15657_v49 = vsel %vm2768_vm3, %v2808_v58, %v2810_v34  ;;  %v15667_v17 = vsel %vm2768_vm3, %v2810_v34, %v2812_v0  ;;  %v2824_v34 = vrot.slane %v14835_v18, 2  ;;  %v14135_v0 = vld [vmem:[%s14554_s25 + $0xd0] sm:$0xff] }
  0xaf   : > { %12746 = vmatmul.mubr.msk.f32.gmra.mxu0 %vm838_vm2, %v15623_v46  ;;  %20749 = vst [vmem:[#allocation154_spill] sm:$0xff] %v15657_v49  ;;  %20750 = vst [vmem:[#allocation155_spill] sm:$0xff] %v15667_v17  ;;  %v15673_v26 = vsel %vm2768_vm3, %v2814_v6, %v2815_v56  ;;  %v15700_v4 = vsel %vm2768_vm3, %v2819_v27, %v2821_v48  ;;  %v2826_v6 = vrot.slane %v14860_v62, 2  ;;  %v2833_v48 = vrot.slane %v14900_v42, 2 }
  0xb0   : > { %12552 = vmatmul.mubr.msk.f32.gmra.mxu1 %vm838_vm2, %v14126_v47  ;;  %12748 = vmatprep.mubr.msk.f32.mxu0 %vm838_vm2, %v15628_v21  ;;  %v15652_v47 = vsel %vm2768_vm3, %v2806_v61, %v2808_v58  ;;  %v2817_v61 = vrot.slane %v14795_v43, 2  ;;  %20751 = vst [vmem:[#allocation156_spill] sm:$0xff] %v15673_v26  ;;  %v2823_v58 = vrot.slane %v14832_v16, 2  ;;  %20754 = vst [vmem:[#allocation159_spill] sm:$0xff] %v15700_v4  ;;  %v20815_v21 = vld [vmem:[#allocation114_spill] sm:$0xff] }
  0xb1   : > { %12554 = vmatprep.mubr.msk.f32.mxu1 %vm838_vm2, %v14127_v11  ;;  %20748 = vst [vmem:[#allocation153_spill] sm:$0xff] %v15652_v47  ;;  %v14132_v11 = vld [vmem:[%s14554_s25 + $0xb0] sm:$0xff]  ;;  %v2896_v46 = vrot.slane %v20815_v21, 2 }
  0xb3   : > { %12749 = vmatmul.mubr.msk.f32.gmra.mxu0 %vm838_vm2, %v15638_v38 }
  0xb4   : > { %12555 = vmatmul.mubr.msk.f32.gmra.mxu1 %vm838_vm2, %v14128_v32  ;;  %12751 = vmatprep.mubr.msk.f32.mxu0 %vm838_vm2, %v15643_v8  ;;  %v15683_v32 = vsel %vm2768_vm3, %v2815_v56, %v2817_v61  ;;  %v15706_v56 = vsel %vm2768_vm3, %v2823_v58, %v2824_v34  ;;  %v2839_v58 = vrot.slane %v14955_v63, 2 }
  0xb5   : > { %12557 = vmatprep.mubr.msk.f32.mxu1 %vm838_vm2, %v14130_v9  ;;  %20752 = vst [vmem:[#allocation157_spill] sm:$0xff] %v15683_v32  ;;  %v15689_v9 = vsel %vm2768_vm3, %v2817_v61, %v2819_v27  ;;  %20755 = vst [vmem:[#allocation160_spill] sm:$0xff] %v15706_v56  ;;  %v2828_v61 = vrot.slane %v14867_v20, 2  ;;  %v2830_v27 = vrot.slane %v14890_v12, 2 }
  0xb6   : > { %20753 = vst [vmem:[#allocation158_spill] sm:$0xff] %v15689_v9 }
  0xb7   : > { %12752 = vmatmul.mubr.msk.f32.gmra.mxu0 %vm838_vm2, %v15652_v47  ;;  %v15733_v12 = vsel %vm2768_vm3, %v2828_v61, %v2830_v27  ;;  %v2850_v27 = vrot.slane %v15027_v45, 2 }
  0xb8   : > { %12558 = vmatmul.mubr.msk.f32.gmra.mxu1 %vm838_vm2, %v14131_v39  ;;  %12754 = vmatprep.mubr.msk.f32.mxu0 %vm838_vm2, %v15657_v49  ;;  %v14133_v39 = vld [vmem:[%s14554_s25 + $0xb8] sm:$0xff]  ;;  %20758 = vst [vmem:[#allocation163_spill] sm:$0xff] %v15733_v12  ;;  %v20808_v49 = vld [vmem:[#allocation107_spill] sm:$0xff] }
  0xb9   : > { %12560 = vmatprep.mubr.msk.f32.mxu1 %vm838_vm2, %v14132_v11  ;;  %v15716_v11 = vsel %vm2768_vm3, %v2824_v34, %v2826_v6  ;;  %v2841_v34 = vrot.slane %v14962_v52, 2  ;;  %v2891_v47 = vrot.slane %v20808_v49, 2 }
  0xba   : > { %20756 = vst [vmem:[#allocation161_spill] sm:$0xff] %v15716_v11 }
  0xbb   : > { %12755 = vmatmul.mubr.msk.f32.gmra.mxu0 %vm838_vm2, %v15667_v17 }
  0xbc   : > { %12561 = vmatmul.mubr.msk.f32.gmra.mxu1 %vm838_vm2, %v14133_v39  ;;  %12757 = vmatprep.mubr.msk.f32.mxu0 %vm838_vm2, %v15673_v26  ;;  %v2832_v39 = vrot.slane %v14897_v59, 2 }
  0xbd   : > { %12563 = vmatprep.mubr.msk.f32.mxu1 %vm838_vm2, %v14134_v30  ;;  %v2837_v30 = vrot.slane %v14932_v13, 2 }
  0xbf   : > { %12758 = vmatmul.mubr.msk.f32.gmra.mxu0 %vm838_vm2, %v15683_v32  ;;  %v15766_v63 = vsel %vm2768_vm3, %v2837_v30, %v2839_v58  ;;  %v2855_v58 = vrot.slane %v15074_v40, 2 }
  0xc0   : > { %12564 = vmatmul.mubr.msk.f32.gmra.mxu1 %vm838_vm2, %v14135_v0  ;;  %12760 = vmatprep.mubr.msk.f32.mxu0 %vm838_vm2, %v15689_v9  ;;  %v2842_v0 = vrot.slane %v14965_v51, 2  ;;  %20762 = vst [vmem:[#allocation167_spill] sm:$0xff] %v15766_v63  ;;  %v20802_v9 = vld [vmem:[#allocation101_spill] sm:$0xff] }
  0xc1   : > { %12566 = vmatprep.mubr.msk.f32.mxu1 %vm838_vm2, %v14795_v43  ;;  %v15722_v43 = vsel %vm2768_vm3, %v2826_v6, %v2828_v61  ;;  %v2846_v6 = vrot.slane %v14997_v35, 2  ;;  %v2848_v61 = vrot.slane %v15020_v33, 2  ;;  %v2853_v33 = vrot.slane %v15065_v41, 2 }
  0xc2   : > { %20757 = vst [vmem:[#allocation162_spill] sm:$0xff] %v15722_v43  ;;  %v2887_v32 = vrot.slane %v20802_v9, 2 }
  0xc3   : > { %12761 = vmatmul.mubr.msk.f32.gmra.mxu0 %vm838_vm2, %v15700_v4 }
  0xc4   : > { %12567 = vmatmul.mubr.msk.f32.gmra.mxu1 %vm838_vm2, %v14802_v50  ;;  %12763 = vmatprep.mubr.msk.f32.mxu0 %vm838_vm2, %v15706_v56  ;;  %v2835_v50 = vrot.slane %v14925_v29, 2 }
  0xc5   : > { %12569 = vmatprep.mubr.msk.f32.mxu1 %vm838_vm2, %v14832_v16  ;;  %v15739_v16 = vsel %vm2768_vm3, %v2832_v39, %v2833_v48  ;;  %v2851_v39 = vrot.slane %v15030_v44, 2 }
  0xc6   : > { %20759 = vst [vmem:[#allocation164_spill] sm:$0xff] %v15739_v16 }
  0xc7   : > { %12764 = vmatmul.mubr.msk.f32.gmra.mxu0 %vm838_vm2, %v15716_v11 }
  0xc8   : > { %12570 = vmatmul.mubr.msk.f32.gmra.mxu1 %vm838_vm2, %v14835_v18  ;;  %12766 = vmatprep.mubr.msk.f32.mxu0 %vm838_vm2, %v15722_v43  ;;  %v15749_v18 = vsel %vm2768_vm3, %v2833_v48, %v2835_v50  ;;  %v20795_v43 = vld [vmem:[#allocation94_spill] sm:$0xff] }
  0xc9   : > { %12572 = vmatprep.mubr.msk.f32.mxu1 %vm838_vm2, %v14860_v62  ;;  %20760 = vst [vmem:[#allocation165_spill] sm:$0xff] %v15749_v18  ;;  %v15755_v62 = vsel %vm2768_vm3, %v2835_v50, %v2837_v30  ;;  %v15811_v30 = vsel %vm2768_vm3, %v2850_v27, %v2851_v39  ;;  %v2859_v27 = vrot.slane %v15106_v28, 2  ;;  %v2882_v11 = vrot.slane %v20795_v43, 2 }
  0xca   : > { %20761 = vst [vmem:[#allocation166_spill] sm:$0xff] %v15755_v62  ;;  %20768 = vst [vmem:[#allocation173_spill] sm:$0xff] %v15811_v30 }
  0xcb   : > { %12767 = vmatmul.mubr.msk.f32.gmra.mxu0 %vm838_vm2, %v15733_v12 }
  0xcc   : > { %12573 = vmatmul.mubr.msk.f32.gmra.mxu1 %vm838_vm2, %v14867_v20  ;;  %12769 = vmatprep.mubr.msk.f32.mxu0 %vm838_vm2, %v15739_v16  ;;  %v15772_v20 = vsel %vm2768_vm3, %v2841_v34, %v2842_v0 }
  0xcd   : > { %12575 = vmatprep.mubr.msk.f32.mxu1 %vm838_vm2, %v14897_v59  ;;  %v2844_v59 = vrot.slane %v14990_v24, 2  ;;  %20763 = vst [vmem:[#allocation168_spill] sm:$0xff] %v15772_v20 }
  0xcf   : > { %12770 = vmatmul.mubr.msk.f32.gmra.mxu0 %vm838_vm2, %v15749_v18  ;;  %v20789_v18 = vld [vmem:[#allocation88_spill] sm:$0xff] }
  0xd0   : > { %12576 = vmatmul.mubr.msk.f32.gmra.mxu1 %vm838_vm2, %v14900_v42  ;;  %12772 = vmatprep.mubr.msk.f32.mxu0 %vm838_vm2, %v15755_v62  ;;  %v15782_v42 = vsel %vm2768_vm3, %v2842_v0, %v2844_v59 }
  0xd1   : > { %12578 = vmatprep.mubr.msk.f32.mxu1 %vm838_vm2, %v14925_v29  ;;  %20764 = vst [vmem:[#allocation169_spill] sm:$0xff] %v15782_v42  ;;  %v15788_v29 = vsel %vm2768_vm3, %v2844_v59, %v2846_v6  ;;  %v2857_v59 = vrot.slane %v15099_v2, 2 }
  0xd2   : > { %20765 = vst [vmem:[#allocation170_spill] sm:$0xff] %v15788_v29 }
  0xd3   : > { %12773 = vmatmul.mubr.msk.f32.gmra.mxu0 %vm838_vm2, %v15766_v63  ;;  %v2873_v63 = vrot.slane %v15206_v36, 2 }
  0xd4   : > { %12579 = vmatmul.mubr.msk.f32.gmra.mxu1 %vm838_vm2, %v14932_v13  ;;  %12775 = vmatprep.mubr.msk.f32.mxu0 %vm838_vm2, %v15772_v20 }
  0xd5   : > { %12581 = vmatprep.mubr.msk.f32.mxu1 %vm838_vm2, %v14962_v52  ;;  %v15803_v52 = vsel %vm2768_vm3, %v2846_v6, %v2848_v61  ;;  %v15835_v61 = vsel %vm2768_vm3, %v2853_v33, %v2855_v58 }
  0xd6   : > { %20767 = vst [vmem:[#allocation172_spill] sm:$0xff] %v15803_v52  ;;  %20772 = vst [vmem:[#allocation177_spill] sm:$0xff] %v15835_v61 }
  0xd7   : > { %v15792_v48 = vpop.f32.mrf.mxu0  ;;  %12776 = vmatmul.mubr.msk.f32.gmra.mxu0 %vm838_vm2, %v15782_v42 }
  0xd8   : > { %v15796_v13 = vpop.f32.mrf.mxu1  ;;  %12582 = vmatmul.mubr.msk.f32.gmra.mxu1 %vm838_vm2, %v14965_v51  ;;  %12778 = vmatprep.mubr.msk.f32.mxu0 %vm838_vm2, %v15788_v29  ;;  %v2864_v29 = vrot.slane %v15141_v10, 2 }
  0xd9   : > { %20766 = vst [vmem:[#allocation171_spill] sm:$0xff] %v15796_v13  ;;  %v15806_v50 = vpop.f32.mrf.mxu0  ;;  %12584 = vmatprep.mubr.msk.f32.mxu1 %vm838_vm2, %v14990_v24  ;;  %v15827_v24 = vsel %vm2768_vm3, %v2851_v39, %v2853_v33  ;;  %v2862_v39 = vrot.slane %v15134_v37, 2 }
  0xda   : > { %v15814_v34 = vpop.f32.mrf.mxu1  ;;  %20771 = vst [vmem:[#allocation176_spill] sm:$0xff] %v15827_v24 }
  0xdb   : > { %20769 = vst [vmem:[#allocation174_spill] sm:$0xff] %v15814_v34  ;;  %v15816_v51 = vpop.f32.mrf.mxu0  ;;  %12779 = vmatmul.mubr.msk.f32.gmra.mxu0 %vm838_vm2, %v15803_v52 }
  0xdc   : > { %v15820_v0 = vpop.f32.mrf.mxu1  ;;  %12585 = vmatmul.mubr.msk.f32.gmra.mxu1 %vm838_vm2, %v14997_v35  ;;  %12781 = vmatprep.mubr.msk.f32.mxu0 %vm838_vm2, %v15811_v30  ;;  %v2860_v35 = vrot.slane %v15109_v54, 2 }
  0xdd   : > { %20770 = vst [vmem:[#allocation175_spill] sm:$0xff] %v15820_v0  ;;  %v15830_v6 = vpop.f32.mrf.mxu0  ;;  %12587 = vmatprep.mubr.msk.f32.mxu1 %vm838_vm2, %v15027_v45  ;;  %v15852_v45 = vsel %vm2768_vm3, %v2855_v58, %v2857_v59  ;;  %v2866_v59 = vrot.slane %v15164_v7, 2 }
  0xde   : > { %v15839_v52 = vpop.f32.mrf.mxu1  ;;  %20775 = vst [vmem:[#allocation180_spill] sm:$0xff] %v15852_v45 }
  0xdf   : > { %20773 = vst [vmem:[#allocation178_spill] sm:$0xff] %v15839_v52  ;;  %v15841_v30 = vpop.f32.mrf.mxu0  ;;  %12782 = vmatmul.mubr.msk.f32.gmra.mxu0 %vm838_vm2, %v15827_v24  ;;  %v15860_v24 = vsel %vm2768_vm3, %v2859_v27, %v2860_v35 }
  0xe0   : > { %v15845_v2 = vpop.f32.mrf.mxu1  ;;  %12588 = vmatmul.mubr.msk.f32.gmra.mxu1 %vm838_vm2, %v15030_v44  ;;  %12784 = vmatprep.mubr.msk.f32.mxu0 %vm838_vm2, %v15835_v61  ;;  %20776 = vst [vmem:[#allocation181_spill] sm:$0xff] %v15860_v24  ;;  %v2868_v61 = vrot.slane %v15171_v60, 2 }
  0xe1   : > { %20774 = vst [vmem:[#allocation179_spill] sm:$0xff] %v15845_v2  ;;  %v15855_v33 = vpop.f32.mrf.mxu0  ;;  %12590 = vmatprep.mubr.msk.f32.mxu1 %vm838_vm2, %v15065_v41  ;;  %v15876_v41 = vsel %vm2768_vm3, %v2860_v35, %v2862_v39  ;;  %v2871_v35 = vrot.slane %v15199_v53, 2 }
  0xe2   : > { %v15863_v42 = vpop.f32.mrf.mxu1  ;;  %20779 = vst [vmem:[#allocation184_spill] sm:$0xff] %v15876_v41 }
  0xe3   : > { %20777 = vst [vmem:[#allocation182_spill] sm:$0xff] %v15863_v42  ;;  %v15865_v44 = vpop.f32.mrf.mxu0  ;;  %12785 = vmatmul.mubr.msk.f32.gmra.mxu0 %vm838_vm2, %v15852_v45  ;;  %v15884_v45 = vsel %vm2768_vm3, %v2862_v39, %v2864_v29 }
  0xe4   : > { %v15869_v58 = vpop.f32.mrf.mxu1  ;;  %12591 = vmatmul.mubr.msk.f32.gmra.mxu1 %vm838_vm2, %v15074_v40  ;;  %12787 = vmatprep.mubr.msk.f32.mxu0 %vm838_vm2, %v15860_v24  ;;  %20780 = vst [vmem:[#allocation185_spill] sm:$0xff] %v15884_v45  ;;  %v2869_v40 = vrot.slane %v15174_v57, 2 }
  0xe5   : > { %20778 = vst [vmem:[#allocation183_spill] sm:$0xff] %v15869_v58  ;;  %v15879_v27 = vpop.f32.mrf.mxu0  ;;  %12593 = vmatprep.mubr.msk.f32.mxu1 %vm838_vm2, %v15106_v28  ;;  %v15901_v28 = vsel %vm2768_vm3, %v2864_v29, %v2866_v59 }
  0xe6   : > { %v15888_v20 = vpop.f32.mrf.mxu1  ;;  %20783 = vst [vmem:[#allocation188_spill] sm:$0xff] %v15901_v28 }
  0xe7   : > { %20781 = vst [vmem:[#allocation186_spill] sm:$0xff] %v15888_v20  ;;  %v15890_v24 = vpop.f32.mrf.mxu0  ;;  %12788 = vmatmul.mubr.msk.f32.gmra.mxu0 %vm838_vm2, %v15876_v41  ;;  %v15909_v41 = vsel %vm2768_vm3, %v2868_v61, %v2869_v40  ;;  %v2875_v61 = vrot.slane %v15229_v25, 2 }
  0xe8   : > { %v15894_v7 = vpop.f32.mrf.mxu1  ;;  %12594 = vmatmul.mubr.msk.f32.gmra.mxu1 %vm838_vm2, %v15109_v54  ;;  %12790 = vmatprep.mubr.msk.f32.mxu0 %vm838_vm2, %v15884_v45  ;;  %20784 = vst [vmem:[#allocation189_spill] sm:$0xff] %v15909_v41  ;;  %v2877_v45 = vrot.slane %v15236_v19, 2 }
  0xe9   : > { %20782 = vst [vmem:[#allocation187_spill] sm:$0xff] %v15894_v7  ;;  %v15904_v39 = vpop.f32.mrf.mxu0  ;;  %12596 = vmatprep.mubr.msk.f32.mxu1 %vm838_vm2, %v15134_v37  ;;  %v15925_v37 = vsel %vm2768_vm3, %v2869_v40, %v2871_v35  ;;  %v20793_v40 = vld [vmem:[#allocation92_spill] sm:$0xff] }
  0xea   : > { %v15912_v62 = vpop.f32.mrf.mxu1  ;;  %20787 = vst [vmem:[#allocation192_spill] sm:$0xff] %v15925_v37 }
  0xeb   : > { %20785 = vst [vmem:[#allocation190_spill] sm:$0xff] %v15912_v62  ;;  %v15914_v54 = vpop.f32.mrf.mxu0  ;;  %12791 = vmatmul.mubr.msk.f32.gmra.mxu0 %vm838_vm2, %v15901_v28  ;;  %v15933_v28 = vsel %vm2768_vm3, %v2871_v35, %v2873_v63  ;;  %v2880_v35 = vrot.slane %v20793_v40, 2 }
  0xec   : > { %v15918_v29 = vpop.f32.mrf.mxu1  ;;  %12597 = vmatmul.mubr.msk.f32.gmra.mxu1 %vm838_vm2, %v15141_v10  ;;  %12793 = vmatprep.mubr.msk.f32.mxu0 %vm838_vm2, %v15909_v41  ;;  %20788 = vst [vmem:[#allocation193_spill] sm:$0xff] %v15933_v28  ;;  %v2878_v10 = vrot.slane %v20789_v18, 2 }
  0xed   : > { %20786 = vst [vmem:[#allocation191_spill] sm:$0xff] %v15918_v29  ;;  %v15928_v59 = vpop.f32.mrf.mxu0  ;;  %12599 = vmatprep.mubr.msk.f32.mxu1 %vm838_vm2, %v15171_v60  ;;  %v15950_v60 = vsel %vm2768_vm3, %v2873_v63, %v2875_v61  ;;  %v20797_v63 = vld [vmem:[#allocation98_spill] sm:$0xff] }
  0xee   : > { %v15937_v16 = vpop.f32.mrf.mxu1  ;;  %20792 = vst [vmem:[#allocation195_spill] sm:$0xff] %v15950_v60  ;;  %v2884_v61 = vrot.slane %v20797_v63, 2  ;;  %v20801_v63 = vld [vmem:[#allocation100_spill] sm:$0xff] }
  0xef   : > { %20790 = vst [vmem:[#allocation88_spill] sm:$0xff] %v15937_v16  ;;  %v15939_v41 = vpop.f32.mrf.mxu0  ;;  %12794 = vmatmul.mubr.msk.f32.gmra.mxu0 %vm838_vm2, %v15925_v37  ;;  %v15958_v37 = vsel %vm2768_vm3, %v2877_v45, %v2878_v10  ;;  %v2886_v4 = vrot.slane %v20801_v63, 2  ;;  %v14146_v16 = vld [vmem:[%s14554_s25 + $0x2d0] sm:$0xff] }
  0xf0   : > { %v15943_v25 = vpop.f32.mrf.mxu1  ;;  %12600 = vmatmul.mubr.msk.f32.gmra.mxu1 %vm838_vm2, %v15174_v57  ;;  %12796 = vmatprep.mubr.msk.f32.mxu0 %vm838_vm2, %v15933_v28  ;;  %20794 = vst [vmem:[#allocation92_spill] sm:$0xff] %v15958_v37 }
  0xf1   : > { %20791 = vst [vmem:[#allocation194_spill] sm:$0xff] %v15943_v25  ;;  %v15953_v12 = vpop.f32.mrf.mxu0  ;;  %12602 = vmatprep.mubr.msk.f32.mxu1 %vm838_vm2, %v15199_v53  ;;  %v15975_v53 = vsel %vm2768_vm3, %v2878_v10, %v2880_v35 }
  0xf2   : > { %v15961_v56 = vpop.f32.mrf.mxu1  ;;  %20799 = vst [vmem:[#allocation196_spill] sm:$0xff] %v15975_v53 }
  0xf3   : > { %20796 = vst [vmem:[#allocation94_spill] sm:$0xff] %v15961_v56  ;;  %v15963_v57 = vpop.f32.mrf.mxu0  ;;  %12797 = vmatmul.mubr.msk.f32.gmra.mxu0 %vm838_vm2, %v15950_v60  ;;  %v15982_v60 = vsel %vm2768_vm3, %v2880_v35, %v2882_v11  ;;  %v20806_v35 = vld [vmem:[#allocation105_spill] sm:$0xff] }
  0xf4   : > { %v15968_v28 = vpop.f32.mrf.mxu1  ;;  %12603 = vmatmul.mubr.msk.f32.gmra.mxu1 %vm838_vm2, %v15206_v36  ;;  %12799 = vmatprep.mubr.msk.f32.mxu0 %vm838_vm2, %v15958_v37  ;;  %20800 = vst [vmem:[#allocation197_spill] sm:$0xff] %v15982_v60  ;;  %v2889_v37 = vrot.slane %v20806_v35, 2 }
  0xf5   : > { %20798 = vst [vmem:[#allocation98_spill] sm:$0xff] %v15968_v28  ;;  %v15977_v45 = vpop.f32.mrf.mxu0  ;;  %12605 = vmatprep.mubr.msk.f32.mxu1 %vm838_vm2, %v15236_v19  ;;  %v15999_v19 = vsel %vm2768_vm3, %v2882_v11, %v2884_v61  ;;  %v20810_v11 = vld [vmem:[#allocation111_spill] sm:$0xff] }
  0xf6   : > { %v15986_v26 = vpop.f32.mrf.mxu1  ;;  %20805 = vst [vmem:[#allocation198_spill] sm:$0xff] %v15999_v19  ;;  %v2893_v61 = vrot.slane %v20810_v11, 2  ;;  %v20814_v11 = vld [vmem:[#allocation113_spill] sm:$0xff] }
  0xf7   : > { %20803 = vst [vmem:[#allocation100_spill] sm:$0xff] %v15986_v26  ;;  %v15988_v36 = vpop.f32.mrf.mxu0  ;;  %12800 = vmatmul.mubr.msk.f32.gmra.mxu0 %vm838_vm2, %v15975_v53  ;;  %v16007_v53 = vsel %vm2768_vm3, %v2886_v4, %v2887_v32  ;;  %v16024_v4 = vsel %vm2768_vm3, %v2887_v32, %v2889_v37  ;;  %v2895_v38 = vrot.slane %v20814_v11, 2 }
  0xf8   : > { %v15992_v10 = vpop.f32.mrf.mxu1  ;;  %12606 = vmatmul.mubr.msk.f32.gmra.mxu1 %vm838_vm2, %v20789_v18  ;;  %12802 = vmatprep.mubr.msk.f32.mxu0 %vm838_vm2, %v15982_v60  ;;  %20807 = vst [vmem:[#allocation105_spill] sm:$0xff] %v16007_v53  ;;  %20812 = vst [vmem:[#allocation199_spill] sm:$0xff] %v16024_v4 }
  0xf9   : > { %20804 = vst [vmem:[#allocation101_spill] sm:$0xff] %v15992_v10  ;;  %v16002_v17 = vpop.f32.mrf.mxu0  ;;  %12608 = vmatprep.mubr.msk.f32.mxu1 %vm838_vm2, %v20793_v40 }
  0xfa   : > { %v16010_v8 = vpop.f32.mrf.mxu1 }
  0xfb   : > { %20809 = vst [vmem:[#allocation107_spill] sm:$0xff] %v16010_v8  ;;  %v16012_v18 = vpop.f32.mrf.mxu0  ;;  %12803 = vmatmul.mubr.msk.f32.gmra.mxu0 %vm838_vm2, %v15999_v19  ;;  %v16031_v19 = vsel %vm2768_vm3, %v2889_v37, %v2891_v47  ;;  %v16048_v37 = vsel %vm2768_vm3, %v2891_v47, %v2893_v61  ;;  %v20823_v47 = vld [vmem:[#allocation124_spill] sm:$0xff] }
  0xfc   : > { %v16017_v60 = vpop.f32.mrf.mxu1  ;;  %12609 = vmatmul.mubr.msk.f32.gmra.mxu1 %vm838_vm2, %v20795_v43  ;;  %12805 = vmatprep.mubr.msk.f32.mxu0 %vm838_vm2, %v16007_v53  ;;  %20813 = vst [vmem:[#allocation200_spill] sm:$0xff] %v16031_v19  ;;  %20818 = vst [vmem:[#allocation201_spill] sm:$0xff] %v16048_v37  ;;  %v2902_v61 = vrot.slane %v20823_v47, 2  ;;  %v2904_v47 = vrot.slane %v15431_v15, 2 }
  0xfd   : > { %20811 = vst [vmem:[#allocation111_spill] sm:$0xff] %v16017_v60  ;;  %v16026_v40 = vpop.f32.mrf.mxu0  ;;  %12611 = vmatprep.mubr.msk.f32.mxu1 %vm838_vm2, %v20801_v63  ;;  %v20819_v63 = vld [vmem:[#allocation118_spill] sm:$0xff] }
  0xfe   : > { %v16035_v22 = vpop.f32.mrf.mxu1  ;;  %v2898_v53 = vrot.slane %v20819_v63, 2 }
  0xff   : > { %20816 = vst [vmem:[#allocation113_spill] sm:$0xff] %v16035_v22  ;;  %v16037_v43 = vpop.f32.mrf.mxu0  ;;  %12806 = vmatmul.mubr.msk.f32.gmra.mxu0 %vm838_vm2, %v16024_v4  ;;  %v16056_v4 = vsel %vm2768_vm3, %v2895_v38, %v2896_v46 }
 0x100   : > { %v16041_v32 = vpop.f32.mrf.mxu1  ;;  %12612 = vmatmul.mubr.msk.f32.gmra.mxu1 %vm838_vm2, %v20802_v9  ;;  %12808 = vmatprep.mubr.msk.f32.mxu0 %vm838_vm2, %v16031_v19  ;;  %20820 = vst [vmem:[#allocation118_spill] sm:$0xff] %v16056_v4  ;;  %v16073_v38 = vsel %vm2768_vm3, %v2896_v46, %v2898_v53 }
 0x101   : > { %20817 = vst [vmem:[#allocation114_spill] sm:$0xff] %v16041_v32  ;;  %v16051_v5 = vpop.f32.mrf.mxu0  ;;  %12614 = vmatprep.mubr.msk.f32.mxu1 %vm838_vm2, %v20806_v35  ;;  %20825 = vst [vmem:[#allocation202_spill] sm:$0xff] %v16073_v38 }
 0x102   : > { %v16059_v32 = vpop.f32.mrf.mxu1 }
 0x103   : > { %20822 = vst [vmem:[#allocation120_spill] sm:$0xff] %v16059_v32  ;;  %v16061_v9 = vpop.f32.mrf.mxu0  ;;  %12809 = vmatmul.mubr.msk.f32.gmra.mxu0 %vm838_vm2, %v16048_v37  ;;  %v16080_v37 = vsel %vm2768_vm3, %v2898_v53, %v2900_v23  ;;  %v16097_v53 = vsel %vm2768_vm3, %v2900_v23, %v2902_v61  ;;  %v2911_v23 = vrot.slane %v15489_v1, 2  ;;  %v14136_v1 = vld [vmem:[%s14554_s25 + $0x280] sm:$0xff] }
 0x104   : > { %v16066_v19 = vpop.f32.mrf.mxu1  ;;  %12615 = vmatmul.mubr.msk.f32.gmra.mxu1 %vm838_vm2, %v20808_v49  ;;  %12811 = vmatprep.mubr.msk.f32.mxu0 %vm838_vm2, %v16056_v4  ;;  %20826 = vst [vmem:[#allocation203_spill] sm:$0xff] %v16080_v37  ;;  %20829 = vst [vmem:[#allocation206_spill] sm:$0xff] %v16097_v53 }
 0x105   : > { %20824 = vst [vmem:[#allocation124_spill] sm:$0xff] %v16066_v19  ;;  %v16075_v35 = vpop.f32.mrf.mxu0  ;;  %12617 = vmatprep.mubr.msk.f32.mxu1 %vm838_vm2, %v20814_v11  ;;  %v2905_v19 = vrot.slane %v15434_v55, 2  ;;  %v2907_v11 = vrot.slane %v15459_v3, 2 }
 0x106   : > { %v16084_v32 = vpop.f32.mrf.mxu1 }
 0x107   : > { %20827 = vst [vmem:[#allocation204_spill] sm:$0xff] %v16084_v32  ;;  %v16086_v49 = vpop.f32.mrf.mxu0  ;;  %12812 = vmatmul.mubr.msk.f32.gmra.mxu0 %vm838_vm2, %v16073_v38  ;;  %v16105_v38 = vsel %vm2768_vm3, %v2904_v47, %v2905_v19 }
 0x108   : > { %v16090_v46 = vpop.f32.mrf.mxu1  ;;  %12618 = vmatmul.mubr.msk.f32.gmra.mxu1 %vm838_vm2, %v20815_v21  ;;  %12814 = vmatprep.mubr.msk.f32.mxu0 %vm838_vm2, %v16080_v37  ;;  %20830 = vst [vmem:[#allocation207_spill] sm:$0xff] %v16105_v38  ;;  %v2909_v21 = vrot.slane %v15466_v14, 2 }
 0x109   : > { %20828 = vst [vmem:[#allocation205_spill] sm:$0xff] %v16090_v46  ;;  %v16100_v4 = vpop.f32.mrf.mxu0  ;;  %12620 = vmatprep.mubr.msk.f32.mxu1 %vm838_vm2, %v20819_v63  ;;  %v16122_v63 = vsel %vm2768_vm3, %v2905_v19, %v2907_v11 }
 0x10a   : > { %v16108_v46 = vpop.f32.mrf.mxu1  ;;  %20833 = vst [vmem:[#allocation210_spill] sm:$0xff] %v16122_v63 }
 0x10b   : > { %20831 = vst [vmem:[#allocation208_spill] sm:$0xff] %v16108_v46  ;;  %v16110_v37 = vpop.f32.mrf.mxu0  ;;  %12815 = vmatmul.mubr.msk.f32.gmra.mxu0 %vm838_vm2, %v16097_v53  ;;  %v16129_v53 = vsel %vm2768_vm3, %v2907_v11, %v2909_v21  ;;  %v14137_v46 = vld [vmem:[%s14554_s25 + $0x288] sm:$0xff]  ;;  %v14138_v11 = vld [vmem:[%s14554_s25 + $0x290] sm:$0xff] }
 0x10c   : > { %v16115_v61 = vpop.f32.mrf.mxu1  ;;  %12621 = vmatmul.mubr.msk.f32.gmra.mxu1 %vm838_vm2, %v20821_v31  ;;  %12817 = vmatprep.mubr.msk.f32.mxu0 %vm838_vm2, %v16105_v38  ;;  %20834 = vst [vmem:[#allocation211_spill] sm:$0xff] %v16129_v53  ;;  %v2914_v31 = vrot.slane %v14137_v46, 2  ;;  %v2916_v22 = vrot.slane %v14138_v11, 2 }
 0x10d   : > { %20832 = vst [vmem:[#allocation209_spill] sm:$0xff] %v16115_v61  ;;  %v16124_v47 = vpop.f32.mrf.mxu0  ;;  %12623 = vmatprep.mubr.msk.f32.mxu1 %vm838_vm2, %v15431_v15  ;;  %v2913_v61 = vrot.slane %v14136_v1, 2  ;;  %v16146_v15 = vsel %vm2768_vm3, %v2909_v21, %v2911_v23  ;;  %v14140_v21 = vld [vmem:[%s14554_s25 + $0x2a0] sm:$0x3] }
 0x10e   : > { %v16133_v32 = vpop.f32.mrf.mxu1  ;;  %20837 = vst [vmem:[#allocation214_spill] sm:$0xff] %v16146_v15  ;;  %v2920_v23 = vrot.slane %v14140_v21, 2  ;;  %v14141_v21 = vld [vmem:[%s14554_s25 + $0x2a8] sm:$0xff] }
 0x10f   : > { %20835 = vst [vmem:[#allocation212_spill] sm:$0xff] %v16133_v32  ;;  %v16135_v38 = vpop.f32.mrf.mxu0  ;;  %12818 = vmatmul.mubr.msk.f32.gmra.mxu0 %vm838_vm2, %v16122_v63  ;;  %v16154_v63 = vsel %vm2768_vm3, %v2913_v61, %v2914_v31 }
 0x110   : > { %v16139_v19 = vpop.f32.mrf.mxu1  ;;  %12624 = vmatmul.mubr.msk.f32.gmra.mxu1 %vm838_vm2, %v15434_v55  ;;  %12820 = vmatprep.mubr.msk.f32.mxu0 %vm838_vm2, %v16129_v53  ;;  %20838 = vst [vmem:[#allocation215_spill] sm:$0xff] %v16154_v63 }
 0x111   : > { %20836 = vst [vmem:[#allocation213_spill] sm:$0xff] %v16139_v19  ;;  %v16149_v32 = vpop.f32.mrf.mxu0  ;;  %12626 = vmatprep.mubr.msk.f32.mxu1 %vm838_vm2, %v15459_v3  ;;  %v14139_v19 = vld [vmem:[%s14554_s25 + $0x298] sm:$0xff]  ;;  %v16171_v3 = vsel %vm2768_vm3, %v2914_v31, %v2916_v22 }
 0x112   : > { %v2918_v55 = vrot.slane %v14139_v19, 2  ;;  %v16157_v60 = vpop.f32.mrf.mxu1  ;;  %20841 = vst [vmem:[#allocation218_spill] sm:$0xff] %v16171_v3 }
 0x113   : > { %20839 = vst [vmem:[#allocation216_spill] sm:$0xff] %v16157_v60  ;;  %v16159_v53 = vpop.f32.mrf.mxu0  ;;  %12821 = vmatmul.mubr.msk.f32.gmra.mxu0 %vm838_vm2, %v16146_v15  ;;  %v14142_v60 = vld [vmem:[%s14554_s25 + $0x2b0] sm:$0xff] }
 0x114   : > { %v16164_v8 = vpop.f32.mrf.mxu1  ;;  %12627 = vmatmul.mubr.msk.f32.gmra.mxu1 %vm838_vm2, %v15466_v14  ;;  %12823 = vmatprep.mubr.msk.f32.mxu0 %vm838_vm2, %v16154_v63  ;;  %v16177_v15 = vsel %vm2768_vm3, %v2916_v22, %v2918_v55  ;;  %v2923_v10 = vrot.slane %v14142_v60, 2  ;;  %v16193_v22 = vsel %vm2768_vm3, %v2918_v55, %v2920_v23 }
 0x115   : > { %20840 = vst [vmem:[#allocation217_spill] sm:$0xff] %v16164_v8  ;;  %v16173_v61 = vpop.f32.mrf.mxu0  ;;  %12629 = vmatprep.mubr.msk.f32.mxu1 %vm838_vm2, %v14136_v1  ;;  %20842 = vst [vmem:[#allocation219_spill] sm:$0xff] %v16177_v15  ;;  %v2922_v8 = vrot.slane %v14141_v21, 2  ;;  %v14143_v1 = vld [vmem:[%s14554_s25 + $0x2b8] sm:$0xff] }
 0x116   : > { %v16181_v14 = vpop.f32.mrf.mxu1  ;;  %20845 = vst [vmem:[#allocation222_spill] sm:$0xff] %v16193_v22  ;;  %v2925_v63 = vrot.slane %v14143_v1, 2 }
 0x117   : > { %20843 = vst [vmem:[#allocation220_spill] sm:$0xff] %v16181_v14  ;;  %v16183_v26 = vpop.f32.mrf.mxu0  ;;  %12824 = vmatmul.mubr.msk.f32.gmra.mxu0 %vm838_vm2, %v16171_v3  ;;  %v16200_v14 = vsel %vm2768_vm3, %v2922_v8, %v2923_v10  ;;  %v14144_v3 = vld [vmem:[%s14554_s25 + $0x2c0] sm:$0xff]  ;;  %v16219_v8 = vld [vmem:[%s20075_s1 + $0x18] sm:$0xf] }
 0x118   : > { %v16187_v31 = vpop.f32.mrf.mxu1  ;;  %12630 = vmatmul.mubr.msk.f32.gmra.mxu1 %vm838_vm2, %v14137_v46  ;;  %12826 = vmatprep.mubr.msk.f32.mxu0 %vm838_vm2, %v16177_v15  ;;  %20846 = vst [vmem:[#allocation223_spill] sm:$0xff] %v16200_v14  ;;  %v16206_v46 = vld [vmem:[%s20075_s1 + $0x14] sm:$0xf] }
 0x119   : > { %20844 = vst [vmem:[#allocation221_spill] sm:$0xff] %v16187_v31  ;;  %v16196_v28 = vpop.f32.mrf.mxu0  ;;  %12632 = vmatprep.mubr.msk.f32.mxu1 %vm838_vm2, %v14138_v11  ;;  %v2927_v31 = vrot.slane %v14144_v3, 2  ;;  %13307 = vmatprep.subr.msk.mxu1 %vm1095_vm0, %v16206_v46  ;;  %v14145_v11 = vld [vmem:[%s14554_s25 + $0x2c8] sm:$0x3] }
 0x11a   : > { %v16208_v15 = vpop.f32.mrf.mxu1  ;;  %v2929_v23 = vrot.slane %v14145_v11, 2  ;;  %v2931_v11 = vrot.slane %v14146_v16, 2  ;;  %13501 = vmatprep.subr.msk.mxu0 %vm1095_vm0, %v16219_v8 }
 0x11b   : > { %20847 = vst [vmem:[#allocation224_spill] sm:$0xff] %v16208_v15  ;;  %v16212_v55 = vpop.f32.mrf.mxu0  ;;  %12827 = vmatmul.mubr.msk.f32.gmra.mxu0 %vm838_vm2, %v16193_v22  ;;  %v16228_v15 = vsel %vm2768_vm3, %v2923_v10, %v2925_v63  ;;  %v16234_v22 = vsel %vm2768_vm3, %v2925_v63, %v2927_v31 }
 0x11c   : > { %v16222_v56 = vpop.f32.mrf.mxu1  ;;  %12633 = vmatmul.mubr.msk.f32.gmra.mxu1 %vm838_vm2, %v14139_v19  ;;  %12829 = vmatprep.mubr.msk.f32.mxu0 %vm838_vm2, %v16200_v14  ;;  %20849 = vst [vmem:[#allocation226_spill] sm:$0xff] %v16228_v15  ;;  %20850 = vst [vmem:[#allocation227_spill] sm:$0xff] %v16234_v22  ;;  %v16252_v63 = vsel %vm2768_vm3, %v2927_v31, %v2929_v23  ;;  %v14148_v14 = vld [vmem:[%s14554_s25 + $0x2e0] sm:$0xff]  ;;  %v14150_v31 = vld [vmem:[%s14554_s25 + $0x2f0] sm:$0x3] }
 0x11d   : > { %20848 = vst [vmem:[#allocation225_spill] sm:$0xff] %v16222_v56  ;;  %v16230_v25 = vpop.f32.mrf.mxu0  ;;  %12635 = vmatprep.mubr.msk.f32.mxu1 %vm838_vm2, %v14141_v21  ;;  %v14147_v56 = vld [vmem:[%s14554_s25 + $0x2d8] sm:$0xff]  ;;  %20853 = vst [vmem:[#allocation230_spill] sm:$0xff] %v16252_v63  ;;  %v2934_v62 = vrot.slane %v14148_v14, 2  ;;  %v2938_v23 = vrot.slane %v14150_v31, 2 }
 0x11e   : > { %v2932_v29 = vrot.slane %v14147_v56, 2  ;;  %v16240_v19 = vpop.f32.mrf.mxu1 }
 0x11f   : > { %20851 = vst [vmem:[#allocation228_spill] sm:$0xff] %v16240_v19  ;;  %v16242_v10 = vpop.f32.mrf.mxu0  ;;  %12830 = vmatmul.mubr.msk.f32.gmra.mxu0 %vm838_vm2, %v16228_v15  ;;  %v14149_v15 = vld [vmem:[%s14554_s25 + $0x2e8] sm:$0xff] }
 0x120   : > { %v16246_v21 = vpop.f32.mrf.mxu1  ;;  %12636 = vmatmul.mubr.msk.f32.gmra.mxu1 %vm838_vm2, %v14142_v60  ;;  %12832 = vmatprep.mubr.msk.f32.mxu0 %vm838_vm2, %v16234_v22  ;;  %v16259_v19 = vsel %vm2768_vm3, %v2931_v11, %v2932_v29 }
 0x121   : > { %20852 = vst [vmem:[#allocation229_spill] sm:$0xff] %v16246_v21  ;;  %v16255_v7 = vpop.f32.mrf.mxu0  ;;  %12638 = vmatprep.mubr.msk.f32.mxu1 %vm838_vm2, %v14143_v1  ;;  %20854 = vst [vmem:[#allocation231_spill] sm:$0xff] %v16259_v19  ;;  %v2936_v21 = vrot.slane %v14149_v15, 2  ;;  %v16275_v1 = vsel %vm2768_vm3, %v2932_v29, %v2934_v62 }
 0x122   : > { %v16262_v60 = vpop.f32.mrf.mxu1  ;;  %20857 = vst [vmem:[#allocation234_spill] sm:$0xff] %v16275_v1 }
 0x123   : > { %20855 = vst [vmem:[#allocation232_spill] sm:$0xff] %v16262_v60  ;;  %v16264_v20 = vpop.f32.mrf.mxu0  ;;  %12833 = vmatmul.mubr.msk.f32.gmra.mxu0 %vm838_vm2, %v16252_v63  ;;  %v16281_v60 = vsel %vm2768_vm3, %v2934_v62, %v2936_v21  ;;  %v14151_v63 = vld [vmem:[%s14554_s25 + $0x2f8] sm:$0xff]  ;;  %v14153_v62 = vld [vmem:[%s14554_s25 + $0x308] sm:$0xff] }
 0x124   : > { %v16269_v22 = vpop.f32.mrf.mxu1  ;;  %12639 = vmatmul.mubr.msk.f32.gmra.mxu1 %vm838_vm2, %v14144_v3  ;;  %12835 = vmatprep.mubr.msk.f32.mxu0 %vm838_vm2, %v16259_v19  ;;  %20858 = vst [vmem:[#allocation235_spill] sm:$0xff] %v16281_v60  ;;  %v2940_v31 = vrot.slane %v14151_v63, 2  ;;  %v2943_v19 = vrot.slane %v14153_v62, 2 }
 0x125   : > { %20856 = vst [vmem:[#allocation233_spill] sm:$0xff] %v16269_v22  ;;  %v16277_v11 = vpop.f32.mrf.mxu0  ;;  %12641 = vmatprep.mubr.msk.f32.mxu1 %vm838_vm2, %v14146_v16  ;;  %v14152_v22 = vld [vmem:[%s14554_s25 + $0x300] sm:$0xff]  ;;  %v16297_v16 = vsel %vm2768_vm3, %v2936_v21, %v2938_v23  ;;  %v14155_v21 = vld [vmem:[%s14554_s25 + $0x318] sm:$0x3] }
 0x126   : > { %v2941_v58 = vrot.slane %v14152_v22, 2  ;;  %v16285_v3 = vpop.f32.mrf.mxu1  ;;  %20862 = vst [vmem:[#allocation239_spill] sm:$0xff] %v16297_v16  ;;  %v2947_v23 = vrot.slane %v14155_v21, 2 }
 0x127   : > { %20859 = vst [vmem:[#allocation236_spill] sm:$0xff] %v16285_v3  ;;  %v16287_v42 = vpop.f32.mrf.mxu0  ;;  %12836 = vmatmul.mubr.msk.f32.gmra.mxu0 %vm838_vm2, %v16275_v1  ;;  %v14154_v1 = vld [vmem:[%s14554_s25 + $0x310] sm:$0xff] }
 0x128   : > { %20860 = vst [vmem:[#allocation237_spill] sm:$0xff] %v16287_v42  ;;  %v16291_v29 = vpop.f32.mrf.mxu1  ;;  %12642 = vmatmul.mubr.msk.f32.gmra.mxu1 %vm838_vm2, %v14147_v56  ;;  %12838 = vmatprep.mubr.msk.f32.mxu0 %vm838_vm2, %v16281_v60  ;;  %v16304_v3 = vsel %vm2768_vm3, %v2940_v31, %v2941_v58 }
 0x129   : > { %20861 = vst [vmem:[#allocation238_spill] sm:$0xff] %v16291_v29  ;;  %v16300_v2 = vpop.f32.mrf.mxu0  ;;  %12644 = vmatprep.mubr.msk.f32.mxu1 %vm838_vm2, %v14148_v14  ;;  %20864 = vst [vmem:[#allocation241_spill] sm:$0xff] %v16304_v3  ;;  %v2945_v29 = vrot.slane %v14154_v1, 2  ;;  %v16320_v14 = vsel %vm2768_vm3, %v2941_v58, %v2943_v19 }
 0x12a   : > { %20863 = vst [vmem:[#allocation240_spill] sm:$0xff] %v16300_v2  ;;  %v16307_v56 = vpop.f32.mrf.mxu1  ;;  %20868 = vst [vmem:[#allocation245_spill] sm:$0xff] %v16320_v14 }
 0x12b   : > { %20865 = vst [vmem:[#allocation242_spill] sm:$0xff] %v16307_v56  ;;  %v16309_v52 = vpop.f32.mrf.mxu0  ;;  %12839 = vmatmul.mubr.msk.f32.gmra.mxu0 %vm838_vm2, %v16297_v16  ;;  %v16326_v56 = vsel %vm2768_vm3, %v2943_v19, %v2945_v29  ;;  %v14156_v16 = vld [vmem:[%s14554_s25 + $0x320] sm:$0xff]  ;;  %v16342_v19 = vsel %vm2768_vm3, %v2945_v29, %v2947_v23 }
 0x12c   : > { %20866 = vst [vmem:[#allocation243_spill] sm:$0xff] %v16309_v52  ;;  %v16314_v60 = vpop.f32.mrf.mxu1  ;;  %12645 = vmatmul.mubr.msk.f32.gmra.mxu1 %vm838_vm2, %v14149_v15  ;;  %12841 = vmatprep.mubr.msk.f32.mxu0 %vm838_vm2, %v16304_v3  ;;  %20870 = vst [vmem:[#allocation247_spill] sm:$0xff] %v16326_v56  ;;  %v2949_v21 = vrot.slane %v14156_v16, 2  ;;  %v14160_v29 = vld [vmem:[%s14554_s25 + $0x340] sm:$0x3] }
 0x12d   : > { %20867 = vst [vmem:[#allocation244_spill] sm:$0xff] %v16314_v60  ;;  %v16322_v31 = vpop.f32.mrf.mxu0  ;;  %12647 = vmatprep.mubr.msk.f32.mxu1 %vm838_vm2, %v14151_v63  ;;  %v14157_v60 = vld [vmem:[%s14554_s25 + $0x328] sm:$0xff]  ;;  %20874 = vst [vmem:[#allocation251_spill] sm:$0xff] %v16342_v19  ;;  %v14158_v63 = vld [vmem:[%s14554_s25 + $0x330] sm:$0xff]  ;;  %v2956_v23 = vrot.slane %v14160_v29, 2 }
 0x12e   : > { %20869 = vst [vmem:[#allocation246_spill] sm:$0xff] %v16322_v31  ;;  %v2950_v0 = vrot.slane %v14157_v60, 2  ;;  %v16330_v15 = vpop.f32.mrf.mxu1  ;;  %v2952_v3 = vrot.slane %v14158_v63, 2 }
 0x12f   : > { %20871 = vst [vmem:[#allocation248_spill] sm:$0xff] %v16330_v15  ;;  %v16332_v34 = vpop.f32.mrf.mxu0  ;;  %12842 = vmatmul.mubr.msk.f32.gmra.mxu0 %vm838_vm2, %v16320_v14  ;;  %v14159_v14 = vld [vmem:[%s14554_s25 + $0x338] sm:$0xff] }
 0x130   : > { %20872 = vst [vmem:[#allocation249_spill] sm:$0xff] %v16332_v34  ;;  %v16336_v58 = vpop.f32.mrf.mxu1  ;;  %12648 = vmatmul.mubr.msk.f32.gmra.mxu1 %vm838_vm2, %v14152_v22  ;;  %12844 = vmatprep.mubr.msk.f32.mxu0 %vm838_vm2, %v16326_v56  ;;  %v16349_v15 = vsel %vm2768_vm3, %v2949_v21, %v2950_v0 }
 0x131   : > { %20873 = vst [vmem:[#allocation250_spill] sm:$0xff] %v16336_v58  ;;  %v16345_v13 = vpop.f32.mrf.mxu0  ;;  %12650 = vmatprep.mubr.msk.f32.mxu1 %vm838_vm2, %v14153_v62  ;;  %20876 = vst [vmem:[#allocation253_spill] sm:$0xff] %v16349_v15  ;;  %v2954_v58 = vrot.slane %v14159_v14, 2  ;;  %v16365_v62 = vsel %vm2768_vm3, %v2950_v0, %v2952_v3 }
 0x132   : > { %20875 = vst [vmem:[#allocation252_spill] sm:$0xff] %v16345_v13  ;;  %v16352_v22 = vpop.f32.mrf.mxu1  ;;  %20880 = vst [vmem:[#allocation257_spill] sm:$0xff] %v16365_v62 }
 0x133   : > { %20877 = vst [vmem:[#allocation254_spill] sm:$0xff] %v16352_v22  ;;  %v16354_v34 = vpop.f32.mrf.mxu0  ;;  %12845 = vmatmul.mubr.msk.f32.gmra.mxu0 %vm838_vm2, %v16342_v19  ;;  %v16371_v22 = vsel %vm2768_vm3, %v2952_v3, %v2954_v58  ;;  %v14161_v19 = vld [vmem:[%s14554_s25 + $0x348] sm:$0xff]  ;;  %v16387_v3 = vsel %vm2768_vm3, %v2954_v58, %v2956_v23 }
 0x134   : > { %20878 = vst [vmem:[#allocation255_spill] sm:$0xff] %v16354_v34  ;;  %v16359_v56 = vpop.f32.mrf.mxu1  ;;  %12651 = vmatmul.mubr.msk.f32.gmra.mxu1 %vm838_vm2, %v14154_v1  ;;  %12847 = vmatprep.mubr.msk.f32.mxu0 %vm838_vm2, %v16349_v15  ;;  %20882 = vst [vmem:[#allocation259_spill] sm:$0xff] %v16371_v22  ;;  %v2958_v29 = vrot.slane %v14161_v19, 2  ;;  %v14165_v58 = vld [vmem:[%s14554_s25 + $0x368] sm:$0x3] }
 0x135   : > { %20879 = vst [vmem:[#allocation256_spill] sm:$0xff] %v16359_v56  ;;  %v16367_v21 = vpop.f32.mrf.mxu0  ;;  %12653 = vmatprep.mubr.msk.f32.mxu1 %vm838_vm2, %v14156_v16  ;;  %v14162_v56 = vld [vmem:[%s14554_s25 + $0x350] sm:$0xff]  ;;  %20886 = vst [vmem:[#allocation263_spill] sm:$0xff] %v16387_v3  ;;  %v14163_v16 = vld [vmem:[%s14554_s25 + $0x358] sm:$0xff]  ;;  %v2965_v23 = vrot.slane %v14165_v58, 2 }
 0x136   : > { %20881 = vst [vmem:[#allocation258_spill] sm:$0xff] %v16367_v21  ;;  %v2959_v34 = vrot.slane %v14162_v56, 2  ;;  %v16375_v1 = vpop.f32.mrf.mxu1  ;;  %v2961_v15 = vrot.slane %v14163_v16, 2 }
 0x137   : > { %20883 = vst [vmem:[#allocation260_spill] sm:$0xff] %v16375_v1  ;;  %v16377_v13 = vpop.f32.mrf.mxu0  ;;  %12848 = vmatmul.mubr.msk.f32.gmra.mxu0 %vm838_vm2, %v16365_v62  ;;  %v14164_v62 = vld [vmem:[%s14554_s25 + $0x360] sm:$0xff] }
 0x138   : > { %20884 = vst [vmem:[#allocation261_spill] sm:$0xff] %v16377_v13  ;;  %v16381_v0 = vpop.f32.mrf.mxu1  ;;  %12654 = vmatmul.mubr.msk.f32.gmra.mxu1 %vm838_vm2, %v14157_v60  ;;  %12850 = vmatprep.mubr.msk.f32.mxu0 %vm838_vm2, %v16371_v22  ;;  %v16394_v1 = vsel %vm2768_vm3, %v2958_v29, %v2959_v34 }
 0x139   : > { %20885 = vst [vmem:[#allocation262_spill] sm:$0xff] %v16381_v0  ;;  %v16390_v21 = vpop.f32.mrf.mxu0  ;;  %12656 = vmatprep.mubr.msk.f32.mxu1 %vm838_vm2, %v14158_v63  ;;  %20888 = vst [vmem:[#allocation265_spill] sm:$0xff] %v16394_v1  ;;  %v2963_v0 = vrot.slane %v14164_v62, 2  ;;  %v16410_v63 = vsel %vm2768_vm3, %v2959_v34, %v2961_v15 }
 0x13a   : > { %20887 = vst [vmem:[#allocation264_spill] sm:$0xff] %v16390_v21  ;;  %v16397_v60 = vpop.f32.mrf.mxu1  ;;  %20892 = vst [vmem:[#allocation269_spill] sm:$0xff] %v16410_v63 }
 0x13b   : > { %20889 = vst [vmem:[#allocation266_spill] sm:$0xff] %v16397_v60  ;;  %v16399_v13 = vpop.f32.mrf.mxu0  ;;  %12851 = vmatmul.mubr.msk.f32.gmra.mxu0 %vm838_vm2, %v16387_v3  ;;  %v16416_v60 = vsel %vm2768_vm3, %v2961_v15, %v2963_v0  ;;  %v14166_v3 = vld [vmem:[%s14554_s25 + $0x370] sm:$0xff]  ;;  %v16432_v15 = vsel %vm2768_vm3, %v2963_v0, %v2965_v23 }
 0x13c   : > { %20890 = vst [vmem:[#allocation267_spill] sm:$0xff] %v16399_v13  ;;  %v16404_v22 = vpop.f32.mrf.mxu1  ;;  %12657 = vmatmul.mubr.msk.f32.gmra.mxu1 %vm838_vm2, %v14159_v14  ;;  %12853 = vmatprep.mubr.msk.f32.mxu0 %vm838_vm2, %v16394_v1  ;;  %20894 = vst [vmem:[#allocation271_spill] sm:$0xff] %v16416_v60  ;;  %v2967_v58 = vrot.slane %v14166_v3, 2  ;;  %v14170_v0 = vld [vmem:[%s14554_s25 + $0x390] sm:$0x3] }
 0x13d   : > { %20891 = vst [vmem:[#allocation268_spill] sm:$0xff] %v16404_v22  ;;  %v16412_v29 = vpop.f32.mrf.mxu0  ;;  %12659 = vmatprep.mubr.msk.f32.mxu1 %vm838_vm2, %v14161_v19  ;;  %v14167_v22 = vld [vmem:[%s14554_s25 + $0x378] sm:$0xff]  ;;  %20898 = vst [vmem:[#allocation275_spill] sm:$0xff] %v16432_v15  ;;  %v14168_v19 = vld [vmem:[%s14554_s25 + $0x380] sm:$0xff]  ;;  %v2974_v23 = vrot.slane %v14170_v0, 2 }
 0x13e   : > { %20893 = vst [vmem:[#allocation270_spill] sm:$0xff] %v16412_v29  ;;  %v2968_v13 = vrot.slane %v14167_v22, 2  ;;  %v16420_v14 = vpop.f32.mrf.mxu1  ;;  %v2970_v1 = vrot.slane %v14168_v19, 2 }
 0x13f   : > { %20895 = vst [vmem:[#allocation272_spill] sm:$0xff] %v16420_v14  ;;  %v16422_v21 = vpop.f32.mrf.mxu0  ;;  %12854 = vmatmul.mubr.msk.f32.gmra.mxu0 %vm838_vm2, %v16410_v63  ;;  %v14169_v63 = vld [vmem:[%s14554_s25 + $0x388] sm:$0xff] }
 0x140   : > { %20896 = vst [vmem:[#allocation273_spill] sm:$0xff] %v16422_v21  ;;  %v16426_v34 = vpop.f32.mrf.mxu1  ;;  %12660 = vmatmul.mubr.msk.f32.gmra.mxu1 %vm838_vm2, %v14162_v56  ;;  %12856 = vmatprep.mubr.msk.f32.mxu0 %vm838_vm2, %v16416_v60  ;;  %v16439_v14 = vsel %vm2768_vm3, %v2967_v58, %v2968_v13 }
 0x141   : > { %20897 = vst [vmem:[#allocation274_spill] sm:$0xff] %v16426_v34  ;;  %v16435_v29 = vpop.f32.mrf.mxu0  ;;  %12662 = vmatprep.mubr.msk.f32.mxu1 %vm838_vm2, %v14163_v16  ;;  %20900 = vst [vmem:[#allocation277_spill] sm:$0xff] %v16439_v14  ;;  %v2972_v34 = vrot.slane %v14169_v63, 2  ;;  %v16455_v16 = vsel %vm2768_vm3, %v2968_v13, %v2970_v1 }
 0x142   : > { %20899 = vst [vmem:[#allocation276_spill] sm:$0xff] %v16435_v29  ;;  %v16442_v56 = vpop.f32.mrf.mxu1  ;;  %20904 = vst [vmem:[#allocation281_spill] sm:$0xff] %v16455_v16 }
 0x143   : > { %20901 = vst [vmem:[#allocation278_spill] sm:$0xff] %v16442_v56  ;;  %v16444_v21 = vpop.f32.mrf.mxu0  ;;  %12857 = vmatmul.mubr.msk.f32.gmra.mxu0 %vm838_vm2, %v16432_v15  ;;  %v16461_v56 = vsel %vm2768_vm3, %v2970_v1, %v2972_v34  ;;  %v14171_v15 = vld [vmem:[%s14554_s25 + $0x398] sm:$0xff]  ;;  %v16477_v1 = vsel %vm2768_vm3, %v2972_v34, %v2974_v23 }
 0x144   : > { %20902 = vst [vmem:[#allocation279_spill] sm:$0xff] %v16444_v21  ;;  %v16449_v60 = vpop.f32.mrf.mxu1  ;;  %12663 = vmatmul.mubr.msk.f32.gmra.mxu1 %vm838_vm2, %v14164_v62  ;;  %12859 = vmatprep.mubr.msk.f32.mxu0 %vm838_vm2, %v16439_v14  ;;  %20906 = vst [vmem:[#allocation283_spill] sm:$0xff] %v16461_v56  ;;  %v2976_v0 = vrot.slane %v14171_v15, 2  ;;  %v14175_v34 = vld [vmem:[%s14554_s25 + $0x3b8] sm:$0x3] }
 0x145   : > { %20903 = vst [vmem:[#allocation280_spill] sm:$0xff] %v16449_v60  ;;  %v16457_v58 = vpop.f32.mrf.mxu0  ;;  %12665 = vmatprep.mubr.msk.f32.mxu1 %vm838_vm2, %v14166_v3  ;;  %v14172_v60 = vld [vmem:[%s14554_s25 + $0x3a0] sm:$0xff]  ;;  %20910 = vst [vmem:[#allocation287_spill] sm:$0xff] %v16477_v1  ;;  %v14173_v3 = vld [vmem:[%s14554_s25 + $0x3a8] sm:$0xff]  ;;  %v2983_v23 = vrot.slane %v14175_v34, 2 }
 0x146   : > { %20905 = vst [vmem:[#allocation282_spill] sm:$0xff] %v16457_v58  ;;  %v2977_v21 = vrot.slane %v14172_v60, 2  ;;  %v16465_v62 = vpop.f32.mrf.mxu1  ;;  %v2979_v14 = vrot.slane %v14173_v3, 2 }
 0x147   : > { %20907 = vst [vmem:[#allocation284_spill] sm:$0xff] %v16465_v62  ;;  %v16467_v29 = vpop.f32.mrf.mxu0  ;;  %12860 = vmatmul.mubr.msk.f32.gmra.mxu0 %vm838_vm2, %v16455_v16  ;;  %v14174_v16 = vld [vmem:[%s14554_s25 + $0x3b0] sm:$0xff] }
 0x148   : > { %20908 = vst [vmem:[#allocation285_spill] sm:$0xff] %v16467_v29  ;;  %v16471_v13 = vpop.f32.mrf.mxu1  ;;  %12666 = vmatmul.mubr.msk.f32.gmra.mxu1 %vm838_vm2, %v14167_v22  ;;  %12862 = vmatprep.mubr.msk.f32.mxu0 %vm838_vm2, %v16461_v56  ;;  %v16484_v62 = vsel %vm2768_vm3, %v2976_v0, %v2977_v21 }
 0x149   : > { %20909 = vst [vmem:[#allocation286_spill] sm:$0xff] %v16471_v13  ;;  %v16480_v58 = vpop.f32.mrf.mxu0  ;;  %12668 = vmatprep.mubr.msk.f32.mxu1 %vm838_vm2, %v14168_v19  ;;  %20912 = vst [vmem:[#allocation289_spill] sm:$0xff] %v16484_v62  ;;  %v2981_v13 = vrot.slane %v14174_v16, 2  ;;  %v16500_v19 = vsel %vm2768_vm3, %v2977_v21, %v2979_v14 }
 0x14a   : > { %20911 = vst [vmem:[#allocation288_spill] sm:$0xff] %v16480_v58  ;;  %v16487_v22 = vpop.f32.mrf.mxu1  ;;  %20916 = vst [vmem:[#allocation293_spill] sm:$0xff] %v16500_v19 }
 0x14b   : > { %20913 = vst [vmem:[#allocation290_spill] sm:$0xff] %v16487_v22  ;;  %v16489_v29 = vpop.f32.mrf.mxu0  ;;  %12863 = vmatmul.mubr.msk.f32.gmra.mxu0 %vm838_vm2, %v16477_v1  ;;  %v16506_v22 = vsel %vm2768_vm3, %v2979_v14, %v2981_v13  ;;  %v14176_v1 = vld [vmem:[%s14554_s25 + $0x3c0] sm:$0xff]  ;;  %v16522_v14 = vsel %vm2768_vm3, %v2981_v13, %v2983_v23 }
 0x14c   : > { %20914 = vst [vmem:[#allocation291_spill] sm:$0xff] %v16489_v29  ;;  %v16494_v56 = vpop.f32.mrf.mxu1  ;;  %12669 = vmatmul.mubr.msk.f32.gmra.mxu1 %vm838_vm2, %v14169_v63  ;;  %12865 = vmatprep.mubr.msk.f32.mxu0 %vm838_vm2, %v16484_v62  ;;  %20918 = vst [vmem:[#allocation295_spill] sm:$0xff] %v16506_v22  ;;  %v2985_v34 = vrot.slane %v14176_v1, 2  ;;  %v14180_v13 = vld [vmem:[%s14554_s25 + $0x3e0] sm:$0x3] }
 0x14d   : > { %20915 = vst [vmem:[#allocation292_spill] sm:$0xff] %v16494_v56  ;;  %v16502_v0 = vpop.f32.mrf.mxu0  ;;  %12671 = vmatprep.mubr.msk.f32.mxu1 %vm838_vm2, %v14171_v15  ;;  %v14177_v56 = vld [vmem:[%s14554_s25 + $0x3c8] sm:$0xff]  ;;  %20922 = vst [vmem:[#allocation299_spill] sm:$0xff] %v16522_v14  ;;  %v14178_v15 = vld [vmem:[%s14554_s25 + $0x3d0] sm:$0xff]  ;;  %v2992_v23 = vrot.slane %v14180_v13, 2 }
 0x14e   : > { %20917 = vst [vmem:[#allocation294_spill] sm:$0xff] %v16502_v0  ;;  %v2986_v29 = vrot.slane %v14177_v56, 2  ;;  %v16510_v63 = vpop.f32.mrf.mxu1  ;;  %v2988_v62 = vrot.slane %v14178_v15, 2  ;;  %v14181_v13 = vld [vmem:[%s14554_s25 + $0x3e8] sm:$0xff] }
 0x14f   : > { %20919 = vst [vmem:[#allocation296_spill] sm:$0xff] %v16510_v63  ;;  %v16512_v58 = vpop.f32.mrf.mxu0  ;;  %12866 = vmatmul.mubr.msk.f32.gmra.mxu0 %vm838_vm2, %v16500_v19  ;;  %v14179_v19 = vld [vmem:[%s14554_s25 + $0x3d8] sm:$0xff] }
 0x150   : > { %20920 = vst [vmem:[#allocation297_spill] sm:$0xff] %v16512_v58  ;;  %v16516_v21 = vpop.f32.mrf.mxu1  ;;  %12672 = vmatmul.mubr.msk.f32.gmra.mxu1 %vm838_vm2, %v14172_v60  ;;  %12868 = vmatprep.mubr.msk.f32.mxu0 %vm838_vm2, %v16506_v22  ;;  %v16529_v63 = vsel %vm2768_vm3, %v2985_v34, %v2986_v29 }
 0x151   : > { %20921 = vst [vmem:[#allocation298_spill] sm:$0xff] %v16516_v21  ;;  %v16525_v0 = vpop.f32.mrf.mxu0  ;;  %12674 = vmatprep.mubr.msk.f32.mxu1 %vm838_vm2, %v14173_v3  ;;  %20924 = vst [vmem:[#allocation301_spill] sm:$0xff] %v16529_v63  ;;  %v2990_v21 = vrot.slane %v14179_v19, 2  ;;  %v16545_v3 = vsel %vm2768_vm3, %v2986_v29, %v2988_v62 }
 0x152   : > { %20923 = vst [vmem:[#allocation300_spill] sm:$0xff] %v16525_v0  ;;  %v16532_v60 = vpop.f32.mrf.mxu1  ;;  %20928 = vst [vmem:[#allocation305_spill] sm:$0xff] %v16545_v3 }
 0x153   : > { %20925 = vst [vmem:[#allocation302_spill] sm:$0xff] %v16532_v60  ;;  %v16534_v58 = vpop.f32.mrf.mxu0  ;;  %12869 = vmatmul.mubr.msk.f32.gmra.mxu0 %vm838_vm2, %v16522_v14  ;;  %v16551_v14 = vsel %vm2768_vm3, %v2988_v62, %v2990_v21  ;;  %v2994_v60 = vrot.slane %v14181_v13, 2  ;;  %v16563_v62 = vsel %vm2768_vm3, %v2990_v21, %v2992_v23  ;;  %v14185_v23 = vld [vmem:[%s14554_s25 + $0x408] sm:$0x3] }
 0x154   : > { %20926 = vst [vmem:[#allocation303_spill] sm:$0xff] %v16534_v58  ;;  %v16539_v22 = vpop.f32.mrf.mxu1  ;;  %12675 = vmatmul.mubr.msk.f32.gmra.mxu1 %vm838_vm2, %v14174_v16  ;;  %12871 = vmatprep.mubr.msk.f32.mxu0 %vm838_vm2, %v16529_v63  ;;  %20930 = vst [vmem:[#allocation307_spill] sm:$0xff] %v16551_v14  ;;  %v3001_v42 = vrot.slane %v14185_v23, 2 }
 0x155   : > { %20927 = vst [vmem:[#allocation304_spill] sm:$0xff] %v16539_v22  ;;  %v16547_v34 = vpop.f32.mrf.mxu0  ;;  %12677 = vmatprep.mubr.msk.f32.mxu1 %vm838_vm2, %v14176_v1  ;;  %v14182_v22 = vld [vmem:[%s14554_s25 + $0x3f0] sm:$0xff]  ;;  %20932 = vst [vmem:[#allocation309_spill] sm:$0xff] %v16563_v62  ;;  %v14183_v1 = vld [vmem:[%s14554_s25 + $0x3f8] sm:$0xff] }
 0x156   : > { %20929 = vst [vmem:[#allocation306_spill] sm:$0xff] %v16547_v34  ;;  %v2995_v58 = vrot.slane %v14182_v22, 2  ;;  %v16555_v16 = vpop.f32.mrf.mxu1  ;;  %v2997_v63 = vrot.slane %v14183_v1, 2  ;;  %v14184_v34 = vld [vmem:[%s14554_s25 + $0x400] sm:$0xff] }
 0x157   : > { %20931 = vst [vmem:[#allocation308_spill] sm:$0xff] %v16555_v16  ;;  %v12729_v0 = vpop.f32.mrf.mxu0  ;;  %12872 = vmatmul.mubr.msk.f32.gmra.mxu0 %vm838_vm2, %v16545_v3  ;;  %v2999_v31 = vrot.slane %v14184_v34, 2 }
 0x158   : > { %v12535_v29 = vpop.f32.mrf.mxu1  ;;  %12678 = vmatmul.mubr.msk.f32.gmra.mxu1 %vm838_vm2, %v14177_v56  ;;  %12874 = vmatprep.mubr.msk.f32.mxu0 %vm838_vm2, %v16551_v14  ;;  %v16570_v3 = vsel %vm2768_vm3, %v2994_v60, %v2995_v58 }
 0x159   : > { %v2135_v16 = vadd.f32 %v12535_v29, %v15792_v48  ;;  %v3382_v52 = vpop.f32.mrf.mxu0  ;;  %12680 = vmatprep.mubr.msk.f32.mxu1 %vm838_vm2, %v14178_v15  ;;  %20933 = vst [vmem:[#allocation310_spill] sm:$0xff] %v16570_v3  ;;  %v16582_v15 = vsel %vm2768_vm3, %v2995_v58, %v2997_v63  ;;  %v14186_v29 = vld [vmem:[%s14554_s25 + $0x410] sm:$0xff] }
 0x15a   : > { %v2129_v56 = vpop.f32.mrf.mxu1  ;;  %20934 = vst [vmem:[#allocation311_spill] sm:$0xff] %v16582_v15 }
 0x15b   : > { %v16572_v2 = vadd.f32 %v12729_v0, %v2135_v16  ;;  %v2130_v14 = vadd.f32 %v2129_v56, %v15806_v50  ;;  %v12732_v21 = vpop.f32.mrf.mxu0  ;;  %12875 = vmatmul.mubr.msk.f32.gmra.mxu0 %vm838_vm2, %v16563_v62  ;;  %v16585_v0 = vsel %vm2768_vm3, %v2997_v63, %v2999_v31  ;;  %v14187_v56 = vld [vmem:[%s14554_s25 + $0x418] sm:$0xff] }
 0x15c   : > { %v12538_v48 = vpop.f32.mrf.mxu1  ;;  %12681 = vmatmul.mubr.msk.f32.gmra.mxu1 %vm838_vm2, %v14179_v19  ;;  %12877 = vmatprep.mubr.msk.f32.mxu0 %vm838_vm2, %v16570_v3  ;;  %20935 = vst [vmem:[#allocation312_spill] sm:$0xff] %v16585_v0  ;;  %v3003_v19 = vrot.slane %v14186_v29, 2  ;;  %v3004_v23 = vrot.slane %v14187_v56, 2 }
 0x15d   : > { %v16587_v50 = vadd.f32 %v3382_v52, %v2130_v14  ;;  %v2145_v60 = vadd.f32 %v12538_v48, %v15816_v51  ;;  %v3392_v16 = vpop.f32.mrf.mxu0  ;;  %12683 = vmatprep.mubr.msk.f32.mxu1 %vm838_vm2, %v14181_v13  ;;  %v16602_v51 = vsel %vm2768_vm3, %v2999_v31, %v3001_v42  ;;  %v14188_v14 = vld [vmem:[%s14554_s25 + $0x420] sm:$0xff] }
 0x15e   : > { %v2139_v3 = vpop.f32.mrf.mxu1  ;;  %20936 = vst [vmem:[#allocation313_spill] sm:$0xff] %v16602_v51  ;;  %v3006_v13 = vrot.slane %v14188_v14, 2 }
 0x15f   : > { %v16593_v62 = vadd.f32 %v12732_v21, %v2145_v60  ;;  %v2140_v58 = vadd.f32 %v2139_v3, %v15830_v6  ;;  %v12735_v63 = vpop.f32.mrf.mxu0  ;;  %12878 = vmatmul.mubr.msk.f32.gmra.mxu0 %vm838_vm2, %v16582_v15  ;;  %v14189_v21 = vld [vmem:[%s14554_s25 + $0x428] sm:$0xff] }
 0x160   : > { %v12541_v52 = vpop.f32.mrf.mxu1  ;;  %12684 = vmatmul.mubr.msk.f32.gmra.mxu1 %vm838_vm2, %v14182_v22  ;;  %12880 = vmatprep.mubr.msk.f32.mxu0 %vm838_vm2, %v16585_v0  ;;  %v3008_v48 = vrot.slane %v14189_v21, 2  ;;  %v16611_v22 = vsel %vm2768_vm3, %v3003_v19, %v3004_v23 }
 0x161   : > { %v16606_v60 = vadd.f32 %v3392_v16, %v2140_v58  ;;  %v2155_v6 = vadd.f32 %v12541_v52, %v15841_v30  ;;  %v3402_v3 = vpop.f32.mrf.mxu0  ;;  %12686 = vmatprep.mubr.msk.f32.mxu1 %vm838_vm2, %v14183_v1  ;;  %20937 = vst [vmem:[#allocation314_spill] sm:$0xff] %v16611_v22  ;;  %v14190_v16 = vld [vmem:[%s14554_s25 + $0x430] sm:$0x3]  ;;  %v16623_v1 = vsel %vm2768_vm3, %v3004_v23, %v3006_v13  ;;  %v14191_v52 = vld [vmem:[%s14554_s25 + $0x438] sm:$0xff] }
 0x162   : > { %v2149_v15 = vpop.f32.mrf.mxu1  ;;  %v3010_v58 = vrot.slane %v14190_v16, 2  ;;  %20938 = vst [vmem:[#allocation315_spill] sm:$0xff] %v16623_v1  ;;  %v16626_v19 = vsel %vm2768_vm3, %v3006_v13, %v3008_v48 }
 0x163   : > { %v16613_v0 = vadd.f32 %v12735_v63, %v2155_v6  ;;  %v2150_v42 = vadd.f32 %v2149_v15, %v15855_v33  ;;  %v12738_v31 = vpop.f32.mrf.mxu0  ;;  %12881 = vmatmul.mubr.msk.f32.gmra.mxu0 %vm838_vm2, %v16602_v51  ;;  %20939 = vst [vmem:[#allocation316_spill] sm:$0xff] %v16626_v19  ;;  %v14192_v6 = vld [vmem:[%s14554_s25 + $0x440] sm:$0xff] }
 0x164   : > { %v12544_v30 = vpop.f32.mrf.mxu1  ;;  %12687 = vmatmul.mubr.msk.f32.gmra.mxu1 %vm838_vm2, %v14184_v34  ;;  %12883 = vmatprep.mubr.msk.f32.mxu0 %vm838_vm2, %v16611_v22  ;;  %v3012_v34 = vrot.slane %v14191_v52, 2  ;;  %v3013_v16 = vrot.slane %v14192_v6, 2 }
 0x165   : > { %v16628_v33 = vadd.f32 %v3402_v3, %v2150_v42  ;;  %v2165_v15 = vadd.f32 %v12544_v30, %v15865_v44  ;;  %v3412_v63 = vpop.f32.mrf.mxu0  ;;  %12689 = vmatprep.mubr.msk.f32.mxu1 %vm838_vm2, %v14186_v29  ;;  %v16643_v44 = vsel %vm2768_vm3, %v3008_v48, %v3010_v58  ;;  %v14193_v29 = vld [vmem:[%s14554_s25 + $0x448] sm:$0xff] }
 0x166   : > { %v2159_v22 = vpop.f32.mrf.mxu1  ;;  %20940 = vst [vmem:[#allocation317_spill] sm:$0xff] %v16643_v44  ;;  %v3015_v42 = vrot.slane %v14193_v29, 2 }
 0x167   : > { %v16634_v51 = vadd.f32 %v12738_v31, %v2165_v15  ;;  %v2160_v23 = vadd.f32 %v2159_v22, %v15879_v27  ;;  %v12741_v13 = vpop.f32.mrf.mxu0  ;;  %12884 = vmatmul.mubr.msk.f32.gmra.mxu0 %vm838_vm2, %v16623_v1  ;;  %v14194_v31 = vld [vmem:[%s14554_s25 + $0x450] sm:$0xff] }
 0x168   : > { %v12547_v3 = vpop.f32.mrf.mxu1  ;;  %12690 = vmatmul.mubr.msk.f32.gmra.mxu1 %vm838_vm2, %v14187_v56  ;;  %12886 = vmatprep.mubr.msk.f32.mxu0 %vm838_vm2, %v16626_v19  ;;  %v3017_v30 = vrot.slane %v14194_v31, 2  ;;  %v16652_v56 = vsel %vm2768_vm3, %v3012_v34, %v3013_v16 }
 0x169   : > { %v16647_v15 = vadd.f32 %v3412_v63, %v2160_v23  ;;  %v2175_v27 = vadd.f32 %v12547_v3, %v15890_v24  ;;  %v3422_v22 = vpop.f32.mrf.mxu0  ;;  %12692 = vmatprep.mubr.msk.f32.mxu1 %vm838_vm2, %v14188_v14  ;;  %20941 = vst [vmem:[#allocation318_spill] sm:$0xff] %v16652_v56  ;;  %v14195_v63 = vld [vmem:[%s14554_s25 + $0x458] sm:$0x3]  ;;  %v16664_v14 = vsel %vm2768_vm3, %v3013_v16, %v3015_v42  ;;  %v14196_v3 = vld [vmem:[%s14554_s25 + $0x460] sm:$0xff] }
 0x16a   : > { %v2169_v1 = vpop.f32.mrf.mxu1  ;;  %v3019_v23 = vrot.slane %v14195_v63, 2  ;;  %20942 = vst [vmem:[#allocation319_spill] sm:$0xff] %v16664_v14  ;;  %v16667_v34 = vsel %vm2768_vm3, %v3015_v42, %v3017_v30 }
 0x16b   : > { %v16654_v19 = vadd.f32 %v12741_v13, %v2175_v27  ;;  %v2170_v48 = vadd.f32 %v2169_v1, %v15904_v39  ;;  %v12744_v58 = vpop.f32.mrf.mxu0  ;;  %12887 = vmatmul.mubr.msk.f32.gmra.mxu0 %vm838_vm2, %v16643_v44  ;;  %20943 = vst [vmem:[#allocation320_spill] sm:$0xff] %v16667_v34  ;;  %v14197_v27 = vld [vmem:[%s14554_s25 + $0x468] sm:$0xff] }
 0x16c   : > { %v12550_v24 = vpop.f32.mrf.mxu1  ;;  %12693 = vmatmul.mubr.msk.f32.gmra.mxu1 %vm838_vm2, %v14189_v21  ;;  %12889 = vmatprep.mubr.msk.f32.mxu0 %vm838_vm2, %v16652_v56  ;;  %v3021_v21 = vrot.slane %v14196_v3, 2  ;;  %v3022_v63 = vrot.slane %v14197_v27, 2 }
 0x16d   : > { %v16669_v39 = vadd.f32 %v3422_v22, %v2170_v48  ;;  %v2185_v1 = vadd.f32 %v12550_v24, %v15914_v54  ;;  %v3432_v13 = vpop.f32.mrf.mxu0  ;;  %12695 = vmatprep.mubr.msk.f32.mxu1 %vm838_vm2, %v14191_v52  ;;  %v16684_v54 = vsel %vm2768_vm3, %v3017_v30, %v3019_v23  ;;  %v14198_v52 = vld [vmem:[%s14554_s25 + $0x470] sm:$0xff] }
 0x16e   : > { %v2179_v56 = vpop.f32.mrf.mxu1  ;;  %20944 = vst [vmem:[#allocation321_spill] sm:$0xff] %v16684_v54  ;;  %v3024_v48 = vrot.slane %v14198_v52, 2 }
 0x16f   : > { %v16675_v44 = vadd.f32 %v12744_v58, %v2185_v1  ;;  %v2180_v16 = vadd.f32 %v2179_v56, %v15928_v59  ;;  %v12747_v42 = vpop.f32.mrf.mxu0  ;;  %12890 = vmatmul.mubr.msk.f32.gmra.mxu0 %vm838_vm2, %v16664_v14  ;;  %v14199_v58 = vld [vmem:[%s14554_s25 + $0x478] sm:$0xff] }
 0x170   : > { %v12553_v22 = vpop.f32.mrf.mxu1  ;;  %12696 = vmatmul.mubr.msk.f32.gmra.mxu1 %vm838_vm2, %v14192_v6  ;;  %12892 = vmatprep.mubr.msk.f32.mxu0 %vm838_vm2, %v16667_v34  ;;  %v3026_v24 = vrot.slane %v14199_v58, 2  ;;  %v16693_v6 = vsel %vm2768_vm3, %v3021_v21, %v3022_v63 }
 0x171   : > { %v16688_v1 = vadd.f32 %v3432_v13, %v2180_v16  ;;  %v2195_v59 = vadd.f32 %v12553_v22, %v15939_v41  ;;  %v3442_v56 = vpop.f32.mrf.mxu0  ;;  %12698 = vmatprep.mubr.msk.f32.mxu1 %vm838_vm2, %v14193_v29  ;;  %20945 = vst [vmem:[#allocation322_spill] sm:$0xff] %v16693_v6  ;;  %v14200_v13 = vld [vmem:[%s14554_s25 + $0x480] sm:$0x3]  ;;  %v16705_v29 = vsel %vm2768_vm3, %v3022_v63, %v3024_v48  ;;  %v14201_v22 = vld [vmem:[%s14554_s25 + $0x488] sm:$0xff] }
 0x172   : > { %v2189_v14 = vpop.f32.mrf.mxu1  ;;  %v3028_v16 = vrot.slane %v14200_v13, 2  ;;  %20946 = vst [vmem:[#allocation323_spill] sm:$0xff] %v16705_v29  ;;  %v16708_v21 = vsel %vm2768_vm3, %v3024_v48, %v3026_v24 }
 0x173   : > { %v16695_v34 = vadd.f32 %v12747_v42, %v2195_v59  ;;  %v2190_v30 = vadd.f32 %v2189_v14, %v15953_v12  ;;  %v12750_v23 = vpop.f32.mrf.mxu0  ;;  %12893 = vmatmul.mubr.msk.f32.gmra.mxu0 %vm838_vm2, %v16684_v54  ;;  %20947 = vst [vmem:[#allocation324_spill] sm:$0xff] %v16708_v21  ;;  %v14202_v59 = vld [vmem:[%s14554_s25 + $0x490] sm:$0xff] }
 0x174   : > { %v12556_v41 = vpop.f32.mrf.mxu1  ;;  %12699 = vmatmul.mubr.msk.f32.gmra.mxu1 %vm838_vm2, %v14194_v31  ;;  %12895 = vmatprep.mubr.msk.f32.mxu0 %vm838_vm2, %v16693_v6  ;;  %v3030_v31 = vrot.slane %v14201_v22, 2  ;;  %v3031_v13 = vrot.slane %v14202_v59, 2 }
 0x175   : > { %v16710_v12 = vadd.f32 %v3442_v56, %v2190_v30  ;;  %v2205_v14 = vadd.f32 %v12556_v41, %v15963_v57  ;;  %v3452_v42 = vpop.f32.mrf.mxu0  ;;  %12701 = vmatprep.mubr.msk.f32.mxu1 %vm838_vm2, %v14196_v3  ;;  %v16725_v57 = vsel %vm2768_vm3, %v3026_v24, %v3028_v16  ;;  %v14203_v3 = vld [vmem:[%s14554_s25 + $0x498] sm:$0xff] }
 0x176   : > { %v2199_v6 = vpop.f32.mrf.mxu1  ;;  %20948 = vst [vmem:[#allocation325_spill] sm:$0xff] %v16725_v57  ;;  %v3033_v30 = vrot.slane %v14203_v3, 2 }
 0x177   : > { %v16716_v54 = vadd.f32 %v12750_v23, %v2205_v14  ;;  %v2200_v63 = vadd.f32 %v2199_v6, %v15977_v45  ;;  %v12753_v48 = vpop.f32.mrf.mxu0  ;;  %12896 = vmatmul.mubr.msk.f32.gmra.mxu0 %vm838_vm2, %v16705_v29  ;;  %v14204_v23 = vld [vmem:[%s14554_s25 + $0x4a0] sm:$0xff] }
 0x178   : > { %v12559_v56 = vpop.f32.mrf.mxu1  ;;  %12702 = vmatmul.mubr.msk.f32.gmra.mxu1 %vm838_vm2, %v14197_v27  ;;  %12898 = vmatprep.mubr.msk.f32.mxu0 %vm838_vm2, %v16708_v21  ;;  %v3035_v41 = vrot.slane %v14204_v23, 2  ;;  %v16734_v27 = vsel %vm2768_vm3, %v3030_v31, %v3031_v13 }
 0x179   : > { %v16729_v14 = vadd.f32 %v3452_v42, %v2200_v63  ;;  %v2215_v45 = vadd.f32 %v12559_v56, %v15988_v36  ;;  %v3462_v6 = vpop.f32.mrf.mxu0  ;;  %12704 = vmatprep.mubr.msk.f32.mxu1 %vm838_vm2, %v14198_v52  ;;  %20949 = vst [vmem:[#allocation326_spill] sm:$0xff] %v16734_v27  ;;  %v14205_v42 = vld [vmem:[%s14554_s25 + $0x4a8] sm:$0x3]  ;;  %v16746_v52 = vsel %vm2768_vm3, %v3031_v13, %v3033_v30  ;;  %v14206_v56 = vld [vmem:[%s14554_s25 + $0x4b0] sm:$0xff] }
 0x17a   : > { %v2209_v29 = vpop.f32.mrf.mxu1  ;;  %v3037_v63 = vrot.slane %v14205_v42, 2  ;;  %20950 = vst [vmem:[#allocation327_spill] sm:$0xff] %v16746_v52  ;;  %v16749_v31 = vsel %vm2768_vm3, %v3033_v30, %v3035_v41 }
 0x17b   : > { %v16736_v21 = vadd.f32 %v12753_v48, %v2215_v45  ;;  %v2210_v24 = vadd.f32 %v2209_v29, %v16002_v17  ;;  %v12756_v16 = vpop.f32.mrf.mxu0  ;;  %12899 = vmatmul.mubr.msk.f32.gmra.mxu0 %vm838_vm2, %v16725_v57  ;;  %20951 = vst [vmem:[#allocation328_spill] sm:$0xff] %v16749_v31  ;;  %v14207_v45 = vld [vmem:[%s14554_s25 + $0x4b8] sm:$0xff] }
 0x17c   : > { %v12562_v36 = vpop.f32.mrf.mxu1  ;;  %12705 = vmatmul.mubr.msk.f32.gmra.mxu1 %vm838_vm2, %v14199_v58  ;;  %12901 = vmatprep.mubr.msk.f32.mxu0 %vm838_vm2, %v16734_v27  ;;  %v3039_v58 = vrot.slane %v14206_v56, 2  ;;  %v3040_v42 = vrot.slane %v14207_v45, 2 }
 0x17d   : > { %v16751_v17 = vadd.f32 %v3462_v6, %v2210_v24  ;;  %v2225_v29 = vadd.f32 %v12562_v36, %v16012_v18  ;;  %v3472_v48 = vpop.f32.mrf.mxu0  ;;  %12707 = vmatprep.mubr.msk.f32.mxu1 %vm838_vm2, %v14201_v22  ;;  %v16766_v18 = vsel %vm2768_vm3, %v3035_v41, %v3037_v63  ;;  %v14208_v22 = vld [vmem:[%s14554_s25 + $0x4c0] sm:$0xff] }
 0x17e   : > { %v2219_v27 = vpop.f32.mrf.mxu1  ;;  %20952 = vst [vmem:[#allocation329_spill] sm:$0xff] %v16766_v18  ;;  %v3042_v24 = vrot.slane %v14208_v22, 2 }
 0x17f   : > { %v16757_v57 = vadd.f32 %v12756_v16, %v2225_v29  ;;  %v2220_v13 = vadd.f32 %v2219_v27, %v16026_v40  ;;  %v12759_v30 = vpop.f32.mrf.mxu0  ;;  %12902 = vmatmul.mubr.msk.f32.gmra.mxu0 %vm838_vm2, %v16746_v52  ;;  %v14209_v16 = vld [vmem:[%s14554_s25 + $0x4c8] sm:$0xff] }
 0x180   : > { %v12565_v6 = vpop.f32.mrf.mxu1  ;;  %12708 = vmatmul.mubr.msk.f32.gmra.mxu1 %vm838_vm2, %v14202_v59  ;;  %12904 = vmatprep.mubr.msk.f32.mxu0 %vm838_vm2, %v16749_v31  ;;  %v3044_v36 = vrot.slane %v14209_v16, 2  ;;  %v16775_v59 = vsel %vm2768_vm3, %v3039_v58, %v3040_v42 }
 0x181   : > { %v16770_v29 = vadd.f32 %v3472_v48, %v2220_v13  ;;  %v2235_v40 = vadd.f32 %v12565_v6, %v16037_v43  ;;  %v3482_v27 = vpop.f32.mrf.mxu0  ;;  %12710 = vmatprep.mubr.msk.f32.mxu1 %vm838_vm2, %v14203_v3  ;;  %20953 = vst [vmem:[#allocation330_spill] sm:$0xff] %v16775_v59  ;;  %v14210_v48 = vld [vmem:[%s14554_s25 + $0x4d0] sm:$0x3]  ;;  %v16787_v3 = vsel %vm2768_vm3, %v3040_v42, %v3042_v24  ;;  %v14211_v6 = vld [vmem:[%s14554_s25 + $0x4d8] sm:$0xff] }
 0x182   : > { %v2229_v52 = vpop.f32.mrf.mxu1  ;;  %v3046_v13 = vrot.slane %v14210_v48, 2  ;;  %20954 = vst [vmem:[#allocation331_spill] sm:$0xff] %v16787_v3  ;;  %v16790_v58 = vsel %vm2768_vm3, %v3042_v24, %v3044_v36 }
 0x183   : > { %v16777_v31 = vadd.f32 %v12759_v30, %v2235_v40  ;;  %v2230_v41 = vadd.f32 %v2229_v52, %v16051_v5  ;;  %v12762_v63 = vpop.f32.mrf.mxu0  ;;  %12905 = vmatmul.mubr.msk.f32.gmra.mxu0 %vm838_vm2, %v16766_v18  ;;  %20955 = vst [vmem:[#allocation332_spill] sm:$0xff] %v16790_v58  ;;  %v3048_v40 = vrot.slane %v14211_v6, 2 }
 0x184   : > { %v12568_v43 = vpop.f32.mrf.mxu1  ;;  %12711 = vmatmul.mubr.msk.f32.gmra.mxu1 %vm838_vm2, %v14204_v23  ;;  %12907 = vmatprep.mubr.msk.f32.mxu0 %vm838_vm2, %v16775_v59  ;;  %v14212_v23 = vld [vmem:[%s14554_s25 + $0x4e0] sm:$0xff] }
 0x185   : > { %v16792_v5 = vadd.f32 %v3482_v27, %v2230_v41  ;;  %v2245_v52 = vadd.f32 %v12568_v43, %v16061_v9  ;;  %v3492_v30 = vpop.f32.mrf.mxu0  ;;  %12713 = vmatprep.mubr.msk.f32.mxu1 %vm838_vm2, %v14206_v56  ;;  %v3049_v48 = vrot.slane %v14212_v23, 2  ;;  %v16807_v9 = vsel %vm2768_vm3, %v3044_v36, %v3046_v13  ;;  %v14213_v56 = vld [vmem:[%s14554_s25 + $0x4e8] sm:$0xff] }
 0x186   : > { %v2239_v18 = vpop.f32.mrf.mxu1  ;;  %20956 = vst [vmem:[#allocation333_spill] sm:$0xff] %v16807_v9  ;;  %v3051_v41 = vrot.slane %v14213_v56, 2 }
 0x187   : > { %v16798_v59 = vadd.f32 %v12762_v63, %v2245_v52  ;;  %v2240_v42 = vadd.f32 %v2239_v18, %v16075_v35  ;;  %v12765_v24 = vpop.f32.mrf.mxu0  ;;  %12908 = vmatmul.mubr.msk.f32.gmra.mxu0 %vm838_vm2, %v16787_v3  ;;  %v16815_v43 = vsel %vm2768_vm3, %v3048_v40, %v3049_v48 }
 0x188   : > { %v12571_v27 = vpop.f32.mrf.mxu1  ;;  %12714 = vmatmul.mubr.msk.f32.gmra.mxu1 %vm838_vm2, %v14207_v45  ;;  %12910 = vmatprep.mubr.msk.f32.mxu0 %vm838_vm2, %v16790_v58  ;;  %20957 = vst [vmem:[#allocation334_spill] sm:$0xff] %v16815_v43  ;;  %v14214_v45 = vld [vmem:[%s14554_s25 + $0x4f0] sm:$0xff] }
 0x189   : > { %v16810_v63 = vadd.f32 %v3492_v30, %v2240_v42  ;;  %v2255_v35 = vadd.f32 %v12571_v27, %v16086_v49  ;;  %v3502_v18 = vpop.f32.mrf.mxu0  ;;  %12716 = vmatprep.mubr.msk.f32.mxu1 %vm838_vm2, %v14208_v22  ;;  %v3053_v52 = vrot.slane %v14214_v45, 2  ;;  %v14215_v30 = vld [vmem:[%s14554_s25 + $0x4f8] sm:$0x3]  ;;  %v16828_v22 = vsel %vm2768_vm3, %v3049_v48, %v3051_v41 }
 0x18a   : > { %v2249_v3 = vpop.f32.mrf.mxu1  ;;  %v3055_v42 = vrot.slane %v14215_v30, 2  ;;  %20958 = vst [vmem:[#allocation335_spill] sm:$0xff] %v16828_v22 }
 0x18b   : > { %v16818_v58 = vadd.f32 %v12765_v24, %v2255_v35  ;;  %v2250_v36 = vadd.f32 %v2249_v3, %v16100_v4  ;;  %v12768_v13 = vpop.f32.mrf.mxu0  ;;  %12911 = vmatmul.mubr.msk.f32.gmra.mxu0 %vm838_vm2, %v16807_v9  ;;  %v16835_v3 = vsel %vm2768_vm3, %v3051_v41, %v3053_v52  ;;  %v20994_v9 = vld [vmem:[#allocation44_spill] sm:$0xff] }
 0x18c   : > { %v12574_v49 = vpop.f32.mrf.mxu1  ;;  %12717 = vmatmul.mubr.msk.f32.gmra.mxu1 %vm838_vm2, %v14209_v16  ;;  %12913 = vmatprep.mubr.msk.f32.mxu0 %vm838_vm2, %v16815_v43  ;;  %20959 = vst [vmem:[#allocation336_spill] sm:$0xff] %v16835_v3 }
 0x18d   : > { %v16830_v40 = vadd.f32 %v3502_v18, %v2250_v36  ;;  %v2265_v24 = vadd.f32 %v12574_v49, %v16110_v37  ;;  %v3512_v4 = vpop.f32.mrf.mxu0  ;;  %12719 = vmatprep.mubr.msk.f32.mxu1 %vm838_vm2, %v14211_v6  ;;  %v16846_v37 = vsel %vm2768_vm3, %v3053_v52, %v3055_v42  ;;  %v20961_v42 = vld [vmem:[#allocation6_spill] sm:$0xff] }
 0x18e   : > { %v2259_v27 = vpop.f32.mrf.mxu1  ;;  %20960 = vst [vmem:[#allocation337_spill] sm:$0xff] %v16846_v37 }
 0x18f   : > { %v16837_v35 = vadd.f32 %v12768_v13, %v2265_v24  ;;  %v2260_v16 = vadd.f32 %v2259_v27, %v16124_v47  ;;  %v12771_v30 = vpop.f32.mrf.mxu0  ;;  %12914 = vmatmul.mubr.msk.f32.gmra.mxu0 %vm838_vm2, %v16828_v22  ;;  %v14216_v24 = vld [vmem:[%s14554_s25 + $0x28] sm:$0xff]  ;;  %v20988_v22 = vld [vmem:[#allocation40_spill] sm:$0xff] }
 0x190   : > { %v12577_v48 = vpop.f32.mrf.mxu1  ;;  %12720 = vmatmul.mubr.msk.f32.gmra.mxu1 %vm838_vm2, %v14212_v23  ;;  %12916 = vmatprep.mubr.msk.f32.mxu0 %vm838_vm2, %v16835_v3 }
 0x191   : > { %v16848_v6 = vadd.f32 %v3512_v4, %v2260_v16  ;;  %v2275_v41 = vadd.f32 %v12577_v48, %v16135_v38  ;;  %v3522_v18 = vpop.f32.mrf.mxu0  ;;  %12722 = vmatprep.mubr.msk.f32.mxu1 %vm838_vm2, %v14213_v56  ;;  %v14217_v48 = vld [vmem:[%s14554_s25 + $0x30] sm:$0xff] }
 0x192   : > { %v2269_v47 = vpop.f32.mrf.mxu1 }
 0x193   : > { %v16852_v36 = vadd.f32 %v12771_v30, %v2275_v41  ;;  %v2270_v13 = vadd.f32 %v2269_v47, %v16149_v32  ;;  %v12774_v23 = vpop.f32.mrf.mxu0  ;;  %12917 = vmatmul.mubr.msk.f32.gmra.mxu0 %vm838_vm2, %v16846_v37  ;;  %v20962_v30 = vld [vmem:[#allocation8_spill] sm:$0xff] }
 0x194   : > { %v12580_v52 = vpop.f32.mrf.mxu1  ;;  %12723 = vmatmul.mubr.msk.f32.gmra.mxu1 %vm838_vm2, %v14214_v45  ;;  %13115 = vmatprep.mubr.msk.f32.mxu0 %vm838_vm2, %v20961_v42  ;;  %v20964_v42 = vld [vmem:[#allocation12_spill] sm:$0xff] }
 0x195   : > { %v16860_v38 = vadd.f32 %v3522_v18, %v2270_v13  ;;  %v2285_v56 = vadd.f32 %v12580_v52, %v16159_v53  ;;  %v3532_v49 = vpop.f32.mrf.mxu0  ;;  %12921 = vmatprep.mubr.msk.f32.mxu1 %vm838_vm2, %v14216_v24  ;;  %v14218_v18 = vld [vmem:[%s14554_s25 + $0x38] sm:$0xff]  ;;  %v20963_v13 = vld [vmem:[#allocation10_spill] sm:$0xff]  ;;  %v20982_v37 = vld [vmem:[#allocation36_spill] sm:$0xff] }
 0x196   : > { %v2279_v32 = vpop.f32.mrf.mxu1 }
 0x197   : > { %v16865_v4 = vadd.f32 %v12774_v23, %v2285_v56  ;;  %v2280_v27 = vadd.f32 %v2279_v32, %v16173_v61  ;;  %v12777_v16 = vpop.f32.mrf.mxu0  ;;  %13116 = vmatmul.mubr.msk.f32.vlgmr.msra.gmra.mxu0 %vm838_vm2, %v20962_v30  ;;  %v20965_v56 = vld [vmem:[#allocation14_spill] sm:$0xff] }
 0x198   : > { %v12583_v45 = vpop.f32.mrf.mxu1  ;;  %12922 = vmatmul.mubr.msk.f32.vlgmr.msra.gmra.mxu1 %vm838_vm2, %v14217_v48  ;;  %13502 = vmatpush3.msk.msra.mxu0 %vm1095_vm0, %v16219_v8  ;;  %v20966_v48 = vld [vmem:[#allocation16_spill] sm:$0xff] }
 0x199   : > { %v16874_v53 = vadd.f32 %v3532_v49, %v2280_v27  ;;  %v2295_v41 = vadd.f32 %v12583_v45, %v16183_v26  ;;  %13308 = vmatpush3.msk.msra.mxu1 %vm1095_vm0, %v16206_v46  ;;  %v3542_v61 = vpop.f32.mrf.mxu0  ;;  %12924 = vmatprep.mubr.msk.f32.mxu1 %vm838_vm2, %v14218_v18  ;;  %v14219_v46 = vld [vmem:[%s14554_s25 + $0x40] sm:$0xff]  ;;  %v14220_v27 = vld [vmem:[%s14554_s25 + $0x50] sm:$0xff] }
 0x19a   : > { %v2289_v47 = vpop.f32.mrf.mxu1  ;;  %13118 = vmatprep.mubr.msk.f32.mxu0 %vm838_vm2, %v20963_v13 }
 0x19b   : > { %v16883_v23 = vadd.f32 %v12777_v16, %v2295_v41  ;;  %v2290_v8 = vadd.f32 %v2289_v47, %v16196_v28  ;;  %v12780_v52 = vpop.f32.mrf.mxu0  ;;  %13119 = vmatmul.mubr.msk.f32.gmra.mxu0 %vm838_vm2, %v20964_v42 }
 0x19c   : > { %v12586_v26 = vpop.f32.mrf.mxu1  ;;  %12925 = vmatmul.mubr.msk.f32.gmra.mxu1 %vm838_vm2, %v14219_v46  ;;  %13121 = vmatprep.mubr.msk.f32.mxu0 %vm838_vm2, %v20965_v56  ;;  %v20968_v46 = vld [vmem:[#allocation20_spill] sm:$0xff] }
 0x19d   : > { %v16892_v49 = vadd.f32 %v3542_v61, %v2290_v8  ;;  %v2305_v24 = vadd.f32 %v12586_v26, %v16212_v55  ;;  %v3552_v32 = vpop.f32.mrf.mxu0  ;;  %12927 = vmatprep.mubr.msk.f32.mxu1 %vm838_vm2, %v14220_v27  ;;  %v14221_v61 = vld [vmem:[%s14554_s25 + $0x58] sm:$0xff]  ;;  %v20967_v55 = vld [vmem:[#allocation18_spill] sm:$0xff] }
 0x19e   : > { %v2299_v28 = vpop.f32.mrf.mxu1  ;;  %v14222_v8 = vld [vmem:[%s14554_s25 + $0x60] sm:$0xff] }
 0x19f   : > { %v16897_v16 = vadd.f32 %v12780_v52, %v2305_v24  ;;  %v2300_v30 = vadd.f32 %v2299_v28, %v16230_v25  ;;  %v12783_v45 = vpop.f32.mrf.mxu0  ;;  %13122 = vmatmul.mubr.msk.f32.gmra.mxu0 %vm838_vm2, %v20966_v48  ;;  %v20978_v48 = vld [vmem:[#allocation32_spill] sm:$0xff] }
 0x1a0   : > { %v12589_v41 = vpop.f32.mrf.mxu1  ;;  %12928 = vmatmul.mubr.msk.f32.gmra.mxu1 %vm838_vm2, %v14221_v61  ;;  %13124 = vmatprep.mubr.msk.f32.mxu0 %vm838_vm2, %v20967_v55 }
 0x1a1   : > { %v16906_v18 = vadd.f32 %v3552_v32, %v2300_v30  ;;  %v2315_v47 = vadd.f32 %v12589_v41, %v16242_v10  ;;  %v3562_v13 = vpop.f32.mrf.mxu0  ;;  %12930 = vmatprep.mubr.msk.f32.mxu1 %vm838_vm2, %v14222_v8  ;;  %v14223_v32 = vld [vmem:[%s14554_s25 + $0x68] sm:$0xff]  ;;  %v20969_v10 = vld [vmem:[#allocation22_spill] sm:$0xff]  ;;  %v20970_v8 = vld [vmem:[#allocation24_spill] sm:$0xff] }
 0x1a2   : > { %v2309_v25 = vpop.f32.mrf.mxu1 }
 0x1a3   : > { %v16911_v52 = vadd.f32 %v12783_v45, %v2315_v47  ;;  %v2310_v42 = vadd.f32 %v2309_v25, %v16255_v7  ;;  %v12786_v26 = vpop.f32.mrf.mxu0  ;;  %13125 = vmatmul.mubr.msk.f32.gmra.mxu0 %vm838_vm2, %v20968_v46  ;;  %v14224_v45 = vld [vmem:[%s14554_s25 + $0x78] sm:$0xff]  ;;  %v20974_v46 = vld [vmem:[#allocation28_spill] sm:$0xff] }
 0x1a4   : > { %v12592_v24 = vpop.f32.mrf.mxu1  ;;  %12931 = vmatmul.mubr.msk.f32.gmra.mxu1 %vm838_vm2, %v14223_v32  ;;  %13127 = vmatprep.mubr.msk.f32.mxu0 %vm838_vm2, %v20969_v10 }
 0x1a5   : > { %v16920_v27 = vadd.f32 %v3562_v13, %v2310_v42  ;;  %v2325_v28 = vadd.f32 %v12592_v24, %v16264_v20  ;;  %v3572_v30 = vpop.f32.mrf.mxu0  ;;  %12933 = vmatprep.mubr.msk.f32.mxu1 %vm838_vm2, %v14224_v45  ;;  %v14225_v13 = vld [vmem:[%s14554_s25 + $0x80] sm:$0xff]  ;;  %v20972_v24 = vld [vmem:[#allocation237_spill] sm:$0xff] }
 0x1a6   : > { %v2319_v7 = vpop.f32.mrf.mxu1  ;;  %v20971_v20 = vld [vmem:[#allocation26_spill] sm:$0xff] }
 0x1a7   : > { %v16925_v41 = vadd.f32 %v12786_v26, %v2325_v28  ;;  %v2320_v61 = vadd.f32 %v2319_v7, %v16277_v11  ;;  %v12789_v47 = vpop.f32.mrf.mxu0  ;;  %13128 = vmatmul.mubr.msk.f32.gmra.mxu0 %vm838_vm2, %v20970_v8  ;;  %v14226_v28 = vld [vmem:[%s14554_s25 + $0x88] sm:$0xff]  ;;  %v20973_v7 = vld [vmem:[#allocation240_spill] sm:$0xff] }
 0x1a8   : > { %v12595_v25 = vpop.f32.mrf.mxu1  ;;  %12934 = vmatmul.mubr.msk.f32.gmra.mxu1 %vm838_vm2, %v14225_v13  ;;  %13130 = vmatprep.mubr.msk.f32.mxu0 %vm838_vm2, %v20971_v20 }
 0x1a9   : > { %v16934_v42 = vadd.f32 %v3572_v30, %v2320_v61  ;;  %v2335_v32 = vadd.f32 %v12595_v25, %v20972_v24  ;;  %v3582_v26 = vpop.f32.mrf.mxu0  ;;  %12936 = vmatprep.mubr.msk.f32.mxu1 %vm838_vm2, %v14226_v28  ;;  %v14227_v30 = vld [vmem:[%s14554_s25 + $0x90] sm:$0xff]  ;;  %v20975_v61 = vld [vmem:[#allocation30_spill] sm:$0xff]  ;;  %v20976_v24 = vld [vmem:[#allocation243_spill] sm:$0xff] }
 0x1aa   : > { %v2329_v11 = vpop.f32.mrf.mxu1 }
 0x1ab   : > { %v16939_v45 = vadd.f32 %v12789_v47, %v2335_v32  ;;  %v2330_v8 = vadd.f32 %v2329_v11, %v20973_v7  ;;  %v12792_v10 = vpop.f32.mrf.mxu0  ;;  %13131 = vmatmul.mubr.msk.f32.gmra.mxu0 %vm838_vm2, %v20974_v46  ;;  %v14228_v32 = vld [vmem:[%s14554_s25 + $0xa0] sm:$0xff] }
 0x1ac   : > { %v12598_v13 = vpop.f32.mrf.mxu1  ;;  %12937 = vmatmul.mubr.msk.f32.gmra.mxu1 %vm838_vm2, %v14227_v30  ;;  %13133 = vmatprep.mubr.msk.f32.mxu0 %vm838_vm2, %v20975_v61  ;;  %v20977_v46 = vld [vmem:[#allocation246_spill] sm:$0xff] }
 0x1ad   : > { %v16948_v25 = vadd.f32 %v3582_v26, %v2330_v8  ;;  %v2345_v28 = vadd.f32 %v12598_v13, %v20976_v24  ;;  %v3592_v47 = vpop.f32.mrf.mxu0  ;;  %12939 = vmatprep.mubr.msk.f32.mxu1 %vm838_vm2, %v14228_v32  ;;  %v14229_v8 = vld [vmem:[%s14554_s25 + $0xa8] sm:$0xff]  ;;  %v20979_v26 = vld [vmem:[#allocation34_spill] sm:$0xff]  ;;  %v20980_v24 = vld [vmem:[#allocation249_spill] sm:$0xff] }
 0x1ae   : > { %v2339_v11 = vpop.f32.mrf.mxu1 }
 0x1af   : > { %v16953_v7 = vadd.f32 %v12792_v10, %v2345_v28  ;;  %v2340_v20 = vadd.f32 %v2339_v11, %v20977_v46  ;;  %v12795_v55 = vpop.f32.mrf.mxu0  ;;  %13134 = vmatmul.mubr.msk.f32.gmra.mxu0 %vm838_vm2, %v20978_v48  ;;  %v14230_v28 = vld [vmem:[%s14554_s25 + $0xb0] sm:$0xff] }
 0x1b0   : > { %v12601_v30 = vpop.f32.mrf.mxu1  ;;  %12940 = vmatmul.mubr.msk.f32.gmra.mxu1 %vm838_vm2, %v14229_v8  ;;  %13136 = vmatprep.mubr.msk.f32.mxu0 %vm838_vm2, %v20979_v26  ;;  %v20981_v48 = vld [vmem:[#allocation252_spill] sm:$0xff] }
 0x1b1   : > { %v16962_v13 = vadd.f32 %v3592_v47, %v2340_v20  ;;  %v2355_v32 = vadd.f32 %v12601_v30, %v20980_v24  ;;  %v3602_v10 = vpop.f32.mrf.mxu0  ;;  %12942 = vmatprep.mubr.msk.f32.mxu1 %vm838_vm2, %v14230_v28  ;;  %v14231_v20 = vld [vmem:[%s14554_s25 + $0xb8] sm:$0xff]  ;;  %v20983_v47 = vld [vmem:[#allocation38_spill] sm:$0xff]  ;;  %v20985_v24 = vld [vmem:[#allocation255_spill] sm:$0xff] }
 0x1b2   : > { %v2349_v46 = vpop.f32.mrf.mxu1 }
 0x1b3   : > { %v16967_v11 = vadd.f32 %v12795_v55, %v2355_v32  ;;  %v2350_v61 = vadd.f32 %v2349_v46, %v20981_v48  ;;  %v12798_v56 = vpop.f32.mrf.mxu0  ;;  %13137 = vmatmul.mubr.msk.f32.gmra.mxu0 %vm838_vm2, %v20982_v37  ;;  %v14232_v32 = vld [vmem:[%s14554_s25 + $0xc8] sm:$0xff]  ;;  %v20987_v37 = vld [vmem:[#allocation258_spill] sm:$0xff] }
 0x1b4   : > { %v12604_v8 = vpop.f32.mrf.mxu1  ;;  %12943 = vmatmul.mubr.msk.f32.gmra.mxu1 %vm838_vm2, %v14231_v20  ;;  %13139 = vmatprep.mubr.msk.f32.mxu0 %vm838_vm2, %v20983_v47 }
 0x1b5   : > { %v16976_v30 = vadd.f32 %v3602_v10, %v2350_v61  ;;  %v2365_v28 = vadd.f32 %v12604_v8, %v20985_v24  ;;  %v3612_v55 = vpop.f32.mrf.mxu0  ;;  %12945 = vmatprep.mubr.msk.f32.mxu1 %vm838_vm2, %v14232_v32  ;;  %v14233_v61 = vld [vmem:[%s14554_s25 + $0xd0] sm:$0xff]  ;;  %v20989_v10 = vld [vmem:[#allocation42_spill] sm:$0xff]  ;;  %v20991_v24 = vld [vmem:[#allocation261_spill] sm:$0xff] }
 0x1b6   : > { %v2359_v48 = vpop.f32.mrf.mxu1 }
 0x1b7   : > { %20984 = vst [vmem:[#allocation6_spill] sm:$0xff] %v16976_v30  ;;  %v16981_v46 = vadd.f32 %v12798_v56, %v2365_v28  ;;  %v2360_v26 = vadd.f32 %v2359_v48, %v20987_v37  ;;  %v12801_v3 = vpop.f32.mrf.mxu0  ;;  %13140 = vmatmul.mubr.msk.f32.gmra.mxu0 %vm838_vm2, %v20988_v22  ;;  %v14234_v28 = vld [vmem:[%s14554_s25 + $0xd8] sm:$0xff]  ;;  %v20993_v22 = vld [vmem:[#allocation264_spill] sm:$0xff] }
 0x1b8   : > { %v12607_v20 = vpop.f32.mrf.mxu1  ;;  %12946 = vmatmul.mubr.msk.f32.gmra.mxu1 %vm838_vm2, %v14233_v61  ;;  %13142 = vmatprep.mubr.msk.f32.mxu0 %vm838_vm2, %v20989_v10  ;;  %v21150_v30 = vld [vmem:[#allocation21_spill] sm:$0xff] }
 0x1b9   : > { %20986 = vst [vmem:[#allocation8_spill] sm:$0xff] %v16981_v46  ;;  %v16990_v8 = vadd.f32 %v3612_v55, %v2360_v26  ;;  %v2375_v32 = vadd.f32 %v12607_v20, %v20991_v24  ;;  %v3622_v56 = vpop.f32.mrf.mxu0  ;;  %12948 = vmatprep.mubr.msk.f32.mxu1 %vm838_vm2, %v14234_v28  ;;  %v14235_v26 = vld [vmem:[%s14554_s25 + $0xe0] sm:$0xff]  ;;  %v20997_v24 = vld [vmem:[#allocation267_spill] sm:$0xff]  ;;  %v21144_v46 = vld [vmem:[#allocation17_spill] sm:$0xff] }
 0x1ba   : > { %v2369_v37 = vpop.f32.mrf.mxu1  ;;  %v20995_v55 = vld [vmem:[#allocation46_spill] sm:$0xff] }
 0x1bb   : > { %20990 = vst [vmem:[#allocation10_spill] sm:$0xff] %v16990_v8  ;;  %v16995_v48 = vadd.f32 %v12801_v3, %v2375_v32  ;;  %v2370_v47 = vadd.f32 %v2369_v37, %v20993_v22  ;;  %v12804_v43 = vpop.f32.mrf.mxu0  ;;  %13143 = vmatmul.mubr.msk.f32.gmra.mxu0 %vm838_vm2, %v20994_v9  ;;  %v14236_v32 = vld [vmem:[%s14554_s25 + $0xf0] sm:$0xff]  ;;  %v20999_v9 = vld [vmem:[#allocation270_spill] sm:$0xff] }
 0x1bc   : > { %v12610_v61 = vpop.f32.mrf.mxu1  ;;  %12949 = vmatmul.mubr.msk.f32.gmra.mxu1 %vm838_vm2, %v14235_v26  ;;  %13145 = vmatprep.mubr.msk.f32.mxu0 %vm838_vm2, %v20995_v55  ;;  %v21000_v8 = vld [vmem:[#allocation48_spill] sm:$0xff] }
 0x1bd   : > { %20992 = vst [vmem:[#allocation12_spill] sm:$0xff] %v16995_v48  ;;  %v17004_v20 = vadd.f32 %v3622_v56, %v2370_v47  ;;  %v2385_v28 = vadd.f32 %v12610_v61, %v20997_v24  ;;  %v3632_v3 = vpop.f32.mrf.mxu0  ;;  %12951 = vmatprep.mubr.msk.f32.mxu1 %vm838_vm2, %v14236_v32  ;;  %v14237_v47 = vld [vmem:[%s14554_s25 + $0xf8] sm:$0xff]  ;;  %v21001_v56 = vld [vmem:[#allocation50_spill] sm:$0xff] }
 0x1be   : > { %v2379_v22 = vpop.f32.mrf.mxu1  ;;  %v21003_v24 = vld [vmem:[#allocation273_spill] sm:$0xff] }
 0x1bf   : > { %20996 = vst [vmem:[#allocation237_spill] sm:$0xff] %v17004_v20  ;;  %v17009_v37 = vadd.f32 %v12804_v43, %v2385_v28  ;;  %v2380_v10 = vadd.f32 %v2379_v22, %v20999_v9  ;;  %v12807_v48 = vpop.f32.mrf.mxu0  ;;  %13146 = vmatmul.mubr.msk.f32.gmra.mxu0 %vm838_vm2, %v21000_v8  ;;  %v14238_v28 = vld [vmem:[%s14554_s25 + $0x100] sm:$0xff]  ;;  %v21005_v8 = vld [vmem:[#allocation276_spill] sm:$0xff] }
 0x1c0   : > { %v12613_v26 = vpop.f32.mrf.mxu1  ;;  %12952 = vmatmul.mubr.msk.f32.gmra.mxu1 %vm838_vm2, %v14237_v47  ;;  %13148 = vmatprep.mubr.msk.f32.mxu0 %vm838_vm2, %v21001_v56  ;;  %v21006_v20 = vld [vmem:[#allocation52_spill] sm:$0xff] }
 0x1c1   : > { %20998 = vst [vmem:[#allocation240_spill] sm:$0xff] %v17009_v37  ;;  %v17018_v61 = vadd.f32 %v3632_v3, %v2380_v10  ;;  %v2395_v32 = vadd.f32 %v12613_v26, %v21003_v24  ;;  %v3642_v43 = vpop.f32.mrf.mxu0  ;;  %12954 = vmatprep.mubr.msk.f32.mxu1 %vm838_vm2, %v14238_v28  ;;  %v14239_v10 = vld [vmem:[%s14554_s25 + $0x108] sm:$0xff]  ;;  %v21007_v3 = vld [vmem:[#allocation54_spill] sm:$0xff] }
 0x1c2   : > { %v2389_v9 = vpop.f32.mrf.mxu1  ;;  %v21009_v24 = vld [vmem:[#allocation279_spill] sm:$0xff] }
 0x1c3   : > { %21002 = vst [vmem:[#allocation243_spill] sm:$0xff] %v17018_v61  ;;  %v17023_v22 = vadd.f32 %v12807_v48, %v2395_v32  ;;  %v2390_v55 = vadd.f32 %v2389_v9, %v21005_v8  ;;  %v12810_v37 = vpop.f32.mrf.mxu0  ;;  %13149 = vmatmul.mubr.msk.f32.gmra.mxu0 %vm838_vm2, %v21006_v20  ;;  %v14240_v32 = vld [vmem:[%s14554_s25 + $0x118] sm:$0xff]  ;;  %v21011_v20 = vld [vmem:[#allocation282_spill] sm:$0xff]  ;;  %v21012_v61 = vld [vmem:[#allocation56_spill] sm:$0xff] }
 0x1c4   : > { %v12616_v47 = vpop.f32.mrf.mxu1  ;;  %12955 = vmatmul.mubr.msk.f32.gmra.mxu1 %vm838_vm2, %v14239_v10  ;;  %13151 = vmatprep.mubr.msk.f32.mxu0 %vm838_vm2, %v21007_v3 }
 0x1c5   : > { %21004 = vst [vmem:[#allocation246_spill] sm:$0xff] %v17023_v22  ;;  %v17032_v26 = vadd.f32 %v3642_v43, %v2390_v55  ;;  %v2405_v28 = vadd.f32 %v12616_v47, %v21009_v24  ;;  %v3652_v48 = vpop.f32.mrf.mxu0  ;;  %12957 = vmatprep.mubr.msk.f32.mxu1 %vm838_vm2, %v14240_v32  ;;  %v14241_v55 = vld [vmem:[%s14554_s25 + $0x120] sm:$0xff]  ;;  %v21015_v24 = vld [vmem:[#allocation285_spill] sm:$0xff] }
 0x1c6   : > { %v2399_v8 = vpop.f32.mrf.mxu1  ;;  %v21013_v43 = vld [vmem:[#allocation58_spill] sm:$0xff] }
 0x1c7   : > { %21008 = vst [vmem:[#allocation249_spill] sm:$0xff] %v17032_v26  ;;  %v17037_v9 = vadd.f32 %v12810_v37, %v2405_v28  ;;  %v2400_v56 = vadd.f32 %v2399_v8, %v21011_v20  ;;  %v12813_v22 = vpop.f32.mrf.mxu0  ;;  %13152 = vmatmul.mubr.msk.f32.gmra.mxu0 %vm838_vm2, %v21012_v61  ;;  %v14242_v28 = vld [vmem:[%s14554_s25 + $0x128] sm:$0xff]  ;;  %v21017_v61 = vld [vmem:[#allocation288_spill] sm:$0xff] }
 0x1c8   : > { %v12619_v10 = vpop.f32.mrf.mxu1  ;;  %12958 = vmatmul.mubr.msk.f32.gmra.mxu1 %vm838_vm2, %v14241_v55  ;;  %13154 = vmatprep.mubr.msk.f32.mxu0 %vm838_vm2, %v21013_v43  ;;  %v21018_v26 = vld [vmem:[#allocation60_spill] sm:$0xff] }
 0x1c9   : > { %21010 = vst [vmem:[#allocation252_spill] sm:$0xff] %v17037_v9  ;;  %v17046_v47 = vadd.f32 %v3652_v48, %v2400_v56  ;;  %v2415_v32 = vadd.f32 %v12619_v10, %v21015_v24  ;;  %v3662_v37 = vpop.f32.mrf.mxu0  ;;  %12960 = vmatprep.mubr.msk.f32.mxu1 %vm838_vm2, %v14242_v28  ;;  %v14243_v56 = vld [vmem:[%s14554_s25 + $0x130] sm:$0xff]  ;;  %v21019_v48 = vld [vmem:[#allocation62_spill] sm:$0xff]  ;;  %v21021_v24 = vld [vmem:[#allocation291_spill] sm:$0xff] }
 0x1ca   : > { %v2409_v20 = vpop.f32.mrf.mxu1 }
 0x1cb   : > { %21014 = vst [vmem:[#allocation255_spill] sm:$0xff] %v17046_v47  ;;  %v17051_v8 = vadd.f32 %v12813_v22, %v2415_v32  ;;  %v2410_v3 = vadd.f32 %v2409_v20, %v21017_v61  ;;  %v12816_v9 = vpop.f32.mrf.mxu0  ;;  %13155 = vmatmul.mubr.msk.f32.gmra.mxu0 %vm838_vm2, %v21018_v26  ;;  %v14244_v32 = vld [vmem:[%s14554_s25 + $0x140] sm:$0xff]  ;;  %v21024_v47 = vld [vmem:[#allocation64_spill] sm:$0xff] }
 0x1cc   : > { %v12622_v55 = vpop.f32.mrf.mxu1  ;;  %12961 = vmatmul.mubr.msk.f32.gmra.mxu1 %vm838_vm2, %v14243_v56  ;;  %13157 = vmatprep.mubr.msk.f32.mxu0 %vm838_vm2, %v21019_v48  ;;  %v21023_v26 = vld [vmem:[#allocation294_spill] sm:$0xff] }
 0x1cd   : > { %21016 = vst [vmem:[#allocation258_spill] sm:$0xff] %v17051_v8  ;;  %v17060_v10 = vadd.f32 %v3662_v37, %v2410_v3  ;;  %v2425_v28 = vadd.f32 %v12622_v55, %v21021_v24  ;;  %v3672_v22 = vpop.f32.mrf.mxu0  ;;  %12963 = vmatprep.mubr.msk.f32.mxu1 %vm838_vm2, %v14244_v32  ;;  %v14245_v3 = vld [vmem:[%s14554_s25 + $0x148] sm:$0xff]  ;;  %v21025_v37 = vld [vmem:[#allocation66_spill] sm:$0xff]  ;;  %v21027_v24 = vld [vmem:[#allocation297_spill] sm:$0xff] }
 0x1ce   : > { %v2419_v61 = vpop.f32.mrf.mxu1 }
 0x1cf   : > { %21020 = vst [vmem:[#allocation261_spill] sm:$0xff] %v17060_v10  ;;  %v17065_v20 = vadd.f32 %v12816_v9, %v2425_v28  ;;  %v2420_v43 = vadd.f32 %v2419_v61, %v21023_v26  ;;  %v12819_v8 = vpop.f32.mrf.mxu0  ;;  %13158 = vmatmul.mubr.msk.f32.gmra.mxu0 %vm838_vm2, %v21024_v47  ;;  %v14246_v28 = vld [vmem:[%s14554_s25 + $0x150] sm:$0xff] }
 0x1d0   : > { %v12625_v56 = vpop.f32.mrf.mxu1  ;;  %12964 = vmatmul.mubr.msk.f32.gmra.mxu1 %vm838_vm2, %v14245_v3  ;;  %13160 = vmatprep.mubr.msk.f32.mxu0 %vm838_vm2, %v21025_v37  ;;  %v21029_v47 = vld [vmem:[#allocation300_spill] sm:$0xff] }
 0x1d1   : > { %21022 = vst [vmem:[#allocation264_spill] sm:$0xff] %v17065_v20  ;;  %v17074_v55 = vadd.f32 %v3672_v22, %v2420_v43  ;;  %v2435_v32 = vadd.f32 %v12625_v56, %v21027_v24  ;;  %v3682_v9 = vpop.f32.mrf.mxu0  ;;  %12966 = vmatprep.mubr.msk.f32.mxu1 %vm838_vm2, %v14246_v28  ;;  %v21030_v10 = vld [vmem:[#allocation68_spill] sm:$0xff]  ;;  %v14247_v43 = vld [vmem:[%s14554_s25 + $0x158] sm:$0xff]  ;;  %v21031_v22 = vld [vmem:[#allocation70_spill] sm:$0xff] }
 0x1d2   : > { %v2429_v26 = vpop.f32.mrf.mxu1  ;;  %v21033_v24 = vld [vmem:[#allocation303_spill] sm:$0xff] }
 0x1d3   : > { %21026 = vst [vmem:[#allocation267_spill] sm:$0xff] %v17074_v55  ;;  %v17079_v61 = vadd.f32 %v12819_v8, %v2435_v32  ;;  %v2430_v48 = vadd.f32 %v2429_v26, %v21029_v47  ;;  %v12822_v20 = vpop.f32.mrf.mxu0  ;;  %13161 = vmatmul.mubr.msk.f32.gmra.mxu0 %vm838_vm2, %v21030_v10  ;;  %v14248_v32 = vld [vmem:[%s14554_s25 + $0x168] sm:$0xff]  ;;  %v21035_v10 = vld [vmem:[#allocation306_spill] sm:$0xff]  ;;  %v21036_v55 = vld [vmem:[#allocation72_spill] sm:$0xff] }
 0x1d4   : > { %v12628_v3 = vpop.f32.mrf.mxu1  ;;  %12967 = vmatmul.mubr.msk.f32.gmra.mxu1 %vm838_vm2, %v14247_v43  ;;  %13163 = vmatprep.mubr.msk.f32.mxu0 %vm838_vm2, %v21031_v22 }
 0x1d5   : > { %21028 = vst [vmem:[#allocation270_spill] sm:$0xff] %v17079_v61  ;;  %v17088_v56 = vadd.f32 %v3682_v9, %v2430_v48  ;;  %v2445_v28 = vadd.f32 %v12628_v3, %v21033_v24  ;;  %v3692_v8 = vpop.f32.mrf.mxu0  ;;  %12969 = vmatprep.mubr.msk.f32.mxu1 %vm838_vm2, %v14248_v32  ;;  %v14249_v48 = vld [vmem:[%s14554_s25 + $0x170] sm:$0xff]  ;;  %v21037_v9 = vld [vmem:[#allocation74_spill] sm:$0xff]  ;;  %v21039_v24 = vld [vmem:[#allocation171_spill] sm:$0xff] }
 0x1d6   : > { %v2439_v47 = vpop.f32.mrf.mxu1 }
 0x1d7   : > { %21032 = vst [vmem:[#allocation273_spill] sm:$0xff] %v17088_v56  ;;  %v17093_v26 = vadd.f32 %v12822_v20, %v2445_v28  ;;  %v2440_v37 = vadd.f32 %v2439_v47, %v21035_v10  ;;  %v12825_v61 = vpop.f32.mrf.mxu0  ;;  %13164 = vmatmul.mubr.msk.f32.gmra.mxu0 %vm838_vm2, %v21036_v55  ;;  %v14250_v28 = vld [vmem:[%s14554_s25 + $0x178] sm:$0xff]  ;;  %v21041_v55 = vld [vmem:[#allocation174_spill] sm:$0xff]  ;;  %v21042_v56 = vld [vmem:[#allocation76_spill] sm:$0xff] }
 0x1d8   : > { %v12631_v43 = vpop.f32.mrf.mxu1  ;;  %12970 = vmatmul.mubr.msk.f32.gmra.mxu1 %vm838_vm2, %v14249_v48  ;;  %13166 = vmatprep.mubr.msk.f32.mxu0 %vm838_vm2, %v21037_v9 }
 0x1d9   : > { %21034 = vst [vmem:[#allocation276_spill] sm:$0xff] %v17093_v26  ;;  %v17102_v3 = vadd.f32 %v3692_v8, %v2440_v37  ;;  %v2455_v32 = vadd.f32 %v12631_v43, %v21039_v24  ;;  %v3702_v20 = vpop.f32.mrf.mxu0  ;;  %12972 = vmatprep.mubr.msk.f32.mxu1 %vm838_vm2, %v14250_v28  ;;  %v14251_v37 = vld [vmem:[%s14554_s25 + $0x180] sm:$0xff]  ;;  %v21045_v24 = vld [vmem:[#allocation175_spill] sm:$0xff] }
 0x1da   : > { %v2449_v10 = vpop.f32.mrf.mxu1  ;;  %v21043_v8 = vld [vmem:[#allocation78_spill] sm:$0xff] }
 0x1db   : > { %21038 = vst [vmem:[#allocation279_spill] sm:$0xff] %v17102_v3  ;;  %v17107_v47 = vadd.f32 %v12825_v61, %v2455_v32  ;;  %v2450_v22 = vadd.f32 %v2449_v10, %v21041_v55  ;;  %v12828_v26 = vpop.f32.mrf.mxu0  ;;  %13167 = vmatmul.mubr.msk.f32.gmra.mxu0 %vm838_vm2, %v21042_v56  ;;  %v14252_v32 = vld [vmem:[%s14554_s25 + $0x190] sm:$0xff]  ;;  %v21047_v56 = vld [vmem:[#allocation178_spill] sm:$0xff] }
 0x1dc   : > { %v12634_v48 = vpop.f32.mrf.mxu1  ;;  %12973 = vmatmul.mubr.msk.f32.gmra.mxu1 %vm838_vm2, %v14251_v37  ;;  %13169 = vmatprep.mubr.msk.f32.mxu0 %vm838_vm2, %v21043_v8  ;;  %v21048_v3 = vld [vmem:[#allocation80_spill] sm:$0xff] }
 0x1dd   : > { %21040 = vst [vmem:[#allocation282_spill] sm:$0xff] %v17107_v47  ;;  %v17116_v43 = vadd.f32 %v3702_v20, %v2450_v22  ;;  %v2465_v28 = vadd.f32 %v12634_v48, %v21045_v24  ;;  %v3712_v61 = vpop.f32.mrf.mxu0  ;;  %12975 = vmatprep.mubr.msk.f32.mxu1 %vm838_vm2, %v14252_v32  ;;  %v14253_v22 = vld [vmem:[%s14554_s25 + $0x198] sm:$0xff]  ;;  %v21049_v20 = vld [vmem:[#allocation82_spill] sm:$0xff]  ;;  %v21051_v24 = vld [vmem:[#allocation179_spill] sm:$0xff] }
 0x1de   : > { %v2459_v55 = vpop.f32.mrf.mxu1 }
 0x1df   : > { %21044 = vst [vmem:[#allocation285_spill] sm:$0xff] %v17116_v43  ;;  %v17121_v10 = vadd.f32 %v12828_v26, %v2465_v28  ;;  %v2460_v9 = vadd.f32 %v2459_v55, %v21047_v56  ;;  %v12831_v47 = vpop.f32.mrf.mxu0  ;;  %13170 = vmatmul.mubr.msk.f32.gmra.mxu0 %vm838_vm2, %v21048_v3  ;;  %v14254_v28 = vld [vmem:[%s14554_s25 + $0x1a0] sm:$0xff]  ;;  %v21054_v43 = vld [vmem:[#allocation84_spill] sm:$0xff] }
 0x1e0   : > { %v12637_v37 = vpop.f32.mrf.mxu1  ;;  %12976 = vmatmul.mubr.msk.f32.gmra.mxu1 %vm838_vm2, %v14253_v22  ;;  %13172 = vmatprep.mubr.msk.f32.mxu0 %vm838_vm2, %v21049_v20  ;;  %v21053_v3 = vld [vmem:[#allocation182_spill] sm:$0xff] }
 0x1e1   : > { %21046 = vst [vmem:[#allocation288_spill] sm:$0xff] %v17121_v10  ;;  %v17130_v48 = vadd.f32 %v3712_v61, %v2460_v9  ;;  %v2475_v32 = vadd.f32 %v12637_v37, %v21051_v24  ;;  %v3722_v26 = vpop.f32.mrf.mxu0  ;;  %12978 = vmatprep.mubr.msk.f32.mxu1 %vm838_vm2, %v14254_v28  ;;  %v14255_v9 = vld [vmem:[%s14554_s25 + $0x1a8] sm:$0xff]  ;;  %v21055_v61 = vld [vmem:[#allocation86_spill] sm:$0xff] }
 0x1e2   : > { %v2469_v56 = vpop.f32.mrf.mxu1  ;;  %v21057_v24 = vld [vmem:[#allocation183_spill] sm:$0xff] }
 0x1e3   : > { %21050 = vst [vmem:[#allocation291_spill] sm:$0xff] %v17130_v48  ;;  %v17135_v55 = vadd.f32 %v12831_v47, %v2475_v32  ;;  %v2470_v8 = vadd.f32 %v2469_v56, %v21053_v3  ;;  %v12834_v10 = vpop.f32.mrf.mxu0  ;;  %13173 = vmatmul.mubr.msk.f32.gmra.mxu0 %vm838_vm2, %v21054_v43  ;;  %v14256_v32 = vld [vmem:[%s14554_s25 + $0x1b8] sm:$0xff]  ;;  %v21059_v43 = vld [vmem:[#allocation186_spill] sm:$0xff] }
 0x1e4   : > { %v12640_v22 = vpop.f32.mrf.mxu1  ;;  %12979 = vmatmul.mubr.msk.f32.gmra.mxu1 %vm838_vm2, %v14255_v9  ;;  %13175 = vmatprep.mubr.msk.f32.mxu0 %vm838_vm2, %v21055_v61  ;;  %v21060_v48 = vld [vmem:[#allocation89_spill] sm:$0xff] }
 0x1e5   : > { %21052 = vst [vmem:[#allocation294_spill] sm:$0xff] %v17135_v55  ;;  %v17144_v37 = vadd.f32 %v3722_v26, %v2470_v8  ;;  %v2485_v28 = vadd.f32 %v12640_v22, %v21057_v24  ;;  %v3732_v47 = vpop.f32.mrf.mxu0  ;;  %12981 = vmatprep.mubr.msk.f32.mxu1 %vm838_vm2, %v14256_v32  ;;  %v14257_v8 = vld [vmem:[%s14554_s25 + $0x1c0] sm:$0xff]  ;;  %v21061_v26 = vld [vmem:[#allocation91_spill] sm:$0xff] }
 0x1e6   : > { %v2479_v3 = vpop.f32.mrf.mxu1  ;;  %v21063_v24 = vld [vmem:[#allocation187_spill] sm:$0xff] }
 0x1e7   : > { %21056 = vst [vmem:[#allocation297_spill] sm:$0xff] %v17144_v37  ;;  %v17149_v56 = vadd.f32 %v12834_v10, %v2485_v28  ;;  %v2480_v20 = vadd.f32 %v2479_v3, %v21059_v43  ;;  %v12837_v55 = vpop.f32.mrf.mxu0  ;;  %13176 = vmatmul.mubr.msk.f32.gmra.mxu0 %vm838_vm2, %v21060_v48  ;;  %v14258_v28 = vld [vmem:[%s14554_s25 + $0x1c8] sm:$0xff]  ;;  %v21065_v48 = vld [vmem:[#allocation190_spill] sm:$0xff] }
 0x1e8   : > { %v12643_v9 = vpop.f32.mrf.mxu1  ;;  %12982 = vmatmul.mubr.msk.f32.gmra.mxu1 %vm838_vm2, %v14257_v8  ;;  %13178 = vmatprep.mubr.msk.f32.mxu0 %vm838_vm2, %v21061_v26  ;;  %v21066_v37 = vld [vmem:[#allocation95_spill] sm:$0xff] }
 0x1e9   : > { %21058 = vst [vmem:[#allocation300_spill] sm:$0xff] %v17149_v56  ;;  %v17158_v22 = vadd.f32 %v3732_v47, %v2480_v20  ;;  %v2495_v32 = vadd.f32 %v12643_v9, %v21063_v24  ;;  %v3742_v10 = vpop.f32.mrf.mxu0  ;;  %12984 = vmatprep.mubr.msk.f32.mxu1 %vm838_vm2, %v14258_v28  ;;  %v14259_v20 = vld [vmem:[%s14554_s25 + $0x1d0] sm:$0xff]  ;;  %v21067_v47 = vld [vmem:[#allocation97_spill] sm:$0xff]  ;;  %v21069_v24 = vld [vmem:[#allocation191_spill] sm:$0xff] }
 0x1ea   : > { %v2489_v43 = vpop.f32.mrf.mxu1 }
 0x1eb   : > { %21062 = vst [vmem:[#allocation303_spill] sm:$0xff] %v17158_v22  ;;  %v17163_v3 = vadd.f32 %v12837_v55, %v2495_v32  ;;  %v2490_v61 = vadd.f32 %v2489_v43, %v21065_v48  ;;  %v12840_v56 = vpop.f32.mrf.mxu0  ;;  %13179 = vmatmul.mubr.msk.f32.gmra.mxu0 %vm838_vm2, %v21066_v37  ;;  %v14260_v32 = vld [vmem:[%s14554_s25 + $0x1e0] sm:$0xff]  ;;  %v21071_v37 = vld [vmem:[#allocation88_spill] sm:$0xff] }
 0x1ec   : > { %v12646_v8 = vpop.f32.mrf.mxu1  ;;  %12985 = vmatmul.mubr.msk.f32.gmra.mxu1 %vm838_vm2, %v14259_v20  ;;  %13181 = vmatprep.mubr.msk.f32.mxu0 %vm838_vm2, %v21067_v47  ;;  %v21072_v22 = vld [vmem:[#allocation102_spill] sm:$0xff] }
 0x1ed   : > { %21064 = vst [vmem:[#allocation306_spill] sm:$0xff] %v17163_v3  ;;  %v17172_v9 = vadd.f32 %v3742_v10, %v2490_v61  ;;  %v2505_v28 = vadd.f32 %v12646_v8, %v21069_v24  ;;  %v3752_v55 = vpop.f32.mrf.mxu0  ;;  %12987 = vmatprep.mubr.msk.f32.mxu1 %vm838_vm2, %v14260_v32  ;;  %v14261_v61 = vld [vmem:[%s14554_s25 + $0x1e8] sm:$0xff]  ;;  %v21073_v10 = vld [vmem:[#allocation104_spill] sm:$0xff]  ;;  %v21075_v24 = vld [vmem:[#allocation194_spill] sm:$0xff] }
 0x1ee   : > { %v2499_v48 = vpop.f32.mrf.mxu1 }
 0x1ef   : > { %21068 = vst [vmem:[#allocation171_spill] sm:$0xff] %v17172_v9  ;;  %v17177_v43 = vadd.f32 %v12840_v56, %v2505_v28  ;;  %v2500_v26 = vadd.f32 %v2499_v48, %v21071_v37  ;;  %v12843_v3 = vpop.f32.mrf.mxu0  ;;  %13182 = vmatmul.mubr.msk.f32.gmra.mxu0 %vm838_vm2, %v21072_v22  ;;  %v14262_v28 = vld [vmem:[%s14554_s25 + $0x1f0] sm:$0xff]  ;;  %v21077_v22 = vld [vmem:[#allocation94_spill] sm:$0xff] }
 0x1f0   : > { %v12649_v20 = vpop.f32.mrf.mxu1  ;;  %12988 = vmatmul.mubr.msk.f32.gmra.mxu1 %vm838_vm2, %v14261_v61  ;;  %13184 = vmatprep.mubr.msk.f32.mxu0 %vm838_vm2, %v21073_v10  ;;  %v21078_v9 = vld [vmem:[#allocation108_spill] sm:$0xff] }
 0x1f1   : > { %21070 = vst [vmem:[#allocation174_spill] sm:$0xff] %v17177_v43  ;;  %v17186_v8 = vadd.f32 %v3752_v55, %v2500_v26  ;;  %v2515_v32 = vadd.f32 %v12649_v20, %v21075_v24  ;;  %v3762_v56 = vpop.f32.mrf.mxu0  ;;  %12990 = vmatprep.mubr.msk.f32.mxu1 %vm838_vm2, %v14262_v28  ;;  %v14263_v26 = vld [vmem:[%s14554_s25 + $0x1f8] sm:$0xff]  ;;  %v21079_v55 = vld [vmem:[#allocation110_spill] sm:$0xff] }
 0x1f2   : > { %v2509_v37 = vpop.f32.mrf.mxu1  ;;  %v21081_v24 = vld [vmem:[#allocation98_spill] sm:$0xff] }
 0x1f3   : > { %21074 = vst [vmem:[#allocation175_spill] sm:$0xff] %v17186_v8  ;;  %v17191_v48 = vadd.f32 %v12843_v3, %v2515_v32  ;;  %v2510_v47 = vadd.f32 %v2509_v37, %v21077_v22  ;;  %v12846_v43 = vpop.f32.mrf.mxu0  ;;  %13185 = vmatmul.mubr.msk.f32.gmra.mxu0 %vm838_vm2, %v21078_v9  ;;  %v14264_v32 = vld [vmem:[%s14554_s25 + $0x208] sm:$0xff]  ;;  %v21083_v9 = vld [vmem:[#allocation100_spill] sm:$0xff] }
 0x1f4   : > { %v12652_v61 = vpop.f32.mrf.mxu1  ;;  %12991 = vmatmul.mubr.msk.f32.gmra.mxu1 %vm838_vm2, %v14263_v26  ;;  %13187 = vmatprep.mubr.msk.f32.mxu0 %vm838_vm2, %v21079_v55  ;;  %v21084_v8 = vld [vmem:[#allocation115_spill] sm:$0xff] }
 0x1f5   : > { %21076 = vst [vmem:[#allocation178_spill] sm:$0xff] %v17191_v48  ;;  %v17200_v20 = vadd.f32 %v3762_v56, %v2510_v47  ;;  %v2525_v28 = vadd.f32 %v12652_v61, %v21081_v24  ;;  %v3772_v3 = vpop.f32.mrf.mxu0  ;;  %12993 = vmatprep.mubr.msk.f32.mxu1 %vm838_vm2, %v14264_v32  ;;  %v14265_v47 = vld [vmem:[%s14554_s25 + $0x210] sm:$0xff]  ;;  %v21085_v56 = vld [vmem:[#allocation117_spill] sm:$0xff] }
 0x1f6   : > { %v2519_v22 = vpop.f32.mrf.mxu1  ;;  %v21087_v24 = vld [vmem:[#allocation101_spill] sm:$0xff] }
 0x1f7   : > { %21080 = vst [vmem:[#allocation179_spill] sm:$0xff] %v17200_v20  ;;  %v17205_v37 = vadd.f32 %v12846_v43, %v2525_v28  ;;  %v2520_v10 = vadd.f32 %v2519_v22, %v21083_v9  ;;  %v12849_v48 = vpop.f32.mrf.mxu0  ;;  %13188 = vmatmul.mubr.msk.f32.gmra.mxu0 %vm838_vm2, %v21084_v8  ;;  %v14266_v28 = vld [vmem:[%s14554_s25 + $0x218] sm:$0xff]  ;;  %v21089_v8 = vld [vmem:[#allocation107_spill] sm:$0xff] }
 0x1f8   : > { %v12655_v26 = vpop.f32.mrf.mxu1  ;;  %12994 = vmatmul.mubr.msk.f32.gmra.mxu1 %vm838_vm2, %v14265_v47  ;;  %13190 = vmatprep.mubr.msk.f32.mxu0 %vm838_vm2, %v21085_v56  ;;  %v21090_v20 = vld [vmem:[#allocation121_spill] sm:$0xff] }
 0x1f9   : > { %21082 = vst [vmem:[#allocation182_spill] sm:$0xff] %v17205_v37  ;;  %v17214_v61 = vadd.f32 %v3772_v3, %v2520_v10  ;;  %v2535_v32 = vadd.f32 %v12655_v26, %v21087_v24  ;;  %v3782_v43 = vpop.f32.mrf.mxu0  ;;  %12996 = vmatprep.mubr.msk.f32.mxu1 %vm838_vm2, %v14266_v28  ;;  %v14267_v10 = vld [vmem:[%s14554_s25 + $0x220] sm:$0xff]  ;;  %v21091_v3 = vld [vmem:[#allocation123_spill] sm:$0xff] }
 0x1fa   : > { %v2529_v9 = vpop.f32.mrf.mxu1  ;;  %v21093_v24 = vld [vmem:[#allocation111_spill] sm:$0xff] }
 0x1fb   : > { %21086 = vst [vmem:[#allocation183_spill] sm:$0xff] %v17214_v61  ;;  %v17219_v22 = vadd.f32 %v12849_v48, %v2535_v32  ;;  %v2530_v55 = vadd.f32 %v2529_v9, %v21089_v8  ;;  %v12852_v37 = vpop.f32.mrf.mxu0  ;;  %13191 = vmatmul.mubr.msk.f32.gmra.mxu0 %vm838_vm2, %v21090_v20  ;;  %v14268_v32 = vld [vmem:[%s14554_s25 + $0x230] sm:$0xff]  ;;  %v21095_v20 = vld [vmem:[#allocation113_spill] sm:$0xff]  ;;  %v21096_v61 = vld [vmem:[#allocation126_spill] sm:$0xff] }
 0x1fc   : > { %v12658_v47 = vpop.f32.mrf.mxu1  ;;  %12997 = vmatmul.mubr.msk.f32.gmra.mxu1 %vm838_vm2, %v14267_v10  ;;  %13193 = vmatprep.mubr.msk.f32.mxu0 %vm838_vm2, %v21091_v3 }
 0x1fd   : > { %21088 = vst [vmem:[#allocation186_spill] sm:$0xff] %v17219_v22  ;;  %v17228_v26 = vadd.f32 %v3782_v43, %v2530_v55  ;;  %v2545_v28 = vadd.f32 %v12658_v47, %v21093_v24  ;;  %v3792_v48 = vpop.f32.mrf.mxu0  ;;  %12999 = vmatprep.mubr.msk.f32.mxu1 %vm838_vm2, %v14268_v32  ;;  %v14269_v55 = vld [vmem:[%s14554_s25 + $0x238] sm:$0xff]  ;;  %v21097_v43 = vld [vmem:[#allocation128_spill] sm:$0xff]  ;;  %v21099_v24 = vld [vmem:[#allocation114_spill] sm:$0xff] }
 0x1fe   : > { %v2539_v8 = vpop.f32.mrf.mxu1 }
 0x1ff   : > { %21092 = vst [vmem:[#allocation187_spill] sm:$0xff] %v17228_v26  ;;  %v17233_v9 = vadd.f32 %v12852_v37, %v2545_v28  ;;  %v2540_v56 = vadd.f32 %v2539_v8, %v21095_v20  ;;  %v12855_v22 = vpop.f32.mrf.mxu0  ;;  %13194 = vmatmul.mubr.msk.f32.gmra.mxu0 %vm838_vm2, %v21096_v61  ;;  %v14270_v28 = vld [vmem:[%s14554_s25 + $0x240] sm:$0xff]  ;;  %v21101_v61 = vld [vmem:[#allocation120_spill] sm:$0xff] }
 0x200   : > { %v12661_v10 = vpop.f32.mrf.mxu1  ;;  %13000 = vmatmul.mubr.msk.f32.gmra.mxu1 %vm838_vm2, %v14269_v55  ;;  %13196 = vmatprep.mubr.msk.f32.mxu0 %vm838_vm2, %v21097_v43  ;;  %v21102_v26 = vld [vmem:[#allocation130_spill] sm:$0xff] }
 0x201   : > { %21094 = vst [vmem:[#allocation190_spill] sm:$0xff] %v17233_v9  ;;  %v17242_v47 = vadd.f32 %v3792_v48, %v2540_v56  ;;  %v2555_v32 = vadd.f32 %v12661_v10, %v21099_v24  ;;  %v3802_v37 = vpop.f32.mrf.mxu0  ;;  %13002 = vmatprep.mubr.msk.f32.mxu1 %vm838_vm2, %v14270_v28  ;;  %v14271_v56 = vld [vmem:[%s14554_s25 + $0x248] sm:$0xff]  ;;  %v21103_v48 = vld [vmem:[#allocation132_spill] sm:$0xff] }
 0x202   : > { %v2549_v20 = vpop.f32.mrf.mxu1  ;;  %v21105_v24 = vld [vmem:[#allocation124_spill] sm:$0xff] }
 0x203   : > { %21098 = vst [vmem:[#allocation191_spill] sm:$0xff] %v17242_v47  ;;  %v17247_v8 = vadd.f32 %v12855_v22, %v2555_v32  ;;  %v2550_v3 = vadd.f32 %v2549_v20, %v21101_v61  ;;  %v12858_v9 = vpop.f32.mrf.mxu0  ;;  %13197 = vmatmul.mubr.msk.f32.gmra.mxu0 %vm838_vm2, %v21102_v26  ;;  %v14272_v32 = vld [vmem:[%s14554_s25 + $0x258] sm:$0xff]  ;;  %v21107_v26 = vld [vmem:[#allocation204_spill] sm:$0xff]  ;;  %v21108_v47 = vld [vmem:[#allocation134_spill] sm:$0xff] }
 0x204   : > { %v12664_v55 = vpop.f32.mrf.mxu1  ;;  %13003 = vmatmul.mubr.msk.f32.gmra.mxu1 %vm838_vm2, %v14271_v56  ;;  %13199 = vmatprep.mubr.msk.f32.mxu0 %vm838_vm2, %v21103_v48 }
 0x205   : > { %21100 = vst [vmem:[#allocation88_spill] sm:$0xff] %v17247_v8  ;;  %v17256_v10 = vadd.f32 %v3802_v37, %v2550_v3  ;;  %v2565_v28 = vadd.f32 %v12664_v55, %v21105_v24  ;;  %v3812_v22 = vpop.f32.mrf.mxu0  ;;  %13005 = vmatprep.mubr.msk.f32.mxu1 %vm838_vm2, %v14272_v32  ;;  %v14273_v3 = vld [vmem:[%s14554_s25 + $0x260] sm:$0xff]  ;;  %v21109_v37 = vld [vmem:[#allocation136_spill] sm:$0xff]  ;;  %v21111_v24 = vld [vmem:[#allocation205_spill] sm:$0xff] }
 0x206   : > { %v2559_v61 = vpop.f32.mrf.mxu1 }
 0x207   : > { %21104 = vst [vmem:[#allocation194_spill] sm:$0xff] %v17256_v10  ;;  %v17261_v20 = vadd.f32 %v12858_v9, %v2565_v28  ;;  %v2560_v43 = vadd.f32 %v2559_v61, %v21107_v26  ;;  %v12861_v8 = vpop.f32.mrf.mxu0  ;;  %13200 = vmatmul.mubr.msk.f32.gmra.mxu0 %vm838_vm2, %v21108_v47  ;;  %v14274_v28 = vld [vmem:[%s14554_s25 + $0x268] sm:$0xff]  ;;  %v21113_v47 = vld [vmem:[#allocation208_spill] sm:$0xff]  ;;  %v21114_v10 = vld [vmem:[#allocation138_spill] sm:$0xff] }
 0x208   : > { %v12667_v56 = vpop.f32.mrf.mxu1  ;;  %13006 = vmatmul.mubr.msk.f32.gmra.mxu1 %vm838_vm2, %v14273_v3  ;;  %13202 = vmatprep.mubr.msk.f32.mxu0 %vm838_vm2, %v21109_v37 }
 0x209   : > { %21106 = vst [vmem:[#allocation94_spill] sm:$0xff] %v17261_v20  ;;  %v17270_v55 = vadd.f32 %v3812_v22, %v2560_v43  ;;  %v2575_v32 = vadd.f32 %v12667_v56, %v21111_v24  ;;  %v3822_v9 = vpop.f32.mrf.mxu0  ;;  %13008 = vmatprep.mubr.msk.f32.mxu1 %vm838_vm2, %v14274_v28  ;;  %v14275_v43 = vld [vmem:[%s14554_s25 + $0x270] sm:$0xff]  ;;  %v21115_v22 = vld [vmem:[#allocation2_spill] sm:$0xff]  ;;  %v21117_v24 = vld [vmem:[#allocation209_spill] sm:$0xff] }
 0x20a   : > { %v2569_v26 = vpop.f32.mrf.mxu1 }
 0x20b   : > { %21110 = vst [vmem:[#allocation98_spill] sm:$0xff] %v17270_v55  ;;  %v17275_v61 = vadd.f32 %v12861_v8, %v2575_v32  ;;  %v2570_v48 = vadd.f32 %v2569_v26, %v21113_v47  ;;  %v12864_v20 = vpop.f32.mrf.mxu0  ;;  %13203 = vmatmul.mubr.msk.f32.gmra.mxu0 %vm838_vm2, %v21114_v10  ;;  %v14276_v32 = vld [vmem:[%s14554_s25 + $0x280] sm:$0xff]  ;;  %v21119_v10 = vld [vmem:[#allocation212_spill] sm:$0xff]  ;;  %v21120_v55 = vld [vmem:[#allocation3_spill] sm:$0xff] }
 0x20c   : > { %v12670_v3 = vpop.f32.mrf.mxu1  ;;  %13009 = vmatmul.mubr.msk.f32.gmra.mxu1 %vm838_vm2, %v14275_v43  ;;  %13205 = vmatprep.mubr.msk.f32.mxu0 %vm838_vm2, %v21115_v22 }
 0x20d   : > { %21112 = vst [vmem:[#allocation100_spill] sm:$0xff] %v17275_v61  ;;  %v17284_v56 = vadd.f32 %v3822_v9, %v2570_v48  ;;  %v2585_v28 = vadd.f32 %v12670_v3, %v21117_v24  ;;  %v3832_v8 = vpop.f32.mrf.mxu0  ;;  %13011 = vmatprep.mubr.msk.f32.mxu1 %vm838_vm2, %v14276_v32  ;;  %v14277_v48 = vld [vmem:[%s14554_s25 + $0x288] sm:$0xff]  ;;  %v21121_v9 = vld [vmem:[#allocation4_spill] sm:$0xff]  ;;  %v21123_v24 = vld [vmem:[#allocation213_spill] sm:$0xff] }
 0x20e   : > { %v2579_v47 = vpop.f32.mrf.mxu1 }
 0x20f   : > { %21116 = vst [vmem:[#allocation101_spill] sm:$0xff] %v17284_v56  ;;  %v17289_v26 = vadd.f32 %v12864_v20, %v2585_v28  ;;  %v2580_v37 = vadd.f32 %v2579_v47, %v21119_v10  ;;  %v12867_v61 = vpop.f32.mrf.mxu0  ;;  %13206 = vmatmul.mubr.msk.f32.gmra.mxu0 %vm838_vm2, %v21120_v55  ;;  %v14278_v28 = vld [vmem:[%s14554_s25 + $0x290] sm:$0xff]  ;;  %v21126_v56 = vld [vmem:[#allocation5_spill] sm:$0xff] }
 0x210   : > { %v12673_v43 = vpop.f32.mrf.mxu1  ;;  %13012 = vmatmul.mubr.msk.f32.gmra.mxu1 %vm838_vm2, %v14277_v48  ;;  %13208 = vmatprep.mubr.msk.f32.mxu0 %vm838_vm2, %v21121_v9  ;;  %v21125_v55 = vld [vmem:[#allocation216_spill] sm:$0xff] }
 0x211   : > { %21118 = vst [vmem:[#allocation107_spill] sm:$0xff] %v17289_v26  ;;  %v17298_v3 = vadd.f32 %v3832_v8, %v2580_v37  ;;  %v2595_v32 = vadd.f32 %v12673_v43, %v21123_v24  ;;  %v3842_v20 = vpop.f32.mrf.mxu0  ;;  %13014 = vmatprep.mubr.msk.f32.mxu1 %vm838_vm2, %v14278_v28  ;;  %v14279_v37 = vld [vmem:[%s14554_s25 + $0x298] sm:$0xff]  ;;  %v21127_v8 = vld [vmem:[#allocation7_spill] sm:$0xff] }
 0x212   : > { %v2589_v10 = vpop.f32.mrf.mxu1  ;;  %v21129_v24 = vld [vmem:[#allocation217_spill] sm:$0xff] }
 0x213   : > { %21122 = vst [vmem:[#allocation111_spill] sm:$0xff] %v17298_v3  ;;  %v17303_v47 = vadd.f32 %v12867_v61, %v2595_v32  ;;  %v2590_v22 = vadd.f32 %v2589_v10, %v21125_v55  ;;  %v12870_v26 = vpop.f32.mrf.mxu0  ;;  %13209 = vmatmul.mubr.msk.f32.gmra.mxu0 %vm838_vm2, %v21126_v56  ;;  %v14280_v32 = vld [vmem:[%s14554_s25 + $0x2a8] sm:$0xff]  ;;  %v21131_v56 = vld [vmem:[#allocation220_spill] sm:$0xff]  ;;  %v21132_v3 = vld [vmem:[#allocation9_spill] sm:$0xff] }
 0x214   : > { %v12676_v48 = vpop.f32.mrf.mxu1  ;;  %13015 = vmatmul.mubr.msk.f32.gmra.mxu1 %vm838_vm2, %v14279_v37  ;;  %13211 = vmatprep.mubr.msk.f32.mxu0 %vm838_vm2, %v21127_v8  ;;  %v14281_v8 = vld [vmem:[%s14554_s25 + $0x2b0] sm:$0xff] }
 0x215   : > { %21124 = vst [vmem:[#allocation113_spill] sm:$0xff] %v17303_v47  ;;  %v17312_v43 = vadd.f32 %v3842_v20, %v2590_v22  ;;  %v2605_v28 = vadd.f32 %v12676_v48, %v21129_v24  ;;  %v3852_v61 = vpop.f32.mrf.mxu0  ;;  %13017 = vmatprep.mubr.msk.f32.mxu1 %vm838_vm2, %v14280_v32  ;;  %v21133_v22 = vld [vmem:[#allocation11_spill] sm:$0xff]  ;;  %v21135_v48 = vld [vmem:[#allocation221_spill] sm:$0xff] }
 0x216   : > { %v2599_v55 = vpop.f32.mrf.mxu1 }
 0x217   : > { %21128 = vst [vmem:[#allocation114_spill] sm:$0xff] %v17312_v43  ;;  %v17317_v10 = vadd.f32 %v12870_v26, %v2605_v28  ;;  %v2600_v9 = vadd.f32 %v2599_v55, %v21131_v56  ;;  %v12873_v47 = vpop.f32.mrf.mxu0  ;;  %13212 = vmatmul.mubr.msk.f32.gmra.mxu0 %vm838_vm2, %v21132_v3  ;;  %v14282_v28 = vld [vmem:[%s14554_s25 + $0x2b8] sm:$0xff]  ;;  %v21139_v3 = vld [vmem:[#allocation15_spill] sm:$0xff] }
 0x218   : > { %v12679_v37 = vpop.f32.mrf.mxu1  ;;  %13018 = vmatmul.mubr.msk.f32.gmra.mxu1 %vm838_vm2, %v14281_v8  ;;  %13214 = vmatprep.mubr.msk.f32.mxu0 %vm838_vm2, %v21133_v22  ;;  %v17334_v56 = vld [vmem:[%s20075_s1 + $0x1c] sm:$0xf]  ;;  %v14283_v22 = vld [vmem:[%s14554_s25 + $0x2c0] sm:$0xff] }
 0x219   : > { %21130 = vst [vmem:[#allocation120_spill] sm:$0xff] %v17317_v10  ;;  %v17326_v20 = vadd.f32 %v3852_v61, %v2600_v9  ;;  %v2615_v24 = vadd.f32 %v12679_v37, %v21135_v48  ;;  %v3862_v26 = vpop.f32.mrf.mxu0  ;;  %13020 = vmatprep.mubr.msk.f32.mxu1 %vm838_vm2, %v14282_v28  ;;  %13695 = vmatprep.subr.msk.mxu1 %vm1095_vm0, %v17334_v56  ;;  %v21137_v9 = vld [vmem:[#allocation224_spill] sm:$0xff]  ;;  %v21138_v37 = vld [vmem:[#allocation13_spill] sm:$0xff]  ;;  %v17346_v48 = vld [vmem:[%s20075_s1 + $0x20] sm:$0xf] }
 0x21a   : > { %v2609_v32 = vpop.f32.mrf.mxu1  ;;  %13889 = vmatprep.subr.msk.mxu0 %vm1095_vm0, %v17346_v48  ;;  %v21143_v10 = vld [vmem:[#allocation228_spill] sm:$0xff] }
 0x21b   : > { %21134 = vst [vmem:[#allocation124_spill] sm:$0xff] %v17326_v20  ;;  %v17338_v8 = vadd.f32 %v12873_v47, %v2615_v24  ;;  %v2610_v61 = vadd.f32 %v2609_v32, %v21137_v9  ;;  %v12876_v55 = vpop.f32.mrf.mxu0  ;;  %13215 = vmatmul.mubr.msk.f32.gmra.mxu0 %vm838_vm2, %v21138_v37  ;;  %v21141_v24 = vld [vmem:[#allocation225_spill] sm:$0xff]  ;;  %v14284_v37 = vld [vmem:[%s14554_s25 + $0x2d0] sm:$0xff] }
 0x21c   : > { %v12682_v28 = vpop.f32.mrf.mxu1  ;;  %13021 = vmatmul.mubr.msk.f32.gmra.mxu1 %vm838_vm2, %v14283_v22  ;;  %13217 = vmatprep.mubr.msk.f32.mxu0 %vm838_vm2, %v21139_v3 }
 0x21d   : > { %21136 = vst [vmem:[#allocation204_spill] sm:$0xff] %v17338_v8  ;;  %v17352_v47 = vadd.f32 %v3862_v26, %v2610_v61  ;;  %v2625_v32 = vadd.f32 %v12682_v28, %v21141_v24  ;;  %v3872_v9 = vpop.f32.mrf.mxu0  ;;  %13023 = vmatprep.mubr.msk.f32.mxu1 %vm838_vm2, %v14284_v37  ;;  %v14285_v61 = vld [vmem:[%s14554_s25 + $0x2d8] sm:$0xff]  ;;  %v21145_v28 = vld [vmem:[#allocation19_spill] sm:$0xff] }
 0x21e   : > { %v2619_v8 = vpop.f32.mrf.mxu1  ;;  %v21147_v24 = vld [vmem:[#allocation229_spill] sm:$0xff] }
 0x21f   : > { %21140 = vst [vmem:[#allocation205_spill] sm:$0xff] %v17352_v47  ;;  %v17359_v20 = vadd.f32 %v12876_v55, %v2625_v32  ;;  %v2620_v22 = vadd.f32 %v2619_v8, %v21143_v10  ;;  %v12879_v43 = vpop.f32.mrf.mxu0  ;;  %13218 = vmatmul.mubr.msk.f32.gmra.mxu0 %vm838_vm2, %v21144_v46  ;;  %v14286_v32 = vld [vmem:[%s14554_s25 + $0x2e0] sm:$0xff]  ;;  %v21149_v46 = vld [vmem:[#allocation232_spill] sm:$0xff] }
 0x220   : > { %v12685_v26 = vpop.f32.mrf.mxu1  ;;  %13024 = vmatmul.mubr.msk.f32.gmra.mxu1 %vm838_vm2, %v14285_v61  ;;  %13220 = vmatprep.mubr.msk.f32.mxu0 %vm838_vm2, %v21145_v28 }
 0x221   : > { %21142 = vst [vmem:[#allocation208_spill] sm:$0xff] %v17359_v20  ;;  %v17368_v37 = vadd.f32 %v3872_v9, %v2620_v22  ;;  %v2635_v3 = vadd.f32 %v12685_v26, %v21147_v24  ;;  %v3882_v55 = vpop.f32.mrf.mxu0  ;;  %13026 = vmatprep.mubr.msk.f32.mxu1 %vm838_vm2, %v14286_v32  ;;  %v14287_v9 = vld [vmem:[%s14554_s25 + $0x2e8] sm:$0xff]  ;;  %v21153_v24 = vld [vmem:[#allocation233_spill] sm:$0xff] }
 0x222   : > { %v2629_v10 = vpop.f32.mrf.mxu1  ;;  %v21151_v22 = vld [vmem:[#allocation23_spill] sm:$0xff] }
 0x223   : > { %21146 = vst [vmem:[#allocation209_spill] sm:$0xff] %v17368_v37  ;;  %v17373_v8 = vadd.f32 %v12879_v43, %v2635_v3  ;;  %v2630_v20 = vadd.f32 %v2629_v10, %v21149_v46  ;;  %v12882_v47 = vpop.f32.mrf.mxu0  ;;  %13221 = vmatmul.mubr.msk.f32.gmra.mxu0 %vm838_vm2, %v21150_v30  ;;  %v14288_v43 = vld [vmem:[%s14554_s25 + $0x2f8] sm:$0xff]  ;;  %v21155_v30 = vld [vmem:[#allocation236_spill] sm:$0xff] }
 0x224   : > { %v12688_v61 = vpop.f32.mrf.mxu1  ;;  %13027 = vmatmul.mubr.msk.f32.gmra.mxu1 %vm838_vm2, %v14287_v9  ;;  %13223 = vmatprep.mubr.msk.f32.mxu0 %vm838_vm2, %v21151_v22  ;;  %v21156_v37 = vld [vmem:[#allocation25_spill] sm:$0xff] }
 0x225   : > { %21148 = vst [vmem:[#allocation212_spill] sm:$0xff] %v17373_v8  ;;  %v17382_v26 = vadd.f32 %v3882_v55, %v2630_v20  ;;  %v2645_v32 = vadd.f32 %v12688_v61, %v21153_v24  ;;  %v3892_v3 = vpop.f32.mrf.mxu0  ;;  %13029 = vmatprep.mubr.msk.f32.mxu1 %vm838_vm2, %v14288_v43  ;;  %v14289_v20 = vld [vmem:[%s14554_s25 + $0x300] sm:$0xff]  ;;  %v21157_v55 = vld [vmem:[#allocation27_spill] sm:$0xff] }
 0x226   : > { %v2639_v46 = vpop.f32.mrf.mxu1  ;;  %v21159_v24 = vld [vmem:[#allocation238_spill] sm:$0xff] }
 0x227   : > { %21152 = vst [vmem:[#allocation213_spill] sm:$0xff] %v17382_v26  ;;  %v17387_v10 = vadd.f32 %v12882_v47, %v2645_v32  ;;  %v2640_v28 = vadd.f32 %v2639_v46, %v21155_v30  ;;  %v12885_v8 = vpop.f32.mrf.mxu0  ;;  %13224 = vmatmul.mubr.msk.f32.gmra.mxu0 %vm838_vm2, %v21156_v37  ;;  %v14290_v32 = vld [vmem:[%s14554_s25 + $0x308] sm:$0xff]  ;;  %v21161_v37 = vld [vmem:[#allocation242_spill] sm:$0xff]  ;;  %v21162_v26 = vld [vmem:[#allocation29_spill] sm:$0xff] }
 0x228   : > { %v12691_v9 = vpop.f32.mrf.mxu1  ;;  %13030 = vmatmul.mubr.msk.f32.gmra.mxu1 %vm838_vm2, %v14289_v20  ;;  %13226 = vmatprep.mubr.msk.f32.mxu0 %vm838_vm2, %v21157_v55 }
 0x229   : > { %21154 = vst [vmem:[#allocation216_spill] sm:$0xff] %v17387_v10  ;;  %v17396_v61 = vadd.f32 %v3892_v3, %v2640_v28  ;;  %v2655_v43 = vadd.f32 %v12691_v9, %v21159_v24  ;;  %v3902_v47 = vpop.f32.mrf.mxu0  ;;  %13032 = vmatprep.mubr.msk.f32.mxu1 %vm838_vm2, %v14290_v32  ;;  %v14291_v28 = vld [vmem:[%s14554_s25 + $0x310] sm:$0xff]  ;;  %v21163_v3 = vld [vmem:[#allocation31_spill] sm:$0xff] }
 0x22a   : > { %v2649_v30 = vpop.f32.mrf.mxu1  ;;  %v21165_v24 = vld [vmem:[#allocation244_spill] sm:$0xff] }
 0x22b   : > { %21158 = vst [vmem:[#allocation217_spill] sm:$0xff] %v17396_v61  ;;  %v17401_v46 = vadd.f32 %v12885_v8, %v2655_v43  ;;  %v2650_v22 = vadd.f32 %v2649_v30, %v21161_v37  ;;  %v12888_v10 = vpop.f32.mrf.mxu0  ;;  %13227 = vmatmul.mubr.msk.f32.gmra.mxu0 %vm838_vm2, %v21162_v26  ;;  %v14292_v43 = vld [vmem:[%s14554_s25 + $0x320] sm:$0xff]  ;;  %v21167_v26 = vld [vmem:[#allocation248_spill] sm:$0xff]  ;;  %v21168_v61 = vld [vmem:[#allocation33_spill] sm:$0xff] }
 0x22c   : > { %v12694_v20 = vpop.f32.mrf.mxu1  ;;  %13033 = vmatmul.mubr.msk.f32.gmra.mxu1 %vm838_vm2, %v14291_v28  ;;  %13229 = vmatprep.mubr.msk.f32.mxu0 %vm838_vm2, %v21163_v3 }
 0x22d   : > { %21160 = vst [vmem:[#allocation220_spill] sm:$0xff] %v17401_v46  ;;  %v17410_v9 = vadd.f32 %v3902_v47, %v2650_v22  ;;  %v2665_v32 = vadd.f32 %v12694_v20, %v21165_v24  ;;  %v3912_v8 = vpop.f32.mrf.mxu0  ;;  %13035 = vmatprep.mubr.msk.f32.mxu1 %vm838_vm2, %v14292_v43  ;;  %v14293_v22 = vld [vmem:[%s14554_s25 + $0x328] sm:$0xff]  ;;  %v21171_v24 = vld [vmem:[#allocation250_spill] sm:$0xff] }
 0x22e   : > { %v2659_v37 = vpop.f32.mrf.mxu1  ;;  %v21169_v47 = vld [vmem:[#allocation35_spill] sm:$0xff] }
 0x22f   : > { %21164 = vst [vmem:[#allocation221_spill] sm:$0xff] %v17410_v9  ;;  %v17415_v30 = vadd.f32 %v12888_v10, %v2665_v32  ;;  %v2660_v55 = vadd.f32 %v2659_v37, %v21167_v26  ;;  %v12891_v46 = vpop.f32.mrf.mxu0  ;;  %13230 = vmatmul.mubr.msk.f32.gmra.mxu0 %vm838_vm2, %v21168_v61  ;;  %v14294_v32 = vld [vmem:[%s14554_s25 + $0x330] sm:$0xff]  ;;  %v21173_v61 = vld [vmem:[#allocation254_spill] sm:$0xff]  ;;  %v21174_v9 = vld [vmem:[#allocation37_spill] sm:$0xff] }
 0x230   : > { %v12697_v28 = vpop.f32.mrf.mxu1  ;;  %13036 = vmatmul.mubr.msk.f32.gmra.mxu1 %vm838_vm2, %v14293_v22  ;;  %13232 = vmatprep.mubr.msk.f32.mxu0 %vm838_vm2, %v21169_v47 }
 0x231   : > { %21166 = vst [vmem:[#allocation224_spill] sm:$0xff] %v17415_v30  ;;  %v17424_v20 = vadd.f32 %v3912_v8, %v2660_v55  ;;  %v2675_v43 = vadd.f32 %v12697_v28, %v21171_v24  ;;  %v3922_v10 = vpop.f32.mrf.mxu0  ;;  %13038 = vmatprep.mubr.msk.f32.mxu1 %vm838_vm2, %v14294_v32  ;;  %v14295_v55 = vld [vmem:[%s14554_s25 + $0x338] sm:$0xff]  ;;  %v21175_v8 = vld [vmem:[#allocation39_spill] sm:$0xff]  ;;  %v21177_v24 = vld [vmem:[#allocation256_spill] sm:$0xff] }
 0x232   : > { %v2669_v26 = vpop.f32.mrf.mxu1 }
 0x233   : > { %21170 = vst [vmem:[#allocation225_spill] sm:$0xff] %v17424_v20  ;;  %v17429_v37 = vadd.f32 %v12891_v46, %v2675_v43  ;;  %v2670_v3 = vadd.f32 %v2669_v26, %v21173_v61  ;;  %v12894_v30 = vpop.f32.mrf.mxu0  ;;  %13233 = vmatmul.mubr.msk.f32.gmra.mxu0 %vm838_vm2, %v21174_v9  ;;  %v14296_v43 = vld [vmem:[%s14554_s25 + $0x348] sm:$0xff]  ;;  %v21179_v9 = vld [vmem:[#allocation260_spill] sm:$0xff]  ;;  %v21180_v20 = vld [vmem:[#allocation41_spill] sm:$0xff] }
 0x234   : > { %v12700_v22 = vpop.f32.mrf.mxu1  ;;  %13039 = vmatmul.mubr.msk.f32.gmra.mxu1 %vm838_vm2, %v14295_v55  ;;  %13235 = vmatprep.mubr.msk.f32.mxu0 %vm838_vm2, %v21175_v8 }
 0x235   : > { %21172 = vst [vmem:[#allocation228_spill] sm:$0xff] %v17429_v37  ;;  %v17438_v28 = vadd.f32 %v3922_v10, %v2670_v3  ;;  %v2685_v32 = vadd.f32 %v12700_v22, %v21177_v24  ;;  %v3932_v46 = vpop.f32.mrf.mxu0  ;;  %13041 = vmatprep.mubr.msk.f32.mxu1 %vm838_vm2, %v14296_v43  ;;  %v14297_v3 = vld [vmem:[%s14554_s25 + $0x350] sm:$0xff]  ;;  %v21181_v10 = vld [vmem:[#allocation43_spill] sm:$0xff]  ;;  %v21183_v24 = vld [vmem:[#allocation262_spill] sm:$0xff] }
 0x236   : > { %v2679_v61 = vpop.f32.mrf.mxu1 }
 0x237   : > { %21176 = vst [vmem:[#allocation229_spill] sm:$0xff] %v17438_v28  ;;  %v17443_v26 = vadd.f32 %v12894_v30, %v2685_v32  ;;  %v2680_v47 = vadd.f32 %v2679_v61, %v21179_v9  ;;  %v12897_v37 = vpop.f32.mrf.mxu0  ;;  %13236 = vmatmul.mubr.msk.f32.gmra.mxu0 %vm838_vm2, %v21180_v20  ;;  %v14298_v32 = vld [vmem:[%s14554_s25 + $0x358] sm:$0xff]  ;;  %v21185_v20 = vld [vmem:[#allocation266_spill] sm:$0xff] }
 0x238   : > { %v12703_v55 = vpop.f32.mrf.mxu1  ;;  %13042 = vmatmul.mubr.msk.f32.gmra.mxu1 %vm838_vm2, %v14297_v3  ;;  %13238 = vmatprep.mubr.msk.f32.mxu0 %vm838_vm2, %v21181_v10  ;;  %v21186_v28 = vld [vmem:[#allocation45_spill] sm:$0xff] }
 0x239   : > { %21178 = vst [vmem:[#allocation232_spill] sm:$0xff] %v17443_v26  ;;  %v17452_v22 = vadd.f32 %v3932_v46, %v2680_v47  ;;  %v2695_v43 = vadd.f32 %v12703_v55, %v21183_v24  ;;  %v3942_v30 = vpop.f32.mrf.mxu0  ;;  %13044 = vmatprep.mubr.msk.f32.mxu1 %vm838_vm2, %v14298_v32  ;;  %v14299_v47 = vld [vmem:[%s14554_s25 + $0x360] sm:$0xff]  ;;  %v21187_v46 = vld [vmem:[#allocation47_spill] sm:$0xff]  ;;  %v21189_v24 = vld [vmem:[#allocation268_spill] sm:$0xff] }
 0x23a   : > { %v2689_v9 = vpop.f32.mrf.mxu1 }
 0x23b   : > { %21182 = vst [vmem:[#allocation233_spill] sm:$0xff] %v17452_v22  ;;  %v17457_v61 = vadd.f32 %v12897_v37, %v2695_v43  ;;  %v2690_v8 = vadd.f32 %v2689_v9, %v21185_v20  ;;  %v12900_v26 = vpop.f32.mrf.mxu0  ;;  %13239 = vmatmul.mubr.msk.f32.gmra.mxu0 %vm838_vm2, %v21186_v28  ;;  %v14300_v43 = vld [vmem:[%s14554_s25 + $0x370] sm:$0xff]  ;;  %v21192_v22 = vld [vmem:[#allocation49_spill] sm:$0xff] }
 0x23c   : > { %v12706_v3 = vpop.f32.mrf.mxu1  ;;  %13045 = vmatmul.mubr.msk.f32.gmra.mxu1 %vm838_vm2, %v14299_v47  ;;  %13241 = vmatprep.mubr.msk.f32.mxu0 %vm838_vm2, %v21187_v46  ;;  %v21191_v28 = vld [vmem:[#allocation272_spill] sm:$0xff] }
 0x23d   : > { %21184 = vst [vmem:[#allocation236_spill] sm:$0xff] %v17457_v61  ;;  %v17466_v55 = vadd.f32 %v3942_v30, %v2690_v8  ;;  %v2705_v32 = vadd.f32 %v12706_v3, %v21189_v24  ;;  %v3952_v37 = vpop.f32.mrf.mxu0  ;;  %13047 = vmatprep.mubr.msk.f32.mxu1 %vm838_vm2, %v14300_v43  ;;  %v14301_v8 = vld [vmem:[%s14554_s25 + $0x378] sm:$0xff]  ;;  %v21193_v30 = vld [vmem:[#allocation51_spill] sm:$0xff]  ;;  %v21195_v24 = vld [vmem:[#allocation274_spill] sm:$0xff] }
 0x23e   : > { %v2699_v20 = vpop.f32.mrf.mxu1 }
 0x23f   : > { %21188 = vst [vmem:[#allocation238_spill] sm:$0xff] %v17466_v55  ;;  %v17471_v9 = vadd.f32 %v12900_v26, %v2705_v32  ;;  %v2700_v10 = vadd.f32 %v2699_v20, %v21191_v28  ;;  %v12903_v61 = vpop.f32.mrf.mxu0  ;;  %13242 = vmatmul.mubr.msk.f32.gmra.mxu0 %vm838_vm2, %v21192_v22  ;;  %v14302_v32 = vld [vmem:[%s14554_s25 + $0x380] sm:$0xff]  ;;  %v21198_v55 = vld [vmem:[#allocation53_spill] sm:$0xff] }
 0x240   : > { %v12709_v47 = vpop.f32.mrf.mxu1  ;;  %13048 = vmatmul.mubr.msk.f32.gmra.mxu1 %vm838_vm2, %v14301_v8  ;;  %13244 = vmatprep.mubr.msk.f32.mxu0 %vm838_vm2, %v21193_v30  ;;  %v21197_v22 = vld [vmem:[#allocation278_spill] sm:$0xff] }
 0x241   : > { %21190 = vst [vmem:[#allocation242_spill] sm:$0xff] %v17471_v9  ;;  %v17480_v3 = vadd.f32 %v3952_v37, %v2700_v10  ;;  %v2715_v43 = vadd.f32 %v12709_v47, %v21195_v24  ;;  %v3962_v26 = vpop.f32.mrf.mxu0  ;;  %13050 = vmatprep.mubr.msk.f32.mxu1 %vm838_vm2, %v14302_v32  ;;  %v14303_v10 = vld [vmem:[%s14554_s25 + $0x388] sm:$0xff]  ;;  %v21201_v24 = vld [vmem:[#allocation280_spill] sm:$0xff] }
 0x242   : > { %v2709_v28 = vpop.f32.mrf.mxu1  ;;  %v21199_v37 = vld [vmem:[#allocation55_spill] sm:$0xff] }
 0x243   : > { %21194 = vst [vmem:[#allocation244_spill] sm:$0xff] %v17480_v3  ;;  %v17485_v20 = vadd.f32 %v12903_v61, %v2715_v43  ;;  %v2710_v46 = vadd.f32 %v2709_v28, %v21197_v22  ;;  %v12906_v9 = vpop.f32.mrf.mxu0  ;;  %13245 = vmatmul.mubr.msk.f32.gmra.mxu0 %vm838_vm2, %v21198_v55  ;;  %v14304_v43 = vld [vmem:[%s14554_s25 + $0x398] sm:$0xff]  ;;  %v21203_v55 = vld [vmem:[#allocation284_spill] sm:$0xff] }
 0x244   : > { %v12712_v8 = vpop.f32.mrf.mxu1  ;;  %13051 = vmatmul.mubr.msk.f32.gmra.mxu1 %vm838_vm2, %v14303_v10  ;;  %13247 = vmatprep.mubr.msk.f32.mxu0 %vm838_vm2, %v21199_v37  ;;  %v21204_v3 = vld [vmem:[#allocation57_spill] sm:$0xff] }
 0x245   : > { %21196 = vst [vmem:[#allocation248_spill] sm:$0xff] %v17485_v20  ;;  %v17494_v47 = vadd.f32 %v3962_v26, %v2710_v46  ;;  %v2725_v32 = vadd.f32 %v12712_v8, %v21201_v24  ;;  %v3972_v61 = vpop.f32.mrf.mxu0  ;;  %13053 = vmatprep.mubr.msk.f32.mxu1 %vm838_vm2, %v14304_v43  ;;  %v14305_v46 = vld [vmem:[%s14554_s25 + $0x3a0] sm:$0xff]  ;;  %v21205_v26 = vld [vmem:[#allocation59_spill] sm:$0xff] }
 0x246   : > { %v2719_v22 = vpop.f32.mrf.mxu1  ;;  %v21207_v24 = vld [vmem:[#allocation286_spill] sm:$0xff] }
 0x247   : > { %21200 = vst [vmem:[#allocation250_spill] sm:$0xff] %v17494_v47  ;;  %v17499_v28 = vadd.f32 %v12906_v9, %v2725_v32  ;;  %v2720_v30 = vadd.f32 %v2719_v22, %v21203_v55  ;;  %v12909_v20 = vpop.f32.mrf.mxu0  ;;  %13248 = vmatmul.mubr.msk.f32.gmra.mxu0 %vm838_vm2, %v21204_v3  ;;  %v14306_v32 = vld [vmem:[%s14554_s25 + $0x3a8] sm:$0xff]  ;;  %v21209_v3 = vld [vmem:[#allocation290_spill] sm:$0xff]  ;;  %v21210_v47 = vld [vmem:[#allocation61_spill] sm:$0xff] }
 0x248   : > { %v12715_v10 = vpop.f32.mrf.mxu1  ;;  %13054 = vmatmul.mubr.msk.f32.gmra.mxu1 %vm838_vm2, %v14305_v46  ;;  %13250 = vmatprep.mubr.msk.f32.mxu0 %vm838_vm2, %v21205_v26 }
 0x249   : > { %21202 = vst [vmem:[#allocation254_spill] sm:$0xff] %v17499_v28  ;;  %v17508_v8 = vadd.f32 %v3972_v61, %v2720_v30  ;;  %v2735_v43 = vadd.f32 %v12715_v10, %v21207_v24  ;;  %v3982_v9 = vpop.f32.mrf.mxu0  ;;  %13056 = vmatprep.mubr.msk.f32.mxu1 %vm838_vm2, %v14306_v32  ;;  %v14307_v30 = vld [vmem:[%s14554_s25 + $0x3b0] sm:$0xff]  ;;  %v21211_v61 = vld [vmem:[#allocation63_spill] sm:$0xff] }
 0x24a   : > { %v2729_v55 = vpop.f32.mrf.mxu1  ;;  %v21213_v24 = vld [vmem:[#allocation292_spill] sm:$0xff] }
 0x24b   : > { %21206 = vst [vmem:[#allocation256_spill] sm:$0xff] %v17508_v8  ;;  %v17513_v22 = vadd.f32 %v12909_v20, %v2735_v43  ;;  %v2730_v37 = vadd.f32 %v2729_v55, %v21209_v3  ;;  %v12912_v28 = vpop.f32.mrf.mxu0  ;;  %13251 = vmatmul.mubr.msk.f32.gmra.mxu0 %vm838_vm2, %v21210_v47  ;;  %v14308_v43 = vld [vmem:[%s14554_s25 + $0x3c0] sm:$0xff]  ;;  %v21215_v47 = vld [vmem:[#allocation296_spill] sm:$0xff]  ;;  %v21216_v8 = vld [vmem:[#allocation65_spill] sm:$0xff] }
 0x24c   : > { %v12718_v46 = vpop.f32.mrf.mxu1  ;;  %13057 = vmatmul.mubr.msk.f32.gmra.mxu1 %vm838_vm2, %v14307_v30  ;;  %13253 = vmatprep.mubr.msk.f32.mxu0 %vm838_vm2, %v21211_v61 }
 0x24d   : > { %21208 = vst [vmem:[#allocation260_spill] sm:$0xff] %v17513_v22  ;;  %v17522_v10 = vadd.f32 %v3982_v9, %v2730_v37  ;;  %v2745_v32 = vadd.f32 %v12718_v46, %v21213_v24  ;;  %v3992_v20 = vpop.f32.mrf.mxu0  ;;  %13059 = vmatprep.mubr.msk.f32.mxu1 %vm838_vm2, %v14308_v43  ;;  %v14309_v37 = vld [vmem:[%s14554_s25 + $0x3c8] sm:$0xff]  ;;  %v21219_v24 = vld [vmem:[#allocation298_spill] sm:$0xff] }
 0x24e   : > { %v2739_v3 = vpop.f32.mrf.mxu1  ;;  %v21217_v9 = vld [vmem:[#allocation67_spill] sm:$0xff] }
 0x24f   : > { %21212 = vst [vmem:[#allocation262_spill] sm:$0xff] %v17522_v10  ;;  %v17527_v55 = vadd.f32 %v12912_v28, %v2745_v32  ;;  %v2740_v26 = vadd.f32 %v2739_v3, %v21215_v47  ;;  %v12915_v22 = vpop.f32.mrf.mxu0  ;;  %13254 = vmatmul.mubr.msk.f32.gmra.mxu0 %vm838_vm2, %v21216_v8  ;;  %v14310_v32 = vld [vmem:[%s14554_s25 + $0x3d0] sm:$0xff]  ;;  %v21221_v8 = vld [vmem:[#allocation302_spill] sm:$0xff]  ;;  %v21222_v10 = vld [vmem:[#allocation69_spill] sm:$0xff] }
 0x250   : > { %v12721_v30 = vpop.f32.mrf.mxu1  ;;  %13060 = vmatmul.mubr.msk.f32.gmra.mxu1 %vm838_vm2, %v14309_v37  ;;  %13256 = vmatprep.mubr.msk.f32.mxu0 %vm838_vm2, %v21217_v9 }
 0x251   : > { %21214 = vst [vmem:[#allocation266_spill] sm:$0xff] %v17527_v55  ;;  %v17536_v46 = vadd.f32 %v3992_v20, %v2740_v26  ;;  %v2755_v43 = vadd.f32 %v12721_v30, %v21219_v24  ;;  %v4002_v28 = vpop.f32.mrf.mxu0  ;;  %13062 = vmatprep.mubr.msk.f32.mxu1 %vm838_vm2, %v14310_v32  ;;  %v14311_v26 = vld [vmem:[%s14554_s25 + $0x3d8] sm:$0xff]  ;;  %v21223_v20 = vld [vmem:[#allocation71_spill] sm:$0xff]  ;;  %v21224_v24 = vld [vmem:[#allocation304_spill] sm:$0xff] }
 0x252   : > { %v2749_v47 = vpop.f32.mrf.mxu1 }
 0x253   : > { %21218 = vst [vmem:[#allocation268_spill] sm:$0xff] %v17536_v46  ;;  %v17541_v3 = vadd.f32 %v12915_v22, %v2755_v43  ;;  %v2750_v61 = vadd.f32 %v2749_v47, %v21221_v8  ;;  %v12918_v55 = vpop.f32.mrf.mxu0  ;;  %13257 = vmatmul.mubr.msk.f32.gmra.mxu0 %vm838_vm2, %v21222_v10  ;;  %v14312_v43 = vld [vmem:[%s14554_s25 + $0x3e8] sm:$0xff]  ;;  %v21225_v10 = vld [vmem:[#allocation308_spill] sm:$0xff]  ;;  %v21226_v46 = vld [vmem:[#allocation73_spill] sm:$0xff] }
 0x254   : > { %v12724_v37 = vpop.f32.mrf.mxu1  ;;  %13063 = vmatmul.mubr.msk.f32.gmra.mxu1 %vm838_vm2, %v14311_v26  ;;  %13259 = vmatprep.mubr.msk.f32.mxu0 %vm838_vm2, %v21223_v20  ;;  %v21228_v20 = vld [vmem:[#allocation77_spill] sm:$0xff] }
 0x255   : > { %21220 = vst [vmem:[#allocation272_spill] sm:$0xff] %v17541_v3  ;;  %v17550_v30 = vadd.f32 %v4002_v28, %v2750_v61  ;;  %v2765_v32 = vadd.f32 %v12724_v37, %v21224_v24  ;;  %v4012_v22 = vpop.f32.mrf.mxu0  ;;  %13065 = vmatprep.mubr.msk.f32.mxu1 %vm838_vm2, %v14312_v43  ;;  %v14313_v61 = vld [vmem:[%s14554_s25 + $0x3f0] sm:$0xff]  ;;  %v21227_v28 = vld [vmem:[#allocation75_spill] sm:$0xff] }
 0x256   : > { %v2759_v8 = vpop.f32.mrf.mxu1 }
 0x257   : > { %v17555_v47 = vadd.f32 %v12918_v55, %v2765_v32  ;;  %v2760_v9 = vadd.f32 %v2759_v8, %v21225_v10  ;;  %v13117_v3 = vpop.f32.mrf.mxu0  ;;  %13260 = vmatmul.mubr.msk.f32.gmra.mxu0 %vm838_vm2, %v21226_v46  ;;  %v14314_v32 = vld [vmem:[%s14554_s25 + $0x3f8] sm:$0xff] }
 0x258   : > { %v12923_v26 = vpop.f32.mrf.mxu1  ;;  %13066 = vmatmul.mubr.msk.f32.gmra.mxu1 %vm838_vm2, %v14313_v61  ;;  %13262 = vmatprep.mubr.msk.f32.mxu0 %vm838_vm2, %v21227_v28  ;;  %v21230_v28 = vld [vmem:[#allocation81_spill] sm:$0xff] }
 0x259   : > { %v17564_v37 = vadd.f32 %v4012_v22, %v2760_v9  ;;  %v4870_v24 = vadd.f32 %v12923_v26, %v16572_v2  ;;  %v5084_v55 = vpop.f32.mrf.mxu0  ;;  %13068 = vmatprep.mubr.msk.f32.mxu1 %vm838_vm2, %v14314_v32  ;;  %v14315_v9 = vld [vmem:[%s14554_s25 + $0x400] sm:$0xff]  ;;  %v21229_v2 = vld [vmem:[#allocation79_spill] sm:$0xff] }
 0x25a   : > { %v4230_v10 = vpop.f32.mrf.mxu1 }
 0x25b   : > { %v17569_v43 = vadd.f32 %v13117_v3, %v4870_v24  ;;  %v4869_v8 = vadd.f32 %v4230_v10, %v16587_v50  ;;  %v13120_v46 = vpop.f32.mrf.mxu0  ;;  %13263 = vmatmul.mubr.msk.f32.gmra.mxu0 %vm838_vm2, %v21228_v20  ;;  %v14316_v24 = vld [vmem:[%s14554_s25 + $0x410] sm:$0xff] }
 0x25c   : > { %v12926_v61 = vpop.f32.mrf.mxu1  ;;  %13069 = vmatmul.mubr.msk.f32.gmra.mxu1 %vm838_vm2, %v14315_v9  ;;  %13265 = vmatprep.mubr.msk.f32.mxu0 %vm838_vm2, %v21229_v2  ;;  %v21232_v2 = vld [vmem:[#allocation85_spill] sm:$0xff] }
 0x25d   : > { %v17578_v22 = vadd.f32 %v5084_v55, %v4869_v8  ;;  %v4872_v26 = vadd.f32 %v12926_v61, %v16593_v62  ;;  %v5094_v3 = vpop.f32.mrf.mxu0  ;;  %13071 = vmatprep.mubr.msk.f32.mxu1 %vm838_vm2, %v14316_v24  ;;  %v14317_v55 = vld [vmem:[%s14554_s25 + $0x418] sm:$0xff]  ;;  %v21231_v62 = vld [vmem:[#allocation83_spill] sm:$0xff] }
 0x25e   : > { %v4240_v50 = vpop.f32.mrf.mxu1 }
 0x25f   : > { %v17583_v32 = vadd.f32 %v13120_v46, %v4872_v26  ;;  %v4871_v10 = vadd.f32 %v4240_v50, %v16606_v60  ;;  %v13123_v20 = vpop.f32.mrf.mxu0  ;;  %13266 = vmatmul.mubr.msk.f32.gmra.mxu0 %vm838_vm2, %v21230_v28  ;;  %v14318_v26 = vld [vmem:[%s14554_s25 + $0x420] sm:$0xff] }
 0x260   : > { %v12929_v9 = vpop.f32.mrf.mxu1  ;;  %13072 = vmatmul.mubr.msk.f32.gmra.mxu1 %vm838_vm2, %v14317_v55  ;;  %13268 = vmatprep.mubr.msk.f32.mxu0 %vm838_vm2, %v21231_v62  ;;  %v21234_v62 = vld [vmem:[#allocation90_spill] sm:$0xff] }
 0x261   : > { %v17592_v8 = vadd.f32 %v5094_v3, %v4871_v10  ;;  %v4874_v61 = vadd.f32 %v12929_v9, %v16613_v0  ;;  %v5104_v46 = vpop.f32.mrf.mxu0  ;;  %13074 = vmatprep.mubr.msk.f32.mxu1 %vm838_vm2, %v14318_v26  ;;  %v14319_v3 = vld [vmem:[%s14554_s25 + $0x428] sm:$0xff] }
 0x262   : > { %v4250_v60 = vpop.f32.mrf.mxu1  ;;  %v21233_v0 = vld [vmem:[#allocation87_spill] sm:$0xff] }
 0x263   : > { %v17597_v24 = vadd.f32 %v13123_v20, %v4874_v61  ;;  %v4873_v50 = vadd.f32 %v4250_v60, %v16628_v33  ;;  %v13126_v28 = vpop.f32.mrf.mxu0  ;;  %13269 = vmatmul.mubr.msk.f32.gmra.mxu0 %vm838_vm2, %v21232_v2  ;;  %v14320_v61 = vld [vmem:[%s14554_s25 + $0x438] sm:$0xff] }
 0x264   : > { %v12932_v55 = vpop.f32.mrf.mxu1  ;;  %13075 = vmatmul.mubr.msk.f32.gmra.mxu1 %vm838_vm2, %v14319_v3  ;;  %13271 = vmatprep.mubr.msk.f32.mxu0 %vm838_vm2, %v21233_v0  ;;  %v21236_v0 = vld [vmem:[#allocation96_spill] sm:$0xff] }
 0x265   : > { %v17606_v10 = vadd.f32 %v5104_v46, %v4873_v50  ;;  %v4876_v9 = vadd.f32 %v12932_v55, %v16634_v51  ;;  %v5114_v20 = vpop.f32.mrf.mxu0  ;;  %13077 = vmatprep.mubr.msk.f32.mxu1 %vm838_vm2, %v14320_v61  ;;  %v14321_v46 = vld [vmem:[%s14554_s25 + $0x440] sm:$0xff]  ;;  %v21235_v51 = vld [vmem:[#allocation93_spill] sm:$0xff] }
 0x266   : > { %v4260_v33 = vpop.f32.mrf.mxu1 }
 0x267   : > { %v17611_v26 = vadd.f32 %v13126_v28, %v4876_v9  ;;  %v4875_v60 = vadd.f32 %v4260_v33, %v16647_v15  ;;  %v13129_v2 = vpop.f32.mrf.mxu0  ;;  %13272 = vmatmul.mubr.msk.f32.gmra.mxu0 %vm838_vm2, %v21234_v62  ;;  %v14322_v9 = vld [vmem:[%s14554_s25 + $0x448] sm:$0xff] }
 0x268   : > { %v12935_v3 = vpop.f32.mrf.mxu1  ;;  %13078 = vmatmul.mubr.msk.f32.gmra.mxu1 %vm838_vm2, %v14321_v46  ;;  %13274 = vmatprep.mubr.msk.f32.mxu0 %vm838_vm2, %v21235_v51  ;;  %v21238_v51 = vld [vmem:[#allocation103_spill] sm:$0xff] }
 0x269   : > { %v17620_v50 = vadd.f32 %v5114_v20, %v4875_v60  ;;  %v4878_v55 = vadd.f32 %v12935_v3, %v16654_v19  ;;  %v5124_v28 = vpop.f32.mrf.mxu0  ;;  %13080 = vmatprep.mubr.msk.f32.mxu1 %vm838_vm2, %v14322_v9  ;;  %v14323_v20 = vld [vmem:[%s14554_s25 + $0x450] sm:$0xff]  ;;  %v21237_v19 = vld [vmem:[#allocation99_spill] sm:$0xff] }
 0x26a   : > { %v4270_v15 = vpop.f32.mrf.mxu1 }
 0x26b   : > { %v17625_v61 = vadd.f32 %v13129_v2, %v4878_v55  ;;  %v4877_v33 = vadd.f32 %v4270_v15, %v16669_v39  ;;  %v13132_v62 = vpop.f32.mrf.mxu0  ;;  %13275 = vmatmul.mubr.msk.f32.gmra.mxu0 %vm838_vm2, %v21236_v0  ;;  %v14324_v55 = vld [vmem:[%s14554_s25 + $0x460] sm:$0xff] }
 0x26c   : > { %v12938_v46 = vpop.f32.mrf.mxu1  ;;  %13081 = vmatmul.mubr.msk.f32.gmra.mxu1 %vm838_vm2, %v14323_v20  ;;  %13277 = vmatprep.mubr.msk.f32.mxu0 %vm838_vm2, %v21237_v19  ;;  %v21240_v19 = vld [vmem:[#allocation109_spill] sm:$0xff] }
 0x26d   : > { %v17634_v60 = vadd.f32 %v5124_v28, %v4877_v33  ;;  %v4880_v3 = vadd.f32 %v12938_v46, %v16675_v44  ;;  %v5134_v2 = vpop.f32.mrf.mxu0  ;;  %13083 = vmatprep.mubr.msk.f32.mxu1 %vm838_vm2, %v14324_v55  ;;  %v14325_v28 = vld [vmem:[%s14554_s25 + $0x468] sm:$0xff]  ;;  %v21239_v44 = vld [vmem:[#allocation106_spill] sm:$0xff] }
 0x26e   : > { %v4280_v39 = vpop.f32.mrf.mxu1 }
 0x26f   : > { %v17639_v9 = vadd.f32 %v13132_v62, %v4880_v3  ;;  %v4879_v15 = vadd.f32 %v4280_v39, %v16688_v1  ;;  %v13135_v0 = vpop.f32.mrf.mxu0  ;;  %13278 = vmatmul.mubr.msk.f32.gmra.mxu0 %vm838_vm2, %v21238_v51  ;;  %v14326_v3 = vld [vmem:[%s14554_s25 + $0x470] sm:$0xff] }
 0x270   : > { %v12941_v20 = vpop.f32.mrf.mxu1  ;;  %13084 = vmatmul.mubr.msk.f32.gmra.mxu1 %vm838_vm2, %v14325_v28  ;;  %13280 = vmatprep.mubr.msk.f32.mxu0 %vm838_vm2, %v21239_v44  ;;  %v21242_v44 = vld [vmem:[#allocation116_spill] sm:$0xff] }
 0x271   : > { %v17648_v33 = vadd.f32 %v5134_v2, %v4879_v15  ;;  %v4882_v46 = vadd.f32 %v12941_v20, %v16695_v34  ;;  %v5144_v62 = vpop.f32.mrf.mxu0  ;;  %13086 = vmatprep.mubr.msk.f32.mxu1 %vm838_vm2, %v14326_v3  ;;  %v14327_v2 = vld [vmem:[%s14554_s25 + $0x478] sm:$0xff]  ;;  %v21241_v34 = vld [vmem:[#allocation112_spill] sm:$0xff] }
 0x272   : > { %v4290_v1 = vpop.f32.mrf.mxu1 }
 0x273   : > { %v17653_v55 = vadd.f32 %v13135_v0, %v4882_v46  ;;  %v4881_v39 = vadd.f32 %v4290_v1, %v16710_v12  ;;  %v13138_v51 = vpop.f32.mrf.mxu0  ;;  %13281 = vmatmul.mubr.msk.f32.gmra.mxu0 %vm838_vm2, %v21240_v19  ;;  %v14328_v46 = vld [vmem:[%s14554_s25 + $0x488] sm:$0xff] }
 0x274   : > { %v12944_v28 = vpop.f32.mrf.mxu1  ;;  %13087 = vmatmul.mubr.msk.f32.gmra.mxu1 %vm838_vm2, %v14327_v2  ;;  %13283 = vmatprep.mubr.msk.f32.mxu0 %vm838_vm2, %v21241_v34  ;;  %v21246_v34 = vld [vmem:[#allocation122_spill] sm:$0xff] }
 0x275   : > { %v17662_v15 = vadd.f32 %v5144_v62, %v4881_v39  ;;  %v4884_v20 = vadd.f32 %v12944_v28, %v16716_v54  ;;  %v5154_v0 = vpop.f32.mrf.mxu0  ;;  %13089 = vmatprep.mubr.msk.f32.mxu1 %vm838_vm2, %v14328_v46  ;;  %v14329_v62 = vld [vmem:[%s14554_s25 + $0x490] sm:$0xff]  ;;  %v21243_v54 = vld [vmem:[#allocation119_spill] sm:$0xff] }
 0x276   : > { %v4300_v12 = vpop.f32.mrf.mxu1 }
 0x277   : > { %v17667_v3 = vadd.f32 %v13138_v51, %v4884_v20  ;;  %v4883_v1 = vadd.f32 %v4300_v12, %v16729_v14  ;;  %v13141_v19 = vpop.f32.mrf.mxu0  ;;  %13284 = vmatmul.mubr.msk.f32.gmra.mxu0 %vm838_vm2, %v21242_v44  ;;  %v14330_v20 = vld [vmem:[%s14554_s25 + $0x498] sm:$0xff] }
 0x278   : > { %v12947_v2 = vpop.f32.mrf.mxu1  ;;  %13090 = vmatmul.mubr.msk.f32.gmra.mxu1 %vm838_vm2, %v14329_v62  ;;  %13286 = vmatprep.mubr.msk.f32.mxu0 %vm838_vm2, %v21243_v54 }
 0x279   : > { %v17676_v39 = vadd.f32 %v5154_v0, %v4883_v1  ;;  %v4886_v28 = vadd.f32 %v12947_v2, %v16736_v21  ;;  %v5164_v51 = vpop.f32.mrf.mxu0  ;;  %13092 = vmatprep.mubr.msk.f32.mxu1 %vm838_vm2, %v14330_v20  ;;  %v14331_v0 = vld [vmem:[%s14554_s25 + $0x4a0] sm:$0xff]  ;;  %v21247_v21 = vld [vmem:[#allocation125_spill] sm:$0xff] }
 0x27a   : > { %v4310_v14 = vpop.f32.mrf.mxu1 }
 0x27b   : > { %21244 = vst [vmem:[#allocation274_spill] sm:$0xff] %v17676_v39  ;;  %v17681_v46 = vadd.f32 %v13141_v19, %v4886_v28  ;;  %v4885_v12 = vadd.f32 %v4310_v14, %v16751_v17  ;;  %v13144_v44 = vpop.f32.mrf.mxu0  ;;  %13287 = vmatmul.mubr.msk.f32.gmra.mxu0 %vm838_vm2, %v21246_v34  ;;  %v14332_v28 = vld [vmem:[%s14554_s25 + $0x4b0] sm:$0xff]  ;;  %v21250_v34 = vld [vmem:[#allocation127_spill] sm:$0xff] }
 0x27c   : > { %v12950_v62 = vpop.f32.mrf.mxu1  ;;  %13093 = vmatmul.mubr.msk.f32.gmra.mxu1 %vm838_vm2, %v14331_v0  ;;  %13289 = vmatprep.mubr.msk.f32.mxu0 %vm838_vm2, %v21247_v21  ;;  %v21261_v39 = vld [vmem:[#allocation139_spill] sm:$0xff] }
 0x27d   : > { %21245 = vst [vmem:[#allocation278_spill] sm:$0xff] %v17681_v46  ;;  %v17690_v1 = vadd.f32 %v5164_v51, %v4885_v12  ;;  %v4888_v2 = vadd.f32 %v12950_v62, %v16757_v57  ;;  %v5174_v19 = vpop.f32.mrf.mxu0  ;;  %13095 = vmatprep.mubr.msk.f32.mxu1 %vm838_vm2, %v14332_v28  ;;  %v14333_v12 = vld [vmem:[%s14554_s25 + $0x4b8] sm:$0xff] }
 0x27e   : > { %v4320_v17 = vpop.f32.mrf.mxu1  ;;  %v21251_v57 = vld [vmem:[#allocation129_spill] sm:$0xff] }
 0x27f   : > { %21248 = vst [vmem:[#allocation280_spill] sm:$0xff] %v17690_v1  ;;  %v17695_v20 = vadd.f32 %v13144_v44, %v4888_v2  ;;  %v4887_v14 = vadd.f32 %v4320_v17, %v16770_v29  ;;  %v13147_v0 = vpop.f32.mrf.mxu0  ;;  %13290 = vmatmul.mubr.msk.f32.gmra.mxu0 %vm838_vm2, %v21250_v34  ;;  %v14334_v2 = vld [vmem:[%s14554_s25 + $0x4c0] sm:$0xff]  ;;  %v371_v34 = vld [vmem:[%s14554_s25 + $0x508] sm:$0xff] }
 0x280   : > { %v12953_v51 = vpop.f32.mrf.mxu1  ;;  %13096 = vmatmul.mubr.msk.f32.gmra.mxu1 %vm838_vm2, %v14333_v12  ;;  %13292 = vmatprep.mubr.msk.f32.mxu0 %vm838_vm2, %v21251_v57  ;;  %v370_v17 = vld [vmem:[%s14554_s25 + $0x500] sm:$0xff]  ;;  %v21254_v57 = vld [vmem:[#allocation131_spill] sm:$0xff] }
 0x281   : > { %21249 = vst [vmem:[#allocation284_spill] sm:$0xff] %v17695_v20  ;;  %v17704_v62 = vadd.f32 %v5174_v19, %v4887_v14  ;;  %v4890_v28 = vadd.f32 %v12953_v51, %v16777_v31  ;;  %v5184_v44 = vpop.f32.mrf.mxu0  ;;  %13098 = vmatprep.mubr.msk.f32.mxu1 %vm838_vm2, %v14334_v2  ;;  %v14335_v31 = vld [vmem:[%s14554_s25 + $0x4c8] sm:$0xff]  ;;  %v21255_v14 = vld [vmem:[#allocation133_spill] sm:$0xff] }
 0x282   : > { %v4330_v29 = vpop.f32.mrf.mxu1  ;;  %v14336_v2 = vld [vmem:[%s14554_s25 + $0x4d8] sm:$0xff] }
 0x283   : > { %21252 = vst [vmem:[#allocation286_spill] sm:$0xff] %v17704_v62  ;;  %v17711_v21 = vadd.f32 %v13147_v0, %v4890_v28  ;;  %v4889_v12 = vadd.f32 %v4330_v29, %v16792_v5  ;;  %v13150_v54 = vpop.f32.mrf.mxu0  ;;  %13293 = vmatmul.mubr.msk.f32.gmra.mxu0 %vm838_vm2, %v21254_v57  ;;  %v4998_v5 = vrot.slane %v370_v17, 1  ;;  %v4999_v29 = vrot.slane %v371_v34, 1  ;;  %v372_v57 = vld [vmem:[%s14554_s25 + $0x510] sm:$0xff]  ;;  %v373_v62 = vld [vmem:[%s14554_s25 + $0x518] sm:$0xff] }
 0x284   : > { %v12956_v19 = vpop.f32.mrf.mxu1  ;;  %13099 = vmatmul.mubr.msk.f32.gmra.mxu1 %vm838_vm2, %v14335_v31  ;;  %13295 = vmatprep.mubr.msk.f32.mxu0 %vm838_vm2, %v21255_v14 }
 0x285   : > { %21253 = vst [vmem:[#allocation290_spill] sm:$0xff] %v17711_v21  ;;  %v17720_v51 = vadd.f32 %v5184_v44, %v4889_v12  ;;  %v4892_v0 = vadd.f32 %v12956_v19, %v16798_v59  ;;  %v5194_v28 = vpop.f32.mrf.mxu0  ;;  %13101 = vmatprep.mubr.msk.f32.mxu1 %vm838_vm2, %v14336_v2  ;;  %v21258_v44 = vld [vmem:[#allocation135_spill] sm:$0xff]  ;;  %v14337_v12 = vld [vmem:[%s14554_s25 + $0x4e0] sm:$0xff]  ;;  %v21259_v19 = vld [vmem:[#allocation137_spill] sm:$0xff]  ;;  %v5001_v2 = vrot.slane %v372_v57, 1 }
 0x286   : > { %v4340_v21 = vpop.f32.mrf.mxu1 }
 0x287   : > { %21256 = vst [vmem:[#allocation292_spill] sm:$0xff] %v17720_v51  ;;  %v17727_v20 = vadd.f32 %v13150_v54, %v4892_v0  ;;  %v4891_v31 = vadd.f32 %v4340_v21, %v16810_v63  ;;  %v13153_v14 = vpop.f32.mrf.mxu0  ;;  %13296 = vmatmul.mubr.msk.f32.gmra.mxu0 %vm838_vm2, %v21258_v44  ;;  %v17742_v63 = vsel %vm549_vm1, %v4998_v5, %v4999_v29  ;;  %v5003_v21 = vrot.slane %v373_v62, 1  ;;  %v374_v44 = vld [vmem:[%s14554_s25 + $0x520] sm:$0x3] }
 0x288   : > { %v12959_v59 = vpop.f32.mrf.mxu1  ;;  %13102 = vmatmul.mubr.msk.f32.gmra.mxu1 %vm838_vm2, %v14337_v12  ;;  %13298 = vmatprep.mubr.msk.f32.mxu0 %vm838_vm2, %v21259_v19  ;;  %21260 = vst [vmem:[#allocation298_spill] sm:$0xff] %v17742_v63  ;;  %v5005_v5 = vrot.slane %v374_v44, 1 }
 0x289   : > { %21257 = vst [vmem:[#allocation296_spill] sm:$0xff] %v17727_v20  ;;  %v17736_v51 = vadd.f32 %v5194_v28, %v4891_v31  ;;  %v4894_v54 = vadd.f32 %v12959_v59, %v16818_v58  ;;  %v5204_v0 = vpop.f32.mrf.mxu0  ;;  %v14338_v20 = vld [vmem:[%s14554_s25 + $0x4e8] sm:$0xff]  ;;  %v14339_v58 = vld [vmem:[%s14554_s25 + $0x4f0] sm:$0xff] }
 0x28a   : > { %13104 = vmatprep.mubr.msk.f32.mxu1 %vm838_vm2, %v14338_v20  ;;  %v4350_v1 = vpop.f32.mrf.mxu1  ;;  %v17755_v20 = vsel %vm549_vm1, %v4999_v29, %v5001_v2 }
 0x28b   : > { %v17745_v12 = vadd.f32 %v13153_v14, %v4894_v54  ;;  %v4893_v19 = vadd.f32 %v4350_v1, %v16830_v40  ;;  %v13156_v46 = vpop.f32.mrf.mxu0  ;;  %13299 = vmatmul.mubr.msk.f32.gmra.mxu0 %vm838_vm2, %v21261_v39  ;;  %21262 = vst [vmem:[#allocation302_spill] sm:$0xff] %v17755_v20  ;;  %v17762_v1 = vsel %vm549_vm1, %v5001_v2, %v5003_v21  ;;  %v14355_v39 = vld [vmem:[%s14554_s25 + $0xe0] sm:$0xff] }
 0x28c   : > { %v12962_v28 = vpop.f32.mrf.mxu1  ;;  %13105 = vmatmul.mubr.msk.f32.gmra.mxu1 %vm838_vm2, %v14339_v58  ;;  %13301 = vmatprep.mubr.msk.f32.mxu0 %vm838_vm2, %v17742_v63  ;;  %21263 = vst [vmem:[#allocation304_spill] sm:$0xff] %v17762_v1 }
 0x28d   : > { %v17757_v31 = vadd.f32 %v5204_v0, %v4893_v19  ;;  %v4896_v14 = vadd.f32 %v12962_v28, %v16837_v35  ;;  %v5214_v40 = vpop.f32.mrf.mxu0  ;;  %13107 = vmatprep.mubr.msk.f32.mxu1 %vm838_vm2, %v370_v17  ;;  %v17773_v35 = vsel %vm549_vm1, %v5003_v21, %v5005_v5  ;;  %v14340_v21 = vld [vmem:[%s14554_s25 + $0x50] sm:$0xff] }
 0x28e   : > { %v4360_v59 = vpop.f32.mrf.mxu1  ;;  %21264 = vst [vmem:[#allocation308_spill] sm:$0xff] %v17773_v35 }
 0x28f   : > { %v17764_v54 = vadd.f32 %v13156_v46, %v4896_v14  ;;  %v4895_v58 = vadd.f32 %v4360_v59, %v16848_v6  ;;  %v13159_v63 = vpop.f32.mrf.mxu0  ;;  %13302 = vmatmul.mubr.msk.f32.gmra.mxu0 %vm838_vm2, %v17755_v20  ;;  %v14341_v59 = vld [vmem:[%s14554_s25 + $0x58] sm:$0xff] }
 0x290   : > { %v12965_v29 = vpop.f32.mrf.mxu1  ;;  %13108 = vmatmul.mubr.msk.f32.gmra.mxu1 %vm838_vm2, %v371_v34  ;;  %13304 = vmatprep.mubr.msk.f32.mxu0 %vm838_vm2, %v17762_v1 }
 0x291   : > { %v17775_v17 = vadd.f32 %v5214_v40, %v4895_v58  ;;  %v4898_v46 = vadd.f32 %v12965_v29, %v16852_v36  ;;  %v5224_v44 = vpop.f32.mrf.mxu0  ;;  %13110 = vmatprep.mubr.msk.f32.mxu1 %vm838_vm2, %v372_v57  ;;  %v21266_v58 = vld [vmem:[#allocation141_spill] sm:$0xff] }
 0x292   : > { %v4370_v6 = vpop.f32.mrf.mxu1 }
 0x293   : > { %v17779_v19 = vadd.f32 %v13159_v63, %v4898_v46  ;;  %v4897_v2 = vadd.f32 %v4370_v6, %v16860_v38  ;;  %v13162_v34 = vpop.f32.mrf.mxu0  ;;  %13305 = vmatmul.mubr.msk.f32.gmra.mxu0 %vm838_vm2, %v17773_v35  ;;  %v21265_v63 = vld [vmem:[#allocation140_spill] sm:$0xff]  ;;  %v21267_v46 = vld [vmem:[#allocation142_spill] sm:$0xff] }
 0x294   : > { %v12968_v0 = vpop.f32.mrf.mxu1  ;;  %13111 = vmatmul.mubr.msk.f32.gmra.mxu1 %vm838_vm2, %v373_v62  ;;  %13503 = vmatprep.mubr.msk.f32.mxu0 %vm838_vm2, %v14340_v21  ;;  %v14342_v6 = vld [vmem:[%s14554_s25 + $0x60] sm:$0xff]  ;;  %v21268_v21 = vld [vmem:[#allocation143_spill] sm:$0xff]  ;;  %v14353_v35 = vld [vmem:[%s14554_s25 + $0xd0] sm:$0xff] }
 0x295   : > { %v17787_v36 = vadd.f32 %v5224_v44, %v4897_v2  ;;  %v4900_v57 = vadd.f32 %v12968_v0, %v16865_v4  ;;  %v5234_v28 = vpop.f32.mrf.mxu0  ;;  %13309 = vmatprep.mubr.msk.f32.mxu1 %vm838_vm2, %v21265_v63  ;;  %v14343_v0 = vld [vmem:[%s14554_s25 + $0x68] sm:$0xff] }
 0x296   : > { %v4380_v38 = vpop.f32.mrf.mxu1 }
 0x297   : > { %v17792_v5 = vadd.f32 %v13162_v34, %v4900_v57  ;;  %v4899_v14 = vadd.f32 %v4380_v38, %v16874_v53  ;;  %v13165_v40 = vpop.f32.mrf.mxu0  ;;  %13504 = vmatmul.mubr.msk.f32.vlgmr.msra.gmra.mxu0 %vm838_vm2, %v14341_v59  ;;  %v21269_v38 = vld [vmem:[#allocation144_spill] sm:$0xff] }
 0x298   : > { %v12971_v62 = vpop.f32.mrf.mxu1  ;;  %13310 = vmatmul.mubr.msk.f32.vlgmr.msra.gmra.mxu1 %vm838_vm2, %v21266_v58  ;;  %13890 = vmatpush3.msk.msra.mxu0 %vm1095_vm0, %v17346_v48 }
 0x299   : > { %v17801_v4 = vadd.f32 %v5234_v28, %v4899_v14  ;;  %v4902_v29 = vadd.f32 %v12971_v62, %v16883_v23  ;;  %13696 = vmatpush3.msk.msra.mxu1 %vm1095_vm0, %v17334_v56  ;;  %v5244_v53 = vpop.f32.mrf.mxu0  ;;  %13312 = vmatprep.mubr.msk.f32.mxu1 %vm838_vm2, %v21267_v46  ;;  %v14344_v56 = vld [vmem:[%s14554_s25 + $0x78] sm:$0xff]  ;;  %v14345_v62 = vld [vmem:[%s14554_s25 + $0x80] sm:$0xff] }
 0x29a   : > { %v4390_v44 = vpop.f32.mrf.mxu1  ;;  %13506 = vmatprep.mubr.msk.f32.mxu0 %vm838_vm2, %v14342_v6  ;;  %v21271_v6 = vld [vmem:[#allocation146_spill] sm:$0xff] }
 0x29b   : > { %v17810_v2 = vadd.f32 %v13165_v40, %v4902_v29  ;;  %v4901_v48 = vadd.f32 %v4390_v44, %v16892_v49  ;;  %v13168_v34 = vpop.f32.mrf.mxu0  ;;  %13507 = vmatmul.mubr.msk.f32.gmra.mxu0 %vm838_vm2, %v14343_v0  ;;  %v21270_v29 = vld [vmem:[#allocation145_spill] sm:$0xff] }
 0x29c   : > { %v12974_v23 = vpop.f32.mrf.mxu1  ;;  %13313 = vmatmul.mubr.msk.f32.gmra.mxu1 %vm838_vm2, %v21268_v21  ;;  %13509 = vmatprep.mubr.msk.f32.mxu0 %vm838_vm2, %v14344_v56  ;;  %v21272_v56 = vld [vmem:[#allocation147_spill] sm:$0xff] }
 0x29d   : > { %v17819_v57 = vadd.f32 %v5244_v53, %v4901_v48  ;;  %v4904_v28 = vadd.f32 %v12974_v23, %v16897_v16  ;;  %v5254_v63 = vpop.f32.mrf.mxu0  ;;  %13315 = vmatprep.mubr.msk.f32.mxu1 %vm838_vm2, %v21269_v38  ;;  %v14346_v16 = vld [vmem:[%s14554_s25 + $0x88] sm:$0xff]  ;;  %v14347_v23 = vld [vmem:[%s14554_s25 + $0x90] sm:$0xff] }
 0x29e   : > { %v4400_v49 = vpop.f32.mrf.mxu1 }
 0x29f   : > { %v17824_v14 = vadd.f32 %v13168_v34, %v4904_v28  ;;  %v4903_v40 = vadd.f32 %v4400_v49, %v16906_v18  ;;  %v13171_v59 = vpop.f32.mrf.mxu0  ;;  %13510 = vmatmul.mubr.msk.f32.gmra.mxu0 %vm838_vm2, %v14345_v62 }
 0x2a0   : > { %v12977_v58 = vpop.f32.mrf.mxu1  ;;  %13316 = vmatmul.mubr.msk.f32.gmra.mxu1 %vm838_vm2, %v21270_v29  ;;  %13512 = vmatprep.mubr.msk.f32.mxu0 %vm838_vm2, %v14346_v16  ;;  %v14349_v16 = vld [vmem:[%s14554_s25 + $0xa8] sm:$0xff] }
 0x2a1   : > { %v17833_v53 = vadd.f32 %v5254_v63, %v4903_v40  ;;  %v4906_v46 = vadd.f32 %v12977_v58, %v16911_v52  ;;  %v5264_v44 = vpop.f32.mrf.mxu0  ;;  %13318 = vmatprep.mubr.msk.f32.mxu1 %vm838_vm2, %v21271_v6  ;;  %v14348_v52 = vld [vmem:[%s14554_s25 + $0xa0] sm:$0xff]  ;;  %v21273_v40 = vld [vmem:[#allocation148_spill] sm:$0xff] }
 0x2a2   : > { %v4410_v18 = vpop.f32.mrf.mxu1 }
 0x2a3   : > { %v17838_v48 = vadd.f32 %v13171_v59, %v4906_v46  ;;  %v4905_v34 = vadd.f32 %v4410_v18, %v16920_v27  ;;  %v13174_v0 = vpop.f32.mrf.mxu0  ;;  %13513 = vmatmul.mubr.msk.f32.gmra.mxu0 %vm838_vm2, %v14347_v23  ;;  %v21274_v18 = vld [vmem:[#allocation149_spill] sm:$0xff]  ;;  %v21275_v23 = vld [vmem:[#allocation150_spill] sm:$0xff] }
 0x2a4   : > { %v12980_v21 = vpop.f32.mrf.mxu1  ;;  %13319 = vmatmul.mubr.msk.f32.gmra.mxu1 %vm838_vm2, %v21272_v56  ;;  %13515 = vmatprep.mubr.msk.f32.mxu0 %vm838_vm2, %v14348_v52 }
 0x2a5   : > { %v17847_v28 = vadd.f32 %v5264_v44, %v4905_v34  ;;  %v4908_v63 = vadd.f32 %v12980_v21, %v16925_v41  ;;  %v5274_v49 = vpop.f32.mrf.mxu0  ;;  %13321 = vmatprep.mubr.msk.f32.mxu1 %vm838_vm2, %v21273_v40  ;;  %v14350_v41 = vld [vmem:[%s14554_s25 + $0xb0] sm:$0xff] }
 0x2a6   : > { %v4420_v27 = vpop.f32.mrf.mxu1 }
 0x2a7   : > { %v17852_v59 = vadd.f32 %v13174_v0, %v4908_v63  ;;  %v4907_v62 = vadd.f32 %v4420_v27, %v16934_v42  ;;  %v13177_v58 = vpop.f32.mrf.mxu0  ;;  %13516 = vmatmul.mubr.msk.f32.gmra.mxu0 %vm838_vm2, %v14349_v16  ;;  %v14351_v27 = vld [vmem:[%s14554_s25 + $0xb8] sm:$0xff] }
 0x2a8   : > { %v12983_v46 = vpop.f32.mrf.mxu1  ;;  %13322 = vmatmul.mubr.msk.f32.gmra.mxu1 %vm838_vm2, %v21274_v18  ;;  %13518 = vmatprep.mubr.msk.f32.mxu0 %vm838_vm2, %v14350_v41  ;;  %v21276_v41 = vld [vmem:[#allocation151_spill] sm:$0xff] }
 0x2a9   : > { %v17861_v44 = vadd.f32 %v5274_v49, %v4907_v62  ;;  %v4910_v34 = vadd.f32 %v12983_v46, %v16939_v45  ;;  %v5284_v0 = vpop.f32.mrf.mxu0  ;;  %13324 = vmatprep.mubr.msk.f32.mxu1 %vm838_vm2, %v21275_v23  ;;  %v14352_v45 = vld [vmem:[%s14554_s25 + $0xc8] sm:$0xff]  ;;  %v21278_v46 = vld [vmem:[#allocation152_spill] sm:$0xff] }
 0x2aa   : > { %v4430_v42 = vpop.f32.mrf.mxu1 }
 0x2ab   : > { %v17866_v21 = vadd.f32 %v13177_v58, %v4910_v34  ;;  %v4909_v52 = vadd.f32 %v4430_v42, %v16948_v25  ;;  %v13180_v63 = vpop.f32.mrf.mxu0  ;;  %13519 = vmatmul.mubr.msk.f32.gmra.mxu0 %vm838_vm2, %v14351_v27 }
 0x2ac   : > { %v12986_v16 = vpop.f32.mrf.mxu1  ;;  %13325 = vmatmul.mubr.msk.f32.gmra.mxu1 %vm838_vm2, %v21276_v41  ;;  %13521 = vmatprep.mubr.msk.f32.mxu0 %vm838_vm2, %v14352_v45  ;;  %v21280_v45 = vld [vmem:[#allocation153_spill] sm:$0xff] }
 0x2ad   : > { %v17875_v49 = vadd.f32 %v5284_v0, %v4909_v52  ;;  %v4912_v62 = vadd.f32 %v12986_v16, %v16953_v7  ;;  %v5294_v58 = vpop.f32.mrf.mxu0  ;;  %13327 = vmatprep.mubr.msk.f32.mxu1 %vm838_vm2, %v21278_v46  ;;  %v14354_v7 = vld [vmem:[%s14554_s25 + $0xd8] sm:$0xff]  ;;  %v21282_v16 = vld [vmem:[#allocation154_spill] sm:$0xff] }
 0x2ae   : > { %v4440_v25 = vpop.f32.mrf.mxu1 }
 0x2af   : > { %21277 = vst [vmem:[#allocation140_spill] sm:$0xff] %v17875_v49  ;;  %v17880_v34 = vadd.f32 %v13180_v63, %v4912_v62  ;;  %v4911_v42 = vadd.f32 %v4440_v25, %v16962_v13  ;;  %v13183_v27 = vpop.f32.mrf.mxu0  ;;  %13522 = vmatmul.mubr.msk.f32.gmra.mxu0 %vm838_vm2, %v14353_v35  ;;  %v21284_v35 = vld [vmem:[#allocation6_spill] sm:$0xff]  ;;  %v14357_v49 = vld [vmem:[%s14554_s25 + $0xf8] sm:$0xff] }
 0x2b0   : > { %v12989_v1 = vpop.f32.mrf.mxu1  ;;  %13328 = vmatmul.mubr.msk.f32.gmra.mxu1 %vm838_vm2, %v21280_v45  ;;  %13524 = vmatprep.mubr.msk.f32.mxu0 %vm838_vm2, %v14354_v7  ;;  %v21285_v7 = vld [vmem:[#allocation155_spill] sm:$0xff] }
 0x2b1   : > { %21279 = vst [vmem:[#allocation141_spill] sm:$0xff] %v17880_v34  ;;  %v17889_v0 = vadd.f32 %v5294_v58, %v4911_v42  ;;  %v4914_v52 = vadd.f32 %v12989_v1, %v16967_v11  ;;  %v5304_v63 = vpop.f32.mrf.mxu0  ;;  %13330 = vmatprep.mubr.msk.f32.mxu1 %vm838_vm2, %v21282_v16  ;;  %v14356_v11 = vld [vmem:[%s14554_s25 + $0xf0] sm:$0xff] }
 0x2b2   : > { %v4450_v13 = vpop.f32.mrf.mxu1  ;;  %v21287_v58 = vld [vmem:[#allocation8_spill] sm:$0xff] }
 0x2b3   : > { %21281 = vst [vmem:[#allocation142_spill] sm:$0xff] %v17889_v0  ;;  %v17894_v62 = vadd.f32 %v13183_v27, %v4914_v52  ;;  %v4913_v25 = vadd.f32 %v4450_v13, %v21284_v35  ;;  %v13186_v20 = vpop.f32.mrf.mxu0  ;;  %13525 = vmatmul.mubr.msk.f32.gmra.mxu0 %vm838_vm2, %v14355_v39  ;;  %v21288_v52 = vld [vmem:[#allocation156_spill] sm:$0xff]  ;;  %v21290_v39 = vld [vmem:[#allocation10_spill] sm:$0xff] }
 0x2b4   : > { %v12992_v34 = vpop.f32.mrf.mxu1  ;;  %13331 = vmatmul.mubr.msk.f32.gmra.mxu1 %vm838_vm2, %v21285_v7  ;;  %13527 = vmatprep.mubr.msk.f32.mxu0 %vm838_vm2, %v14356_v11  ;;  %v21291_v11 = vld [vmem:[#allocation157_spill] sm:$0xff] }
 0x2b5   : > { %21283 = vst [vmem:[#allocation143_spill] sm:$0xff] %v17894_v62  ;;  %v17903_v1 = vadd.f32 %v5304_v63, %v4913_v25  ;;  %v4916_v42 = vadd.f32 %v12992_v34, %v21287_v58  ;;  %v5314_v27 = vpop.f32.mrf.mxu0  ;;  %13333 = vmatprep.mubr.msk.f32.mxu1 %vm838_vm2, %v21288_v52  ;;  %v14358_v34 = vld [vmem:[%s14554_s25 + $0x100] sm:$0xff]  ;;  %v21293_v25 = vld [vmem:[#allocation12_spill] sm:$0xff]  ;;  %v14359_v52 = vld [vmem:[%s14554_s25 + $0x108] sm:$0xff] }
 0x2b6   : > { %v4460_v13 = vpop.f32.mrf.mxu1 }
 0x2b7   : > { %21286 = vst [vmem:[#allocation144_spill] sm:$0xff] %v17903_v1  ;;  %v17908_v35 = vadd.f32 %v13186_v20, %v4916_v42  ;;  %v4915_v62 = vadd.f32 %v4460_v13, %v21290_v39  ;;  %v13189_v0 = vpop.f32.mrf.mxu0  ;;  %13528 = vmatmul.mubr.msk.f32.gmra.mxu0 %vm838_vm2, %v14357_v49  ;;  %v21294_v42 = vld [vmem:[#allocation158_spill] sm:$0xff]  ;;  %v21296_v49 = vld [vmem:[#allocation237_spill] sm:$0xff] }
 0x2b8   : > { %v12995_v7 = vpop.f32.mrf.mxu1  ;;  %13334 = vmatmul.mubr.msk.f32.gmra.mxu1 %vm838_vm2, %v21291_v11  ;;  %13530 = vmatprep.mubr.msk.f32.mxu0 %vm838_vm2, %v14358_v34  ;;  %v21297_v34 = vld [vmem:[#allocation159_spill] sm:$0xff] }
 0x2b9   : > { %21289 = vst [vmem:[#allocation145_spill] sm:$0xff] %v17908_v35  ;;  %v17917_v63 = vadd.f32 %v5314_v27, %v4915_v62  ;;  %v4918_v20 = vadd.f32 %v12995_v7, %v21293_v25  ;;  %v5324_v58 = vpop.f32.mrf.mxu0  ;;  %13336 = vmatprep.mubr.msk.f32.mxu1 %vm838_vm2, %v21294_v42  ;;  %v14360_v62 = vld [vmem:[%s14554_s25 + $0x118] sm:$0xff]  ;;  %v21299_v27 = vld [vmem:[#allocation240_spill] sm:$0xff]  ;;  %v14361_v42 = vld [vmem:[%s14554_s25 + $0x120] sm:$0xff] }
 0x2ba   : > { %v4470_v13 = vpop.f32.mrf.mxu1 }
 0x2bb   : > { %21292 = vst [vmem:[#allocation146_spill] sm:$0xff] %v17917_v63  ;;  %v17922_v39 = vadd.f32 %v13189_v0, %v4918_v20  ;;  %v4917_v35 = vadd.f32 %v4470_v13, %v21296_v49  ;;  %v13192_v1 = vpop.f32.mrf.mxu0  ;;  %13531 = vmatmul.mubr.msk.f32.gmra.mxu0 %vm838_vm2, %v14359_v52  ;;  %v21300_v20 = vld [vmem:[#allocation160_spill] sm:$0xff]  ;;  %v21302_v52 = vld [vmem:[#allocation243_spill] sm:$0xff] }
 0x2bc   : > { %v12998_v11 = vpop.f32.mrf.mxu1  ;;  %13337 = vmatmul.mubr.msk.f32.gmra.mxu1 %vm838_vm2, %v21297_v34  ;;  %13533 = vmatprep.mubr.msk.f32.mxu0 %vm838_vm2, %v14360_v62  ;;  %v21303_v62 = vld [vmem:[#allocation161_spill] sm:$0xff] }
 0x2bd   : > { %21295 = vst [vmem:[#allocation147_spill] sm:$0xff] %v17922_v39  ;;  %v17931_v7 = vadd.f32 %v5324_v58, %v4917_v35  ;;  %v4920_v0 = vadd.f32 %v12998_v11, %v21299_v27  ;;  %v5334_v25 = vpop.f32.mrf.mxu0  ;;  %13339 = vmatprep.mubr.msk.f32.mxu1 %vm838_vm2, %v21300_v20  ;;  %v14362_v35 = vld [vmem:[%s14554_s25 + $0x128] sm:$0xff]  ;;  %v21305_v58 = vld [vmem:[#allocation246_spill] sm:$0xff]  ;;  %v14363_v20 = vld [vmem:[%s14554_s25 + $0x130] sm:$0xff] }
 0x2be   : > { %v4480_v13 = vpop.f32.mrf.mxu1 }
 0x2bf   : > { %21298 = vst [vmem:[#allocation148_spill] sm:$0xff] %v17931_v7  ;;  %v17936_v49 = vadd.f32 %v13192_v1, %v4920_v0  ;;  %v4919_v39 = vadd.f32 %v4480_v13, %v21302_v52  ;;  %v13195_v63 = vpop.f32.mrf.mxu0  ;;  %13534 = vmatmul.mubr.msk.f32.gmra.mxu0 %vm838_vm2, %v14361_v42  ;;  %v21306_v0 = vld [vmem:[#allocation162_spill] sm:$0xff]  ;;  %v21308_v42 = vld [vmem:[#allocation249_spill] sm:$0xff] }
 0x2c0   : > { %v13001_v34 = vpop.f32.mrf.mxu1  ;;  %13340 = vmatmul.mubr.msk.f32.gmra.mxu1 %vm838_vm2, %v21303_v62  ;;  %13536 = vmatprep.mubr.msk.f32.mxu0 %vm838_vm2, %v14362_v35  ;;  %v21309_v35 = vld [vmem:[#allocation163_spill] sm:$0xff] }
 0x2c1   : > { %21301 = vst [vmem:[#allocation149_spill] sm:$0xff] %v17936_v49  ;;  %v17945_v11 = vadd.f32 %v5334_v25, %v4919_v39  ;;  %v4922_v1 = vadd.f32 %v13001_v34, %v21305_v58  ;;  %v5344_v27 = vpop.f32.mrf.mxu0  ;;  %13342 = vmatprep.mubr.msk.f32.mxu1 %vm838_vm2, %v21306_v0  ;;  %v14364_v39 = vld [vmem:[%s14554_s25 + $0x140] sm:$0xff]  ;;  %v21311_v25 = vld [vmem:[#allocation252_spill] sm:$0xff]  ;;  %v14365_v0 = vld [vmem:[%s14554_s25 + $0x148] sm:$0xff] }
 0x2c2   : > { %v4490_v13 = vpop.f32.mrf.mxu1 }
 0x2c3   : > { %21304 = vst [vmem:[#allocation150_spill] sm:$0xff] %v17945_v11  ;;  %v17950_v52 = vadd.f32 %v13195_v63, %v4922_v1  ;;  %v4921_v49 = vadd.f32 %v4490_v13, %v21308_v42  ;;  %v13198_v7 = vpop.f32.mrf.mxu0  ;;  %13537 = vmatmul.mubr.msk.f32.gmra.mxu0 %vm838_vm2, %v14363_v20  ;;  %v21312_v1 = vld [vmem:[#allocation164_spill] sm:$0xff]  ;;  %v21314_v20 = vld [vmem:[#allocation255_spill] sm:$0xff] }
 0x2c4   : > { %v13004_v62 = vpop.f32.mrf.mxu1  ;;  %13343 = vmatmul.mubr.msk.f32.gmra.mxu1 %vm838_vm2, %v21309_v35  ;;  %13539 = vmatprep.mubr.msk.f32.mxu0 %vm838_vm2, %v14364_v39  ;;  %v21315_v39 = vld [vmem:[#allocation165_spill] sm:$0xff] }
 0x2c5   : > { %21307 = vst [vmem:[#allocation151_spill] sm:$0xff] %v17950_v52  ;;  %v17959_v34 = vadd.f32 %v5344_v27, %v4921_v49  ;;  %v4924_v63 = vadd.f32 %v13004_v62, %v21311_v25  ;;  %v5354_v58 = vpop.f32.mrf.mxu0  ;;  %13345 = vmatprep.mubr.msk.f32.mxu1 %vm838_vm2, %v21312_v1  ;;  %v14366_v49 = vld [vmem:[%s14554_s25 + $0x150] sm:$0xff]  ;;  %v21317_v27 = vld [vmem:[#allocation258_spill] sm:$0xff]  ;;  %v14367_v1 = vld [vmem:[%s14554_s25 + $0x158] sm:$0xff] }
 0x2c6   : > { %v4500_v13 = vpop.f32.mrf.mxu1 }
 0x2c7   : > { %21310 = vst [vmem:[#allocation152_spill] sm:$0xff] %v17959_v34  ;;  %v17964_v42 = vadd.f32 %v13198_v7, %v4924_v63  ;;  %v4923_v52 = vadd.f32 %v4500_v13, %v21314_v20  ;;  %v13201_v11 = vpop.f32.mrf.mxu0  ;;  %13540 = vmatmul.mubr.msk.f32.gmra.mxu0 %vm838_vm2, %v14365_v0  ;;  %v21318_v63 = vld [vmem:[#allocation166_spill] sm:$0xff]  ;;  %v21320_v0 = vld [vmem:[#allocation261_spill] sm:$0xff] }
 0x2c8   : > { %v13007_v35 = vpop.f32.mrf.mxu1  ;;  %13346 = vmatmul.mubr.msk.f32.gmra.mxu1 %vm838_vm2, %v21315_v39  ;;  %13542 = vmatprep.mubr.msk.f32.mxu0 %vm838_vm2, %v14366_v49  ;;  %v21321_v49 = vld [vmem:[#allocation167_spill] sm:$0xff] }
 0x2c9   : > { %21313 = vst [vmem:[#allocation153_spill] sm:$0xff] %v17964_v42  ;;  %v17973_v62 = vadd.f32 %v5354_v58, %v4923_v52  ;;  %v4926_v7 = vadd.f32 %v13007_v35, %v21317_v27  ;;  %v5364_v25 = vpop.f32.mrf.mxu0  ;;  %13348 = vmatprep.mubr.msk.f32.mxu1 %vm838_vm2, %v21318_v63  ;;  %v14368_v52 = vld [vmem:[%s14554_s25 + $0x168] sm:$0xff]  ;;  %v21323_v58 = vld [vmem:[#allocation264_spill] sm:$0xff] }
 0x2ca   : > { %v4510_v13 = vpop.f32.mrf.mxu1  ;;  %v14369_v63 = vld [vmem:[%s14554_s25 + $0x170] sm:$0xff] }
 0x2cb   : > { %21316 = vst [vmem:[#allocation154_spill] sm:$0xff] %v17973_v62  ;;  %v17978_v20 = vadd.f32 %v13201_v11, %v4926_v7  ;;  %v4925_v42 = vadd.f32 %v4510_v13, %v21320_v0  ;;  %v13204_v34 = vpop.f32.mrf.mxu0  ;;  %13543 = vmatmul.mubr.msk.f32.gmra.mxu0 %vm838_vm2, %v14367_v1  ;;  %v21324_v7 = vld [vmem:[#allocation168_spill] sm:$0xff]  ;;  %v21326_v1 = vld [vmem:[#allocation267_spill] sm:$0xff] }
 0x2cc   : > { %v13010_v39 = vpop.f32.mrf.mxu1  ;;  %13349 = vmatmul.mubr.msk.f32.gmra.mxu1 %vm838_vm2, %v21321_v49  ;;  %13545 = vmatprep.mubr.msk.f32.mxu0 %vm838_vm2, %v14368_v52  ;;  %v21327_v52 = vld [vmem:[#allocation169_spill] sm:$0xff] }
 0x2cd   : > { %21319 = vst [vmem:[#allocation6_spill] sm:$0xff] %v17978_v20  ;;  %v17987_v35 = vadd.f32 %v5364_v25, %v4925_v42  ;;  %v4928_v11 = vadd.f32 %v13010_v39, %v21323_v58  ;;  %v5374_v27 = vpop.f32.mrf.mxu0  ;;  %13351 = vmatprep.mubr.msk.f32.mxu1 %vm838_vm2, %v21324_v7  ;;  %v14370_v42 = vld [vmem:[%s14554_s25 + $0x178] sm:$0xff]  ;;  %v21329_v25 = vld [vmem:[#allocation270_spill] sm:$0xff] }
 0x2ce   : > { %v4520_v13 = vpop.f32.mrf.mxu1  ;;  %v14371_v7 = vld [vmem:[%s14554_s25 + $0x180] sm:$0xff] }
 0x2cf   : > { %21322 = vst [vmem:[#allocation8_spill] sm:$0xff] %v17987_v35  ;;  %v17992_v0 = vadd.f32 %v13204_v34, %v4928_v11  ;;  %v4927_v20 = vadd.f32 %v4520_v13, %v21326_v1  ;;  %v13207_v62 = vpop.f32.mrf.mxu0  ;;  %13546 = vmatmul.mubr.msk.f32.gmra.mxu0 %vm838_vm2, %v14369_v63  ;;  %v21330_v11 = vld [vmem:[#allocation170_spill] sm:$0xff]  ;;  %v21332_v63 = vld [vmem:[#allocation273_spill] sm:$0xff] }
 0x2d0   : > { %v13013_v49 = vpop.f32.mrf.mxu1  ;;  %13352 = vmatmul.mubr.msk.f32.gmra.mxu1 %vm838_vm2, %v21327_v52  ;;  %13548 = vmatprep.mubr.msk.f32.mxu0 %vm838_vm2, %v14370_v42  ;;  %v21333_v42 = vld [vmem:[#allocation172_spill] sm:$0xff] }
 0x2d1   : > { %21325 = vst [vmem:[#allocation10_spill] sm:$0xff] %v17992_v0  ;;  %v18001_v39 = vadd.f32 %v5374_v27, %v4927_v20  ;;  %v4930_v34 = vadd.f32 %v13013_v49, %v21329_v25  ;;  %v5384_v58 = vpop.f32.mrf.mxu0  ;;  %13354 = vmatprep.mubr.msk.f32.mxu1 %vm838_vm2, %v21330_v11  ;;  %v14372_v20 = vld [vmem:[%s14554_s25 + $0x190] sm:$0xff]  ;;  %v14373_v11 = vld [vmem:[%s14554_s25 + $0x198] sm:$0xff] }
 0x2d2   : > { %v4530_v13 = vpop.f32.mrf.mxu1  ;;  %v21335_v27 = vld [vmem:[#allocation276_spill] sm:$0xff] }
 0x2d3   : > { %21328 = vst [vmem:[#allocation12_spill] sm:$0xff] %v18001_v39  ;;  %v18006_v1 = vadd.f32 %v13207_v62, %v4930_v34  ;;  %v4929_v0 = vadd.f32 %v4530_v13, %v21332_v63  ;;  %v13210_v35 = vpop.f32.mrf.mxu0  ;;  %13549 = vmatmul.mubr.msk.f32.gmra.mxu0 %vm838_vm2, %v14371_v7  ;;  %v21336_v34 = vld [vmem:[#allocation173_spill] sm:$0xff]  ;;  %v21338_v7 = vld [vmem:[#allocation279_spill] sm:$0xff] }
 0x2d4   : > { %v13016_v52 = vpop.f32.mrf.mxu1  ;;  %13355 = vmatmul.mubr.msk.f32.gmra.mxu1 %vm838_vm2, %v21333_v42  ;;  %13551 = vmatprep.mubr.msk.f32.mxu0 %vm838_vm2, %v14372_v20  ;;  %v21339_v20 = vld [vmem:[#allocation176_spill] sm:$0xff] }
 0x2d5   : > { %21331 = vst [vmem:[#allocation237_spill] sm:$0xff] %v18006_v1  ;;  %v18015_v49 = vadd.f32 %v5384_v58, %v4929_v0  ;;  %v4932_v62 = vadd.f32 %v13016_v52, %v21335_v27  ;;  %v5394_v25 = vpop.f32.mrf.mxu0  ;;  %13357 = vmatprep.mubr.msk.f32.mxu1 %vm838_vm2, %v21336_v34  ;;  %v14374_v0 = vld [vmem:[%s14554_s25 + $0x1a0] sm:$0xff]  ;;  %v14375_v34 = vld [vmem:[%s14554_s25 + $0x1a8] sm:$0xff] }
 0x2d6   : > { %v4540_v13 = vpop.f32.mrf.mxu1  ;;  %v21341_v58 = vld [vmem:[#allocation282_spill] sm:$0xff] }
 0x2d7   : > { %21334 = vst [vmem:[#allocation240_spill] sm:$0xff] %v18015_v49  ;;  %v18020_v63 = vadd.f32 %v13210_v35, %v4932_v62  ;;  %v4931_v1 = vadd.f32 %v4540_v13, %v21338_v7  ;;  %v13213_v39 = vpop.f32.mrf.mxu0  ;;  %13552 = vmatmul.mubr.msk.f32.gmra.mxu0 %vm838_vm2, %v14373_v11  ;;  %v21342_v62 = vld [vmem:[#allocation177_spill] sm:$0xff] }
 0x2d8   : > { %v13019_v42 = vpop.f32.mrf.mxu1  ;;  %13358 = vmatmul.mubr.msk.f32.gmra.mxu1 %vm838_vm2, %v21339_v20  ;;  %13554 = vmatprep.mubr.msk.f32.mxu0 %vm838_vm2, %v14374_v0  ;;  %v21344_v11 = vld [vmem:[#allocation285_spill] sm:$0xff]  ;;  %v21345_v0 = vld [vmem:[#allocation180_spill] sm:$0xff] }
 0x2d9   : > { %21337 = vst [vmem:[#allocation243_spill] sm:$0xff] %v18020_v63  ;;  %v18029_v52 = vadd.f32 %v5394_v25, %v4931_v1  ;;  %v4934_v35 = vadd.f32 %v13019_v42, %v21341_v58  ;;  %v5404_v27 = vpop.f32.mrf.mxu0  ;;  %13360 = vmatprep.mubr.msk.f32.mxu1 %vm838_vm2, %v21342_v62  ;;  %v14376_v1 = vld [vmem:[%s14554_s25 + $0x1b8] sm:$0xff]  ;;  %v21347_v25 = vld [vmem:[#allocation288_spill] sm:$0xff]  ;;  %v14377_v62 = vld [vmem:[%s14554_s25 + $0x1c0] sm:$0xff] }
 0x2da   : > { %v4550_v13 = vpop.f32.mrf.mxu1 }
 0x2db   : > { %21340 = vst [vmem:[#allocation246_spill] sm:$0xff] %v18029_v52  ;;  %v18034_v7 = vadd.f32 %v13213_v39, %v4934_v35  ;;  %v4933_v63 = vadd.f32 %v4550_v13, %v21344_v11  ;;  %v13216_v49 = vpop.f32.mrf.mxu0  ;;  %13555 = vmatmul.mubr.msk.f32.gmra.mxu0 %vm838_vm2, %v14375_v34  ;;  %v21348_v35 = vld [vmem:[#allocation181_spill] sm:$0xff]  ;;  %v21350_v34 = vld [vmem:[#allocation291_spill] sm:$0xff] }
 0x2dc   : > { %v13022_v20 = vpop.f32.mrf.mxu1  ;;  %13361 = vmatmul.mubr.msk.f32.gmra.mxu1 %vm838_vm2, %v21345_v0  ;;  %13557 = vmatprep.mubr.msk.f32.mxu0 %vm838_vm2, %v14376_v1  ;;  %v21351_v1 = vld [vmem:[#allocation184_spill] sm:$0xff] }
 0x2dd   : > { %21343 = vst [vmem:[#allocation249_spill] sm:$0xff] %v18034_v7  ;;  %v18043_v42 = vadd.f32 %v5404_v27, %v4933_v63  ;;  %v4936_v39 = vadd.f32 %v13022_v20, %v21347_v25  ;;  %v5414_v58 = vpop.f32.mrf.mxu0  ;;  %13363 = vmatprep.mubr.msk.f32.mxu1 %vm838_vm2, %v21348_v35  ;;  %v14378_v63 = vld [vmem:[%s14554_s25 + $0x1c8] sm:$0xff]  ;;  %v21353_v27 = vld [vmem:[#allocation294_spill] sm:$0xff]  ;;  %v14379_v35 = vld [vmem:[%s14554_s25 + $0x1d0] sm:$0xff] }
 0x2de   : > { %v4560_v13 = vpop.f32.mrf.mxu1 }
 0x2df   : > { %21346 = vst [vmem:[#allocation252_spill] sm:$0xff] %v18043_v42  ;;  %v18048_v11 = vadd.f32 %v13216_v49, %v4936_v39  ;;  %v4935_v7 = vadd.f32 %v4560_v13, %v21350_v34  ;;  %v13219_v52 = vpop.f32.mrf.mxu0  ;;  %13558 = vmatmul.mubr.msk.f32.gmra.mxu0 %vm838_vm2, %v14377_v62  ;;  %v21354_v39 = vld [vmem:[#allocation185_spill] sm:$0xff] }
 0x2e0   : > { %v13025_v0 = vpop.f32.mrf.mxu1  ;;  %13364 = vmatmul.mubr.msk.f32.gmra.mxu1 %vm838_vm2, %v21351_v1  ;;  %13560 = vmatprep.mubr.msk.f32.mxu0 %vm838_vm2, %v14378_v63  ;;  %v21356_v62 = vld [vmem:[#allocation297_spill] sm:$0xff]  ;;  %v21357_v63 = vld [vmem:[#allocation188_spill] sm:$0xff] }
 0x2e1   : > { %21349 = vst [vmem:[#allocation255_spill] sm:$0xff] %v18048_v11  ;;  %v18057_v20 = vadd.f32 %v5414_v58, %v4935_v7  ;;  %v4938_v49 = vadd.f32 %v13025_v0, %v21353_v27  ;;  %v5424_v25 = vpop.f32.mrf.mxu0  ;;  %13366 = vmatprep.mubr.msk.f32.mxu1 %vm838_vm2, %v21354_v39  ;;  %v14380_v7 = vld [vmem:[%s14554_s25 + $0x1e0] sm:$0xff]  ;;  %v21359_v58 = vld [vmem:[#allocation300_spill] sm:$0xff]  ;;  %v14381_v39 = vld [vmem:[%s14554_s25 + $0x1e8] sm:$0xff] }
 0x2e2   : > { %v4570_v13 = vpop.f32.mrf.mxu1 }
 0x2e3   : > { %21352 = vst [vmem:[#allocation258_spill] sm:$0xff] %v18057_v20  ;;  %v18062_v34 = vadd.f32 %v13219_v52, %v4938_v49  ;;  %v4937_v11 = vadd.f32 %v4570_v13, %v21356_v62  ;;  %v13222_v42 = vpop.f32.mrf.mxu0  ;;  %13561 = vmatmul.mubr.msk.f32.gmra.mxu0 %vm838_vm2, %v14379_v35  ;;  %v21360_v49 = vld [vmem:[#allocation189_spill] sm:$0xff]  ;;  %v21362_v35 = vld [vmem:[#allocation303_spill] sm:$0xff] }
 0x2e4   : > { %v13028_v1 = vpop.f32.mrf.mxu1  ;;  %13367 = vmatmul.mubr.msk.f32.gmra.mxu1 %vm838_vm2, %v21357_v63  ;;  %13563 = vmatprep.mubr.msk.f32.mxu0 %vm838_vm2, %v14380_v7  ;;  %v21363_v7 = vld [vmem:[#allocation192_spill] sm:$0xff] }
 0x2e5   : > { %21355 = vst [vmem:[#allocation261_spill] sm:$0xff] %v18062_v34  ;;  %v18071_v0 = vadd.f32 %v5424_v25, %v4937_v11  ;;  %v4940_v52 = vadd.f32 %v13028_v1, %v21359_v58  ;;  %v5434_v27 = vpop.f32.mrf.mxu0  ;;  %13369 = vmatprep.mubr.msk.f32.mxu1 %vm838_vm2, %v21360_v49  ;;  %v14382_v11 = vld [vmem:[%s14554_s25 + $0x1f0] sm:$0xff]  ;;  %v21365_v25 = vld [vmem:[#allocation306_spill] sm:$0xff]  ;;  %v14383_v49 = vld [vmem:[%s14554_s25 + $0x1f8] sm:$0xff] }
 0x2e6   : > { %v4580_v13 = vpop.f32.mrf.mxu1 }
 0x2e7   : > { %21358 = vst [vmem:[#allocation264_spill] sm:$0xff] %v18071_v0  ;;  %v18076_v62 = vadd.f32 %v13222_v42, %v4940_v52  ;;  %v4939_v34 = vadd.f32 %v4580_v13, %v21362_v35  ;;  %v13225_v20 = vpop.f32.mrf.mxu0  ;;  %13564 = vmatmul.mubr.msk.f32.gmra.mxu0 %vm838_vm2, %v14381_v39  ;;  %v21366_v52 = vld [vmem:[#allocation193_spill] sm:$0xff]  ;;  %v21368_v39 = vld [vmem:[#allocation171_spill] sm:$0xff] }
 0x2e8   : > { %v13031_v63 = vpop.f32.mrf.mxu1  ;;  %13370 = vmatmul.mubr.msk.f32.gmra.mxu1 %vm838_vm2, %v21363_v7  ;;  %13566 = vmatprep.mubr.msk.f32.mxu0 %vm838_vm2, %v14382_v11  ;;  %v21369_v11 = vld [vmem:[#allocation195_spill] sm:$0xff] }
 0x2e9   : > { %21361 = vst [vmem:[#allocation267_spill] sm:$0xff] %v18076_v62  ;;  %v18085_v1 = vadd.f32 %v5434_v27, %v4939_v34  ;;  %v4942_v42 = vadd.f32 %v13031_v63, %v21365_v25  ;;  %v5444_v58 = vpop.f32.mrf.mxu0  ;;  %13372 = vmatprep.mubr.msk.f32.mxu1 %vm838_vm2, %v21366_v52  ;;  %v14384_v34 = vld [vmem:[%s14554_s25 + $0x208] sm:$0xff]  ;;  %v21371_v27 = vld [vmem:[#allocation174_spill] sm:$0xff]  ;;  %v14385_v52 = vld [vmem:[%s14554_s25 + $0x210] sm:$0xff] }
 0x2ea   : > { %v4590_v13 = vpop.f32.mrf.mxu1 }
 0x2eb   : > { %21364 = vst [vmem:[#allocation270_spill] sm:$0xff] %v18085_v1  ;;  %v18090_v35 = vadd.f32 %v13225_v20, %v4942_v42  ;;  %v4941_v62 = vadd.f32 %v4590_v13, %v21368_v39  ;;  %v13228_v0 = vpop.f32.mrf.mxu0  ;;  %13567 = vmatmul.mubr.msk.f32.gmra.mxu0 %vm838_vm2, %v14383_v49  ;;  %v21372_v42 = vld [vmem:[#allocation92_spill] sm:$0xff]  ;;  %v21374_v49 = vld [vmem:[#allocation175_spill] sm:$0xff] }
 0x2ec   : > { %v13034_v7 = vpop.f32.mrf.mxu1  ;;  %13373 = vmatmul.mubr.msk.f32.gmra.mxu1 %vm838_vm2, %v21369_v11  ;;  %13569 = vmatprep.mubr.msk.f32.mxu0 %vm838_vm2, %v14384_v34  ;;  %v21375_v34 = vld [vmem:[#allocation196_spill] sm:$0xff] }
 0x2ed   : > { %21367 = vst [vmem:[#allocation273_spill] sm:$0xff] %v18090_v35  ;;  %v18099_v63 = vadd.f32 %v5444_v58, %v4941_v62  ;;  %v4944_v20 = vadd.f32 %v13034_v7, %v21371_v27  ;;  %v5454_v25 = vpop.f32.mrf.mxu0  ;;  %13375 = vmatprep.mubr.msk.f32.mxu1 %vm838_vm2, %v21372_v42  ;;  %v14386_v62 = vld [vmem:[%s14554_s25 + $0x218] sm:$0xff]  ;;  %v21377_v58 = vld [vmem:[#allocation178_spill] sm:$0xff] }
 0x2ee   : > { %v4600_v13 = vpop.f32.mrf.mxu1  ;;  %v14387_v42 = vld [vmem:[%s14554_s25 + $0x220] sm:$0xff] }
 0x2ef   : > { %21370 = vst [vmem:[#allocation276_spill] sm:$0xff] %v18099_v63  ;;  %v18104_v39 = vadd.f32 %v13228_v0, %v4944_v20  ;;  %v4943_v35 = vadd.f32 %v4600_v13, %v21374_v49  ;;  %v13231_v1 = vpop.f32.mrf.mxu0  ;;  %13570 = vmatmul.mubr.msk.f32.gmra.mxu0 %vm838_vm2, %v14385_v52  ;;  %v21378_v20 = vld [vmem:[#allocation197_spill] sm:$0xff]  ;;  %v21380_v52 = vld [vmem:[#allocation179_spill] sm:$0xff] }
 0x2f0   : > { %v13037_v11 = vpop.f32.mrf.mxu1  ;;  %13376 = vmatmul.mubr.msk.f32.gmra.mxu1 %vm838_vm2, %v21375_v34  ;;  %13572 = vmatprep.mubr.msk.f32.mxu0 %vm838_vm2, %v14386_v62  ;;  %v21381_v62 = vld [vmem:[#allocation198_spill] sm:$0xff] }
 0x2f1   : > { %21373 = vst [vmem:[#allocation279_spill] sm:$0xff] %v18104_v39  ;;  %v18113_v7 = vadd.f32 %v5454_v25, %v4943_v35  ;;  %v4946_v0 = vadd.f32 %v13037_v11, %v21377_v58  ;;  %v5464_v27 = vpop.f32.mrf.mxu0  ;;  %13378 = vmatprep.mubr.msk.f32.mxu1 %vm838_vm2, %v21378_v20  ;;  %v14388_v35 = vld [vmem:[%s14554_s25 + $0x230] sm:$0xff]  ;;  %v21383_v25 = vld [vmem:[#allocation182_spill] sm:$0xff]  ;;  %v14389_v20 = vld [vmem:[%s14554_s25 + $0x238] sm:$0xff] }
 0x2f2   : > { %v4610_v13 = vpop.f32.mrf.mxu1 }
 0x2f3   : > { %21376 = vst [vmem:[#allocation282_spill] sm:$0xff] %v18113_v7  ;;  %v18118_v49 = vadd.f32 %v13231_v1, %v4946_v0  ;;  %v4945_v39 = vadd.f32 %v4610_v13, %v21380_v52  ;;  %v13234_v63 = vpop.f32.mrf.mxu0  ;;  %13573 = vmatmul.mubr.msk.f32.gmra.mxu0 %vm838_vm2, %v14387_v42  ;;  %v21384_v0 = vld [vmem:[#allocation105_spill] sm:$0xff]  ;;  %v21386_v42 = vld [vmem:[#allocation183_spill] sm:$0xff] }
 0x2f4   : > { %v13040_v34 = vpop.f32.mrf.mxu1  ;;  %13379 = vmatmul.mubr.msk.f32.gmra.mxu1 %vm838_vm2, %v21381_v62  ;;  %13575 = vmatprep.mubr.msk.f32.mxu0 %vm838_vm2, %v14388_v35  ;;  %v21387_v35 = vld [vmem:[#allocation199_spill] sm:$0xff] }
 0x2f5   : > { %21379 = vst [vmem:[#allocation285_spill] sm:$0xff] %v18118_v49  ;;  %v18127_v11 = vadd.f32 %v5464_v27, %v4945_v39  ;;  %v4948_v1 = vadd.f32 %v13040_v34, %v21383_v25  ;;  %v5474_v58 = vpop.f32.mrf.mxu0  ;;  %13381 = vmatprep.mubr.msk.f32.mxu1 %vm838_vm2, %v21384_v0  ;;  %v14390_v39 = vld [vmem:[%s14554_s25 + $0x240] sm:$0xff]  ;;  %v14391_v0 = vld [vmem:[%s14554_s25 + $0x248] sm:$0xff] }
 0x2f6   : > { %v4620_v13 = vpop.f32.mrf.mxu1  ;;  %v21389_v27 = vld [vmem:[#allocation186_spill] sm:$0xff] }
 0x2f7   : > { %21382 = vst [vmem:[#allocation288_spill] sm:$0xff] %v18127_v11  ;;  %v18132_v52 = vadd.f32 %v13234_v63, %v4948_v1  ;;  %v4947_v49 = vadd.f32 %v4620_v13, %v21386_v42  ;;  %v13237_v7 = vpop.f32.mrf.mxu0  ;;  %13576 = vmatmul.mubr.msk.f32.gmra.mxu0 %vm838_vm2, %v14389_v20  ;;  %v21390_v1 = vld [vmem:[#allocation200_spill] sm:$0xff]  ;;  %v21392_v20 = vld [vmem:[#allocation187_spill] sm:$0xff] }
 0x2f8   : > { %v13043_v62 = vpop.f32.mrf.mxu1  ;;  %13382 = vmatmul.mubr.msk.f32.gmra.mxu1 %vm838_vm2, %v21387_v35  ;;  %13578 = vmatprep.mubr.msk.f32.mxu0 %vm838_vm2, %v14390_v39  ;;  %v21393_v39 = vld [vmem:[#allocation201_spill] sm:$0xff] }
 0x2f9   : > { %21385 = vst [vmem:[#allocation291_spill] sm:$0xff] %v18132_v52  ;;  %v18141_v34 = vadd.f32 %v5474_v58, %v4947_v49  ;;  %v4950_v63 = vadd.f32 %v13043_v62, %v21389_v27  ;;  %v5484_v25 = vpop.f32.mrf.mxu0  ;;  %13384 = vmatprep.mubr.msk.f32.mxu1 %vm838_vm2, %v21390_v1  ;;  %v14392_v49 = vld [vmem:[%s14554_s25 + $0x258] sm:$0xff]  ;;  %v21395_v58 = vld [vmem:[#allocation190_spill] sm:$0xff] }
 0x2fa   : > { %v4630_v13 = vpop.f32.mrf.mxu1  ;;  %v14393_v1 = vld [vmem:[%s14554_s25 + $0x260] sm:$0xff] }
 0x2fb   : > { %21388 = vst [vmem:[#allocation294_spill] sm:$0xff] %v18141_v34  ;;  %v18146_v42 = vadd.f32 %v13237_v7, %v4950_v63  ;;  %v4949_v52 = vadd.f32 %v4630_v13, %v21392_v20  ;;  %v13240_v11 = vpop.f32.mrf.mxu0  ;;  %13579 = vmatmul.mubr.msk.f32.gmra.mxu0 %vm838_vm2, %v14391_v0  ;;  %v21396_v63 = vld [vmem:[#allocation118_spill] sm:$0xff]  ;;  %v21398_v0 = vld [vmem:[#allocation191_spill] sm:$0xff] }
 0x2fc   : > { %v13046_v35 = vpop.f32.mrf.mxu1  ;;  %13385 = vmatmul.mubr.msk.f32.gmra.mxu1 %vm838_vm2, %v21393_v39  ;;  %13581 = vmatprep.mubr.msk.f32.mxu0 %vm838_vm2, %v14392_v49  ;;  %v21399_v49 = vld [vmem:[#allocation202_spill] sm:$0xff] }
 0x2fd   : > { %21391 = vst [vmem:[#allocation297_spill] sm:$0xff] %v18146_v42  ;;  %v18155_v62 = vadd.f32 %v5484_v25, %v4949_v52  ;;  %v4952_v7 = vadd.f32 %v13046_v35, %v21395_v58  ;;  %v5494_v27 = vpop.f32.mrf.mxu0  ;;  %13387 = vmatprep.mubr.msk.f32.mxu1 %vm838_vm2, %v21396_v63  ;;  %v14394_v52 = vld [vmem:[%s14554_s25 + $0x268] sm:$0xff]  ;;  %v21401_v25 = vld [vmem:[#allocation88_spill] sm:$0xff] }
 0x2fe   : > { %v4640_v13 = vpop.f32.mrf.mxu1  ;;  %v14395_v63 = vld [vmem:[%s14554_s25 + $0x270] sm:$0xff] }
 0x2ff   : > { %21394 = vst [vmem:[#allocation300_spill] sm:$0xff] %v18155_v62  ;;  %v18160_v20 = vadd.f32 %v13240_v11, %v4952_v7  ;;  %v4951_v42 = vadd.f32 %v4640_v13, %v21398_v0  ;;  %v13243_v34 = vpop.f32.mrf.mxu0  ;;  %13582 = vmatmul.mubr.msk.f32.gmra.mxu0 %vm838_vm2, %v14393_v1  ;;  %v21402_v7 = vld [vmem:[#allocation203_spill] sm:$0xff]  ;;  %v21404_v1 = vld [vmem:[#allocation194_spill] sm:$0xff] }
 0x300   : > { %v13049_v39 = vpop.f32.mrf.mxu1  ;;  %13388 = vmatmul.mubr.msk.f32.gmra.mxu1 %vm838_vm2, %v21399_v49  ;;  %13584 = vmatprep.mubr.msk.f32.mxu0 %vm838_vm2, %v14394_v52  ;;  %v21405_v52 = vld [vmem:[#allocation206_spill] sm:$0xff] }
 0x301   : > { %21397 = vst [vmem:[#allocation303_spill] sm:$0xff] %v18160_v20  ;;  %v18169_v35 = vadd.f32 %v5494_v27, %v4951_v42  ;;  %v4954_v11 = vadd.f32 %v13049_v39, %v21401_v25  ;;  %v5504_v58 = vpop.f32.mrf.mxu0  ;;  %13390 = vmatprep.mubr.msk.f32.mxu1 %vm838_vm2, %v21402_v7  ;;  %v14396_v42 = vld [vmem:[%s14554_s25 + $0x280] sm:$0xff]  ;;  %v14397_v7 = vld [vmem:[%s14554_s25 + $0x288] sm:$0xff] }
 0x302   : > { %v4650_v13 = vpop.f32.mrf.mxu1  ;;  %v21407_v27 = vld [vmem:[#allocation94_spill] sm:$0xff] }
 0x303   : > { %21400 = vst [vmem:[#allocation306_spill] sm:$0xff] %v18169_v35  ;;  %v18174_v0 = vadd.f32 %v13243_v34, %v4954_v11  ;;  %v4953_v20 = vadd.f32 %v4650_v13, %v21404_v1  ;;  %v13246_v62 = vpop.f32.mrf.mxu0  ;;  %13585 = vmatmul.mubr.msk.f32.gmra.mxu0 %vm838_vm2, %v14395_v63  ;;  %v21408_v11 = vld [vmem:[#allocation207_spill] sm:$0xff]  ;;  %v21410_v63 = vld [vmem:[#allocation98_spill] sm:$0xff] }
 0x304   : > { %v13052_v49 = vpop.f32.mrf.mxu1  ;;  %13391 = vmatmul.mubr.msk.f32.gmra.mxu1 %vm838_vm2, %v21405_v52  ;;  %13587 = vmatprep.mubr.msk.f32.mxu0 %vm838_vm2, %v14396_v42  ;;  %v21411_v42 = vld [vmem:[#allocation210_spill] sm:$0xff] }
 0x305   : > { %21403 = vst [vmem:[#allocation171_spill] sm:$0xff] %v18174_v0  ;;  %v18183_v39 = vadd.f32 %v5504_v58, %v4953_v20  ;;  %v4956_v34 = vadd.f32 %v13052_v49, %v21407_v27  ;;  %v5514_v25 = vpop.f32.mrf.mxu0  ;;  %13393 = vmatprep.mubr.msk.f32.mxu1 %vm838_vm2, %v21408_v11  ;;  %v14398_v20 = vld [vmem:[%s14554_s25 + $0x290] sm:$0xff]  ;;  %v14399_v11 = vld [vmem:[%s14554_s25 + $0x298] sm:$0xff] }
 0x306   : > { %v4660_v13 = vpop.f32.mrf.mxu1  ;;  %v21413_v58 = vld [vmem:[#allocation100_spill] sm:$0xff] }
 0x307   : > { %21406 = vst [vmem:[#allocation174_spill] sm:$0xff] %v18183_v39  ;;  %v18188_v1 = vadd.f32 %v13246_v62, %v4956_v34  ;;  %v4955_v0 = vadd.f32 %v4660_v13, %v21410_v63  ;;  %v13249_v35 = vpop.f32.mrf.mxu0  ;;  %13588 = vmatmul.mubr.msk.f32.gmra.mxu0 %vm838_vm2, %v14397_v7  ;;  %v21414_v34 = vld [vmem:[#allocation211_spill] sm:$0xff]  ;;  %v21416_v7 = vld [vmem:[#allocation101_spill] sm:$0xff] }
 0x308   : > { %v13055_v52 = vpop.f32.mrf.mxu1  ;;  %13394 = vmatmul.mubr.msk.f32.gmra.mxu1 %vm838_vm2, %v21411_v42  ;;  %13590 = vmatprep.mubr.msk.f32.mxu0 %vm838_vm2, %v14398_v20  ;;  %v21417_v20 = vld [vmem:[#allocation214_spill] sm:$0xff] }
 0x309   : > { %21409 = vst [vmem:[#allocation175_spill] sm:$0xff] %v18188_v1  ;;  %v18197_v49 = vadd.f32 %v5514_v25, %v4955_v0  ;;  %v4958_v62 = vadd.f32 %v13055_v52, %v21413_v58  ;;  %v5524_v27 = vpop.f32.mrf.mxu0  ;;  %13396 = vmatprep.mubr.msk.f32.mxu1 %vm838_vm2, %v21414_v34  ;;  %v14400_v0 = vld [vmem:[%s14554_s25 + $0x2a8] sm:$0xff]  ;;  %v14401_v34 = vld [vmem:[%s14554_s25 + $0x2b0] sm:$0xff] }
 0x30a   : > { %v4670_v13 = vpop.f32.mrf.mxu1  ;;  %v21419_v25 = vld [vmem:[#allocation107_spill] sm:$0xff] }
 0x30b   : > { %21412 = vst [vmem:[#allocation178_spill] sm:$0xff] %v18197_v49  ;;  %v18202_v63 = vadd.f32 %v13249_v35, %v4958_v62  ;;  %v4957_v1 = vadd.f32 %v4670_v13, %v21416_v7  ;;  %v13252_v39 = vpop.f32.mrf.mxu0  ;;  %13591 = vmatmul.mubr.msk.f32.gmra.mxu0 %vm838_vm2, %v14399_v11  ;;  %v21420_v62 = vld [vmem:[#allocation215_spill] sm:$0xff] }
 0x30c   : > { %v13058_v42 = vpop.f32.mrf.mxu1  ;;  %13397 = vmatmul.mubr.msk.f32.gmra.mxu1 %vm838_vm2, %v21417_v20  ;;  %13593 = vmatprep.mubr.msk.f32.mxu0 %vm838_vm2, %v14400_v0  ;;  %v21422_v11 = vld [vmem:[#allocation111_spill] sm:$0xff]  ;;  %v21423_v0 = vld [vmem:[#allocation218_spill] sm:$0xff] }
 0x30d   : > { %21415 = vst [vmem:[#allocation179_spill] sm:$0xff] %v18202_v63  ;;  %v18211_v52 = vadd.f32 %v5524_v27, %v4957_v1  ;;  %v4960_v35 = vadd.f32 %v13058_v42, %v21419_v25  ;;  %v5534_v58 = vpop.f32.mrf.mxu0  ;;  %13399 = vmatprep.mubr.msk.f32.mxu1 %vm838_vm2, %v21420_v62  ;;  %v14402_v1 = vld [vmem:[%s14554_s25 + $0x2b8] sm:$0xff]  ;;  %v14403_v62 = vld [vmem:[%s14554_s25 + $0x2c0] sm:$0xff] }
 0x30e   : > { %v4680_v13 = vpop.f32.mrf.mxu1  ;;  %v21425_v27 = vld [vmem:[#allocation113_spill] sm:$0xff] }
 0x30f   : > { %21418 = vst [vmem:[#allocation182_spill] sm:$0xff] %v18211_v52  ;;  %v18216_v7 = vadd.f32 %v13252_v39, %v4960_v35  ;;  %v4959_v63 = vadd.f32 %v4680_v13, %v21422_v11  ;;  %v13255_v49 = vpop.f32.mrf.mxu0  ;;  %13594 = vmatmul.mubr.msk.f32.gmra.mxu0 %vm838_vm2, %v14401_v34  ;;  %v21426_v35 = vld [vmem:[#allocation219_spill] sm:$0xff]  ;;  %v21428_v34 = vld [vmem:[#allocation114_spill] sm:$0xff] }
 0x310   : > { %v13061_v20 = vpop.f32.mrf.mxu1  ;;  %13400 = vmatmul.mubr.msk.f32.gmra.mxu1 %vm838_vm2, %v21423_v0  ;;  %13596 = vmatprep.mubr.msk.f32.mxu0 %vm838_vm2, %v14402_v1  ;;  %v21429_v1 = vld [vmem:[#allocation222_spill] sm:$0xff] }
 0x311   : > { %21421 = vst [vmem:[#allocation183_spill] sm:$0xff] %v18216_v7  ;;  %v18225_v42 = vadd.f32 %v5534_v58, %v4959_v63  ;;  %v4962_v39 = vadd.f32 %v13061_v20, %v21425_v27  ;;  %v5544_v25 = vpop.f32.mrf.mxu0  ;;  %13402 = vmatprep.mubr.msk.f32.mxu1 %vm838_vm2, %v21426_v35  ;;  %v14404_v63 = vld [vmem:[%s14554_s25 + $0x2d0] sm:$0xff]  ;;  %v14405_v35 = vld [vmem:[%s14554_s25 + $0x2d8] sm:$0xff] }
 0x312   : > { %v4690_v13 = vpop.f32.mrf.mxu1  ;;  %v21431_v58 = vld [vmem:[#allocation120_spill] sm:$0xff] }
 0x313   : > { %21424 = vst [vmem:[#allocation186_spill] sm:$0xff] %v18225_v42  ;;  %v18230_v11 = vadd.f32 %v13255_v49, %v4962_v39  ;;  %v4961_v7 = vadd.f32 %v4690_v13, %v21428_v34  ;;  %v13258_v52 = vpop.f32.mrf.mxu0  ;;  %13597 = vmatmul.mubr.msk.f32.gmra.mxu0 %vm838_vm2, %v14403_v62  ;;  %v21432_v39 = vld [vmem:[#allocation223_spill] sm:$0xff]  ;;  %v21434_v62 = vld [vmem:[#allocation124_spill] sm:$0xff] }
 0x314   : > { %v13064_v0 = vpop.f32.mrf.mxu1  ;;  %13403 = vmatmul.mubr.msk.f32.gmra.mxu1 %vm838_vm2, %v21429_v1  ;;  %13599 = vmatprep.mubr.msk.f32.mxu0 %vm838_vm2, %v14404_v63  ;;  %v21435_v63 = vld [vmem:[#allocation226_spill] sm:$0xff] }
 0x315   : > { %21427 = vst [vmem:[#allocation187_spill] sm:$0xff] %v18230_v11  ;;  %v18239_v20 = vadd.f32 %v5544_v25, %v4961_v7  ;;  %v4964_v49 = vadd.f32 %v13064_v0, %v21431_v58  ;;  %v5554_v27 = vpop.f32.mrf.mxu0  ;;  %13405 = vmatprep.mubr.msk.f32.mxu1 %vm838_vm2, %v21432_v39  ;;  %v14406_v7 = vld [vmem:[%s14554_s25 + $0x2e0] sm:$0xff]  ;;  %v21437_v25 = vld [vmem:[#allocation204_spill] sm:$0xff]  ;;  %v14407_v39 = vld [vmem:[%s14554_s25 + $0x2e8] sm:$0xff] }
 0x316   : > { %v4700_v13 = vpop.f32.mrf.mxu1 }
 0x317   : > { %21430 = vst [vmem:[#allocation190_spill] sm:$0xff] %v18239_v20  ;;  %v18244_v34 = vadd.f32 %v13258_v52, %v4964_v49  ;;  %v4963_v11 = vadd.f32 %v4700_v13, %v21434_v62  ;;  %v13261_v42 = vpop.f32.mrf.mxu0  ;;  %13600 = vmatmul.mubr.msk.f32.gmra.mxu0 %vm838_vm2, %v14405_v35  ;;  %v21438_v49 = vld [vmem:[#allocation227_spill] sm:$0xff]  ;;  %v21440_v35 = vld [vmem:[#allocation205_spill] sm:$0xff] }
 0x318   : > { %v13067_v1 = vpop.f32.mrf.mxu1  ;;  %13406 = vmatmul.mubr.msk.f32.gmra.mxu1 %vm838_vm2, %v21435_v63  ;;  %13602 = vmatprep.mubr.msk.f32.mxu0 %vm838_vm2, %v14406_v7  ;;  %v21441_v7 = vld [vmem:[#allocation230_spill] sm:$0xff] }
 0x319   : > { %21433 = vst [vmem:[#allocation191_spill] sm:$0xff] %v18244_v34  ;;  %v18253_v0 = vadd.f32 %v5554_v27, %v4963_v11  ;;  %v4966_v52 = vadd.f32 %v13067_v1, %v21437_v25  ;;  %v5564_v58 = vpop.f32.mrf.mxu0  ;;  %13408 = vmatprep.mubr.msk.f32.mxu1 %vm838_vm2, %v21438_v49  ;;  %v14408_v11 = vld [vmem:[%s14554_s25 + $0x2f8] sm:$0xff]  ;;  %v21443_v27 = vld [vmem:[#allocation208_spill] sm:$0xff]  ;;  %v14409_v49 = vld [vmem:[%s14554_s25 + $0x300] sm:$0xff] }
 0x31a   : > { %v4710_v13 = vpop.f32.mrf.mxu1 }
 0x31b   : > { %21436 = vst [vmem:[#allocation88_spill] sm:$0xff] %v18253_v0  ;;  %v18258_v62 = vadd.f32 %v13261_v42, %v4966_v52  ;;  %v4965_v34 = vadd.f32 %v4710_v13, %v21440_v35  ;;  %v13264_v20 = vpop.f32.mrf.mxu0  ;;  %13603 = vmatmul.mubr.msk.f32.gmra.mxu0 %vm838_vm2, %v14407_v39  ;;  %v21444_v52 = vld [vmem:[#allocation231_spill] sm:$0xff]  ;;  %v21446_v39 = vld [vmem:[#allocation209_spill] sm:$0xff] }
 0x31c   : > { %v13070_v63 = vpop.f32.mrf.mxu1  ;;  %13409 = vmatmul.mubr.msk.f32.gmra.mxu1 %vm838_vm2, %v21441_v7  ;;  %13605 = vmatprep.mubr.msk.f32.mxu0 %vm838_vm2, %v14408_v11  ;;  %v21447_v11 = vld [vmem:[#allocation234_spill] sm:$0xff] }
 0x31d   : > { %21439 = vst [vmem:[#allocation194_spill] sm:$0xff] %v18258_v62  ;;  %v18267_v1 = vadd.f32 %v5564_v58, %v4965_v34  ;;  %v4968_v42 = vadd.f32 %v13070_v63, %v21443_v27  ;;  %v5574_v25 = vpop.f32.mrf.mxu0  ;;  %13411 = vmatprep.mubr.msk.f32.mxu1 %vm838_vm2, %v21444_v52  ;;  %v14410_v34 = vld [vmem:[%s14554_s25 + $0x308] sm:$0xff]  ;;  %v21449_v58 = vld [vmem:[#allocation212_spill] sm:$0xff] }
 0x31e   : > { %v4720_v13 = vpop.f32.mrf.mxu1  ;;  %v14411_v52 = vld [vmem:[%s14554_s25 + $0x310] sm:$0xff] }
 0x31f   : > { %21442 = vst [vmem:[#allocation94_spill] sm:$0xff] %v18267_v1  ;;  %v18272_v35 = vadd.f32 %v13264_v20, %v4968_v42  ;;  %v4967_v62 = vadd.f32 %v4720_v13, %v21446_v39  ;;  %v13267_v0 = vpop.f32.mrf.mxu0  ;;  %13606 = vmatmul.mubr.msk.f32.gmra.mxu0 %vm838_vm2, %v14409_v49  ;;  %v21450_v42 = vld [vmem:[#allocation235_spill] sm:$0xff]  ;;  %v21452_v49 = vld [vmem:[#allocation213_spill] sm:$0xff] }
 0x320   : > { %v13073_v7 = vpop.f32.mrf.mxu1  ;;  %13412 = vmatmul.mubr.msk.f32.gmra.mxu1 %vm838_vm2, %v21447_v11  ;;  %13608 = vmatprep.mubr.msk.f32.mxu0 %vm838_vm2, %v14410_v34  ;;  %v21453_v34 = vld [vmem:[#allocation239_spill] sm:$0xff] }
 0x321   : > { %21445 = vst [vmem:[#allocation98_spill] sm:$0xff] %v18272_v35  ;;  %v18281_v63 = vadd.f32 %v5574_v25, %v4967_v62  ;;  %v4970_v20 = vadd.f32 %v13073_v7, %v21449_v58  ;;  %v5584_v27 = vpop.f32.mrf.mxu0  ;;  %13414 = vmatprep.mubr.msk.f32.mxu1 %vm838_vm2, %v21450_v42  ;;  %v14412_v62 = vld [vmem:[%s14554_s25 + $0x320] sm:$0xff]  ;;  %v21455_v25 = vld [vmem:[#allocation216_spill] sm:$0xff]  ;;  %v14413_v42 = vld [vmem:[%s14554_s25 + $0x328] sm:$0xff] }
 0x322   : > { %v4730_v13 = vpop.f32.mrf.mxu1 }
 0x323   : > { %21448 = vst [vmem:[#allocation100_spill] sm:$0xff] %v18281_v63  ;;  %v18286_v39 = vadd.f32 %v13267_v0, %v4970_v20  ;;  %v4969_v35 = vadd.f32 %v4730_v13, %v21452_v49  ;;  %v13270_v1 = vpop.f32.mrf.mxu0  ;;  %13609 = vmatmul.mubr.msk.f32.gmra.mxu0 %vm838_vm2, %v14411_v52  ;;  %v21456_v20 = vld [vmem:[#allocation241_spill] sm:$0xff] }
 0x324   : > { %v13076_v11 = vpop.f32.mrf.mxu1  ;;  %13415 = vmatmul.mubr.msk.f32.gmra.mxu1 %vm838_vm2, %v21453_v34  ;;  %13611 = vmatprep.mubr.msk.f32.mxu0 %vm838_vm2, %v14412_v62  ;;  %v21458_v52 = vld [vmem:[#allocation217_spill] sm:$0xff] }
 0x325   : > { %21451 = vst [vmem:[#allocation101_spill] sm:$0xff] %v18286_v39  ;;  %v18295_v7 = vadd.f32 %v5584_v27, %v4969_v35  ;;  %v4972_v0 = vadd.f32 %v13076_v11, %v21455_v25  ;;  %v5594_v58 = vpop.f32.mrf.mxu0  ;;  %13417 = vmatprep.mubr.msk.f32.mxu1 %vm838_vm2, %v21456_v20  ;;  %v21459_v62 = vld [vmem:[#allocation245_spill] sm:$0xff]  ;;  %v14414_v35 = vld [vmem:[%s14554_s25 + $0x330] sm:$0xff] }
 0x326   : > { %v4740_v13 = vpop.f32.mrf.mxu1  ;;  %v21461_v27 = vld [vmem:[#allocation220_spill] sm:$0xff]  ;;  %v14415_v20 = vld [vmem:[%s14554_s25 + $0x338] sm:$0xff] }
 0x327   : > { %21454 = vst [vmem:[#allocation107_spill] sm:$0xff] %v18295_v7  ;;  %v18300_v49 = vadd.f32 %v13270_v1, %v4972_v0  ;;  %v4971_v39 = vadd.f32 %v4740_v13, %v21458_v52  ;;  %v13273_v63 = vpop.f32.mrf.mxu0  ;;  %13612 = vmatmul.mubr.msk.f32.gmra.mxu0 %vm838_vm2, %v14413_v42  ;;  %v21462_v0 = vld [vmem:[#allocation247_spill] sm:$0xff]  ;;  %v21464_v42 = vld [vmem:[#allocation221_spill] sm:$0xff] }
 0x328   : > { %v13079_v34 = vpop.f32.mrf.mxu1  ;;  %13418 = vmatmul.mubr.msk.f32.gmra.mxu1 %vm838_vm2, %v21459_v62  ;;  %13614 = vmatprep.mubr.msk.f32.mxu0 %vm838_vm2, %v14414_v35  ;;  %v21465_v35 = vld [vmem:[#allocation251_spill] sm:$0xff] }
 0x329   : > { %21457 = vst [vmem:[#allocation111_spill] sm:$0xff] %v18300_v49  ;;  %v18309_v11 = vadd.f32 %v5594_v58, %v4971_v39  ;;  %v4974_v1 = vadd.f32 %v13079_v34, %v21461_v27  ;;  %v5604_v25 = vpop.f32.mrf.mxu0  ;;  %13420 = vmatprep.mubr.msk.f32.mxu1 %vm838_vm2, %v21462_v0  ;;  %v14416_v39 = vld [vmem:[%s14554_s25 + $0x348] sm:$0xff]  ;;  %v21467_v58 = vld [vmem:[#allocation224_spill] sm:$0xff] }
 0x32a   : > { %v4750_v13 = vpop.f32.mrf.mxu1  ;;  %v14417_v0 = vld [vmem:[%s14554_s25 + $0x350] sm:$0xff] }
 0x32b   : > { %21460 = vst [vmem:[#allocation113_spill] sm:$0xff] %v18309_v11  ;;  %v18314_v52 = vadd.f32 %v13273_v63, %v4974_v1  ;;  %v4973_v49 = vadd.f32 %v4750_v13, %v21464_v42  ;;  %v13276_v7 = vpop.f32.mrf.mxu0  ;;  %13615 = vmatmul.mubr.msk.f32.gmra.mxu0 %vm838_vm2, %v14415_v20  ;;  %v21468_v1 = vld [vmem:[#allocation253_spill] sm:$0xff] }
 0x32c   : > { %v13082_v62 = vpop.f32.mrf.mxu1  ;;  %13421 = vmatmul.mubr.msk.f32.gmra.mxu1 %vm838_vm2, %v21465_v35  ;;  %13617 = vmatprep.mubr.msk.f32.mxu0 %vm838_vm2, %v14416_v39  ;;  %v21470_v20 = vld [vmem:[#allocation225_spill] sm:$0xff] }
 0x32d   : > { %21463 = vst [vmem:[#allocation114_spill] sm:$0xff] %v18314_v52  ;;  %v18323_v34 = vadd.f32 %v5604_v25, %v4973_v49  ;;  %v4976_v63 = vadd.f32 %v13082_v62, %v21467_v58  ;;  %v5614_v27 = vpop.f32.mrf.mxu0  ;;  %13423 = vmatprep.mubr.msk.f32.mxu1 %vm838_vm2, %v21468_v1  ;;  %v21471_v39 = vld [vmem:[#allocation257_spill] sm:$0xff]  ;;  %v21473_v25 = vld [vmem:[#allocation228_spill] sm:$0xff]  ;;  %v14419_v1 = vld [vmem:[%s14554_s25 + $0x360] sm:$0xff] }
 0x32e   : > { %v4760_v13 = vpop.f32.mrf.mxu1  ;;  %v14418_v49 = vld [vmem:[%s14554_s25 + $0x358] sm:$0xff] }
 0x32f   : > { %21466 = vst [vmem:[#allocation120_spill] sm:$0xff] %v18323_v34  ;;  %v18328_v42 = vadd.f32 %v13276_v7, %v4976_v63  ;;  %v4975_v52 = vadd.f32 %v4760_v13, %v21470_v20  ;;  %v13279_v11 = vpop.f32.mrf.mxu0  ;;  %13618 = vmatmul.mubr.msk.f32.gmra.mxu0 %vm838_vm2, %v14417_v0  ;;  %v21474_v63 = vld [vmem:[#allocation259_spill] sm:$0xff]  ;;  %v21476_v0 = vld [vmem:[#allocation229_spill] sm:$0xff] }
 0x330   : > { %v13085_v35 = vpop.f32.mrf.mxu1  ;;  %13424 = vmatmul.mubr.msk.f32.gmra.mxu1 %vm838_vm2, %v21471_v39  ;;  %13620 = vmatprep.mubr.msk.f32.mxu0 %vm838_vm2, %v14418_v49  ;;  %v21477_v49 = vld [vmem:[#allocation263_spill] sm:$0xff] }
 0x331   : > { %21469 = vst [vmem:[#allocation124_spill] sm:$0xff] %v18328_v42  ;;  %v18337_v62 = vadd.f32 %v5614_v27, %v4975_v52  ;;  %v4978_v7 = vadd.f32 %v13085_v35, %v21473_v25  ;;  %v5624_v58 = vpop.f32.mrf.mxu0  ;;  %13426 = vmatprep.mubr.msk.f32.mxu1 %vm838_vm2, %v21474_v63  ;;  %v14420_v52 = vld [vmem:[%s14554_s25 + $0x370] sm:$0xff]  ;;  %v14421_v63 = vld [vmem:[%s14554_s25 + $0x378] sm:$0xff] }
 0x332   : > { %v4770_v13 = vpop.f32.mrf.mxu1  ;;  %v21479_v27 = vld [vmem:[#allocation232_spill] sm:$0xff] }
 0x333   : > { %21472 = vst [vmem:[#allocation204_spill] sm:$0xff] %v18337_v62  ;;  %v18342_v20 = vadd.f32 %v13279_v11, %v4978_v7  ;;  %v4977_v42 = vadd.f32 %v4770_v13, %v21476_v0  ;;  %v13282_v34 = vpop.f32.mrf.mxu0  ;;  %13621 = vmatmul.mubr.msk.f32.gmra.mxu0 %vm838_vm2, %v14419_v1  ;;  %v21480_v7 = vld [vmem:[#allocation265_spill] sm:$0xff] }
 0x334   : > { %v13088_v39 = vpop.f32.mrf.mxu1  ;;  %13427 = vmatmul.mubr.msk.f32.gmra.mxu1 %vm838_vm2, %v21477_v49  ;;  %13623 = vmatprep.mubr.msk.f32.mxu0 %vm838_vm2, %v14420_v52  ;;  %v21482_v1 = vld [vmem:[#allocation233_spill] sm:$0xff] }
 0x335   : > { %21475 = vst [vmem:[#allocation205_spill] sm:$0xff] %v18342_v20  ;;  %v18351_v35 = vadd.f32 %v5624_v58, %v4977_v42  ;;  %v4980_v11 = vadd.f32 %v13088_v39, %v21479_v27  ;;  %v5634_v25 = vpop.f32.mrf.mxu0  ;;  %13429 = vmatprep.mubr.msk.f32.mxu1 %vm838_vm2, %v21480_v7  ;;  %v21483_v52 = vld [vmem:[#allocation269_spill] sm:$0xff]  ;;  %v14422_v42 = vld [vmem:[%s14554_s25 + $0x380] sm:$0xff]  ;;  %v21485_v58 = vld [vmem:[#allocation236_spill] sm:$0xff] }
 0x336   : > { %v4780_v13 = vpop.f32.mrf.mxu1  ;;  %v14423_v7 = vld [vmem:[%s14554_s25 + $0x388] sm:$0xff] }
 0x337   : > { %21478 = vst [vmem:[#allocation208_spill] sm:$0xff] %v18351_v35  ;;  %v18356_v0 = vadd.f32 %v13282_v34, %v4980_v11  ;;  %v4979_v20 = vadd.f32 %v4780_v13, %v21482_v1  ;;  %v13285_v62 = vpop.f32.mrf.mxu0  ;;  %13624 = vmatmul.mubr.msk.f32.gmra.mxu0 %vm838_vm2, %v14421_v63  ;;  %v21486_v11 = vld [vmem:[#allocation271_spill] sm:$0xff]  ;;  %v21488_v63 = vld [vmem:[#allocation238_spill] sm:$0xff] }
 0x338   : > { %v13091_v49 = vpop.f32.mrf.mxu1  ;;  %13430 = vmatmul.mubr.msk.f32.gmra.mxu1 %vm838_vm2, %v21483_v52  ;;  %13626 = vmatprep.mubr.msk.f32.mxu0 %vm838_vm2, %v14422_v42  ;;  %v21489_v42 = vld [vmem:[#allocation275_spill] sm:$0xff] }
 0x339   : > { %21481 = vst [vmem:[#allocation209_spill] sm:$0xff] %v18356_v0  ;;  %v18365_v39 = vadd.f32 %v5634_v25, %v4979_v20  ;;  %v4982_v34 = vadd.f32 %v13091_v49, %v21485_v58  ;;  %v5644_v27 = vpop.f32.mrf.mxu0  ;;  %13432 = vmatprep.mubr.msk.f32.mxu1 %vm838_vm2, %v21486_v11  ;;  %v14424_v20 = vld [vmem:[%s14554_s25 + $0x398] sm:$0xff]  ;;  %v21491_v25 = vld [vmem:[#allocation242_spill] sm:$0xff] }
 0x33a   : > { %v4790_v13 = vpop.f32.mrf.mxu1  ;;  %v14425_v11 = vld [vmem:[%s14554_s25 + $0x3a0] sm:$0xff] }
 0x33b   : > { %21484 = vst [vmem:[#allocation212_spill] sm:$0xff] %v18365_v39  ;;  %v18370_v1 = vadd.f32 %v13285_v62, %v4982_v34  ;;  %v4981_v0 = vadd.f32 %v4790_v13, %v21488_v63  ;;  %v13288_v35 = vpop.f32.mrf.mxu0  ;;  %13627 = vmatmul.mubr.msk.f32.gmra.mxu0 %vm838_vm2, %v14423_v7  ;;  %v21492_v34 = vld [vmem:[#allocation277_spill] sm:$0xff]  ;;  %v21494_v7 = vld [vmem:[#allocation244_spill] sm:$0xff] }
 0x33c   : > { %v13094_v52 = vpop.f32.mrf.mxu1  ;;  %13433 = vmatmul.mubr.msk.f32.gmra.mxu1 %vm838_vm2, %v21489_v42  ;;  %13629 = vmatprep.mubr.msk.f32.mxu0 %vm838_vm2, %v14424_v20  ;;  %v21495_v20 = vld [vmem:[#allocation281_spill] sm:$0xff] }
 0x33d   : > { %21487 = vst [vmem:[#allocation213_spill] sm:$0xff] %v18370_v1  ;;  %v18379_v49 = vadd.f32 %v5644_v27, %v4981_v0  ;;  %v4984_v62 = vadd.f32 %v13094_v52, %v21491_v25  ;;  %v5654_v58 = vpop.f32.mrf.mxu0  ;;  %13435 = vmatprep.mubr.msk.f32.mxu1 %vm838_vm2, %v21492_v34  ;;  %v14426_v0 = vld [vmem:[%s14554_s25 + $0x3a8] sm:$0xff]  ;;  %v21497_v27 = vld [vmem:[#allocation248_spill] sm:$0xff] }
 0x33e   : > { %v4800_v13 = vpop.f32.mrf.mxu1  ;;  %v14427_v34 = vld [vmem:[%s14554_s25 + $0x3b0] sm:$0xff] }
 0x33f   : > { %21490 = vst [vmem:[#allocation216_spill] sm:$0xff] %v18379_v49  ;;  %v18384_v63 = vadd.f32 %v13288_v35, %v4984_v62  ;;  %v4983_v1 = vadd.f32 %v4800_v13, %v21494_v7  ;;  %v13291_v39 = vpop.f32.mrf.mxu0  ;;  %13630 = vmatmul.mubr.msk.f32.gmra.mxu0 %vm838_vm2, %v14425_v11  ;;  %v21498_v62 = vld [vmem:[#allocation283_spill] sm:$0xff]  ;;  %v21500_v11 = vld [vmem:[#allocation250_spill] sm:$0xff] }
 0x340   : > { %v13097_v42 = vpop.f32.mrf.mxu1  ;;  %13436 = vmatmul.mubr.msk.f32.gmra.mxu1 %vm838_vm2, %v21495_v20  ;;  %13632 = vmatprep.mubr.msk.f32.mxu0 %vm838_vm2, %v14426_v0  ;;  %v21501_v0 = vld [vmem:[#allocation287_spill] sm:$0xff] }
 0x341   : > { %21493 = vst [vmem:[#allocation217_spill] sm:$0xff] %v18384_v63  ;;  %v18393_v52 = vadd.f32 %v5654_v58, %v4983_v1  ;;  %v4986_v35 = vadd.f32 %v13097_v42, %v21497_v27  ;;  %v5664_v25 = vpop.f32.mrf.mxu0  ;;  %13438 = vmatprep.mubr.msk.f32.mxu1 %vm838_vm2, %v21498_v62  ;;  %v14428_v1 = vld [vmem:[%s14554_s25 + $0x3c0] sm:$0xff]  ;;  %v14429_v62 = vld [vmem:[%s14554_s25 + $0x3c8] sm:$0xff] }
 0x342   : > { %v4810_v13 = vpop.f32.mrf.mxu1  ;;  %v21503_v58 = vld [vmem:[#allocation254_spill] sm:$0xff] }
 0x343   : > { %21496 = vst [vmem:[#allocation220_spill] sm:$0xff] %v18393_v52  ;;  %v18398_v7 = vadd.f32 %v13291_v39, %v4986_v35  ;;  %v4985_v63 = vadd.f32 %v4810_v13, %v21500_v11  ;;  %v13294_v49 = vpop.f32.mrf.mxu0  ;;  %13633 = vmatmul.mubr.msk.f32.gmra.mxu0 %vm838_vm2, %v14427_v34  ;;  %v21504_v35 = vld [vmem:[#allocation289_spill] sm:$0xff]  ;;  %v21506_v34 = vld [vmem:[#allocation256_spill] sm:$0xff] }
 0x344   : > { %v13100_v20 = vpop.f32.mrf.mxu1  ;;  %13439 = vmatmul.mubr.msk.f32.gmra.mxu1 %vm838_vm2, %v21501_v0  ;;  %13635 = vmatprep.mubr.msk.f32.mxu0 %vm838_vm2, %v14428_v1  ;;  %v21507_v1 = vld [vmem:[#allocation293_spill] sm:$0xff] }
 0x345   : > { %21499 = vst [vmem:[#allocation221_spill] sm:$0xff] %v18398_v7  ;;  %v18407_v42 = vadd.f32 %v5664_v25, %v4985_v63  ;;  %v4988_v39 = vadd.f32 %v13100_v20, %v21503_v58  ;;  %v5674_v27 = vpop.f32.mrf.mxu0  ;;  %13441 = vmatprep.mubr.msk.f32.mxu1 %vm838_vm2, %v21504_v35  ;;  %v14430_v63 = vld [vmem:[%s14554_s25 + $0x3d0] sm:$0xff]  ;;  %v14431_v35 = vld [vmem:[%s14554_s25 + $0x3d8] sm:$0xff] }
 0x346   : > { %v4820_v13 = vpop.f32.mrf.mxu1  ;;  %v21509_v25 = vld [vmem:[#allocation260_spill] sm:$0xff] }
 0x347   : > { %21502 = vst [vmem:[#allocation224_spill] sm:$0xff] %v18407_v42  ;;  %v18412_v11 = vadd.f32 %v13294_v49, %v4988_v39  ;;  %v4987_v7 = vadd.f32 %v4820_v13, %v21506_v34  ;;  %v13297_v52 = vpop.f32.mrf.mxu0  ;;  %13636 = vmatmul.mubr.msk.f32.gmra.mxu0 %vm838_vm2, %v14429_v62  ;;  %v21510_v39 = vld [vmem:[#allocation295_spill] sm:$0xff]  ;;  %v21512_v62 = vld [vmem:[#allocation262_spill] sm:$0xff] }
 0x348   : > { %v13103_v0 = vpop.f32.mrf.mxu1  ;;  %13442 = vmatmul.mubr.msk.f32.gmra.mxu1 %vm838_vm2, %v21507_v1  ;;  %13638 = vmatprep.mubr.msk.f32.mxu0 %vm838_vm2, %v14430_v63  ;;  %v21513_v63 = vld [vmem:[#allocation299_spill] sm:$0xff] }
 0x349   : > { %21505 = vst [vmem:[#allocation225_spill] sm:$0xff] %v18412_v11  ;;  %v18421_v20 = vadd.f32 %v5674_v27, %v4987_v7  ;;  %v4990_v49 = vadd.f32 %v13103_v0, %v21509_v25  ;;  %v5684_v58 = vpop.f32.mrf.mxu0  ;;  %13444 = vmatprep.mubr.msk.f32.mxu1 %vm838_vm2, %v21510_v39  ;;  %v14432_v7 = vld [vmem:[%s14554_s25 + $0x3e8] sm:$0xff]  ;;  %v21515_v27 = vld [vmem:[#allocation266_spill] sm:$0xff]  ;;  %v14433_v39 = vld [vmem:[%s14554_s25 + $0x3f0] sm:$0xff] }
 0x34a   : > { %v4830_v13 = vpop.f32.mrf.mxu1 }
 0x34b   : > { %21508 = vst [vmem:[#allocation228_spill] sm:$0xff] %v18421_v20  ;;  %v18426_v34 = vadd.f32 %v13297_v52, %v4990_v49  ;;  %v4989_v11 = vadd.f32 %v4830_v13, %v21512_v62  ;;  %v13300_v42 = vpop.f32.mrf.mxu0  ;;  %13639 = vmatmul.mubr.msk.f32.gmra.mxu0 %vm838_vm2, %v14431_v35  ;;  %v21516_v49 = vld [vmem:[#allocation301_spill] sm:$0xff]  ;;  %v21518_v35 = vld [vmem:[#allocation268_spill] sm:$0xff] }
 0x34c   : > { %v13106_v1 = vpop.f32.mrf.mxu1  ;;  %13445 = vmatmul.mubr.msk.f32.gmra.mxu1 %vm838_vm2, %v21513_v63  ;;  %13641 = vmatprep.mubr.msk.f32.mxu0 %vm838_vm2, %v14432_v7  ;;  %v21519_v7 = vld [vmem:[#allocation305_spill] sm:$0xff] }
 0x34d   : > { %21511 = vst [vmem:[#allocation229_spill] sm:$0xff] %v18426_v34  ;;  %v18435_v0 = vadd.f32 %v5684_v58, %v4989_v11  ;;  %v4992_v52 = vadd.f32 %v13106_v1, %v21515_v27  ;;  %v5694_v25 = vpop.f32.mrf.mxu0  ;;  %13447 = vmatprep.mubr.msk.f32.mxu1 %vm838_vm2, %v21516_v49  ;;  %v14434_v11 = vld [vmem:[%s14554_s25 + $0x3f8] sm:$0xff]  ;;  %v21521_v58 = vld [vmem:[#allocation272_spill] sm:$0xff] }
 0x34e   : > { %v4840_v13 = vpop.f32.mrf.mxu1 }
 0x34f   : > { %21514 = vst [vmem:[#allocation232_spill] sm:$0xff] %v18435_v0  ;;  %v18440_v62 = vadd.f32 %v13300_v42, %v4992_v52  ;;  %v4991_v34 = vadd.f32 %v4840_v13, %v21518_v35  ;;  %v13303_v20 = vpop.f32.mrf.mxu0  ;;  %13642 = vmatmul.mubr.msk.f32.gmra.mxu0 %vm838_vm2, %v14433_v39  ;;  %v21522_v52 = vld [vmem:[#allocation307_spill] sm:$0xff]  ;;  %v14435_v0 = vld [vmem:[%s14554_s25 + $0x400] sm:$0xff] }
 0x350   : > { %v13109_v63 = vpop.f32.mrf.mxu1  ;;  %13448 = vmatmul.mubr.msk.f32.gmra.mxu1 %vm838_vm2, %v21519_v7  ;;  %13644 = vmatprep.mubr.msk.f32.mxu0 %vm838_vm2, %v14434_v11  ;;  %v21524_v11 = vld [vmem:[#allocation309_spill] sm:$0xff] }
 0x351   : > { %21517 = vst [vmem:[#allocation233_spill] sm:$0xff] %v18440_v62  ;;  %v18449_v1 = vadd.f32 %v5694_v25, %v4991_v34  ;;  %v4994_v42 = vadd.f32 %v13109_v63, %v21521_v58  ;;  %v5704_v27 = vpop.f32.mrf.mxu0  ;;  %13450 = vmatprep.mubr.msk.f32.mxu1 %vm838_vm2, %v21522_v52  ;;  %v14436_v34 = vld [vmem:[%s14554_s25 + $0x410] sm:$0xff]  ;;  %v21526_v58 = vld [vmem:[#allocation310_spill] sm:$0xff] }
 0x352   : > { %v4850_v13 = vpop.f32.mrf.mxu1 }
 0x353   : > { %21520 = vst [vmem:[#allocation236_spill] sm:$0xff] %v18449_v1  ;;  %v18454_v35 = vadd.f32 %v13303_v20, %v4994_v42  ;;  %v4993_v39 = vadd.f32 %v4850_v13, %v17550_v30  ;;  %v13306_v62 = vpop.f32.mrf.mxu0  ;;  %13645 = vmatmul.mubr.msk.f32.gmra.mxu0 %vm838_vm2, %v14435_v0 }
 0x354   : > { %v13112_v7 = vpop.f32.mrf.mxu1  ;;  %13451 = vmatmul.mubr.msk.f32.gmra.mxu1 %vm838_vm2, %v21524_v11  ;;  %13647 = vmatprep.mubr.msk.f32.mxu0 %vm838_vm2, %v14436_v34  ;;  %v21528_v34 = vld [vmem:[#allocation311_spill] sm:$0xff] }
 0x355   : > { %21523 = vst [vmem:[#allocation238_spill] sm:$0xff] %v18454_v35  ;;  %v18463_v63 = vadd.f32 %v5704_v27, %v4993_v39  ;;  %v4996_v20 = vadd.f32 %v13112_v7, %v17555_v47  ;;  %v5714_v25 = vpop.f32.mrf.mxu0  ;;  %13453 = vmatprep.mubr.msk.f32.mxu1 %vm838_vm2, %v21526_v58  ;;  %v14437_v35 = vld [vmem:[%s14554_s25 + $0x418] sm:$0xff]  ;;  %v14438_v47 = vld [vmem:[%s14554_s25 + $0x420] sm:$0xff]  ;;  %v21530_v39 = vld [vmem:[#allocation312_spill] sm:$0xff] }
 0x356   : > { %v4860_v30 = vpop.f32.mrf.mxu1 }
 0x357   : > { %21525 = vst [vmem:[#allocation242_spill] sm:$0xff] %v18463_v63  ;;  %v18468_v42 = vadd.f32 %v13306_v62, %v4996_v20  ;;  %v4995_v0 = vadd.f32 %v4860_v30, %v17564_v37  ;;  %v13505_v13 = vpop.f32.mrf.mxu0  ;;  %13648 = vmatmul.mubr.msk.f32.gmra.mxu0 %vm838_vm2, %v14437_v35 }
 0x358   : > { %v13311_v1 = vpop.f32.mrf.mxu1  ;;  %13454 = vmatmul.mubr.msk.f32.gmra.mxu1 %vm838_vm2, %v21528_v34  ;;  %13650 = vmatprep.mubr.msk.f32.mxu0 %vm838_vm2, %v14438_v47  ;;  %v21532_v47 = vld [vmem:[#allocation313_spill] sm:$0xff] }
 0x359   : > { %21527 = vst [vmem:[#allocation244_spill] sm:$0xff] %v18468_v42  ;;  %v18477_v7 = vadd.f32 %v5714_v25, %v4995_v0  ;;  %v6577_v62 = vadd.f32 %v13311_v1, %v17569_v43  ;;  %v6785_v27 = vpop.f32.mrf.mxu0  ;;  %13456 = vmatprep.mubr.msk.f32.mxu1 %vm838_vm2, %v21530_v39  ;;  %v14439_v42 = vld [vmem:[%s14554_s25 + $0x428] sm:$0xff]  ;;  %v14440_v43 = vld [vmem:[%s14554_s25 + $0x438] sm:$0xff] }
 0x35a   : > { %v5937_v37 = vpop.f32.mrf.mxu1 }
 0x35b   : > { %21529 = vst [vmem:[#allocation248_spill] sm:$0xff] %v18477_v7  ;;  %v18482_v20 = vadd.f32 %v13505_v13, %v6577_v62  ;;  %v6576_v35 = vadd.f32 %v5937_v37, %v17578_v22  ;;  %v13508_v30 = vpop.f32.mrf.mxu0  ;;  %13651 = vmatmul.mubr.msk.f32.gmra.mxu0 %vm838_vm2, %v14439_v42  ;;  %v21534_v13 = vld [vmem:[#allocation314_spill] sm:$0xff] }
 0x35c   : > { %v13314_v63 = vpop.f32.mrf.mxu1  ;;  %13457 = vmatmul.mubr.msk.f32.gmra.mxu1 %vm838_vm2, %v21532_v47  ;;  %13653 = vmatprep.mubr.msk.f32.mxu0 %vm838_vm2, %v14440_v43  ;;  %v21536_v43 = vld [vmem:[#allocation315_spill] sm:$0xff] }
 0x35d   : > { %21531 = vst [vmem:[#allocation250_spill] sm:$0xff] %v18482_v20  ;;  %v18491_v1 = vadd.f32 %v6785_v27, %v6576_v35  ;;  %v6579_v25 = vadd.f32 %v13314_v63, %v17583_v32  ;;  %v6795_v0 = vpop.f32.mrf.mxu0  ;;  %13459 = vmatprep.mubr.msk.f32.mxu1 %vm838_vm2, %v21534_v13  ;;  %v14441_v20 = vld [vmem:[%s14554_s25 + $0x440] sm:$0xff]  ;;  %v14442_v32 = vld [vmem:[%s14554_s25 + $0x448] sm:$0xff] }
 0x35e   : > { %v5947_v22 = vpop.f32.mrf.mxu1 }
 0x35f   : > { %21533 = vst [vmem:[#allocation254_spill] sm:$0xff] %v18491_v1  ;;  %v18496_v62 = vadd.f32 %v13508_v30, %v6579_v25  ;;  %v6578_v42 = vadd.f32 %v5947_v22, %v17592_v8  ;;  %v13511_v37 = vpop.f32.mrf.mxu0  ;;  %13654 = vmatmul.mubr.msk.f32.gmra.mxu0 %vm838_vm2, %v14441_v20  ;;  %v21538_v30 = vld [vmem:[#allocation316_spill] sm:$0xff] }
 0x360   : > { %v13317_v7 = vpop.f32.mrf.mxu1  ;;  %13460 = vmatmul.mubr.msk.f32.gmra.mxu1 %vm838_vm2, %v21536_v43  ;;  %13656 = vmatprep.mubr.msk.f32.mxu0 %vm838_vm2, %v14442_v32  ;;  %v21540_v32 = vld [vmem:[#allocation317_spill] sm:$0xff] }
 0x361   : > { %21535 = vst [vmem:[#allocation256_spill] sm:$0xff] %v18496_v62  ;;  %v18505_v63 = vadd.f32 %v6795_v0, %v6578_v42  ;;  %v6581_v27 = vadd.f32 %v13317_v7, %v17597_v24  ;;  %v6805_v35 = vpop.f32.mrf.mxu0  ;;  %13462 = vmatprep.mubr.msk.f32.mxu1 %vm838_vm2, %v21538_v30  ;;  %v14443_v62 = vld [vmem:[%s14554_s25 + $0x450] sm:$0xff]  ;;  %v14444_v24 = vld [vmem:[%s14554_s25 + $0x460] sm:$0xff] }
 0x362   : > { %v5957_v8 = vpop.f32.mrf.mxu1 }
 0x363   : > { %21537 = vst [vmem:[#allocation260_spill] sm:$0xff] %v18505_v63  ;;  %v18510_v25 = vadd.f32 %v13511_v37, %v6581_v27  ;;  %v6580_v20 = vadd.f32 %v5957_v8, %v17606_v10  ;;  %v13514_v22 = vpop.f32.mrf.mxu0  ;;  %13657 = vmatmul.mubr.msk.f32.gmra.mxu0 %vm838_vm2, %v14443_v62  ;;  %v21542_v37 = vld [vmem:[#allocation318_spill] sm:$0xff] }
 0x364   : > { %v13320_v1 = vpop.f32.mrf.mxu1  ;;  %13463 = vmatmul.mubr.msk.f32.gmra.mxu1 %vm838_vm2, %v21540_v32  ;;  %13659 = vmatprep.mubr.msk.f32.mxu0 %vm838_vm2, %v14444_v24  ;;  %v21544_v24 = vld [vmem:[#allocation319_spill] sm:$0xff] }
 0x365   : > { %21539 = vst [vmem:[#allocation262_spill] sm:$0xff] %v18510_v25  ;;  %v18519_v7 = vadd.f32 %v6805_v35, %v6580_v20  ;;  %v6583_v0 = vadd.f32 %v13320_v1, %v17611_v26  ;;  %v6815_v42 = vpop.f32.mrf.mxu0  ;;  %13465 = vmatprep.mubr.msk.f32.mxu1 %vm838_vm2, %v21542_v37  ;;  %v14445_v25 = vld [vmem:[%s14554_s25 + $0x468] sm:$0xff]  ;;  %v14446_v26 = vld [vmem:[%s14554_s25 + $0x470] sm:$0xff] }
 0x366   : > { %v5967_v10 = vpop.f32.mrf.mxu1 }
 0x367   : > { %21541 = vst [vmem:[#allocation266_spill] sm:$0xff] %v18519_v7  ;;  %v18524_v27 = vadd.f32 %v13514_v22, %v6583_v0  ;;  %v6582_v62 = vadd.f32 %v5967_v10, %v17620_v50  ;;  %v13517_v8 = vpop.f32.mrf.mxu0  ;;  %13660 = vmatmul.mubr.msk.f32.gmra.mxu0 %vm838_vm2, %v14445_v25  ;;  %v21546_v22 = vld [vmem:[#allocation320_spill] sm:$0xff] }
 0x368   : > { %v13323_v63 = vpop.f32.mrf.mxu1  ;;  %13466 = vmatmul.mubr.msk.f32.gmra.mxu1 %vm838_vm2, %v21544_v24  ;;  %13662 = vmatprep.mubr.msk.f32.mxu0 %vm838_vm2, %v14446_v26  ;;  %v21548_v26 = vld [vmem:[#allocation321_spill] sm:$0xff] }
 0x369   : > { %21543 = vst [vmem:[#allocation301_spill] sm:$0xff] %v18524_v27  ;;  %v18533_v1 = vadd.f32 %v6815_v42, %v6582_v62  ;;  %v6585_v35 = vadd.f32 %v13323_v63, %v17625_v61  ;;  %v6825_v20 = vpop.f32.mrf.mxu0  ;;  %13468 = vmatprep.mubr.msk.f32.mxu1 %vm838_vm2, %v21546_v22  ;;  %v14447_v27 = vld [vmem:[%s14554_s25 + $0x478] sm:$0xff]  ;;  %v14448_v61 = vld [vmem:[%s14554_s25 + $0x488] sm:$0xff] }
 0x36a   : > { %v5977_v50 = vpop.f32.mrf.mxu1 }
 0x36b   : > { %21545 = vst [vmem:[#allocation268_spill] sm:$0xff] %v18533_v1  ;;  %v18538_v0 = vadd.f32 %v13517_v8, %v6585_v35  ;;  %v6584_v25 = vadd.f32 %v5977_v50, %v17634_v60  ;;  %v13520_v10 = vpop.f32.mrf.mxu0  ;;  %13663 = vmatmul.mubr.msk.f32.gmra.mxu0 %vm838_vm2, %v14447_v27  ;;  %v21550_v8 = vld [vmem:[#allocation322_spill] sm:$0xff] }
 0x36c   : > { %v13326_v7 = vpop.f32.mrf.mxu1  ;;  %13469 = vmatmul.mubr.msk.f32.gmra.mxu1 %vm838_vm2, %v21548_v26  ;;  %13665 = vmatprep.mubr.msk.f32.mxu0 %vm838_vm2, %v14448_v61  ;;  %v21552_v61 = vld [vmem:[#allocation323_spill] sm:$0xff] }
 0x36d   : > { %21547 = vst [vmem:[#allocation272_spill] sm:$0xff] %v18538_v0  ;;  %v18547_v63 = vadd.f32 %v6825_v20, %v6584_v25  ;;  %v6587_v42 = vadd.f32 %v13326_v7, %v17639_v9  ;;  %v6835_v62 = vpop.f32.mrf.mxu0  ;;  %13471 = vmatprep.mubr.msk.f32.mxu1 %vm838_vm2, %v21550_v8  ;;  %v14449_v0 = vld [vmem:[%s14554_s25 + $0x490] sm:$0xff]  ;;  %v14450_v9 = vld [vmem:[%s14554_s25 + $0x498] sm:$0xff] }
 0x36e   : > { %v5987_v60 = vpop.f32.mrf.mxu1 }
 0x36f   : > { %21549 = vst [vmem:[#allocation307_spill] sm:$0xff] %v18547_v63  ;;  %v18552_v35 = vadd.f32 %v13520_v10, %v6587_v42  ;;  %v6586_v27 = vadd.f32 %v5987_v60, %v17648_v33  ;;  %v13523_v50 = vpop.f32.mrf.mxu0  ;;  %13666 = vmatmul.mubr.msk.f32.gmra.mxu0 %vm838_vm2, %v14449_v0  ;;  %v21554_v10 = vld [vmem:[#allocation324_spill] sm:$0xff] }
 0x370   : > { %v13329_v1 = vpop.f32.mrf.mxu1  ;;  %13472 = vmatmul.mubr.msk.f32.gmra.mxu1 %vm838_vm2, %v21552_v61  ;;  %13668 = vmatprep.mubr.msk.f32.mxu0 %vm838_vm2, %v14450_v9  ;;  %v21556_v9 = vld [vmem:[#allocation325_spill] sm:$0xff] }
 0x371   : > { %21551 = vst [vmem:[#allocation309_spill] sm:$0xff] %v18552_v35  ;;  %v18561_v7 = vadd.f32 %v6835_v62, %v6586_v27  ;;  %v6589_v20 = vadd.f32 %v13329_v1, %v17653_v55  ;;  %v6845_v25 = vpop.f32.mrf.mxu0  ;;  %13474 = vmatprep.mubr.msk.f32.mxu1 %vm838_vm2, %v21554_v10  ;;  %v14451_v35 = vld [vmem:[%s14554_s25 + $0x4a0] sm:$0xff]  ;;  %v14452_v55 = vld [vmem:[%s14554_s25 + $0x4b0] sm:$0xff] }
 0x372   : > { %v5997_v33 = vpop.f32.mrf.mxu1 }
 0x373   : > { %21553 = vst [vmem:[#allocation310_spill] sm:$0xff] %v18561_v7  ;;  %v18566_v42 = vadd.f32 %v13523_v50, %v6589_v20  ;;  %v6588_v0 = vadd.f32 %v5997_v33, %v17662_v15  ;;  %v13526_v60 = vpop.f32.mrf.mxu0  ;;  %13669 = vmatmul.mubr.msk.f32.gmra.mxu0 %vm838_vm2, %v14451_v35  ;;  %v21558_v50 = vld [vmem:[#allocation326_spill] sm:$0xff]  ;;  %v14453_v7 = vld [vmem:[%s14554_s25 + $0x4b8] sm:$0xff] }
 0x374   : > { %v13332_v63 = vpop.f32.mrf.mxu1  ;;  %13475 = vmatmul.mubr.msk.f32.gmra.mxu1 %vm838_vm2, %v21556_v9  ;;  %13671 = vmatprep.mubr.msk.f32.mxu0 %vm838_vm2, %v14452_v55  ;;  %v21560_v35 = vld [vmem:[#allocation274_spill] sm:$0xff]  ;;  %v21561_v55 = vld [vmem:[#allocation327_spill] sm:$0xff] }
 0x375   : > { %21555 = vst [vmem:[#allocation311_spill] sm:$0xff] %v18566_v42  ;;  %v18575_v1 = vadd.f32 %v6845_v25, %v6588_v0  ;;  %v6591_v62 = vadd.f32 %v13332_v63, %v17667_v3  ;;  %v6855_v27 = vpop.f32.mrf.mxu0  ;;  %13477 = vmatprep.mubr.msk.f32.mxu1 %vm838_vm2, %v21558_v50  ;;  %v14454_v3 = vld [vmem:[%s14554_s25 + $0x4c0] sm:$0xff]  ;;  %v14455_v50 = vld [vmem:[%s14554_s25 + $0x4c8] sm:$0xff] }
 0x376   : > { %v6007_v15 = vpop.f32.mrf.mxu1  ;;  %v21563_v25 = vld [vmem:[#allocation278_spill] sm:$0xff] }
 0x377   : > { %21557 = vst [vmem:[#allocation312_spill] sm:$0xff] %v18575_v1  ;;  %v18580_v20 = vadd.f32 %v13526_v60, %v6591_v62  ;;  %v6590_v33 = vadd.f32 %v6007_v15, %v21560_v35  ;;  %v13529_v42 = vpop.f32.mrf.mxu0  ;;  %13672 = vmatmul.mubr.msk.f32.gmra.mxu0 %vm838_vm2, %v14453_v7  ;;  %v21564_v62 = vld [vmem:[#allocation328_spill] sm:$0xff] }
 0x378   : > { %v13335_v9 = vpop.f32.mrf.mxu1  ;;  %13478 = vmatmul.mubr.msk.f32.gmra.mxu1 %vm838_vm2, %v21561_v55  ;;  %13674 = vmatprep.mubr.msk.f32.mxu0 %vm838_vm2, %v14454_v3  ;;  %v21566_v7 = vld [vmem:[#allocation280_spill] sm:$0xff]  ;;  %v21567_v3 = vld [vmem:[#allocation329_spill] sm:$0xff] }
 0x379   : > { %21559 = vst [vmem:[#allocation313_spill] sm:$0xff] %v18580_v20  ;;  %v18589_v63 = vadd.f32 %v6855_v27, %v6590_v33  ;;  %v6593_v0 = vadd.f32 %v13335_v9, %v21563_v25  ;;  %v6865_v60 = vpop.f32.mrf.mxu0  ;;  %13480 = vmatprep.mubr.msk.f32.mxu1 %vm838_vm2, %v21564_v62  ;;  %v14456_v9 = vld [vmem:[%s14554_s25 + $0x4d8] sm:$0xff]  ;;  %v21569_v33 = vld [vmem:[#allocation284_spill] sm:$0xff]  ;;  %v14457_v62 = vld [vmem:[%s14554_s25 + $0x4e0] sm:$0xff] }
 0x37a   : > { %v6017_v15 = vpop.f32.mrf.mxu1 }
 0x37b   : > { %21562 = vst [vmem:[#allocation314_spill] sm:$0xff] %v18589_v63  ;;  %v18594_v35 = vadd.f32 %v13529_v42, %v6593_v0  ;;  %v6592_v20 = vadd.f32 %v6017_v15, %v21566_v7  ;;  %v13532_v1 = vpop.f32.mrf.mxu0  ;;  %13675 = vmatmul.mubr.msk.f32.gmra.mxu0 %vm838_vm2, %v14455_v50  ;;  %v21570_v0 = vld [vmem:[#allocation330_spill] sm:$0xff] }
 0x37c   : > { %v13338_v55 = vpop.f32.mrf.mxu1  ;;  %13481 = vmatmul.mubr.msk.f32.gmra.mxu1 %vm838_vm2, %v21567_v3  ;;  %13677 = vmatprep.mubr.msk.f32.mxu0 %vm838_vm2, %v14456_v9  ;;  %v21572_v50 = vld [vmem:[#allocation286_spill] sm:$0xff]  ;;  %v21573_v9 = vld [vmem:[#allocation331_spill] sm:$0xff] }
 0x37d   : > { %21565 = vst [vmem:[#allocation315_spill] sm:$0xff] %v18594_v35  ;;  %v18603_v27 = vadd.f32 %v6865_v60, %v6592_v20  ;;  %v6595_v42 = vadd.f32 %v13338_v55, %v21569_v33  ;;  %v6875_v25 = vpop.f32.mrf.mxu0  ;;  %13483 = vmatprep.mubr.msk.f32.mxu1 %vm838_vm2, %v21570_v0  ;;  %v14458_v20 = vld [vmem:[%s14554_s25 + $0x4e8] sm:$0xff]  ;;  %v21575_v60 = vld [vmem:[#allocation290_spill] sm:$0xff]  ;;  %v14459_v0 = vld [vmem:[%s14554_s25 + $0x4f0] sm:$0xff] }
 0x37e   : > { %v6027_v15 = vpop.f32.mrf.mxu1 }
 0x37f   : > { %21568 = vst [vmem:[#allocation316_spill] sm:$0xff] %v18603_v27  ;;  %v18608_v7 = vadd.f32 %v13532_v1, %v6595_v42  ;;  %v6594_v35 = vadd.f32 %v6027_v15, %v21572_v50  ;;  %v13535_v63 = vpop.f32.mrf.mxu0  ;;  %13678 = vmatmul.mubr.msk.f32.gmra.mxu0 %vm838_vm2, %v14457_v62  ;;  %v21576_v42 = vld [vmem:[#allocation332_spill] sm:$0xff] }
 0x380   : > { %v13341_v3 = vpop.f32.mrf.mxu1  ;;  %13484 = vmatmul.mubr.msk.f32.gmra.mxu1 %vm838_vm2, %v21573_v9  ;;  %13680 = vmatprep.mubr.msk.f32.mxu0 %vm838_vm2, %v14458_v20  ;;  %v21578_v62 = vld [vmem:[#allocation292_spill] sm:$0xff]  ;;  %v21579_v20 = vld [vmem:[#allocation333_spill] sm:$0xff] }
 0x381   : > { %21571 = vst [vmem:[#allocation317_spill] sm:$0xff] %v18608_v7  ;;  %v18617_v55 = vadd.f32 %v6875_v25, %v6594_v35  ;;  %v6597_v1 = vadd.f32 %v13341_v3, %v21575_v60  ;;  %v6885_v33 = vpop.f32.mrf.mxu0  ;;  %13486 = vmatprep.mubr.msk.f32.mxu1 %vm838_vm2, %v21576_v42  ;;  %v14460_v35 = vld [vmem:[%s14554_s25 + $0x500] sm:$0xff]  ;;  %v21581_v25 = vld [vmem:[#allocation296_spill] sm:$0xff] }
 0x382   : > { %v6037_v15 = vpop.f32.mrf.mxu1 }
 0x383   : > { %21574 = vst [vmem:[#allocation318_spill] sm:$0xff] %v18617_v55  ;;  %v18622_v50 = vadd.f32 %v13535_v63, %v6597_v1  ;;  %v6596_v7 = vadd.f32 %v6037_v15, %v21578_v62  ;;  %v13538_v27 = vpop.f32.mrf.mxu0  ;;  %13681 = vmatmul.mubr.msk.f32.gmra.mxu0 %vm838_vm2, %v14459_v0  ;;  %v21582_v1 = vld [vmem:[#allocation334_spill] sm:$0xff]  ;;  %v5851_v15 = vrot.slane %v14460_v35, 2  ;;  %v14461_v0 = vld [vmem:[%s14554_s25 + $0x508] sm:$0xff] }
 0x384   : > { %v13344_v9 = vpop.f32.mrf.mxu1  ;;  %13487 = vmatmul.mubr.msk.f32.gmra.mxu1 %vm838_vm2, %v21579_v20  ;;  %13683 = vmatprep.mubr.msk.f32.mxu0 %vm838_vm2, %v14460_v35 }
 0x385   : > { %21577 = vst [vmem:[#allocation319_spill] sm:$0xff] %v18622_v50  ;;  %v18631_v3 = vadd.f32 %v6885_v33, %v6596_v7  ;;  %v6599_v60 = vadd.f32 %v13344_v9, %v21581_v25  ;;  %v6895_v63 = vpop.f32.mrf.mxu0  ;;  %13489 = vmatprep.mubr.msk.f32.mxu1 %vm838_vm2, %v21582_v1  ;;  %v5852_v50 = vrot.slane %v14461_v0, 2  ;;  %v21584_v33 = vld [vmem:[#allocation335_spill] sm:$0xff]  ;;  %v14462_v9 = vld [vmem:[%s14554_s25 + $0x510] sm:$0xff] }
 0x386   : > { %v6047_v62 = vpop.f32.mrf.mxu1 }
 0x387   : > { %21580 = vst [vmem:[#allocation320_spill] sm:$0xff] %v18631_v3  ;;  %v18637_v55 = vadd.f32 %v13538_v27, %v6599_v60  ;;  %v6598_v20 = vadd.f32 %v6047_v62, %v17736_v51  ;;  %v13541_v42 = vpop.f32.mrf.mxu0  ;;  %13684 = vmatmul.mubr.msk.f32.gmra.mxu0 %vm838_vm2, %v14461_v0  ;;  %v21586_v60 = vld [vmem:[#allocation336_spill] sm:$0xff]  ;;  %v375_v51 = vld [vmem:[%s14554_s25 + $0x528] sm:$0xff]  ;;  %v5854_v62 = vrot.slane %v14462_v9, 2  ;;  %v18652_v0 = vsel %vm2768_vm3, %v5851_v15, %v5852_v50  ;;  %v14463_v3 = vld [vmem:[%s14554_s25 + $0x518] sm:$0xff] }
 0x388   : > { %v13347_v7 = vpop.f32.mrf.mxu1  ;;  %13490 = vmatmul.mubr.msk.f32.gmra.mxu1 %vm838_vm2, %v21584_v33  ;;  %13686 = vmatprep.mubr.msk.f32.mxu0 %vm838_vm2, %v14462_v9  ;;  %v5856_v33 = vrot.slane %v14463_v3, 2  ;;  %v376_v9 = vld [vmem:[%s14554_s25 + $0x530] sm:$0xff] }
 0x389   : > { %21583 = vst [vmem:[#allocation321_spill] sm:$0xff] %v18637_v55  ;;  %v18645_v35 = vadd.f32 %v6895_v63, %v6598_v20  ;;  %v6601_v25 = vadd.f32 %v13347_v7, %v17745_v12  ;;  %v6905_v27 = vpop.f32.mrf.mxu0  ;;  %13492 = vmatprep.mubr.msk.f32.mxu1 %vm838_vm2, %v21586_v60  ;;  %v21588_v7 = vld [vmem:[#allocation337_spill] sm:$0xff] }
 0x38a   : > { %v6057_v55 = vpop.f32.mrf.mxu1 }
 0x38b   : > { %21585 = vst [vmem:[#allocation322_spill] sm:$0xff] %v18645_v35  ;;  %v18655_v1 = vadd.f32 %v13541_v42, %v6601_v25  ;;  %v6600_v20 = vadd.f32 %v6057_v55, %v17757_v31  ;;  %v13544_v12 = vpop.f32.mrf.mxu0  ;;  %13687 = vmatmul.mubr.msk.f32.gmra.mxu0 %vm838_vm2, %v14463_v3  ;;  %v18669_v31 = vsel %vm2768_vm3, %v5852_v50, %v5854_v62  ;;  %v377_v55 = vld [vmem:[%s14554_s25 + $0x538] sm:$0xff]  ;;  %v14464_v42 = vld [vmem:[%s14554_s25 + $0x520] sm:$0x3] }
 0x38c   : > { %v13350_v63 = vpop.f32.mrf.mxu1  ;;  %13493 = vmatmul.mubr.msk.f32.gmra.mxu1 %vm838_vm2, %v21588_v7  ;;  %13689 = vmatprep.mubr.msk.f32.mxu0 %vm838_vm2, %v375_v51  ;;  %v5858_v3 = vrot.slane %v14464_v42, 2  ;;  %v378_v50 = vld [vmem:[%s14554_s25 + $0x540] sm:$0xff] }
 0x38d   : > { %21587 = vst [vmem:[#allocation323_spill] sm:$0xff] %v18655_v1  ;;  %v18663_v15 = vadd.f32 %v6905_v27, %v6600_v20  ;;  %v6603_v35 = vadd.f32 %v13350_v63, %v17764_v54  ;;  %v6915_v60 = vpop.f32.mrf.mxu0  ;;  %13495 = vmatprep.mubr.msk.f32.mxu1 %vm838_vm2, %v18652_v0  ;;  %v18674_v1 = vsel %vm2768_vm3, %v5854_v62, %v5856_v33 }
 0x38e   : > { %v6067_v25 = vpop.f32.mrf.mxu1 }
 0x38f   : > { %v18676_v51 = vadd.f32 %v13544_v12, %v6603_v35  ;;  %v6602_v27 = vadd.f32 %v6067_v25, %v17775_v17  ;;  %v13547_v54 = vpop.f32.mrf.mxu0  ;;  %13690 = vmatmul.mubr.msk.f32.gmra.mxu0 %vm838_vm2, %v376_v9  ;;  %v18690_v17 = vsel %vm2768_vm3, %v5856_v33, %v5858_v3  ;;  %v21589_v3 = vld [vmem:[#allocation14_spill] sm:$0xff] }
 0x390   : > { %v13353_v20 = vpop.f32.mrf.mxu1  ;;  %13496 = vmatmul.mubr.msk.f32.gmra.mxu1 %vm838_vm2, %v18669_v31  ;;  %13692 = vmatprep.mubr.msk.f32.mxu0 %vm838_vm2, %v377_v55 }
 0x391   : > { %v18684_v63 = vadd.f32 %v6915_v60, %v6602_v27  ;;  %v6605_v42 = vadd.f32 %v13353_v20, %v17779_v19  ;;  %v6925_v62 = vpop.f32.mrf.mxu0  ;;  %13498 = vmatprep.mubr.msk.f32.mxu1 %vm838_vm2, %v18674_v1 }
 0x392   : > { %v6077_v35 = vpop.f32.mrf.mxu1 }
 0x393   : > { %v18692_v12 = vadd.f32 %v13547_v54, %v6605_v42  ;;  %v6604_v9 = vadd.f32 %v6077_v35, %v17787_v36  ;;  %v13550_v25 = vpop.f32.mrf.mxu0  ;;  %13693 = vmatmul.mubr.msk.f32.gmra.mxu0 %vm838_vm2, %v378_v50  ;;  %v21590_v42 = vld [vmem:[#allocation16_spill] sm:$0xff]  ;;  %v21591_v35 = vld [vmem:[#allocation18_spill] sm:$0xff] }
 0x394   : > { %v13356_v55 = vpop.f32.mrf.mxu1  ;;  %13499 = vmatmul.mubr.msk.f32.gmra.mxu1 %vm838_vm2, %v18690_v17  ;;  %13891 = vmatprep.mubr.msk.f32.mxu0 %vm838_vm2, %v21269_v38 }
 0x395   : > { %v18700_v19 = vadd.f32 %v6925_v62, %v6604_v9  ;;  %v6607_v33 = vadd.f32 %v13356_v55, %v17792_v5  ;;  %v6935_v60 = vpop.f32.mrf.mxu0  ;;  %13697 = vmatprep.mubr.msk.f32.mxu1 %vm838_vm2, %v21589_v3  ;;  %v21593_v3 = vld [vmem:[#allocation22_spill] sm:$0xff] }
 0x396   : > { %v6087_v27 = vpop.f32.mrf.mxu1 }
 0x397   : > { %v18705_v36 = vadd.f32 %v13550_v25, %v6607_v33  ;;  %v6606_v54 = vadd.f32 %v6087_v27, %v17801_v4  ;;  %v13553_v20 = vpop.f32.mrf.mxu0  ;;  %13892 = vmatmul.mubr.msk.f32.vlgmr.msra.gmra.mxu0 %vm838_vm2, %v21270_v29  ;;  %v21592_v33 = vld [vmem:[#allocation20_spill] sm:$0xff] }
 0x398   : > { %v13359_v50 = vpop.f32.mrf.mxu1  ;;  %13698 = vmatmul.mubr.msk.f32.vlgmr.msra.gmra.mxu1 %vm838_vm2, %v21590_v42  ;;  %13894 = vmatprep.mubr.msk.f32.mxu0 %vm838_vm2, %v21271_v6 }
 0x399   : > { %v18714_v5 = vadd.f32 %v6935_v60, %v6606_v54  ;;  %v6609_v38 = vadd.f32 %v13359_v50, %v17810_v2  ;;  %v6945_v62 = vpop.f32.mrf.mxu0  ;;  %13700 = vmatprep.mubr.msk.f32.mxu1 %vm838_vm2, %v21591_v35  ;;  %v21594_v50 = vld [vmem:[#allocation24_spill] sm:$0xff] }
 0x39a   : > { %v6097_v4 = vpop.f32.mrf.mxu1 }
 0x39b   : > { %v18719_v9 = vadd.f32 %v13553_v20, %v6609_v38  ;;  %v6608_v29 = vadd.f32 %v6097_v4, %v17819_v57  ;;  %v13556_v25 = vpop.f32.mrf.mxu0  ;;  %13895 = vmatmul.mubr.msk.f32.gmra.mxu0 %vm838_vm2, %v21272_v56  ;;  %v21595_v38 = vld [vmem:[#allocation26_spill] sm:$0xff] }
 0x39c   : > { %v13362_v55 = vpop.f32.mrf.mxu1  ;;  %13701 = vmatmul.mubr.msk.f32.gmra.mxu1 %vm838_vm2, %v21592_v33  ;;  %13897 = vmatprep.mubr.msk.f32.mxu0 %vm838_vm2, %v21273_v40 }
 0x39d   : > { %v18728_v2 = vadd.f32 %v6945_v62, %v6608_v29  ;;  %v6611_v6 = vadd.f32 %v13362_v55, %v17824_v14  ;;  %v6955_v60 = vpop.f32.mrf.mxu0  ;;  %13703 = vmatprep.mubr.msk.f32.mxu1 %vm838_vm2, %v21593_v3  ;;  %v21596_v29 = vld [vmem:[#allocation28_spill] sm:$0xff]  ;;  %v21597_v55 = vld [vmem:[#allocation30_spill] sm:$0xff] }
 0x39e   : > { %v6107_v57 = vpop.f32.mrf.mxu1  ;;  %v21598_v3 = vld [vmem:[#allocation32_spill] sm:$0xff] }
 0x39f   : > { %v18733_v27 = vadd.f32 %v13556_v25, %v6611_v6  ;;  %v6610_v56 = vadd.f32 %v6107_v57, %v17833_v53  ;;  %v13559_v54 = vpop.f32.mrf.mxu0  ;;  %13898 = vmatmul.mubr.msk.f32.gmra.mxu0 %vm838_vm2, %v21274_v18 }
 0x3a0   : > { %v13365_v20 = vpop.f32.mrf.mxu1  ;;  %13704 = vmatmul.mubr.msk.f32.gmra.mxu1 %vm838_vm2, %v21594_v50  ;;  %13900 = vmatprep.mubr.msk.f32.mxu0 %vm838_vm2, %v21275_v23 }
 0x3a1   : > { %v18742_v14 = vadd.f32 %v6955_v60, %v6610_v56  ;;  %v6613_v40 = vadd.f32 %v13365_v20, %v17838_v48  ;;  %v6965_v42 = vpop.f32.mrf.mxu0  ;;  %13706 = vmatprep.mubr.msk.f32.mxu1 %vm838_vm2, %v21595_v38  ;;  %v21599_v56 = vld [vmem:[#allocation34_spill] sm:$0xff]  ;;  %v21600_v20 = vld [vmem:[#allocation140_spill] sm:$0xff] }
 0x3a2   : > { %v6117_v53 = vpop.f32.mrf.mxu1  ;;  %v21602_v38 = vld [vmem:[#allocation36_spill] sm:$0xff] }
 0x3a3   : > { %v18747_v62 = vadd.f32 %v13559_v54, %v6613_v40  ;;  %v6612_v18 = vadd.f32 %v6117_v53, %v17847_v28  ;;  %v13562_v35 = vpop.f32.mrf.mxu0  ;;  %13901 = vmatmul.mubr.msk.f32.gmra.mxu0 %vm838_vm2, %v21276_v41  ;;  %v21601_v40 = vld [vmem:[#allocation155_spill] sm:$0xff]  ;;  %v21604_v53 = vld [vmem:[#allocation141_spill] sm:$0xff] }
 0x3a4   : > { %v13368_v4 = vpop.f32.mrf.mxu1  ;;  %13707 = vmatmul.mubr.msk.f32.gmra.mxu1 %vm838_vm2, %v21596_v29  ;;  %13903 = vmatprep.mubr.msk.f32.mxu0 %vm838_vm2, %v21278_v46 }
 0x3a5   : > { %v18756_v48 = vadd.f32 %v6965_v42, %v6612_v18  ;;  %v6615_v23 = vadd.f32 %v13368_v4, %v17852_v59  ;;  %v6975_v25 = vpop.f32.mrf.mxu0  ;;  %13709 = vmatprep.mubr.msk.f32.mxu1 %vm838_vm2, %v21597_v55  ;;  %v21605_v4 = vld [vmem:[#allocation38_spill] sm:$0xff] }
 0x3a6   : > { %v6127_v28 = vpop.f32.mrf.mxu1 }
 0x3a7   : > { %v18761_v33 = vadd.f32 %v13562_v35, %v6615_v23  ;;  %v6614_v41 = vadd.f32 %v6127_v28, %v17861_v44  ;;  %v13565_v6 = vpop.f32.mrf.mxu0  ;;  %13904 = vmatmul.mubr.msk.f32.gmra.mxu0 %vm838_vm2, %v21280_v45 }
 0x3a8   : > { %v13371_v60 = vpop.f32.mrf.mxu1  ;;  %13710 = vmatmul.mubr.msk.f32.gmra.mxu1 %vm838_vm2, %v21598_v3  ;;  %13906 = vmatprep.mubr.msk.f32.mxu0 %vm838_vm2, %v21282_v16  ;;  %v21603_v16 = vld [vmem:[#allocation156_spill] sm:$0xff]  ;;  %v21609_v3 = vld [vmem:[#allocation158_spill] sm:$0xff] }
 0x3a9   : > { %v18770_v59 = vadd.f32 %v6975_v25, %v6614_v41  ;;  %v6617_v46 = vadd.f32 %v13371_v60, %v17866_v21  ;;  %v6985_v57 = vpop.f32.mrf.mxu0  ;;  %13712 = vmatprep.mubr.msk.f32.mxu1 %vm838_vm2, %v21599_v56  ;;  %v21606_v25 = vld [vmem:[#allocation142_spill] sm:$0xff]  ;;  %v21607_v41 = vld [vmem:[#allocation157_spill] sm:$0xff]  ;;  %v21608_v60 = vld [vmem:[#allocation40_spill] sm:$0xff] }
 0x3aa   : > { %v6137_v44 = vpop.f32.mrf.mxu1 }
 0x3ab   : > { %v18775_v54 = vadd.f32 %v13565_v6, %v6617_v46  ;;  %v6616_v45 = vadd.f32 %v6137_v44, %v21600_v20  ;;  %v13568_v50 = vpop.f32.mrf.mxu0  ;;  %13907 = vmatmul.mubr.msk.f32.gmra.mxu0 %vm838_vm2, %v21601_v40  ;;  %v21611_v20 = vld [vmem:[#allocation42_spill] sm:$0xff]  ;;  %v21612_v40 = vld [vmem:[#allocation144_spill] sm:$0xff] }
 0x3ac   : > { %v13374_v42 = vpop.f32.mrf.mxu1  ;;  %13713 = vmatmul.mubr.msk.f32.gmra.mxu1 %vm838_vm2, %v21602_v38  ;;  %13909 = vmatprep.mubr.msk.f32.mxu0 %vm838_vm2, %v21603_v16  ;;  %v21613_v16 = vld [vmem:[#allocation159_spill] sm:$0xff] }
 0x3ad   : > { %v18784_v21 = vadd.f32 %v6985_v57, %v6616_v45  ;;  %v6619_v18 = vadd.f32 %v13374_v42, %v21604_v53  ;;  %v6995_v35 = vpop.f32.mrf.mxu0  ;;  %13715 = vmatprep.mubr.msk.f32.mxu1 %vm838_vm2, %v21605_v4  ;;  %v21610_v57 = vld [vmem:[#allocation143_spill] sm:$0xff] }
 0x3ae   : > { %v6147_v29 = vpop.f32.mrf.mxu1 }
 0x3af   : > { %v18789_v23 = vadd.f32 %v13568_v50, %v6619_v18  ;;  %v6618_v55 = vadd.f32 %v6147_v29, %v21606_v25  ;;  %v13571_v28 = vpop.f32.mrf.mxu0  ;;  %13910 = vmatmul.mubr.msk.f32.gmra.mxu0 %vm838_vm2, %v21607_v41  ;;  %v21614_v18 = vld [vmem:[#allocation44_spill] sm:$0xff]  ;;  %v21616_v29 = vld [vmem:[#allocation145_spill] sm:$0xff] }
 0x3b0   : > { %v13377_v6 = vpop.f32.mrf.mxu1  ;;  %13716 = vmatmul.mubr.msk.f32.gmra.mxu1 %vm838_vm2, %v21608_v60  ;;  %13912 = vmatprep.mubr.msk.f32.mxu0 %vm838_vm2, %v21609_v3  ;;  %v21618_v60 = vld [vmem:[#allocation146_spill] sm:$0xff] }
 0x3b1   : > { %v18798_v46 = vadd.f32 %v6995_v35, %v6618_v55  ;;  %v6621_v56 = vadd.f32 %v13377_v6, %v21610_v57  ;;  %v7005_v44 = vpop.f32.mrf.mxu0  ;;  %13718 = vmatprep.mubr.msk.f32.mxu1 %vm838_vm2, %v21611_v20  ;;  %v21615_v35 = vld [vmem:[#allocation160_spill] sm:$0xff] }
 0x3b2   : > { %v6157_v45 = vpop.f32.mrf.mxu1 }
 0x3b3   : > { %v18803_v50 = vadd.f32 %v13571_v28, %v6621_v56  ;;  %v6620_v42 = vadd.f32 %v6157_v45, %v21612_v40  ;;  %v13574_v38 = vpop.f32.mrf.mxu0  ;;  %13913 = vmatmul.mubr.msk.f32.gmra.mxu0 %vm838_vm2, %v21613_v16  ;;  %v21617_v28 = vld [vmem:[#allocation46_spill] sm:$0xff]  ;;  %v21619_v56 = vld [vmem:[#allocation161_spill] sm:$0xff]  ;;  %v21620_v45 = vld [vmem:[#allocation48_spill] sm:$0xff] }
 0x3b4   : > { %v13380_v53 = vpop.f32.mrf.mxu1  ;;  %13719 = vmatmul.mubr.msk.f32.gmra.mxu1 %vm838_vm2, %v21614_v18  ;;  %13915 = vmatprep.mubr.msk.f32.mxu0 %vm838_vm2, %v21615_v35 }
 0x3b5   : > { %v18812_v4 = vadd.f32 %v7005_v44, %v6620_v42  ;;  %v6623_v25 = vadd.f32 %v13380_v53, %v21616_v29  ;;  %v7015_v55 = vpop.f32.mrf.mxu0  ;;  %13721 = vmatprep.mubr.msk.f32.mxu1 %vm838_vm2, %v21617_v28  ;;  %v21621_v44 = vld [vmem:[#allocation162_spill] sm:$0xff]  ;;  %v21622_v42 = vld [vmem:[#allocation147_spill] sm:$0xff]  ;;  %v21625_v29 = vld [vmem:[#allocation148_spill] sm:$0xff] }
 0x3b6   : > { %v6167_v41 = vpop.f32.mrf.mxu1 }
 0x3b7   : > { %v18817_v6 = vadd.f32 %v13574_v38, %v6623_v25  ;;  %v6622_v3 = vadd.f32 %v6167_v41, %v21618_v60  ;;  %v13577_v57 = vpop.f32.mrf.mxu0  ;;  %13916 = vmatmul.mubr.msk.f32.gmra.mxu0 %vm838_vm2, %v21619_v56  ;;  %v21623_v38 = vld [vmem:[#allocation50_spill] sm:$0xff]  ;;  %v21626_v41 = vld [vmem:[#allocation163_spill] sm:$0xff]  ;;  %v21627_v56 = vld [vmem:[#allocation52_spill] sm:$0xff] }
 0x3b8   : > { %v13383_v20 = vpop.f32.mrf.mxu1  ;;  %13722 = vmatmul.mubr.msk.f32.gmra.mxu1 %vm838_vm2, %v21620_v45  ;;  %13918 = vmatprep.mubr.msk.f32.mxu0 %vm838_vm2, %v21621_v44 }
 0x3b9   : > { %v18826_v40 = vadd.f32 %v7015_v55, %v6622_v3  ;;  %v6625_v16 = vadd.f32 %v13383_v20, %v21622_v42  ;;  %v7025_v53 = vpop.f32.mrf.mxu0  ;;  %13724 = vmatprep.mubr.msk.f32.mxu1 %vm838_vm2, %v21623_v38  ;;  %v21628_v55 = vld [vmem:[#allocation164_spill] sm:$0xff]  ;;  %v21630_v20 = vld [vmem:[#allocation149_spill] sm:$0xff]  ;;  %v21633_v38 = vld [vmem:[#allocation150_spill] sm:$0xff] }
 0x3ba   : > { %v6177_v18 = vpop.f32.mrf.mxu1 }
 0x3bb   : > { %v18831_v35 = vadd.f32 %v13577_v57, %v6625_v16  ;;  %v6624_v25 = vadd.f32 %v6177_v18, %v21625_v29  ;;  %v13580_v28 = vpop.f32.mrf.mxu0  ;;  %13919 = vmatmul.mubr.msk.f32.gmra.mxu0 %vm838_vm2, %v21626_v41  ;;  %v21631_v57 = vld [vmem:[#allocation54_spill] sm:$0xff]  ;;  %v21634_v41 = vld [vmem:[#allocation165_spill] sm:$0xff] }
 0x3bc   : > { %v13386_v60 = vpop.f32.mrf.mxu1  ;;  %13725 = vmatmul.mubr.msk.f32.gmra.mxu1 %vm838_vm2, %v21627_v56  ;;  %13921 = vmatprep.mubr.msk.f32.mxu0 %vm838_vm2, %v21628_v55 }
 0x3bd   : > { %21624 = vst [vmem:[#allocation324_spill] sm:$0xff] %v18831_v35  ;;  %v18840_v3 = vadd.f32 %v7025_v53, %v6624_v25  ;;  %v6627_v45 = vadd.f32 %v13386_v60, %v21630_v20  ;;  %v7035_v44 = vpop.f32.mrf.mxu0  ;;  %13727 = vmatprep.mubr.msk.f32.mxu1 %vm838_vm2, %v21631_v57  ;;  %v21635_v35 = vld [vmem:[#allocation56_spill] sm:$0xff]  ;;  %v21636_v53 = vld [vmem:[#allocation166_spill] sm:$0xff]  ;;  %v21638_v60 = vld [vmem:[#allocation151_spill] sm:$0xff] }
 0x3be   : > { %v6187_v42 = vpop.f32.mrf.mxu1 }
 0x3bf   : > { %21629 = vst [vmem:[#allocation274_spill] sm:$0xff] %v18840_v3  ;;  %v18845_v16 = vadd.f32 %v13580_v28, %v6627_v45  ;;  %v6626_v18 = vadd.f32 %v6187_v42, %v21633_v38  ;;  %v13583_v29 = vpop.f32.mrf.mxu0  ;;  %13922 = vmatmul.mubr.msk.f32.gmra.mxu0 %vm838_vm2, %v21634_v41  ;;  %v21639_v28 = vld [vmem:[#allocation58_spill] sm:$0xff]  ;;  %v21641_v42 = vld [vmem:[#allocation152_spill] sm:$0xff] }
 0x3c0   : > { %v13389_v56 = vpop.f32.mrf.mxu1  ;;  %13728 = vmatmul.mubr.msk.f32.gmra.mxu1 %vm838_vm2, %v21635_v35  ;;  %13924 = vmatprep.mubr.msk.f32.mxu0 %vm838_vm2, %v21636_v53  ;;  %v21643_v3 = vld [vmem:[#allocation60_spill] sm:$0xff] }
 0x3c1   : > { %21632 = vst [vmem:[#allocation278_spill] sm:$0xff] %v18845_v16  ;;  %v18854_v25 = vadd.f32 %v7035_v44, %v6626_v18  ;;  %v6629_v55 = vadd.f32 %v13389_v56, %v21638_v60  ;;  %v7045_v20 = vpop.f32.mrf.mxu0  ;;  %13730 = vmatprep.mubr.msk.f32.mxu1 %vm838_vm2, %v21639_v28  ;;  %v21642_v16 = vld [vmem:[#allocation167_spill] sm:$0xff]  ;;  %v21644_v44 = vld [vmem:[#allocation168_spill] sm:$0xff]  ;;  %v21646_v56 = vld [vmem:[#allocation153_spill] sm:$0xff] }
 0x3c2   : > { %v6197_v45 = vpop.f32.mrf.mxu1 }
 0x3c3   : > { %21637 = vst [vmem:[#allocation280_spill] sm:$0xff] %v18854_v25  ;;  %v18859_v57 = vadd.f32 %v13583_v29, %v6629_v55  ;;  %v6628_v38 = vadd.f32 %v6197_v45, %v21641_v42  ;;  %v13586_v41 = vpop.f32.mrf.mxu0  ;;  %13925 = vmatmul.mubr.msk.f32.gmra.mxu0 %vm838_vm2, %v21642_v16  ;;  %v21647_v29 = vld [vmem:[#allocation62_spill] sm:$0xff]  ;;  %v21651_v25 = vld [vmem:[#allocation64_spill] sm:$0xff] }
 0x3c4   : > { %v13392_v35 = vpop.f32.mrf.mxu1  ;;  %13731 = vmatmul.mubr.msk.f32.gmra.mxu1 %vm838_vm2, %v21643_v3  ;;  %13927 = vmatprep.mubr.msk.f32.mxu0 %vm838_vm2, %v21644_v44  ;;  %v21649_v45 = vld [vmem:[#allocation154_spill] sm:$0xff] }
 0x3c5   : > { %21640 = vst [vmem:[#allocation284_spill] sm:$0xff] %v18859_v57  ;;  %v18868_v18 = vadd.f32 %v7045_v20, %v6628_v38  ;;  %v6631_v53 = vadd.f32 %v13392_v35, %v21646_v56  ;;  %v7055_v60 = vpop.f32.mrf.mxu0  ;;  %13733 = vmatprep.mubr.msk.f32.mxu1 %vm838_vm2, %v21647_v29  ;;  %v21650_v57 = vld [vmem:[#allocation169_spill] sm:$0xff]  ;;  %v21652_v20 = vld [vmem:[#allocation170_spill] sm:$0xff] }
 0x3c6   : > { %v6207_v55 = vpop.f32.mrf.mxu1  ;;  %v21654_v35 = vld [vmem:[#allocation6_spill] sm:$0xff] }
 0x3c7   : > { %21645 = vst [vmem:[#allocation286_spill] sm:$0xff] %v18868_v18  ;;  %v18873_v28 = vadd.f32 %v13586_v41, %v6631_v53  ;;  %v6630_v16 = vadd.f32 %v6207_v55, %v21649_v45  ;;  %v13589_v42 = vpop.f32.mrf.mxu0  ;;  %13928 = vmatmul.mubr.msk.f32.gmra.mxu0 %vm838_vm2, %v21650_v57  ;;  %v21655_v41 = vld [vmem:[#allocation66_spill] sm:$0xff]  ;;  %v21657_v55 = vld [vmem:[#allocation8_spill] sm:$0xff] }
 0x3c8   : > { %v13395_v3 = vpop.f32.mrf.mxu1  ;;  %13734 = vmatmul.mubr.msk.f32.gmra.mxu1 %vm838_vm2, %v21651_v25  ;;  %13930 = vmatprep.mubr.msk.f32.mxu0 %vm838_vm2, %v21652_v20  ;;  %v21659_v18 = vld [vmem:[#allocation68_spill] sm:$0xff] }
 0x3c9   : > { %21648 = vst [vmem:[#allocation290_spill] sm:$0xff] %v18873_v28  ;;  %v18882_v38 = vadd.f32 %v7055_v60, %v6630_v16  ;;  %v6633_v44 = vadd.f32 %v13395_v3, %v21654_v35  ;;  %v7065_v56 = vpop.f32.mrf.mxu0  ;;  %13736 = vmatprep.mubr.msk.f32.mxu1 %vm838_vm2, %v21655_v41  ;;  %v21658_v28 = vld [vmem:[#allocation172_spill] sm:$0xff]  ;;  %v21660_v60 = vld [vmem:[#allocation173_spill] sm:$0xff]  ;;  %v21662_v3 = vld [vmem:[#allocation10_spill] sm:$0xff] }
 0x3ca   : > { %v6217_v53 = vpop.f32.mrf.mxu1 }
 0x3cb   : > { %21653 = vst [vmem:[#allocation292_spill] sm:$0xff] %v18882_v38  ;;  %v18887_v29 = vadd.f32 %v13589_v42, %v6633_v44  ;;  %v6632_v57 = vadd.f32 %v6217_v53, %v21657_v55  ;;  %v13592_v45 = vpop.f32.mrf.mxu0  ;;  %13931 = vmatmul.mubr.msk.f32.gmra.mxu0 %vm838_vm2, %v21658_v28  ;;  %v21663_v42 = vld [vmem:[#allocation70_spill] sm:$0xff]  ;;  %v21665_v53 = vld [vmem:[#allocation12_spill] sm:$0xff] }
 0x3cc   : > { %v13398_v25 = vpop.f32.mrf.mxu1  ;;  %13737 = vmatmul.mubr.msk.f32.gmra.mxu1 %vm838_vm2, %v21659_v18  ;;  %13933 = vmatprep.mubr.msk.f32.mxu0 %vm838_vm2, %v21660_v60  ;;  %v21667_v38 = vld [vmem:[#allocation72_spill] sm:$0xff] }
 0x3cd   : > { %21656 = vst [vmem:[#allocation296_spill] sm:$0xff] %v18887_v29  ;;  %v18896_v16 = vadd.f32 %v7065_v56, %v6632_v57  ;;  %v6635_v20 = vadd.f32 %v13398_v25, %v21662_v3  ;;  %v7075_v35 = vpop.f32.mrf.mxu0  ;;  %13739 = vmatprep.mubr.msk.f32.mxu1 %vm838_vm2, %v21663_v42  ;;  %v21666_v29 = vld [vmem:[#allocation176_spill] sm:$0xff]  ;;  %v21668_v56 = vld [vmem:[#allocation177_spill] sm:$0xff] }
 0x3ce   : > { %v6227_v44 = vpop.f32.mrf.mxu1  ;;  %v21670_v25 = vld [vmem:[#allocation237_spill] sm:$0xff] }
 0x3cf   : > { %21661 = vst [vmem:[#allocation337_spill] sm:$0xff] %v18896_v16  ;;  %v18901_v41 = vadd.f32 %v13592_v45, %v6635_v20  ;;  %v6634_v28 = vadd.f32 %v6227_v44, %v21665_v53  ;;  %v13595_v55 = vpop.f32.mrf.mxu0  ;;  %13934 = vmatmul.mubr.msk.f32.gmra.mxu0 %vm838_vm2, %v21666_v29  ;;  %v21671_v45 = vld [vmem:[#allocation74_spill] sm:$0xff]  ;;  %v21673_v44 = vld [vmem:[#allocation240_spill] sm:$0xff] }
 0x3d0   : > { %v13401_v18 = vpop.f32.mrf.mxu1  ;;  %13740 = vmatmul.mubr.msk.f32.gmra.mxu1 %vm838_vm2, %v21667_v38  ;;  %13936 = vmatprep.mubr.msk.f32.mxu0 %vm838_vm2, %v21668_v56  ;;  %v21675_v16 = vld [vmem:[#allocation76_spill] sm:$0xff] }
 0x3d1   : > { %21664 = vst [vmem:[#allocation14_spill] sm:$0xff] %v18901_v41  ;;  %v18910_v57 = vadd.f32 %v7075_v35, %v6634_v28  ;;  %v6637_v60 = vadd.f32 %v13401_v18, %v21670_v25  ;;  %v7085_v3 = vpop.f32.mrf.mxu0  ;;  %13742 = vmatprep.mubr.msk.f32.mxu1 %vm838_vm2, %v21671_v45  ;;  %v21674_v41 = vld [vmem:[#allocation180_spill] sm:$0xff]  ;;  %v21676_v35 = vld [vmem:[#allocation181_spill] sm:$0xff]  ;;  %v21678_v18 = vld [vmem:[#allocation243_spill] sm:$0xff] }
 0x3d2   : > { %v6237_v20 = vpop.f32.mrf.mxu1 }
 0x3d3   : > { %21669 = vst [vmem:[#allocation16_spill] sm:$0xff] %v18910_v57  ;;  %v18915_v42 = vadd.f32 %v13595_v55, %v6637_v60  ;;  %v6636_v29 = vadd.f32 %v6237_v20, %v21673_v44  ;;  %v13598_v53 = vpop.f32.mrf.mxu0  ;;  %13937 = vmatmul.mubr.msk.f32.gmra.mxu0 %vm838_vm2, %v21674_v41  ;;  %v21679_v55 = vld [vmem:[#allocation78_spill] sm:$0xff]  ;;  %v21683_v57 = vld [vmem:[#allocation80_spill] sm:$0xff] }
 0x3d4   : > { %v13404_v38 = vpop.f32.mrf.mxu1  ;;  %13743 = vmatmul.mubr.msk.f32.gmra.mxu1 %vm838_vm2, %v21675_v16  ;;  %13939 = vmatprep.mubr.msk.f32.mxu0 %vm838_vm2, %v21676_v35  ;;  %v21681_v20 = vld [vmem:[#allocation246_spill] sm:$0xff] }
 0x3d5   : > { %21672 = vst [vmem:[#allocation18_spill] sm:$0xff] %v18915_v42  ;;  %v18924_v28 = vadd.f32 %v7085_v3, %v6636_v29  ;;  %v6639_v56 = vadd.f32 %v13404_v38, %v21678_v18  ;;  %v7095_v25 = vpop.f32.mrf.mxu0  ;;  %13745 = vmatprep.mubr.msk.f32.mxu1 %vm838_vm2, %v21679_v55  ;;  %v21682_v42 = vld [vmem:[#allocation184_spill] sm:$0xff]  ;;  %v21684_v3 = vld [vmem:[#allocation185_spill] sm:$0xff] }
 0x3d6   : > { %v6247_v60 = vpop.f32.mrf.mxu1  ;;  %v21686_v38 = vld [vmem:[#allocation249_spill] sm:$0xff] }
 0x3d7   : > { %21677 = vst [vmem:[#allocation20_spill] sm:$0xff] %v18924_v28  ;;  %v18929_v45 = vadd.f32 %v13598_v53, %v6639_v56  ;;  %v6638_v41 = vadd.f32 %v6247_v60, %v21681_v20  ;;  %v13601_v44 = vpop.f32.mrf.mxu0  ;;  %13940 = vmatmul.mubr.msk.f32.gmra.mxu0 %vm838_vm2, %v21682_v42  ;;  %v21687_v53 = vld [vmem:[#allocation82_spill] sm:$0xff]  ;;  %v21689_v60 = vld [vmem:[#allocation252_spill] sm:$0xff] }
 0x3d8   : > { %v13407_v16 = vpop.f32.mrf.mxu1  ;;  %13746 = vmatmul.mubr.msk.f32.gmra.mxu1 %vm838_vm2, %v21683_v57  ;;  %13942 = vmatprep.mubr.msk.f32.mxu0 %vm838_vm2, %v21684_v3  ;;  %v21691_v28 = vld [vmem:[#allocation84_spill] sm:$0xff] }
 0x3d9   : > { %21680 = vst [vmem:[#allocation22_spill] sm:$0xff] %v18929_v45  ;;  %v18938_v29 = vadd.f32 %v7095_v25, %v6638_v41  ;;  %v6641_v35 = vadd.f32 %v13407_v16, %v21686_v38  ;;  %v7105_v18 = vpop.f32.mrf.mxu0  ;;  %13748 = vmatprep.mubr.msk.f32.mxu1 %vm838_vm2, %v21687_v53  ;;  %v21690_v45 = vld [vmem:[#allocation188_spill] sm:$0xff]  ;;  %v21692_v25 = vld [vmem:[#allocation189_spill] sm:$0xff]  ;;  %v21694_v16 = vld [vmem:[#allocation255_spill] sm:$0xff] }
 0x3da   : > { %v6257_v56 = vpop.f32.mrf.mxu1 }
 0x3db   : > { %21685 = vst [vmem:[#allocation24_spill] sm:$0xff] %v18938_v29  ;;  %v18943_v55 = vadd.f32 %v13601_v44, %v6641_v35  ;;  %v6640_v42 = vadd.f32 %v6257_v56, %v21689_v60  ;;  %v13604_v20 = vpop.f32.mrf.mxu0  ;;  %13943 = vmatmul.mubr.msk.f32.gmra.mxu0 %vm838_vm2, %v21690_v45  ;;  %v21695_v44 = vld [vmem:[#allocation86_spill] sm:$0xff]  ;;  %v21699_v29 = vld [vmem:[#allocation89_spill] sm:$0xff] }
 0x3dc   : > { %v13410_v57 = vpop.f32.mrf.mxu1  ;;  %13749 = vmatmul.mubr.msk.f32.gmra.mxu1 %vm838_vm2, %v21691_v28  ;;  %13945 = vmatprep.mubr.msk.f32.mxu0 %vm838_vm2, %v21692_v25  ;;  %v21697_v56 = vld [vmem:[#allocation258_spill] sm:$0xff] }
 0x3dd   : > { %21688 = vst [vmem:[#allocation26_spill] sm:$0xff] %v18943_v55  ;;  %v18952_v41 = vadd.f32 %v7105_v18, %v6640_v42  ;;  %v6643_v3 = vadd.f32 %v13410_v57, %v21694_v16  ;;  %v7115_v38 = vpop.f32.mrf.mxu0  ;;  %13751 = vmatprep.mubr.msk.f32.mxu1 %vm838_vm2, %v21695_v44  ;;  %v21698_v55 = vld [vmem:[#allocation192_spill] sm:$0xff]  ;;  %v21700_v18 = vld [vmem:[#allocation193_spill] sm:$0xff] }
 0x3de   : > { %v6267_v35 = vpop.f32.mrf.mxu1  ;;  %v21702_v57 = vld [vmem:[#allocation261_spill] sm:$0xff] }
 0x3df   : > { %21693 = vst [vmem:[#allocation28_spill] sm:$0xff] %v18952_v41  ;;  %v18957_v53 = vadd.f32 %v13604_v20, %v6643_v3  ;;  %v6642_v45 = vadd.f32 %v6267_v35, %v21697_v56  ;;  %v13607_v60 = vpop.f32.mrf.mxu0  ;;  %13946 = vmatmul.mubr.msk.f32.gmra.mxu0 %vm838_vm2, %v21698_v55  ;;  %v21703_v20 = vld [vmem:[#allocation91_spill] sm:$0xff]  ;;  %v21705_v35 = vld [vmem:[#allocation264_spill] sm:$0xff] }
 0x3e0   : > { %v13413_v28 = vpop.f32.mrf.mxu1  ;;  %13752 = vmatmul.mubr.msk.f32.gmra.mxu1 %vm838_vm2, %v21699_v29  ;;  %13948 = vmatprep.mubr.msk.f32.mxu0 %vm838_vm2, %v21700_v18  ;;  %v21707_v41 = vld [vmem:[#allocation95_spill] sm:$0xff] }
 0x3e1   : > { %21696 = vst [vmem:[#allocation30_spill] sm:$0xff] %v18957_v53  ;;  %v18966_v42 = vadd.f32 %v7115_v38, %v6642_v45  ;;  %v6645_v25 = vadd.f32 %v13413_v28, %v21702_v57  ;;  %v7125_v16 = vpop.f32.mrf.mxu0  ;;  %13754 = vmatprep.mubr.msk.f32.mxu1 %vm838_vm2, %v21703_v20  ;;  %v21706_v53 = vld [vmem:[#allocation195_spill] sm:$0xff]  ;;  %v21708_v38 = vld [vmem:[#allocation92_spill] sm:$0xff] }
 0x3e2   : > { %v6277_v3 = vpop.f32.mrf.mxu1  ;;  %v21710_v28 = vld [vmem:[#allocation267_spill] sm:$0xff] }
 0x3e3   : > { %21701 = vst [vmem:[#allocation32_spill] sm:$0xff] %v18966_v42  ;;  %v18971_v44 = vadd.f32 %v13607_v60, %v6645_v25  ;;  %v6644_v55 = vadd.f32 %v6277_v3, %v21705_v35  ;;  %v13610_v56 = vpop.f32.mrf.mxu0  ;;  %13949 = vmatmul.mubr.msk.f32.gmra.mxu0 %vm838_vm2, %v21706_v53  ;;  %v21711_v60 = vld [vmem:[#allocation97_spill] sm:$0xff]  ;;  %v21713_v3 = vld [vmem:[#allocation270_spill] sm:$0xff] }
 0x3e4   : > { %v13416_v29 = vpop.f32.mrf.mxu1  ;;  %13755 = vmatmul.mubr.msk.f32.gmra.mxu1 %vm838_vm2, %v21707_v41  ;;  %13951 = vmatprep.mubr.msk.f32.mxu0 %vm838_vm2, %v21708_v38  ;;  %v21715_v42 = vld [vmem:[#allocation102_spill] sm:$0xff] }
 0x3e5   : > { %21704 = vst [vmem:[#allocation34_spill] sm:$0xff] %v18971_v44  ;;  %v18980_v45 = vadd.f32 %v7125_v16, %v6644_v55  ;;  %v6647_v18 = vadd.f32 %v13416_v29, %v21710_v28  ;;  %v7135_v57 = vpop.f32.mrf.mxu0  ;;  %13757 = vmatprep.mubr.msk.f32.mxu1 %vm838_vm2, %v21711_v60  ;;  %v21714_v44 = vld [vmem:[#allocation196_spill] sm:$0xff]  ;;  %v21716_v16 = vld [vmem:[#allocation197_spill] sm:$0xff] }
 0x3e6   : > { %v6287_v25 = vpop.f32.mrf.mxu1  ;;  %v21718_v29 = vld [vmem:[#allocation273_spill] sm:$0xff] }
 0x3e7   : > { %21709 = vst [vmem:[#allocation140_spill] sm:$0xff] %v18980_v45  ;;  %v18985_v20 = vadd.f32 %v13610_v56, %v6647_v18  ;;  %v6646_v53 = vadd.f32 %v6287_v25, %v21713_v3  ;;  %v13613_v35 = vpop.f32.mrf.mxu0  ;;  %13952 = vmatmul.mubr.msk.f32.gmra.mxu0 %vm838_vm2, %v21714_v44  ;;  %v21719_v56 = vld [vmem:[#allocation104_spill] sm:$0xff] }
 0x3e8   : > { %v13419_v41 = vpop.f32.mrf.mxu1  ;;  %13758 = vmatmul.mubr.msk.f32.gmra.mxu1 %vm838_vm2, %v21715_v42  ;;  %13954 = vmatprep.mubr.msk.f32.mxu0 %vm838_vm2, %v21716_v16  ;;  %v21721_v25 = vld [vmem:[#allocation276_spill] sm:$0xff] }
 0x3e9   : > { %21712 = vst [vmem:[#allocation155_spill] sm:$0xff] %v18985_v20  ;;  %v18994_v55 = vadd.f32 %v7135_v57, %v6646_v53  ;;  %v6649_v38 = vadd.f32 %v13419_v41, %v21718_v29  ;;  %v7145_v28 = vpop.f32.mrf.mxu0  ;;  %13760 = vmatprep.mubr.msk.f32.mxu1 %vm838_vm2, %v21719_v56  ;;  %v21722_v20 = vld [vmem:[#allocation198_spill] sm:$0xff]  ;;  %v21723_v45 = vld [vmem:[#allocation108_spill] sm:$0xff]  ;;  %v21724_v57 = vld [vmem:[#allocation105_spill] sm:$0xff] }
 0x3ea   : > { %v6297_v18 = vpop.f32.mrf.mxu1  ;;  %v21726_v41 = vld [vmem:[#allocation279_spill] sm:$0xff] }
 0x3eb   : > { %21717 = vst [vmem:[#allocation36_spill] sm:$0xff] %v18994_v55  ;;  %v18999_v60 = vadd.f32 %v13613_v35, %v6649_v38  ;;  %v6648_v44 = vadd.f32 %v6297_v18, %v21721_v25  ;;  %v13616_v3 = vpop.f32.mrf.mxu0  ;;  %13955 = vmatmul.mubr.msk.f32.gmra.mxu0 %vm838_vm2, %v21722_v20  ;;  %v21727_v35 = vld [vmem:[#allocation110_spill] sm:$0xff]  ;;  %v21731_v55 = vld [vmem:[#allocation115_spill] sm:$0xff] }
 0x3ec   : > { %v13422_v42 = vpop.f32.mrf.mxu1  ;;  %13761 = vmatmul.mubr.msk.f32.gmra.mxu1 %vm838_vm2, %v21723_v45  ;;  %13957 = vmatprep.mubr.msk.f32.mxu0 %vm838_vm2, %v21724_v57  ;;  %v21729_v18 = vld [vmem:[#allocation282_spill] sm:$0xff] }
 0x3ed   : > { %21720 = vst [vmem:[#allocation156_spill] sm:$0xff] %v18999_v60  ;;  %v19008_v53 = vadd.f32 %v7145_v28, %v6648_v44  ;;  %v6651_v16 = vadd.f32 %v13422_v42, %v21726_v41  ;;  %v7155_v29 = vpop.f32.mrf.mxu0  ;;  %13763 = vmatprep.mubr.msk.f32.mxu1 %vm838_vm2, %v21727_v35  ;;  %v21730_v60 = vld [vmem:[#allocation199_spill] sm:$0xff]  ;;  %v21732_v28 = vld [vmem:[#allocation200_spill] sm:$0xff]  ;;  %v21734_v42 = vld [vmem:[#allocation285_spill] sm:$0xff] }
 0x3ee   : > { %v6307_v38 = vpop.f32.mrf.mxu1 }
 0x3ef   : > { %21725 = vst [vmem:[#allocation141_spill] sm:$0xff] %v19008_v53  ;;  %v19013_v56 = vadd.f32 %v13616_v3, %v6651_v16  ;;  %v6650_v20 = vadd.f32 %v6307_v38, %v21729_v18  ;;  %v13619_v25 = vpop.f32.mrf.mxu0  ;;  %13958 = vmatmul.mubr.msk.f32.gmra.mxu0 %vm838_vm2, %v21730_v60  ;;  %v21735_v3 = vld [vmem:[#allocation117_spill] sm:$0xff]  ;;  %v21737_v38 = vld [vmem:[#allocation288_spill] sm:$0xff] }
 0x3f0   : > { %v13425_v45 = vpop.f32.mrf.mxu1  ;;  %13764 = vmatmul.mubr.msk.f32.gmra.mxu1 %vm838_vm2, %v21731_v55  ;;  %13960 = vmatprep.mubr.msk.f32.mxu0 %vm838_vm2, %v21732_v28  ;;  %v21739_v53 = vld [vmem:[#allocation121_spill] sm:$0xff] }
 0x3f1   : > { %21728 = vst [vmem:[#allocation38_spill] sm:$0xff] %v19013_v56  ;;  %v19022_v44 = vadd.f32 %v7155_v29, %v6650_v20  ;;  %v6653_v57 = vadd.f32 %v13425_v45, %v21734_v42  ;;  %v7165_v41 = vpop.f32.mrf.mxu0  ;;  %13766 = vmatprep.mubr.msk.f32.mxu1 %vm838_vm2, %v21735_v3  ;;  %v21738_v56 = vld [vmem:[#allocation201_spill] sm:$0xff]  ;;  %v21740_v29 = vld [vmem:[#allocation118_spill] sm:$0xff]  ;;  %v21742_v45 = vld [vmem:[#allocation291_spill] sm:$0xff] }
 0x3f2   : > { %v6317_v16 = vpop.f32.mrf.mxu1 }
 0x3f3   : > { %21733 = vst [vmem:[#allocation142_spill] sm:$0xff] %v19022_v44  ;;  %v19027_v35 = vadd.f32 %v13619_v25, %v6653_v57  ;;  %v6652_v60 = vadd.f32 %v6317_v16, %v21737_v38  ;;  %v13622_v18 = vpop.f32.mrf.mxu0  ;;  %13961 = vmatmul.mubr.msk.f32.gmra.mxu0 %vm838_vm2, %v21738_v56  ;;  %v21743_v25 = vld [vmem:[#allocation123_spill] sm:$0xff]  ;;  %v21745_v16 = vld [vmem:[#allocation294_spill] sm:$0xff] }
 0x3f4   : > { %v13428_v55 = vpop.f32.mrf.mxu1  ;;  %13767 = vmatmul.mubr.msk.f32.gmra.mxu1 %vm838_vm2, %v21739_v53  ;;  %13963 = vmatprep.mubr.msk.f32.mxu0 %vm838_vm2, %v21740_v29  ;;  %v21747_v44 = vld [vmem:[#allocation126_spill] sm:$0xff] }
 0x3f5   : > { %21736 = vst [vmem:[#allocation157_spill] sm:$0xff] %v19027_v35  ;;  %v19036_v20 = vadd.f32 %v7165_v41, %v6652_v60  ;;  %v6655_v28 = vadd.f32 %v13428_v55, %v21742_v45  ;;  %v7175_v42 = vpop.f32.mrf.mxu0  ;;  %13769 = vmatprep.mubr.msk.f32.mxu1 %vm838_vm2, %v21743_v25  ;;  %v21746_v35 = vld [vmem:[#allocation202_spill] sm:$0xff]  ;;  %v21748_v41 = vld [vmem:[#allocation203_spill] sm:$0xff]  ;;  %v21750_v55 = vld [vmem:[#allocation297_spill] sm:$0xff] }
 0x3f6   : > { %v6327_v57 = vpop.f32.mrf.mxu1 }
 0x3f7   : > { %21741 = vst [vmem:[#allocation40_spill] sm:$0xff] %v19036_v20  ;;  %v19041_v3 = vadd.f32 %v13622_v18, %v6655_v28  ;;  %v6654_v56 = vadd.f32 %v6327_v57, %v21745_v16  ;;  %v13625_v38 = vpop.f32.mrf.mxu0  ;;  %13964 = vmatmul.mubr.msk.f32.gmra.mxu0 %vm838_vm2, %v21746_v35  ;;  %v21751_v18 = vld [vmem:[#allocation128_spill] sm:$0xff]  ;;  %v21755_v20 = vld [vmem:[#allocation130_spill] sm:$0xff] }
 0x3f8   : > { %v13431_v53 = vpop.f32.mrf.mxu1  ;;  %13770 = vmatmul.mubr.msk.f32.gmra.mxu1 %vm838_vm2, %v21747_v44  ;;  %13966 = vmatprep.mubr.msk.f32.mxu0 %vm838_vm2, %v21748_v41  ;;  %v21753_v57 = vld [vmem:[#allocation300_spill] sm:$0xff] }
 0x3f9   : > { %21744 = vst [vmem:[#allocation158_spill] sm:$0xff] %v19041_v3  ;;  %v19050_v60 = vadd.f32 %v7175_v42, %v6654_v56  ;;  %v6657_v29 = vadd.f32 %v13431_v53, %v21750_v55  ;;  %v7185_v45 = vpop.f32.mrf.mxu0  ;;  %13772 = vmatprep.mubr.msk.f32.mxu1 %vm838_vm2, %v21751_v18  ;;  %v21754_v3 = vld [vmem:[#allocation206_spill] sm:$0xff]  ;;  %v21756_v42 = vld [vmem:[#allocation207_spill] sm:$0xff] }
 0x3fa   : > { %v6337_v28 = vpop.f32.mrf.mxu1  ;;  %v21758_v53 = vld [vmem:[#allocation303_spill] sm:$0xff] }
 0x3fb   : > { %21749 = vst [vmem:[#allocation143_spill] sm:$0xff] %v19050_v60  ;;  %v19055_v25 = vadd.f32 %v13625_v38, %v6657_v29  ;;  %v6656_v35 = vadd.f32 %v6337_v28, %v21753_v57  ;;  %v13628_v16 = vpop.f32.mrf.mxu0  ;;  %13967 = vmatmul.mubr.msk.f32.gmra.mxu0 %vm838_vm2, %v21754_v3  ;;  %v21759_v38 = vld [vmem:[#allocation132_spill] sm:$0xff]  ;;  %v21761_v28 = vld [vmem:[#allocation306_spill] sm:$0xff] }
 0x3fc   : > { %v13434_v44 = vpop.f32.mrf.mxu1  ;;  %13773 = vmatmul.mubr.msk.f32.gmra.mxu1 %vm838_vm2, %v21755_v20  ;;  %13969 = vmatprep.mubr.msk.f32.mxu0 %vm838_vm2, %v21756_v42  ;;  %v21763_v60 = vld [vmem:[#allocation134_spill] sm:$0xff] }
 0x3fd   : > { %21752 = vst [vmem:[#allocation42_spill] sm:$0xff] %v19055_v25  ;;  %v19064_v56 = vadd.f32 %v7185_v45, %v6656_v35  ;;  %v6659_v41 = vadd.f32 %v13434_v44, %v21758_v53  ;;  %v7195_v55 = vpop.f32.mrf.mxu0  ;;  %13775 = vmatprep.mubr.msk.f32.mxu1 %vm838_vm2, %v21759_v38  ;;  %v21762_v25 = vld [vmem:[#allocation210_spill] sm:$0xff]  ;;  %v21764_v45 = vld [vmem:[#allocation211_spill] sm:$0xff] }
 0x3fe   : > { %v6347_v29 = vpop.f32.mrf.mxu1  ;;  %v21766_v44 = vld [vmem:[#allocation171_spill] sm:$0xff] }
 0x3ff   : > { %21757 = vst [vmem:[#allocation144_spill] sm:$0xff] %v19064_v56  ;;  %v19069_v18 = vadd.f32 %v13628_v16, %v6659_v41  ;;  %v6658_v3 = vadd.f32 %v6347_v29, %v21761_v28  ;;  %v13631_v57 = vpop.f32.mrf.mxu0  ;;  %13970 = vmatmul.mubr.msk.f32.gmra.mxu0 %vm838_vm2, %v21762_v25  ;;  %v21767_v16 = vld [vmem:[#allocation136_spill] sm:$0xff]  ;;  %v21769_v29 = vld [vmem:[#allocation174_spill] sm:$0xff] }
 0x400   : > { %v13437_v20 = vpop.f32.mrf.mxu1  ;;  %13776 = vmatmul.mubr.msk.f32.gmra.mxu1 %vm838_vm2, %v21763_v60  ;;  %13972 = vmatprep.mubr.msk.f32.mxu0 %vm838_vm2, %v21764_v45  ;;  %v21771_v56 = vld [vmem:[#allocation138_spill] sm:$0xff] }
 0x401   : > { %21760 = vst [vmem:[#allocation159_spill] sm:$0xff] %v19069_v18  ;;  %v19078_v35 = vadd.f32 %v7195_v55, %v6658_v3  ;;  %v6661_v42 = vadd.f32 %v13437_v20, %v21766_v44  ;;  %v7205_v53 = vpop.f32.mrf.mxu0  ;;  %13778 = vmatprep.mubr.msk.f32.mxu1 %vm838_vm2, %v21767_v16  ;;  %v21770_v18 = vld [vmem:[#allocation214_spill] sm:$0xff]  ;;  %v21772_v55 = vld [vmem:[#allocation215_spill] sm:$0xff] }
 0x402   : > { %v6357_v41 = vpop.f32.mrf.mxu1  ;;  %v21774_v20 = vld [vmem:[#allocation175_spill] sm:$0xff] }
 0x403   : > { %21765 = vst [vmem:[#allocation44_spill] sm:$0xff] %v19078_v35  ;;  %v19083_v38 = vadd.f32 %v13631_v57, %v6661_v42  ;;  %v6660_v25 = vadd.f32 %v6357_v41, %v21769_v29  ;;  %v13634_v28 = vpop.f32.mrf.mxu0  ;;  %13973 = vmatmul.mubr.msk.f32.gmra.mxu0 %vm838_vm2, %v21770_v18  ;;  %v21775_v57 = vld [vmem:[#allocation2_spill] sm:$0xff]  ;;  %v21779_v35 = vld [vmem:[#allocation3_spill] sm:$0xff] }
 0x404   : > { %v13440_v60 = vpop.f32.mrf.mxu1  ;;  %13779 = vmatmul.mubr.msk.f32.gmra.mxu1 %vm838_vm2, %v21771_v56  ;;  %13975 = vmatprep.mubr.msk.f32.mxu0 %vm838_vm2, %v21772_v55  ;;  %v21777_v41 = vld [vmem:[#allocation178_spill] sm:$0xff] }
 0x405   : > { %21768 = vst [vmem:[#allocation160_spill] sm:$0xff] %v19083_v38  ;;  %v19092_v3 = vadd.f32 %v7205_v53, %v6660_v25  ;;  %v6663_v45 = vadd.f32 %v13440_v60, %v21774_v20  ;;  %v7215_v44 = vpop.f32.mrf.mxu0  ;;  %13781 = vmatprep.mubr.msk.f32.mxu1 %vm838_vm2, %v21775_v57  ;;  %v21778_v38 = vld [vmem:[#allocation218_spill] sm:$0xff]  ;;  %v21780_v53 = vld [vmem:[#allocation219_spill] sm:$0xff] }
 0x406   : > { %v6367_v42 = vpop.f32.mrf.mxu1  ;;  %v21782_v60 = vld [vmem:[#allocation179_spill] sm:$0xff] }
 0x407   : > { %21773 = vst [vmem:[#allocation145_spill] sm:$0xff] %v19092_v3  ;;  %v19097_v16 = vadd.f32 %v13634_v28, %v6663_v45  ;;  %v6662_v18 = vadd.f32 %v6367_v42, %v21777_v41  ;;  %v13637_v29 = vpop.f32.mrf.mxu0  ;;  %13976 = vmatmul.mubr.msk.f32.gmra.mxu0 %vm838_vm2, %v21778_v38  ;;  %v21783_v28 = vld [vmem:[#allocation4_spill] sm:$0xff]  ;;  %v21785_v42 = vld [vmem:[#allocation182_spill] sm:$0xff]  ;;  %v21787_v3 = vld [vmem:[#allocation5_spill] sm:$0xff] }
 0x408   : > { %v13443_v56 = vpop.f32.mrf.mxu1  ;;  %13782 = vmatmul.mubr.msk.f32.gmra.mxu1 %vm838_vm2, %v21779_v35  ;;  %13978 = vmatprep.mubr.msk.f32.mxu0 %vm838_vm2, %v21780_v53 }
 0x409   : > { %21776 = vst [vmem:[#allocation46_spill] sm:$0xff] %v19097_v16  ;;  %v19106_v25 = vadd.f32 %v7215_v44, %v6662_v18  ;;  %v6665_v55 = vadd.f32 %v13443_v56, %v21782_v60  ;;  %v7225_v20 = vpop.f32.mrf.mxu0  ;;  %13784 = vmatprep.mubr.msk.f32.mxu1 %vm838_vm2, %v21783_v28  ;;  %v21786_v16 = vld [vmem:[#allocation222_spill] sm:$0xff]  ;;  %v21788_v44 = vld [vmem:[#allocation223_spill] sm:$0xff] }
 0x40a   : > { %v6377_v45 = vpop.f32.mrf.mxu1  ;;  %v21790_v56 = vld [vmem:[#allocation183_spill] sm:$0xff] }
 0x40b   : > { %21781 = vst [vmem:[#allocation146_spill] sm:$0xff] %v19106_v25  ;;  %v19111_v57 = vadd.f32 %v13637_v29, %v6665_v55  ;;  %v6664_v38 = vadd.f32 %v6377_v45, %v21785_v42  ;;  %v13640_v41 = vpop.f32.mrf.mxu0  ;;  %13979 = vmatmul.mubr.msk.f32.gmra.mxu0 %vm838_vm2, %v21786_v16  ;;  %v21791_v29 = vld [vmem:[#allocation7_spill] sm:$0xff]  ;;  %v21793_v45 = vld [vmem:[#allocation186_spill] sm:$0xff]  ;;  %v21795_v25 = vld [vmem:[#allocation9_spill] sm:$0xff] }
 0x40c   : > { %v13446_v35 = vpop.f32.mrf.mxu1  ;;  %13785 = vmatmul.mubr.msk.f32.gmra.mxu1 %vm838_vm2, %v21787_v3  ;;  %13981 = vmatprep.mubr.msk.f32.mxu0 %vm838_vm2, %v21788_v44 }
 0x40d   : > { %21784 = vst [vmem:[#allocation161_spill] sm:$0xff] %v19111_v57  ;;  %v19120_v18 = vadd.f32 %v7225_v20, %v6664_v38  ;;  %v6667_v53 = vadd.f32 %v13446_v35, %v21790_v56  ;;  %v7235_v60 = vpop.f32.mrf.mxu0  ;;  %13787 = vmatprep.mubr.msk.f32.mxu1 %vm838_vm2, %v21791_v29  ;;  %v21794_v57 = vld [vmem:[#allocation226_spill] sm:$0xff]  ;;  %v21796_v20 = vld [vmem:[#allocation227_spill] sm:$0xff] }
 0x40e   : > { %v6387_v55 = vpop.f32.mrf.mxu1  ;;  %v21798_v35 = vld [vmem:[#allocation187_spill] sm:$0xff] }
 0x40f   : > { %21789 = vst [vmem:[#allocation48_spill] sm:$0xff] %v19120_v18  ;;  %v19125_v28 = vadd.f32 %v13640_v41, %v6667_v53  ;;  %v6666_v16 = vadd.f32 %v6387_v55, %v21793_v45  ;;  %v13643_v42 = vpop.f32.mrf.mxu0  ;;  %13982 = vmatmul.mubr.msk.f32.gmra.mxu0 %vm838_vm2, %v21794_v57  ;;  %v21799_v41 = vld [vmem:[#allocation11_spill] sm:$0xff]  ;;  %v21801_v55 = vld [vmem:[#allocation190_spill] sm:$0xff]  ;;  %v21803_v18 = vld [vmem:[#allocation13_spill] sm:$0xff] }
 0x410   : > { %v13449_v3 = vpop.f32.mrf.mxu1  ;;  %13788 = vmatmul.mubr.msk.f32.gmra.mxu1 %vm838_vm2, %v21795_v25  ;;  %13984 = vmatprep.mubr.msk.f32.mxu0 %vm838_vm2, %v21796_v20 }
 0x411   : > { %21792 = vst [vmem:[#allocation162_spill] sm:$0xff] %v19125_v28  ;;  %v19134_v38 = vadd.f32 %v7235_v60, %v6666_v16  ;;  %v6669_v44 = vadd.f32 %v13449_v3, %v21798_v35  ;;  %v7245_v56 = vpop.f32.mrf.mxu0  ;;  %13790 = vmatprep.mubr.msk.f32.mxu1 %vm838_vm2, %v21799_v41  ;;  %v21802_v28 = vld [vmem:[#allocation230_spill] sm:$0xff]  ;;  %v21804_v60 = vld [vmem:[#allocation231_spill] sm:$0xff] }
 0x412   : > { %v6397_v53 = vpop.f32.mrf.mxu1  ;;  %v21806_v3 = vld [vmem:[#allocation191_spill] sm:$0xff] }
 0x413   : > { %21797 = vst [vmem:[#allocation147_spill] sm:$0xff] %v19134_v38  ;;  %v19139_v29 = vadd.f32 %v13643_v42, %v6669_v44  ;;  %v6668_v57 = vadd.f32 %v6397_v53, %v21801_v55  ;;  %v13646_v45 = vpop.f32.mrf.mxu0  ;;  %13985 = vmatmul.mubr.msk.f32.gmra.mxu0 %vm838_vm2, %v21802_v28  ;;  %v21807_v42 = vld [vmem:[#allocation15_spill] sm:$0xff]  ;;  %v21809_v53 = vld [vmem:[#allocation88_spill] sm:$0xff]  ;;  %v21811_v38 = vld [vmem:[#allocation17_spill] sm:$0xff] }
 0x414   : > { %v13452_v25 = vpop.f32.mrf.mxu1  ;;  %13791 = vmatmul.mubr.msk.f32.gmra.mxu1 %vm838_vm2, %v21803_v18  ;;  %13987 = vmatprep.mubr.msk.f32.mxu0 %vm838_vm2, %v21804_v60 }
 0x415   : > { %21800 = vst [vmem:[#allocation50_spill] sm:$0xff] %v19139_v29  ;;  %v19148_v16 = vadd.f32 %v7245_v56, %v6668_v57  ;;  %v6671_v20 = vadd.f32 %v13452_v25, %v21806_v3  ;;  %v7255_v35 = vpop.f32.mrf.mxu0  ;;  %13793 = vmatprep.mubr.msk.f32.mxu1 %vm838_vm2, %v21807_v42  ;;  %v21810_v29 = vld [vmem:[#allocation234_spill] sm:$0xff]  ;;  %v21812_v56 = vld [vmem:[#allocation235_spill] sm:$0xff] }
 0x416   : > { %v6407_v44 = vpop.f32.mrf.mxu1  ;;  %v21814_v25 = vld [vmem:[#allocation194_spill] sm:$0xff] }
 0x417   : > { %21805 = vst [vmem:[#allocation148_spill] sm:$0xff] %v19148_v16  ;;  %v19153_v41 = vadd.f32 %v13646_v45, %v6671_v20  ;;  %v6670_v28 = vadd.f32 %v6407_v44, %v21809_v53  ;;  %v13649_v55 = vpop.f32.mrf.mxu0  ;;  %13988 = vmatmul.mubr.msk.f32.gmra.mxu0 %vm838_vm2, %v21810_v29  ;;  %v21815_v45 = vld [vmem:[#allocation19_spill] sm:$0xff]  ;;  %v21817_v44 = vld [vmem:[#allocation94_spill] sm:$0xff]  ;;  %v21819_v16 = vld [vmem:[#allocation21_spill] sm:$0xff] }
 0x418   : > { %v13455_v18 = vpop.f32.mrf.mxu1  ;;  %13794 = vmatmul.mubr.msk.f32.gmra.mxu1 %vm838_vm2, %v21811_v38  ;;  %13990 = vmatprep.mubr.msk.f32.mxu0 %vm838_vm2, %v21812_v56 }
 0x419   : > { %21808 = vst [vmem:[#allocation163_spill] sm:$0xff] %v19153_v41  ;;  %v19162_v57 = vadd.f32 %v7255_v35, %v6670_v28  ;;  %v6673_v60 = vadd.f32 %v13455_v18, %v21814_v25  ;;  %v7265_v3 = vpop.f32.mrf.mxu0  ;;  %13796 = vmatprep.mubr.msk.f32.mxu1 %vm838_vm2, %v21815_v45  ;;  %v21818_v41 = vld [vmem:[#allocation239_spill] sm:$0xff]  ;;  %v21820_v35 = vld [vmem:[#allocation241_spill] sm:$0xff]  ;;  %v21822_v18 = vld [vmem:[#allocation98_spill] sm:$0xff] }
 0x41a   : > { %v6417_v20 = vpop.f32.mrf.mxu1 }
 0x41b   : > { %21813 = vst [vmem:[#allocation52_spill] sm:$0xff] %v19162_v57  ;;  %v19167_v42 = vadd.f32 %v13649_v55, %v6673_v60  ;;  %v6672_v29 = vadd.f32 %v6417_v20, %v21817_v44  ;;  %v13652_v53 = vpop.f32.mrf.mxu0  ;;  %13991 = vmatmul.mubr.msk.f32.gmra.mxu0 %vm838_vm2, %v21818_v41  ;;  %v21823_v55 = vld [vmem:[#allocation23_spill] sm:$0xff]  ;;  %v21825_v20 = vld [vmem:[#allocation100_spill] sm:$0xff]  ;;  %v21827_v57 = vld [vmem:[#allocation25_spill] sm:$0xff] }
 0x41c   : > { %v13458_v38 = vpop.f32.mrf.mxu1  ;;  %13797 = vmatmul.mubr.msk.f32.gmra.mxu1 %vm838_vm2, %v21819_v16  ;;  %13993 = vmatprep.mubr.msk.f32.mxu0 %vm838_vm2, %v21820_v35 }
 0x41d   : > { %21816 = vst [vmem:[#allocation164_spill] sm:$0xff] %v19167_v42  ;;  %v19176_v28 = vadd.f32 %v7265_v3, %v6672_v29  ;;  %v6675_v56 = vadd.f32 %v13458_v38, %v21822_v18  ;;  %v7275_v25 = vpop.f32.mrf.mxu0  ;;  %13799 = vmatprep.mubr.msk.f32.mxu1 %vm838_vm2, %v21823_v55  ;;  %v21826_v42 = vld [vmem:[#allocation245_spill] sm:$0xff]  ;;  %v21828_v3 = vld [vmem:[#allocation247_spill] sm:$0xff] }
 0x41e   : > { %v6427_v60 = vpop.f32.mrf.mxu1  ;;  %v21830_v38 = vld [vmem:[#allocation101_spill] sm:$0xff] }
 0x41f   : > { %21821 = vst [vmem:[#allocation149_spill] sm:$0xff] %v19176_v28  ;;  %v19181_v45 = vadd.f32 %v13652_v53, %v6675_v56  ;;  %v6674_v41 = vadd.f32 %v6427_v60, %v21825_v20  ;;  %v13655_v44 = vpop.f32.mrf.mxu0  ;;  %13994 = vmatmul.mubr.msk.f32.gmra.mxu0 %vm838_vm2, %v21826_v42  ;;  %v21831_v53 = vld [vmem:[#allocation27_spill] sm:$0xff]  ;;  %v21835_v28 = vld [vmem:[#allocation29_spill] sm:$0xff] }
 0x420   : > { %v13461_v16 = vpop.f32.mrf.mxu1  ;;  %13800 = vmatmul.mubr.msk.f32.gmra.mxu1 %vm838_vm2, %v21827_v57  ;;  %13996 = vmatprep.mubr.msk.f32.mxu0 %vm838_vm2, %v21828_v3  ;;  %v21833_v60 = vld [vmem:[#allocation107_spill] sm:$0xff] }
 0x421   : > { %21824 = vst [vmem:[#allocation54_spill] sm:$0xff] %v19181_v45  ;;  %v19190_v29 = vadd.f32 %v7275_v25, %v6674_v41  ;;  %v6677_v35 = vadd.f32 %v13461_v16, %v21830_v38  ;;  %v7285_v18 = vpop.f32.mrf.mxu0  ;;  %13802 = vmatprep.mubr.msk.f32.mxu1 %vm838_vm2, %v21831_v53  ;;  %v21834_v45 = vld [vmem:[#allocation251_spill] sm:$0xff]  ;;  %v21836_v25 = vld [vmem:[#allocation253_spill] sm:$0xff] }
 0x422   : > { %v6437_v56 = vpop.f32.mrf.mxu1  ;;  %v21838_v16 = vld [vmem:[#allocation111_spill] sm:$0xff] }
 0x423   : > { %21829 = vst [vmem:[#allocation150_spill] sm:$0xff] %v19190_v29  ;;  %v19195_v55 = vadd.f32 %v13655_v44, %v6677_v35  ;;  %v6676_v42 = vadd.f32 %v6437_v56, %v21833_v60  ;;  %v13658_v20 = vpop.f32.mrf.mxu0  ;;  %13997 = vmatmul.mubr.msk.f32.gmra.mxu0 %vm838_vm2, %v21834_v45  ;;  %v21839_v44 = vld [vmem:[#allocation31_spill] sm:$0xff]  ;;  %v21841_v56 = vld [vmem:[#allocation113_spill] sm:$0xff] }
 0x424   : > { %v13464_v57 = vpop.f32.mrf.mxu1  ;;  %13803 = vmatmul.mubr.msk.f32.gmra.mxu1 %vm838_vm2, %v21835_v28  ;;  %13999 = vmatprep.mubr.msk.f32.mxu0 %vm838_vm2, %v21836_v25  ;;  %v21843_v29 = vld [vmem:[#allocation33_spill] sm:$0xff] }
 0x425   : > { %21832 = vst [vmem:[#allocation165_spill] sm:$0xff] %v19195_v55  ;;  %v19204_v41 = vadd.f32 %v7285_v18, %v6676_v42  ;;  %v6679_v3 = vadd.f32 %v13464_v57, %v21838_v16  ;;  %v7295_v38 = vpop.f32.mrf.mxu0  ;;  %13805 = vmatprep.mubr.msk.f32.mxu1 %vm838_vm2, %v21839_v44  ;;  %v21842_v55 = vld [vmem:[#allocation257_spill] sm:$0xff]  ;;  %v21844_v18 = vld [vmem:[#allocation259_spill] sm:$0xff]  ;;  %v21846_v57 = vld [vmem:[#allocation114_spill] sm:$0xff] }
 0x426   : > { %v6447_v35 = vpop.f32.mrf.mxu1 }
 0x427   : > { %21837 = vst [vmem:[#allocation56_spill] sm:$0xff] %v19204_v41  ;;  %v19209_v53 = vadd.f32 %v13658_v20, %v6679_v3  ;;  %v6678_v45 = vadd.f32 %v6447_v35, %v21841_v56  ;;  %v13661_v60 = vpop.f32.mrf.mxu0  ;;  %14000 = vmatmul.mubr.msk.f32.gmra.mxu0 %vm838_vm2, %v21842_v55  ;;  %v21847_v20 = vld [vmem:[#allocation35_spill] sm:$0xff]  ;;  %v21849_v35 = vld [vmem:[#allocation120_spill] sm:$0xff]  ;;  %v21851_v41 = vld [vmem:[#allocation37_spill] sm:$0xff] }
 0x428   : > { %v13467_v28 = vpop.f32.mrf.mxu1  ;;  %13806 = vmatmul.mubr.msk.f32.gmra.mxu1 %vm838_vm2, %v21843_v29  ;;  %14002 = vmatprep.mubr.msk.f32.mxu0 %vm838_vm2, %v21844_v18 }
 0x429   : > { %21840 = vst [vmem:[#allocation166_spill] sm:$0xff] %v19209_v53  ;;  %v19218_v42 = vadd.f32 %v7295_v38, %v6678_v45  ;;  %v6681_v25 = vadd.f32 %v13467_v28, %v21846_v57  ;;  %v7305_v16 = vpop.f32.mrf.mxu0  ;;  %13808 = vmatprep.mubr.msk.f32.mxu1 %vm838_vm2, %v21847_v20  ;;  %v21850_v53 = vld [vmem:[#allocation263_spill] sm:$0xff]  ;;  %v21852_v38 = vld [vmem:[#allocation265_spill] sm:$0xff]  ;;  %v21854_v28 = vld [vmem:[#allocation124_spill] sm:$0xff] }
 0x42a   : > { %v6457_v3 = vpop.f32.mrf.mxu1 }
 0x42b   : > { %21845 = vst [vmem:[#allocation151_spill] sm:$0xff] %v19218_v42  ;;  %v19223_v44 = vadd.f32 %v13661_v60, %v6681_v25  ;;  %v6680_v55 = vadd.f32 %v6457_v3, %v21849_v35  ;;  %v13664_v56 = vpop.f32.mrf.mxu0  ;;  %14003 = vmatmul.mubr.msk.f32.gmra.mxu0 %vm838_vm2, %v21850_v53  ;;  %v21855_v60 = vld [vmem:[#allocation39_spill] sm:$0xff]  ;;  %v21857_v3 = vld [vmem:[#allocation204_spill] sm:$0xff]  ;;  %v21859_v42 = vld [vmem:[#allocation41_spill] sm:$0xff] }
 0x42c   : > { %v13470_v29 = vpop.f32.mrf.mxu1  ;;  %13809 = vmatmul.mubr.msk.f32.gmra.mxu1 %vm838_vm2, %v21851_v41  ;;  %14005 = vmatprep.mubr.msk.f32.mxu0 %vm838_vm2, %v21852_v38 }
 0x42d   : > { %21848 = vst [vmem:[#allocation58_spill] sm:$0xff] %v19223_v44  ;;  %v19232_v45 = vadd.f32 %v7305_v16, %v6680_v55  ;;  %v6683_v18 = vadd.f32 %v13470_v29, %v21854_v28  ;;  %v7315_v57 = vpop.f32.mrf.mxu0  ;;  %13811 = vmatprep.mubr.msk.f32.mxu1 %vm838_vm2, %v21855_v60  ;;  %v21858_v44 = vld [vmem:[#allocation269_spill] sm:$0xff]  ;;  %v21860_v16 = vld [vmem:[#allocation271_spill] sm:$0xff] }
 0x42e   : > { %v6467_v25 = vpop.f32.mrf.mxu1  ;;  %v21862_v29 = vld [vmem:[#allocation205_spill] sm:$0xff] }
 0x42f   : > { %21853 = vst [vmem:[#allocation152_spill] sm:$0xff] %v19232_v45  ;;  %v19237_v20 = vadd.f32 %v13664_v56, %v6683_v18  ;;  %v6682_v53 = vadd.f32 %v6467_v25, %v21857_v3  ;;  %v13667_v35 = vpop.f32.mrf.mxu0  ;;  %14006 = vmatmul.mubr.msk.f32.gmra.mxu0 %vm838_vm2, %v21858_v44  ;;  %v21863_v56 = vld [vmem:[#allocation43_spill] sm:$0xff]  ;;  %v21865_v25 = vld [vmem:[#allocation208_spill] sm:$0xff]  ;;  %v21867_v45 = vld [vmem:[#allocation45_spill] sm:$0xff] }
 0x430   : > { %v13473_v41 = vpop.f32.mrf.mxu1  ;;  %13812 = vmatmul.mubr.msk.f32.gmra.mxu1 %vm838_vm2, %v21859_v42  ;;  %14008 = vmatprep.mubr.msk.f32.mxu0 %vm838_vm2, %v21860_v16 }
 0x431   : > { %21856 = vst [vmem:[#allocation167_spill] sm:$0xff] %v19237_v20  ;;  %v19246_v55 = vadd.f32 %v7315_v57, %v6682_v53  ;;  %v6685_v38 = vadd.f32 %v13473_v41, %v21862_v29  ;;  %v7325_v28 = vpop.f32.mrf.mxu0  ;;  %13814 = vmatprep.mubr.msk.f32.mxu1 %vm838_vm2, %v21863_v56  ;;  %v21866_v20 = vld [vmem:[#allocation275_spill] sm:$0xff]  ;;  %v21868_v57 = vld [vmem:[#allocation277_spill] sm:$0xff] }
 0x432   : > { %v6477_v18 = vpop.f32.mrf.mxu1  ;;  %v21870_v41 = vld [vmem:[#allocation209_spill] sm:$0xff] }
 0x433   : > { %21861 = vst [vmem:[#allocation60_spill] sm:$0xff] %v19246_v55  ;;  %v19251_v60 = vadd.f32 %v13667_v35, %v6685_v38  ;;  %v6684_v44 = vadd.f32 %v6477_v18, %v21865_v25  ;;  %v13670_v3 = vpop.f32.mrf.mxu0  ;;  %14009 = vmatmul.mubr.msk.f32.gmra.mxu0 %vm838_vm2, %v21866_v20  ;;  %v21871_v35 = vld [vmem:[#allocation47_spill] sm:$0xff]  ;;  %v21873_v18 = vld [vmem:[#allocation212_spill] sm:$0xff]  ;;  %v21875_v55 = vld [vmem:[#allocation49_spill] sm:$0xff] }
 0x434   : > { %v13476_v42 = vpop.f32.mrf.mxu1  ;;  %13815 = vmatmul.mubr.msk.f32.gmra.mxu1 %vm838_vm2, %v21867_v45  ;;  %14011 = vmatprep.mubr.msk.f32.mxu0 %vm838_vm2, %v21868_v57 }
 0x435   : > { %21864 = vst [vmem:[#allocation168_spill] sm:$0xff] %v19251_v60  ;;  %v19260_v53 = vadd.f32 %v7325_v28, %v6684_v44  ;;  %v6687_v16 = vadd.f32 %v13476_v42, %v21870_v41  ;;  %v7335_v29 = vpop.f32.mrf.mxu0  ;;  %13817 = vmatprep.mubr.msk.f32.mxu1 %vm838_vm2, %v21871_v35  ;;  %v21874_v60 = vld [vmem:[#allocation281_spill] sm:$0xff]  ;;  %v21876_v28 = vld [vmem:[#allocation283_spill] sm:$0xff] }
 0x436   : > { %v6487_v38 = vpop.f32.mrf.mxu1  ;;  %v21878_v42 = vld [vmem:[#allocation213_spill] sm:$0xff] }
 0x437   : > { %21869 = vst [vmem:[#allocation153_spill] sm:$0xff] %v19260_v53  ;;  %v19265_v56 = vadd.f32 %v13670_v3, %v6687_v16  ;;  %v6686_v20 = vadd.f32 %v6487_v38, %v21873_v18  ;;  %v13673_v25 = vpop.f32.mrf.mxu0  ;;  %14012 = vmatmul.mubr.msk.f32.gmra.mxu0 %vm838_vm2, %v21874_v60  ;;  %v21879_v3 = vld [vmem:[#allocation51_spill] sm:$0xff]  ;;  %v21881_v38 = vld [vmem:[#allocation216_spill] sm:$0xff]  ;;  %v21883_v53 = vld [vmem:[#allocation53_spill] sm:$0xff] }
 0x438   : > { %v13479_v45 = vpop.f32.mrf.mxu1  ;;  %13818 = vmatmul.mubr.msk.f32.gmra.mxu1 %vm838_vm2, %v21875_v55  ;;  %14014 = vmatprep.mubr.msk.f32.mxu0 %vm838_vm2, %v21876_v28 }
 0x439   : > { %21872 = vst [vmem:[#allocation62_spill] sm:$0xff] %v19265_v56  ;;  %v19274_v44 = vadd.f32 %v7335_v29, %v6686_v20  ;;  %v6689_v57 = vadd.f32 %v13479_v45, %v21878_v42  ;;  %v7345_v41 = vpop.f32.mrf.mxu0  ;;  %13820 = vmatprep.mubr.msk.f32.mxu1 %vm838_vm2, %v21879_v3  ;;  %v21882_v56 = vld [vmem:[#allocation287_spill] sm:$0xff]  ;;  %v21884_v29 = vld [vmem:[#allocation289_spill] sm:$0xff] }
 0x43a   : > { %v6497_v16 = vpop.f32.mrf.mxu1  ;;  %v21886_v45 = vld [vmem:[#allocation217_spill] sm:$0xff] }
 0x43b   : > { %21877 = vst [vmem:[#allocation154_spill] sm:$0xff] %v19274_v44  ;;  %v19279_v35 = vadd.f32 %v13673_v25, %v6689_v57  ;;  %v6688_v60 = vadd.f32 %v6497_v16, %v21881_v38  ;;  %v13676_v18 = vpop.f32.mrf.mxu0  ;;  %14015 = vmatmul.mubr.msk.f32.gmra.mxu0 %vm838_vm2, %v21882_v56  ;;  %v21887_v25 = vld [vmem:[#allocation55_spill] sm:$0xff]  ;;  %v21889_v16 = vld [vmem:[#allocation220_spill] sm:$0xff]  ;;  %v21891_v44 = vld [vmem:[#allocation57_spill] sm:$0xff] }
 0x43c   : > { %v13482_v55 = vpop.f32.mrf.mxu1  ;;  %13821 = vmatmul.mubr.msk.f32.gmra.mxu1 %vm838_vm2, %v21883_v53  ;;  %14017 = vmatprep.mubr.msk.f32.mxu0 %vm838_vm2, %v21884_v29 }
 0x43d   : > { %21880 = vst [vmem:[#allocation169_spill] sm:$0xff] %v19279_v35  ;;  %v19288_v20 = vadd.f32 %v7345_v41, %v6688_v60  ;;  %v6691_v28 = vadd.f32 %v13482_v55, %v21886_v45  ;;  %v7355_v42 = vpop.f32.mrf.mxu0  ;;  %13823 = vmatprep.mubr.msk.f32.mxu1 %vm838_vm2, %v21887_v25  ;;  %v21890_v35 = vld [vmem:[#allocation293_spill] sm:$0xff]  ;;  %v21892_v41 = vld [vmem:[#allocation295_spill] sm:$0xff] }
 0x43e   : > { %v6507_v57 = vpop.f32.mrf.mxu1  ;;  %v21893_v55 = vld [vmem:[#allocation221_spill] sm:$0xff] }
 0x43f   : > { %21885 = vst [vmem:[#allocation64_spill] sm:$0xff] %v19288_v20  ;;  %v19293_v3 = vadd.f32 %v13676_v18, %v6691_v28  ;;  %v6690_v56 = vadd.f32 %v6507_v57, %v21889_v16  ;;  %v13679_v38 = vpop.f32.mrf.mxu0  ;;  %14018 = vmatmul.mubr.msk.f32.gmra.mxu0 %vm838_vm2, %v21890_v35  ;;  %v21894_v18 = vld [vmem:[#allocation59_spill] sm:$0xff]  ;;  %v21896_v57 = vld [vmem:[#allocation224_spill] sm:$0xff]  ;;  %v21898_v20 = vld [vmem:[#allocation61_spill] sm:$0xff] }
 0x440   : > { %v13485_v53 = vpop.f32.mrf.mxu1  ;;  %13824 = vmatmul.mubr.msk.f32.gmra.mxu1 %vm838_vm2, %v21891_v44  ;;  %14020 = vmatprep.mubr.msk.f32.mxu0 %vm838_vm2, %v21892_v41 }
 0x441   : > { %21888 = vst [vmem:[#allocation170_spill] sm:$0xff] %v19293_v3  ;;  %v19302_v60 = vadd.f32 %v7355_v42, %v6690_v56  ;;  %v6693_v29 = vadd.f32 %v13485_v53, %v21893_v55  ;;  %v7365_v45 = vpop.f32.mrf.mxu0  ;;  %13826 = vmatprep.mubr.msk.f32.mxu1 %vm838_vm2, %v21894_v18  ;;  %v21897_v3 = vld [vmem:[#allocation299_spill] sm:$0xff]  ;;  %v21899_v56 = vld [vmem:[#allocation225_spill] sm:$0xff]  ;;  %v21901_v18 = vld [vmem:[#allocation228_spill] sm:$0xff] }
 0x442   : > { %v6517_v28 = vpop.f32.mrf.mxu1 }
 0x443   : > { %v19307_v25 = vadd.f32 %v13679_v38, %v6693_v29  ;;  %v6692_v35 = vadd.f32 %v6517_v28, %v21896_v57  ;;  %v13682_v16 = vpop.f32.mrf.mxu0  ;;  %14021 = vmatmul.mubr.msk.f32.gmra.mxu0 %vm838_vm2, %v21897_v3  ;;  %v21900_v38 = vld [vmem:[#allocation63_spill] sm:$0xff]  ;;  %v21902_v57 = vld [vmem:[#allocation305_spill] sm:$0xff] }
 0x444   : > { %v13488_v44 = vpop.f32.mrf.mxu1  ;;  %13827 = vmatmul.mubr.msk.f32.gmra.mxu1 %vm838_vm2, %v21898_v20  ;;  %14023 = vmatprep.mubr.msk.f32.mxu0 %vm838_vm2, %v21516_v49 }
 0x445   : > { %21895 = vst [vmem:[#allocation6_spill] sm:$0xff] %v19307_v25  ;;  %v19316_v42 = vadd.f32 %v7365_v45, %v6692_v35  ;;  %v6695_v53 = vadd.f32 %v13488_v44, %v21899_v56  ;;  %v7375_v41 = vpop.f32.mrf.mxu0  ;;  %13829 = vmatprep.mubr.msk.f32.mxu1 %vm838_vm2, %v21900_v38  ;;  %v21903_v25 = vld [vmem:[#allocation65_spill] sm:$0xff]  ;;  %v21906_v38 = vld [vmem:[#allocation232_spill] sm:$0xff] }
 0x446   : > { %v6527_v55 = vpop.f32.mrf.mxu1  ;;  %v21904_v45 = vld [vmem:[#allocation229_spill] sm:$0xff] }
 0x447   : > { %v19321_v29 = vadd.f32 %v13682_v16, %v6695_v53  ;;  %v6694_v3 = vadd.f32 %v6527_v55, %v21901_v18  ;;  %v13685_v28 = vpop.f32.mrf.mxu0  ;;  %14024 = vmatmul.mubr.msk.f32.gmra.mxu0 %vm838_vm2, %v21902_v57  ;;  %v21905_v16 = vld [vmem:[#allocation67_spill] sm:$0xff]  ;;  %v21907_v57 = vld [vmem:[#allocation69_spill] sm:$0xff] }
 0x448   : > { %v13491_v20 = vpop.f32.mrf.mxu1  ;;  %13830 = vmatmul.mubr.msk.f32.gmra.mxu1 %vm838_vm2, %v21903_v25  ;;  %14026 = vmatprep.mubr.msk.f32.mxu0 %vm838_vm2, %v21522_v52 }
 0x449   : > { %v19330_v49 = vadd.f32 %v7375_v41, %v6694_v3  ;;  %v6697_v35 = vadd.f32 %v13491_v20, %v21904_v45  ;;  %v7385_v44 = vpop.f32.mrf.mxu0  ;;  %13832 = vmatprep.mubr.msk.f32.mxu1 %vm838_vm2, %v21905_v16  ;;  %v21908_v41 = vld [vmem:[#allocation233_spill] sm:$0xff]  ;;  %v21910_v16 = vld [vmem:[#allocation236_spill] sm:$0xff] }
 0x44a   : > { %v6537_v56 = vpop.f32.mrf.mxu1 }
 0x44b   : > { %v19335_v53 = vadd.f32 %v13685_v28, %v6697_v35  ;;  %v6696_v55 = vadd.f32 %v6537_v56, %v21906_v38  ;;  %v13688_v18 = vpop.f32.mrf.mxu0  ;;  %14027 = vmatmul.mubr.msk.f32.gmra.mxu0 %vm838_vm2, %v21524_v11  ;;  %v21909_v28 = vld [vmem:[#allocation71_spill] sm:$0xff] }
 0x44c   : > { %v13494_v25 = vpop.f32.mrf.mxu1  ;;  %13833 = vmatmul.mubr.msk.f32.gmra.mxu1 %vm838_vm2, %v21907_v57  ;;  %14029 = vmatprep.mubr.msk.f32.mxu0 %vm838_vm2, %v21526_v58  ;;  %v21911_v57 = vld [vmem:[#allocation73_spill] sm:$0xff] }
 0x44d   : > { %v19344_v52 = vadd.f32 %v7385_v44, %v6696_v55  ;;  %v6699_v3 = vadd.f32 %v13494_v25, %v21908_v41  ;;  %v7395_v20 = vpop.f32.mrf.mxu0  ;;  %13835 = vmatprep.mubr.msk.f32.mxu1 %vm838_vm2, %v21909_v28  ;;  %v21912_v44 = vld [vmem:[#allocation238_spill] sm:$0xff] }
 0x44e   : > { %v6547_v45 = vpop.f32.mrf.mxu1  ;;  %v21914_v28 = vld [vmem:[#allocation242_spill] sm:$0xff] }
 0x44f   : > { %v19349_v35 = vadd.f32 %v13688_v18, %v6699_v3  ;;  %v6698_v11 = vadd.f32 %v6547_v45, %v21910_v16  ;;  %v13691_v56 = vpop.f32.mrf.mxu0  ;;  %14030 = vmatmul.mubr.msk.f32.gmra.mxu0 %vm838_vm2, %v21528_v34  ;;  %v21913_v18 = vld [vmem:[#allocation75_spill] sm:$0xff] }
 0x450   : > { %v13497_v38 = vpop.f32.mrf.mxu1  ;;  %13836 = vmatmul.mubr.msk.f32.gmra.mxu1 %vm838_vm2, %v21911_v57  ;;  %14032 = vmatprep.mubr.msk.f32.mxu0 %vm838_vm2, %v21530_v39  ;;  %v21915_v57 = vld [vmem:[#allocation77_spill] sm:$0xff] }
 0x451   : > { %v19358_v58 = vadd.f32 %v7395_v20, %v6698_v11  ;;  %v6701_v55 = vadd.f32 %v13497_v38, %v21912_v44  ;;  %v7405_v25 = vpop.f32.mrf.mxu0  ;;  %13838 = vmatprep.mubr.msk.f32.mxu1 %vm838_vm2, %v21913_v18  ;;  %v21917_v20 = vld [vmem:[#allocation244_spill] sm:$0xff] }
 0x452   : > { %v6557_v41 = vpop.f32.mrf.mxu1  ;;  %v21920_v18 = vld [vmem:[#allocation248_spill] sm:$0xff] }
 0x453   : > { %v19363_v3 = vadd.f32 %v13691_v56, %v6701_v55  ;;  %v6700_v34 = vadd.f32 %v6557_v41, %v21914_v28  ;;  %v13694_v45 = vpop.f32.mrf.mxu0  ;;  %14033 = vmatmul.mubr.msk.f32.gmra.mxu0 %vm838_vm2, %v21532_v47  ;;  %v21918_v56 = vld [vmem:[#allocation79_spill] sm:$0xff] }
 0x454   : > { %v13500_v16 = vpop.f32.mrf.mxu1  ;;  %13839 = vmatmul.mubr.msk.f32.gmra.mxu1 %vm838_vm2, %v21915_v57  ;;  %14035 = vmatprep.mubr.msk.f32.mxu0 %vm838_vm2, %v21534_v13  ;;  %v21921_v13 = vld [vmem:[#allocation81_spill] sm:$0xff]  ;;  %v21924_v57 = vld [vmem:[#allocation83_spill] sm:$0xff] }
 0x455   : > { %v19372_v39 = vadd.f32 %v7405_v25, %v6700_v34  ;;  %v6703_v11 = vadd.f32 %v13500_v16, %v21917_v20  ;;  %v7415_v38 = vpop.f32.mrf.mxu0  ;;  %13841 = vmatprep.mubr.msk.f32.mxu1 %vm838_vm2, %v21918_v56  ;;  %v21923_v34 = vld [vmem:[#allocation250_spill] sm:$0xff] }
 0x456   : > { %v6567_v44 = vpop.f32.mrf.mxu1  ;;  %v19394_v20 = vld [vmem:[%s20076_s2] ss:$0 sm:$0xff] }
 0x457   : > { %21916 = vst [vmem:[#allocation66_spill] sm:$0xff] %v19372_v39  ;;  %v19377_v55 = vadd.f32 %v13694_v45, %v6703_v11  ;;  %v6702_v47 = vadd.f32 %v6567_v44, %v21920_v18  ;;  %v13893_v41 = vpop.f32.mrf.mxu0  ;;  %14036 = vmatmul.mubr.msk.f32.gmra.mxu0 %vm838_vm2, %v21536_v43  ;;  %v21925_v56 = vld [vmem:[#allocation254_spill] sm:$0xff] }
 0x458   : > { %v13699_v28 = vpop.f32.mrf.mxu1  ;;  %13842 = vmatmul.mubr.msk.f32.gmra.mxu1 %vm838_vm2, %v21921_v13  ;;  %14038 = vmatprep.mubr.msk.f32.mxu0 %vm838_vm2, %v21538_v30  ;;  %v21927_v13 = vld [vmem:[#allocation256_spill] sm:$0xff] }
 0x459   : > { %21919 = vst [vmem:[#allocation8_spill] sm:$0xff] %v19377_v55  ;;  %v19386_v25 = vadd.f32 %v7415_v38, %v6702_v47  ;;  %v8279_v16 = vadd.f32 %v13699_v28, %v21923_v34  ;;  %v8492_v45 = vpop.f32.mrf.mxu0  ;;  %13844 = vmatprep.mubr.msk.f32.mxu1 %vm838_vm2, %v21924_v57  ;;  %v21926_v38 = vld [vmem:[#allocation85_spill] sm:$0xff] }
 0x45a   : > { %v7639_v43 = vpop.f32.mrf.mxu1 }
 0x45b   : > { %21922 = vst [vmem:[#allocation172_spill] sm:$0xff] %v19386_v25  ;;  %v9132_v11 = vadd.f32 %v13893_v41, %v8279_v16  ;;  %v8278_v44 = vadd.f32 %v7639_v43, %v21925_v56  ;;  %v13896_v18 = vpop.f32.mrf.mxu0  ;;  %14039 = vmatmul.mubr.msk.f32.gmra.mxu0 %vm838_vm2, %v21540_v32  ;;  %v21928_v16 = vld [vmem:[#allocation87_spill] sm:$0xff] }
 0x45c   : > { %v13702_v30 = vpop.f32.mrf.mxu1  ;;  %13845 = vmatmul.mubr.msk.f32.gmra.mxu1 %vm838_vm2, %v21926_v38  ;;  %14041 = vmatprep.mubr.msk.f32.mxu0 %vm838_vm2, %v21542_v37 }
 0x45d   : > { %v9267_v47 = vadd.f32 %v19394_v20, %v9132_v11  ;;  %v9131_v28 = vadd.f32 %v8492_v45, %v8278_v44  ;;  %v8281_v34 = vadd.f32 %v13702_v30, %v21927_v13  ;;  %v8502_v41 = vpop.f32.mrf.mxu0  ;;  %13847 = vmatprep.mubr.msk.f32.mxu1 %vm838_vm2, %v21928_v16  ;;  %v21929_v11 = vld [vmem:[#allocation260_spill] sm:$0xff]  ;;  %v21930_v30 = vld [vmem:[#allocation90_spill] sm:$0xff] }
 0x45e   : > { %v7649_v57 = vpop.f32.mrf.mxu1  ;;  %v21932_v16 = vld [vmem:[#allocation262_spill] sm:$0xff] }
 0x45f   : > { %vm9395_vm5 = vcmp.ge.f32.partialorder %v9267_v47, 0.0  ;;  %v9523_v32 = vmul.f32 0.01, %v9267_v47  ;;  %v9266_v37 = vadd.f32 %v19394_v20, %v9131_v28  ;;  %v9134_v43 = vadd.f32 %v13896_v18, %v8281_v34  ;;  %v13899_v45 = vpop.f32.mrf.mxu0  ;;  %14042 = vmatmul.mubr.msk.f32.gmra.mxu0 %vm838_vm2, %v21544_v24  ;;  %v21931_v34 = vld [vmem:[#allocation93_spill] sm:$0xff] }
 0x460   : > { %v8280_v56 = vadd.f32 %v7649_v57, %v21929_v11  ;;  %v13705_v44 = vpop.f32.mrf.mxu1  ;;  %13848 = vmatmul.mubr.msk.f32.gmra.mxu1 %vm838_vm2, %v21930_v30  ;;  %14044 = vmatprep.mubr.msk.f32.mxu0 %vm838_vm2, %v21546_v22 }
 0x461   : > { %v9651_v38 = vsel %vm9395_vm5, %v9267_v47, %v9523_v32  ;;  %vm9394_vm6 = vcmp.ge.f32.partialorder %v9266_v37, 0.0  ;;  %v9522_v13 = vmul.f32 0.01, %v9266_v37  ;;  %v9269_v28 = vadd.f32 %v19394_v20, %v9134_v43  ;;  %v8512_v18 = vpop.f32.mrf.mxu0  ;;  %13850 = vmatprep.mubr.msk.f32.mxu1 %vm838_vm2, %v21931_v34  ;;  %v21933_v47 = vld [vmem:[#allocation266_spill] sm:$0xff] }
 0x462   : > { %9780 = vst.msk [vmem:[%s19411_s19 + $0x8] sm:$0xff] %vm9778_vm4, %v9651_v38  ;;  %v9133_v24 = vadd.f32 %v8502_v41, %v8280_v56  ;;  %v8283_v57 = vadd.f32 %v13705_v44, %v21932_v16  ;;  %v7659_v11 = vpop.f32.mrf.mxu1  ;;  %v21934_v41 = vld [vmem:[#allocation96_spill] sm:$0xff]  ;;  %v21935_v44 = vld [vmem:[#allocation301_spill] sm:$0xff] }
 0x463   : > { %v9650_v30 = vsel %vm9394_vm6, %v9266_v37, %v9522_v13  ;;  %vm9397_vm7 = vcmp.ge.f32.partialorder %v9269_v28, 0.0  ;;  %v9525_v22 = vmul.f32 0.01, %v9269_v28  ;;  %v8282_v32 = vadd.f32 %v7659_v11, %v21933_v47  ;;  %v13902_v25 = vpop.f32.mrf.mxu0  ;;  %14045 = vmatmul.mubr.msk.f32.gmra.mxu0 %vm838_vm2, %v21548_v26  ;;  %v21936_v11 = vld [vmem:[#allocation99_spill] sm:$0xff] }
 0x464   : > { %9779 = vst.msk [vmem:[%s19411_s19] sm:$0xff] %vm9778_vm4, %v9650_v30  ;;  %v9268_v43 = vadd.f32 %v19394_v20, %v9133_v24  ;;  %v9136_v34 = vadd.f32 %v13899_v45, %v8283_v57  ;;  %v13708_v38 = vpop.f32.mrf.mxu1  ;;  %13851 = vmatmul.mubr.msk.f32.gmra.mxu1 %vm838_vm2, %v21934_v41  ;;  %14047 = vmatprep.mubr.msk.f32.mxu0 %vm838_vm2, %v21550_v8  ;;  %v21937_v8 = vld [vmem:[#allocation268_spill] sm:$0xff] }
 0x465   : > { %v9653_v37 = vsel %vm9397_vm7, %v9269_v28, %v9525_v22  ;;  %v9135_v56 = vadd.f32 %v8512_v18, %v8282_v32  ;;  %v8285_v13 = vadd.f32 %v13708_v38, %v21935_v44  ;;  %v8522_v16 = vpop.f32.mrf.mxu0  ;;  %13853 = vmatprep.mubr.msk.f32.mxu1 %vm838_vm2, %v21936_v11  ;;  %v21938_v38 = vld [vmem:[#allocation103_spill] sm:$0xff] }
 0x466   : > { %9782 = vst.msk [vmem:[%s19411_s19 + $0x18] sm:$0xff] %vm9778_vm4, %v9653_v37  ;;  %vm9396_vm8 = vcmp.ge.f32.partialorder %v9268_v43, 0.0  ;;  %v9524_v26 = vmul.f32 0.01, %v9268_v43  ;;  %v9271_v45 = vadd.f32 %v19394_v20, %v9136_v34  ;;  %v7669_v24 = vpop.f32.mrf.mxu1 }
 0x467   : > { %v9270_v57 = vadd.f32 %v19394_v20, %v9135_v56  ;;  %v9138_v30 = vadd.f32 %v13902_v25, %v8285_v13  ;;  %v8284_v28 = vadd.f32 %v7669_v24, %v21937_v8  ;;  %v13905_v18 = vpop.f32.mrf.mxu0  ;;  %14048 = vmatmul.mubr.msk.f32.gmra.mxu0 %vm838_vm2, %v21552_v61  ;;  %v21940_v56 = vld [vmem:[#allocation272_spill] sm:$0xff]  ;;  %v21941_v8 = vld [vmem:[#allocation325_spill] sm:$0xff] }
 0x468   : > { %v9652_v22 = vsel %vm9396_vm8, %v9268_v43, %v9524_v26  ;;  %vm9399_vm9 = vcmp.ge.f32.partialorder %v9271_v45, 0.0  ;;  %v9527_v47 = vmul.f32 0.01, %v9271_v45  ;;  %v13711_v32 = vpop.f32.mrf.mxu1  ;;  %13854 = vmatmul.mubr.msk.f32.gmra.mxu1 %vm838_vm2, %v21938_v38  ;;  %14050 = vmatprep.mubr.msk.f32.mxu0 %vm838_vm2, %v21554_v10  ;;  %v21939_v43 = vld [vmem:[#allocation106_spill] sm:$0xff]  ;;  %v21945_v38 = vld [vmem:[#allocation309_spill] sm:$0xff] }
 0x469   : > { %9781 = vst.msk [vmem:[%s19411_s19 + $0x10] sm:$0xff] %vm9778_vm4, %v9652_v22  ;;  %vm9398_vm10 = vcmp.ge.f32.partialorder %v9270_v57, 0.0  ;;  %v9526_v25 = vmul.f32 0.01, %v9270_v57  ;;  %v9273_v34 = vadd.f32 %v19394_v20, %v9138_v30  ;;  %v9137_v41 = vadd.f32 %v8522_v16, %v8284_v28  ;;  %v8532_v61 = vpop.f32.mrf.mxu0  ;;  %13856 = vmatprep.mubr.msk.f32.mxu1 %vm838_vm2, %v21939_v43  ;;  %v21942_v30 = vld [vmem:[#allocation307_spill] sm:$0xff]  ;;  %v21943_v22 = vld [vmem:[#allocation109_spill] sm:$0xff] }
 0x46a   : > { %v9655_v37 = vsel %vm9399_vm9, %v9271_v45, %v9527_v47  ;;  %v8287_v44 = vadd.f32 %v13711_v32, %v21940_v56  ;;  %v7679_v13 = vpop.f32.mrf.mxu1  ;;  %v21944_v47 = vld [vmem:[#allocation326_spill] sm:$0xff]  ;;  %v21946_v43 = vld [vmem:[#allocation112_spill] sm:$0xff] }
 0x46b   : > { %9784 = vst.msk [vmem:[%s19411_s19 + $0x28] sm:$0xff] %vm9778_vm4, %v9655_v37  ;;  %v9654_v11 = vsel %vm9398_vm10, %v9270_v57, %v9526_v25  ;;  %vm9401_vm11 = vcmp.ge.f32.partialorder %v9273_v34, 0.0  ;;  %v9529_v10 = vmul.f32 0.01, %v9273_v34  ;;  %v9272_v26 = vadd.f32 %v19394_v20, %v9137_v41  ;;  %v13908_v24 = vpop.f32.mrf.mxu0  ;;  %14051 = vmatmul.mubr.msk.f32.gmra.mxu0 %vm838_vm2, %v21941_v8 }
 0x46c   : > { %9783 = vst.msk [vmem:[%s19411_s19 + $0x20] sm:$0xff] %vm9778_vm4, %v9654_v11  ;;  %v9140_v16 = vadd.f32 %v13905_v18, %v8287_v44  ;;  %v8286_v45 = vadd.f32 %v7679_v13, %v21942_v30  ;;  %v13714_v28 = vpop.f32.mrf.mxu1  ;;  %13857 = vmatmul.mubr.msk.f32.gmra.mxu1 %vm838_vm2, %v21943_v22  ;;  %14053 = vmatprep.mubr.msk.f32.mxu0 %vm838_vm2, %v21944_v47  ;;  %v21947_v11 = vld [vmem:[#allocation310_spill] sm:$0xff]  ;;  %v21949_v47 = vld [vmem:[#allocation116_spill] sm:$0xff] }
 0x46d   : > { %v9657_v57 = vsel %vm9401_vm11, %v9273_v34, %v9529_v10  ;;  %vm9400_vm12 = vcmp.ge.f32.partialorder %v9272_v26, 0.0  ;;  %v9528_v32 = vmul.f32 0.01, %v9272_v26  ;;  %v8289_v25 = vadd.f32 %v13714_v28, %v21945_v38  ;;  %v8542_v41 = vpop.f32.mrf.mxu0  ;;  %13859 = vmatprep.mubr.msk.f32.mxu1 %vm838_vm2, %v21946_v43  ;;  %v21948_v34 = vld [vmem:[#allocation327_spill] sm:$0xff] }
 0x46e   : > { %9786 = vst.msk [vmem:[%s19411_s19 + $0x38] sm:$0xff] %vm9778_vm4, %v9657_v57  ;;  %v9275_v18 = vadd.f32 %v19394_v20, %v9140_v16  ;;  %v9139_v37 = vadd.f32 %v8532_v61, %v8286_v45  ;;  %v7689_v56 = vpop.f32.mrf.mxu1  ;;  %v21950_v61 = vld [vmem:[#allocation328_spill] sm:$0xff]  ;;  %v21951_v16 = vld [vmem:[#allocation311_spill] sm:$0xff] }
 0x46f   : > { %v9656_v44 = vsel %vm9400_vm12, %v9272_v26, %v9528_v32  ;;  %v9142_v13 = vadd.f32 %v13908_v24, %v8289_v25  ;;  %v8288_v8 = vadd.f32 %v7689_v56, %v21947_v11  ;;  %v13911_v30 = vpop.f32.mrf.mxu0  ;;  %14054 = vmatmul.mubr.msk.f32.gmra.mxu0 %vm838_vm2, %v21948_v34  ;;  %v21952_v32 = vld [vmem:[#allocation119_spill] sm:$0xff] }
 0x470   : > { %9785 = vst.msk [vmem:[%s19411_s19 + $0x30] sm:$0xff] %vm9778_vm4, %v9656_v44  ;;  %vm9403_vm13 = vcmp.ge.f32.partialorder %v9275_v18, 0.0  ;;  %v9531_v10 = vmul.f32 0.01, %v9275_v18  ;;  %v9274_v28 = vadd.f32 %v19394_v20, %v9139_v37  ;;  %v13717_v22 = vpop.f32.mrf.mxu1  ;;  %13860 = vmatmul.mubr.msk.f32.gmra.mxu1 %vm838_vm2, %v21949_v47  ;;  %14056 = vmatprep.mubr.msk.f32.mxu0 %vm838_vm2, %v21950_v61 }
 0x471   : > { %v9277_v26 = vadd.f32 %v19394_v20, %v9142_v13  ;;  %v9141_v24 = vadd.f32 %v8542_v41, %v8288_v8  ;;  %v8291_v45 = vadd.f32 %v13717_v22, %v21951_v16  ;;  %v8552_v57 = vpop.f32.mrf.mxu0  ;;  %13862 = vmatprep.mubr.msk.f32.mxu1 %vm838_vm2, %v21952_v32  ;;  %v21953_v13 = vld [vmem:[#allocation329_spill] sm:$0xff]  ;;  %v21954_v8 = vld [vmem:[#allocation312_spill] sm:$0xff]  ;;  %v21956_v22 = vld [vmem:[#allocation330_spill] sm:$0xff] }
 0x472   : > { %v9659_v38 = vsel %vm9403_vm13, %v9275_v18, %v9531_v10  ;;  %vm9402_vm14 = vcmp.ge.f32.partialorder %v9274_v28, 0.0  ;;  %v9530_v25 = vmul.f32 0.01, %v9274_v28  ;;  %v7699_v43 = vpop.f32.mrf.mxu1  ;;  %v21955_v10 = vld [vmem:[#allocation122_spill] sm:$0xff]  ;;  %v21957_v16 = vld [vmem:[#allocation125_spill] sm:$0xff] }
 0x473   : > { %9788 = vst.msk [vmem:[%s19411_s19 + $0x48] sm:$0xff] %vm9778_vm4, %v9659_v38  ;;  %vm9405_vm15 = vcmp.ge.f32.partialorder %v9277_v26, 0.0  ;;  %v9533_v37 = vmul.f32 0.01, %v9277_v26  ;;  %v9276_v56 = vadd.f32 %v19394_v20, %v9141_v24  ;;  %v9144_v44 = vadd.f32 %v13911_v30, %v8291_v45  ;;  %v13914_v41 = vpop.f32.mrf.mxu0  ;;  %14057 = vmatmul.mubr.msk.f32.gmra.mxu0 %vm838_vm2, %v21953_v13  ;;  %v21958_v45 = vld [vmem:[#allocation313_spill] sm:$0xff] }
 0x474   : > { %v9658_v11 = vsel %vm9402_vm14, %v9274_v28, %v9530_v25  ;;  %v8290_v34 = vadd.f32 %v7699_v43, %v21954_v8  ;;  %v13720_v18 = vpop.f32.mrf.mxu1  ;;  %13863 = vmatmul.mubr.msk.f32.gmra.mxu1 %vm838_vm2, %v21955_v10  ;;  %14059 = vmatprep.mubr.msk.f32.mxu0 %vm838_vm2, %v21956_v22  ;;  %v21963_v22 = vld [vmem:[#allocation315_spill] sm:$0xff] }
 0x475   : > { %9787 = vst.msk [vmem:[%s19411_s19 + $0x40] sm:$0xff] %vm9778_vm4, %v9658_v11  ;;  %v9661_v47 = vsel %vm9405_vm15, %v9277_v26, %v9533_v37  ;;  %vm9404_vm0 = vcmp.ge.f32.partialorder %v9276_v56, 0.0  ;;  %v9532_v30 = vmul.f32 0.01, %v9276_v56  ;;  %v9279_v61 = vadd.f32 %v19394_v20, %v9144_v44  ;;  %v8562_v24 = vpop.f32.mrf.mxu0  ;;  %13865 = vmatprep.mubr.msk.f32.mxu1 %vm838_vm2, %v21957_v16  ;;  %v21959_v26 = vld [vmem:[#allocation314_spill] sm:$0xff]  ;;  %v21960_v11 = vld [vmem:[#allocation331_spill] sm:$0xff] }
 0x476   : > { %9790 = vst.msk [vmem:[%s19411_s19 + $0x58] sm:$0xff] %vm9778_vm4, %v9661_v47  ;;  %v9143_v28 = vadd.f32 %v8552_v57, %v8290_v34  ;;  %v8293_v32 = vadd.f32 %v13720_v18, %v21958_v45  ;;  %v7709_v38 = vpop.f32.mrf.mxu1  ;;  %v21961_v57 = vld [vmem:[#allocation127_spill] sm:$0xff]  ;;  %v21962_v34 = vld [vmem:[#allocation332_spill] sm:$0xff]  ;;  %v21964_v16 = vld [vmem:[#allocation129_spill] sm:$0xff] }
 0x477   : > { %v9660_v25 = vsel %vm9404_vm0, %v9276_v56, %v9532_v30  ;;  %vm9407_vm5 = vcmp.ge.f32.partialorder %v9279_v61, 0.0  ;;  %v9535_v43 = vmul.f32 0.01, %v9279_v61  ;;  %v8292_v37 = vadd.f32 %v7709_v38, %v21959_v26  ;;  %v13917_v13 = vpop.f32.mrf.mxu0  ;;  %14060 = vmatmul.mubr.msk.f32.gmra.mxu0 %vm838_vm2, %v21960_v11 }
 0x478   : > { %9789 = vst.msk [vmem:[%s19411_s19 + $0x50] sm:$0xff] %vm9778_vm4, %v9660_v25  ;;  %v9278_v44 = vadd.f32 %v19394_v20, %v9143_v28  ;;  %v9146_v8 = vadd.f32 %v13914_v41, %v8293_v32  ;;  %v13723_v10 = vpop.f32.mrf.mxu1  ;;  %13866 = vmatmul.mubr.msk.f32.gmra.mxu1 %vm838_vm2, %v21961_v57  ;;  %14062 = vmatprep.mubr.msk.f32.mxu0 %vm838_vm2, %v21962_v34  ;;  %v21965_v25 = vld [vmem:[#allocation316_spill] sm:$0xff]  ;;  %v21968_v57 = vld [vmem:[#allocation334_spill] sm:$0xff] }
 0x479   : > { %v9663_v56 = vsel %vm9407_vm5, %v9279_v61, %v9535_v43  ;;  %v9145_v18 = vadd.f32 %v8562_v24, %v8292_v37  ;;  %v8295_v47 = vadd.f32 %v13723_v10, %v21963_v22  ;;  %v8572_v30 = vpop.f32.mrf.mxu0  ;;  %13868 = vmatprep.mubr.msk.f32.mxu1 %vm838_vm2, %v21964_v16  ;;  %v21966_v43 = vld [vmem:[#allocation333_spill] sm:$0xff]  ;;  %v21967_v10 = vld [vmem:[#allocation131_spill] sm:$0xff] }
 0x47a   : > { %9792 = vst.msk [vmem:[%s19411_s19 + $0x68] sm:$0xff] %vm9778_vm4, %v9663_v56  ;;  %vm9406_vm6 = vcmp.ge.f32.partialorder %v9278_v44, 0.0  ;;  %v9534_v41 = vmul.f32 0.01, %v9278_v44  ;;  %v9281_v28 = vadd.f32 %v19394_v20, %v9146_v8  ;;  %v7719_v45 = vpop.f32.mrf.mxu1  ;;  %v21969_v56 = vld [vmem:[#allocation133_spill] sm:$0xff] }
 0x47b   : > { %v9280_v32 = vadd.f32 %v19394_v20, %v9145_v18  ;;  %v9148_v38 = vadd.f32 %v13917_v13, %v8295_v47  ;;  %v8294_v61 = vadd.f32 %v7719_v45, %v21965_v25  ;;  %v13920_v24 = vpop.f32.mrf.mxu0  ;;  %14063 = vmatmul.mubr.msk.f32.gmra.mxu0 %vm838_vm2, %v21966_v43  ;;  %v21970_v22 = vld [vmem:[#allocation317_spill] sm:$0xff] }
 0x47c   : > { %v9662_v26 = vsel %vm9406_vm6, %v9278_v44, %v9534_v41  ;;  %vm9409_vm7 = vcmp.ge.f32.partialorder %v9281_v28, 0.0  ;;  %v9537_v37 = vmul.f32 0.01, %v9281_v28  ;;  %v13726_v11 = vpop.f32.mrf.mxu1  ;;  %13869 = vmatmul.mubr.msk.f32.gmra.mxu1 %vm838_vm2, %v21967_v10  ;;  %14065 = vmatprep.mubr.msk.f32.mxu0 %vm838_vm2, %v21968_v57  ;;  %v21973_v10 = vld [vmem:[#allocation135_spill] sm:$0xff]  ;;  %v19551_v57 = vld [vmem:[%s14554_s25 + $0x530] sm:$0xff] }
 0x47d   : > { %9791 = vst.msk [vmem:[%s19411_s19 + $0x60] sm:$0xff] %vm9778_vm4, %v9662_v26  ;;  %vm9408_vm8 = vcmp.ge.f32.partialorder %v9280_v32, 0.0  ;;  %v9536_v13 = vmul.f32 0.01, %v9280_v32  ;;  %v9283_v8 = vadd.f32 %v19394_v20, %v9148_v38  ;;  %v9147_v34 = vadd.f32 %v8572_v30, %v8294_v61  ;;  %v8582_v44 = vpop.f32.mrf.mxu0  ;;  %13871 = vmatprep.mubr.msk.f32.mxu1 %vm838_vm2, %v21969_v56  ;;  %v21971_v38 = vld [vmem:[#allocation335_spill] sm:$0xff]  ;;  %v21972_v26 = vld [vmem:[#allocation318_spill] sm:$0xff] }
 0x47e   : > { %v9665_v18 = vsel %vm9409_vm7, %v9281_v28, %v9537_v37  ;;  %v8297_v47 = vadd.f32 %v13726_v11, %v21970_v22  ;;  %v7729_v16 = vpop.f32.mrf.mxu1  ;;  %v14465_v30 = vld [vmem:[%s14554_s25 + $0x528] sm:$0xff] }
 0x47f   : > { %9794 = vst.msk [vmem:[%s19411_s19 + $0x78] sm:$0xff] %vm9778_vm4, %v9665_v18  ;;  %v9664_v41 = vsel %vm9408_vm8, %v9280_v32, %v9536_v13  ;;  %vm9411_vm9 = vcmp.ge.f32.partialorder %v9283_v8, 0.0  ;;  %v9539_v45 = vmul.f32 0.01, %v9283_v8  ;;  %v9282_v25 = vadd.f32 %v19394_v20, %v9147_v34  ;;  %v13923_v43 = vpop.f32.mrf.mxu0  ;;  %14066 = vmatmul.mubr.msk.f32.gmra.mxu0 %vm838_vm2, %v21971_v38  ;;  %v21974_v32 = vld [vmem:[#allocation336_spill] sm:$0xff]  ;;  %v21975_v18 = vld [vmem:[#allocation319_spill] sm:$0xff] }
 0x480   : > { %v7553_v61 = vrot.slane %v14465_v30, 1  ;;  %9793 = vst.msk [vmem:[%s19411_s19 + $0x70] sm:$0xff] %vm9778_vm4, %v9664_v41  ;;  %v9150_v28 = vadd.f32 %v13920_v24, %v8297_v47  ;;  %v8296_v37 = vadd.f32 %v7729_v16, %v21972_v26  ;;  %v13729_v11 = vpop.f32.mrf.mxu1  ;;  %13872 = vmatmul.mubr.msk.f32.gmra.mxu1 %vm838_vm2, %v21973_v10  ;;  %14068 = vmatprep.mubr.msk.f32.mxu0 %vm838_vm2, %v21974_v32  ;;  %v7554_v13 = vrot.slane %v19551_v57, 1  ;;  %v21976_v47 = vld [vmem:[#allocation137_spill] sm:$0xff] }
 0x481   : > { %v9667_v34 = vsel %vm9411_vm9, %v9283_v8, %v9539_v45  ;;  %vm9410_vm10 = vcmp.ge.f32.partialorder %v9282_v25, 0.0  ;;  %v9538_v56 = vmul.f32 0.01, %v9282_v25  ;;  %v8299_v22 = vadd.f32 %v13729_v11, %v21975_v18  ;;  %v8592_v24 = vpop.f32.mrf.mxu0  ;;  %13874 = vmatprep.mubr.msk.f32.mxu1 %vm838_vm2, %v21976_v47  ;;  %v19562_v32 = vld [vmem:[%s14554_s25 + $0x538] sm:$0xff]  ;;  %v21977_v18 = vld [vmem:[#allocation320_spill] sm:$0xff]  ;;  %v21980_v47 = vld [vmem:[#allocation298_spill] sm:$0xff] }
 0x482   : > { %v8406_v16 = vrot.slane %v14465_v30, 2  ;;  %9796 = vst.msk [vmem:[%s19411_s19 + $0x88] sm:$0xff] %vm9778_vm4, %v9667_v34  ;;  %v9285_v41 = vadd.f32 %v19394_v20, %v9150_v28  ;;  %v9149_v38 = vadd.f32 %v8582_v44, %v8296_v37  ;;  %v7739_v26 = vpop.f32.mrf.mxu1  ;;  %v20596_v10 = vrot.slane %v19551_v57, 2  ;;  %v21978_v34 = vld [vmem:[#allocation139_spill] sm:$0xff] }
 0x483   : > { %v20595_v8 = vrot.slane %v19562_v32, 1  ;;  %v9666_v45 = vsel %vm9410_vm10, %v9282_v25, %v9538_v56  ;;  %v9152_v11 = vadd.f32 %v13923_v43, %v8299_v22  ;;  %v8298_v55 = vadd.f32 %v7739_v26, %v21977_v18  ;;  %v13926_v39 = vpop.f32.mrf.mxu0  ;;  %14069 = vmatmul.mubr.msk.f32.gmra.mxu0 %vm838_vm2, %v21588_v7  ;;  %v21979_v7 = vld [vmem:[#allocation321_spill] sm:$0xff] }
 0x484   : > { %v8409_v30 = vrot.slane %v19562_v32, 2  ;;  %9795 = vst.msk [vmem:[%s19411_s19 + $0x80] sm:$0xff] %vm9778_vm4, %v9666_v45  ;;  %vm9413_vm11 = vcmp.ge.f32.partialorder %v9285_v41, 0.0  ;;  %v9541_v44 = vmul.f32 0.01, %v9285_v41  ;;  %v9284_v28 = vadd.f32 %v19394_v20, %v9149_v38  ;;  %v13732_v37 = vpop.f32.mrf.mxu1  ;;  %13875 = vmatmul.mubr.msk.f32.gmra.mxu1 %vm838_vm2, %v21978_v34  ;;  %14071 = vmatprep.mubr.msk.f32.mxu0 %vm838_vm2, %v18652_v0 }
 0x485   : > { %v9287_v25 = vadd.f32 %v19394_v20, %v9152_v11  ;;  %v9151_v43 = vadd.f32 %v8592_v24, %v8298_v55  ;;  %v8301_v56 = vadd.f32 %v13732_v37, %v21979_v7  ;;  %v8602_v22 = vpop.f32.mrf.mxu0  ;;  %13877 = vmatprep.mubr.msk.f32.mxu1 %vm838_vm2, %v21980_v47  ;;  %v7555_v26 = vsel %vm549_vm1, %v7553_v61, %v7554_v13  ;;  %v379_v61 = vld [vmem:[%s14554_s25 + $0x548] sm:$0x3]  ;;  %v21982_v47 = vld [vmem:[#allocation302_spill] sm:$0xff] }
 0x486   : > { %v9669_v38 = vsel %vm9413_vm11, %v9285_v41, %v9541_v44  ;;  %vm9412_vm12 = vcmp.ge.f32.partialorder %v9284_v28, 0.0  ;;  %v9540_v45 = vmul.f32 0.01, %v9284_v28  ;;  %v7749_v18 = vpop.f32.mrf.mxu1  ;;  %v8408_v0 = vsel %vm2768_vm3, %v8406_v16, %v20596_v10  ;;  %v21981_v44 = vld [vmem:[#allocation322_spill] sm:$0xff] }
 0x487   : > { %9798 = vst.msk [vmem:[%s19411_s19 + $0x98] sm:$0xff] %vm9778_vm4, %v9669_v38  ;;  %vm9415_vm13 = vcmp.ge.f32.partialorder %v9287_v25, 0.0  ;;  %v9543_v55 = vmul.f32 0.01, %v9287_v25  ;;  %v9286_v24 = vadd.f32 %v19394_v20, %v9151_v43  ;;  %v9154_v11 = vadd.f32 %v13926_v39, %v8301_v56  ;;  %v13929_v37 = vpop.f32.mrf.mxu0  ;;  %14072 = vmatmul.mubr.msk.f32.gmra.mxu0 %vm838_vm2, %v18669_v31  ;;  %v14468_v16 = vld [vmem:[%s14554_s25 + $0x540] sm:$0xff] }
 0x488   : > { %v9668_v41 = vsel %vm9412_vm12, %v9284_v28, %v9540_v45  ;;  %v8300_v34 = vadd.f32 %v7749_v18, %v21981_v44  ;;  %v13735_v7 = vpop.f32.mrf.mxu1  ;;  %13878 = vmatmul.mubr.msk.f32.gmra.mxu1 %vm838_vm2, %v21982_v47  ;;  %14074 = vmatprep.mubr.msk.f32.mxu0 %vm838_vm2, %v18674_v1  ;;  %v7557_v39 = vsel %vm549_vm1, %v7554_v13, %v20595_v8  ;;  %v8411_v43 = vrot.slane %v14468_v16, 2  ;;  %v21983_v45 = vld [vmem:[#allocation304_spill] sm:$0xff]  ;;  %v21984_v18 = vld [vmem:[#allocation323_spill] sm:$0xff] }
 0x489   : > { %9797 = vst.msk [vmem:[%s19411_s19 + $0x90] sm:$0xff] %vm9778_vm4, %v9668_v41  ;;  %v9671_v31 = vsel %vm9415_vm13, %v9287_v25, %v9543_v55  ;;  %vm9414_vm14 = vcmp.ge.f32.partialorder %v9286_v24, 0.0  ;;  %v9542_v28 = vmul.f32 0.01, %v9286_v24  ;;  %v9289_v56 = vadd.f32 %v19394_v20, %v9154_v11  ;;  %v8612_v38 = vpop.f32.mrf.mxu0  ;;  %13880 = vmatprep.mubr.msk.f32.mxu1 %vm838_vm2, %v21983_v45 }
 0x48a   : > { %9800 = vst.msk [vmem:[%s19411_s19 + $0xa8] sm:$0xff] %vm9778_vm4, %v9671_v31  ;;  %v9153_v1 = vadd.f32 %v8602_v22, %v8300_v34  ;;  %v8303_v13 = vadd.f32 %v13735_v7, %v21984_v18  ;;  %v7759_v44 = vpop.f32.mrf.mxu1  ;;  %v7558_v47 = vrot.slane %v14468_v16, 1  ;;  %v7560_v8 = vrot.slane %v379_v61, 1  ;;  %v21985_v7 = vld [vmem:[#allocation308_spill] sm:$0xff] }
 0x48b   : > { %v9670_v41 = vsel %vm9414_vm14, %v9286_v24, %v9542_v28  ;;  %vm9417_vm15 = vcmp.ge.f32.partialorder %v9289_v56, 0.0  ;;  %v9545_v25 = vmul.f32 0.01, %v9289_v56  ;;  %v8302_v55 = vadd.f32 %v7759_v44, %v18663_v15  ;;  %v13932_v10 = vpop.f32.mrf.mxu0  ;;  %14075 = vmatmul.mubr.msk.f32.gmra.mxu0 %vm838_vm2, %v18690_v17 }
 0x48c   : > { %9799 = vst.msk [vmem:[%s19411_s19 + $0xa0] sm:$0xff] %vm9778_vm4, %v9670_v41  ;;  %v9288_v11 = vadd.f32 %v19394_v20, %v9153_v1  ;;  %v9156_v22 = vadd.f32 %v13929_v37, %v8303_v13  ;;  %v13738_v34 = vpop.f32.mrf.mxu1  ;;  %13881 = vmatmul.mubr.msk.f32.gmra.mxu1 %vm838_vm2, %v21985_v7  ;;  %14077 = vmatprep.mubr.msk.f32.mxu0 %vm838_vm2, %v8408_v0  ;;  %v21986_v15 = vrot.slane %v19551_v57, 2  ;;  %v8413_v16 = vrot.slane %v379_v61, 2 }
 0x48d   : > { %v9673_v31 = vsel %vm9417_vm15, %v9289_v56, %v9545_v25  ;;  %v9155_v17 = vadd.f32 %v8612_v38, %v8302_v55  ;;  %v8305_v28 = vadd.f32 %v13738_v34, %v18676_v51  ;;  %v8622_v45 = vpop.f32.mrf.mxu0  ;;  %13883 = vmatprep.mubr.msk.f32.mxu1 %vm838_vm2, %v7555_v26  ;;  %v8412_v37 = vsel %vm2768_vm3, %v8409_v30, %v8411_v43 }
 0x48e   : > { %v8410_v24 = vsel %vm2768_vm3, %v21986_v15, %v8409_v30  ;;  %9802 = vst.msk [vmem:[%s19411_s19 + $0xb8] sm:$0xff] %vm9778_vm4, %v9673_v31  ;;  %vm9416_vm0 = vcmp.ge.f32.partialorder %v9288_v11, 0.0  ;;  %v9544_v0 = vmul.f32 0.01, %v9288_v11  ;;  %v9291_v57 = vadd.f32 %v19394_v20, %v9156_v22  ;;  %v7769_v1 = vpop.f32.mrf.mxu1 }
 0x48f   : > { %v21987_v61 = vrot.slane %v19562_v32, 1  ;;  %v9290_v51 = vadd.f32 %v19394_v20, %v9155_v17  ;;  %v9158_v38 = vadd.f32 %v13932_v10, %v8305_v28  ;;  %v8304_v26 = vadd.f32 %v7769_v1, %v18684_v63  ;;  %v13935_v18 = vpop.f32.mrf.mxu0  ;;  %14078 = vmatmul.mubr.msk.f32.gmra.mxu0 %vm838_vm2, %v8410_v24 }
 0x490   : > { %v7561_v30 = vsel %vm549_vm1, %v7558_v47, %v7560_v8  ;;  %v9672_v13 = vsel %vm9416_vm0, %v9288_v11, %v9544_v0  ;;  %vm9419_vm5 = vcmp.ge.f32.partialorder %v9291_v57, 0.0  ;;  %v9547_v44 = vmul.f32 0.01, %v9291_v57  ;;  %v13741_v41 = vpop.f32.mrf.mxu1  ;;  %13884 = vmatmul.mubr.msk.f32.gmra.mxu1 %vm838_vm2, %v7557_v39  ;;  %14080 = vmatprep.mubr.msk.f32.mxu0 %vm838_vm2, %v8412_v37 }
 0x491   : > { %v7559_v56 = vsel %vm549_vm1, %v21987_v61, %v7558_v47  ;;  %v8414_v32 = vsel %vm2768_vm3, %v8411_v43, %v8413_v16  ;;  %9801 = vst.msk [vmem:[%s19411_s19 + $0xb0] sm:$0xff] %vm9778_vm4, %v9672_v13  ;;  %vm9418_vm6 = vcmp.ge.f32.partialorder %v9290_v51, 0.0  ;;  %v9546_v63 = vmul.f32 0.01, %v9290_v51  ;;  %v8632_v8 = vpop.f32.mrf.mxu0 }
 0x492   : > { %v9293_v10 = vadd.f32 %v19394_v20, %v9158_v38  ;;  %v9157_v25 = vadd.f32 %v8622_v45, %v8304_v26  ;;  %13886 = vmatprep.mubr.msk.f32.mxu1 %vm838_vm2, %v7559_v56  ;;  %v9675_v47 = vsel %vm9419_vm5, %v9291_v57, %v9547_v44  ;;  %v8307_v55 = vadd.f32 %v13741_v41, %v18692_v12  ;;  %v7779_v11 = vpop.f32.mrf.mxu1 }
 0x493   : > { %9804 = vst.msk [vmem:[%s19411_s19 + $0xc8] sm:$0xff] %vm9778_vm4, %v9675_v47  ;;  %v9674_v39 = vsel %vm9418_vm6, %v9290_v51, %v9546_v63  ;;  %v13938_v34 = vpop.f32.mrf.mxu0  ;;  %14081 = vmatmul.mubr.msk.f32.gmra.mxu0 %vm838_vm2, %v8414_v32  ;;  %v8306_v15 = vadd.f32 %v7779_v11, %v18700_v19 }
 0x494   : > { %vm9421_vm1 = vcmp.ge.f32.partialorder %v9293_v10, 0.0  ;;  %v9549_v43 = vmul.f32 0.01, %v9293_v10  ;;  %v9292_v22 = vadd.f32 %v19394_v20, %v9157_v25  ;;  %9803 = vst.msk [vmem:[%s19411_s19 + $0xc0] sm:$0xff] %vm9778_vm4, %v9674_v39  ;;  %v9160_v7 = vadd.f32 %v13935_v18, %v8307_v55  ;;  %v13744_v24 = vpop.f32.mrf.mxu1  ;;  %13887 = vmatmul.mubr.msk.f32.gmra.mxu1 %vm838_vm2, %v7561_v30 }
 0x495   : > { %v8309_v31 = vadd.f32 %v13744_v24, %v18705_v36  ;;  %v8642_v17 = vpop.f32.mrf.mxu0  ;;  %v9159_v45 = vadd.f32 %v8632_v8, %v8306_v15 }
 0x496   : > { %v9677_v12 = vsel %vm9421_vm1, %v9293_v10, %v9549_v43  ;;  %vm9420_vm3 = vcmp.ge.f32.partialorder %v9292_v22, 0.0  ;;  %v9548_v16 = vmul.f32 0.01, %v9292_v22  ;;  %v9295_v28 = vadd.f32 %v19394_v20, %v9160_v7  ;;  %v7789_v37 = vpop.f32.mrf.mxu1 }
 0x497   : > { %9806 = vst.msk [vmem:[%s19411_s19 + $0xd8] sm:$0xff] %vm9778_vm4, %v9677_v12  ;;  %v9162_v57 = vadd.f32 %v13938_v34, %v8309_v31  ;;  %v8308_v19 = vadd.f32 %v7789_v37, %v18714_v5  ;;  %v13941_v1 = vpop.f32.mrf.mxu0  ;;  %v9294_v56 = vadd.f32 %v19394_v20, %v9159_v45 }
 0x498   : > { %v9676_v0 = vsel %vm9420_vm3, %v9292_v22, %v9548_v16  ;;  %vm9423_vm2 = vcmp.ge.f32.partialorder %v9295_v28, 0.0  ;;  %v9551_v61 = vmul.f32 0.01, %v9295_v28  ;;  %v13747_v36 = vpop.f32.mrf.mxu1 }
 0x499   : > { %9805 = vst.msk [vmem:[%s19411_s19 + $0xd0] sm:$0xff] %vm9778_vm4, %v9676_v0  ;;  %v9297_v51 = vadd.f32 %v19394_v20, %v9162_v57  ;;  %v9161_v38 = vadd.f32 %v8642_v17, %v8308_v19  ;;  %v8311_v26 = vadd.f32 %v13747_v36, %v18719_v9  ;;  %v8652_v18 = vpop.f32.mrf.mxu0  ;;  %vm9422_vm7 = vcmp.ge.f32.partialorder %v9294_v56, 0.0 }
 0x49a   : > { %v9679_v30 = vsel %vm9423_vm2, %v9295_v28, %v9551_v61  ;;  %v9550_v13 = vmul.f32 0.01, %v9294_v56  ;;  %v7799_v44 = vpop.f32.mrf.mxu1 }
 0x49b   : > { %9808 = vst.msk [vmem:[%s19411_s19 + $0xe8] sm:$0xff] %vm9778_vm4, %v9679_v30  ;;  %vm9425_vm8 = vcmp.ge.f32.partialorder %v9297_v51, 0.0  ;;  %v9553_v5 = vmul.f32 0.01, %v9297_v51  ;;  %v9296_v41 = vadd.f32 %v19394_v20, %v9161_v38  ;;  %v9164_v32 = vadd.f32 %v13941_v1, %v8311_v26  ;;  %v13944_v63 = vpop.f32.mrf.mxu0 }
 0x49c   : > { %v9678_v10 = vsel %vm9422_vm7, %v9294_v56, %v9550_v13  ;;  %v8310_v25 = vadd.f32 %v7799_v44, %v18728_v2  ;;  %v13750_v8 = vpop.f32.mrf.mxu1 }
 0x49d   : > { %9807 = vst.msk [vmem:[%s19411_s19 + $0xe0] sm:$0xff] %vm9778_vm4, %v9678_v10  ;;  %v9681_v9 = vsel %vm9425_vm8, %v9297_v51, %v9553_v5  ;;  %vm9424_vm9 = vcmp.ge.f32.partialorder %v9296_v41, 0.0  ;;  %v9552_v47 = vmul.f32 0.01, %v9296_v41  ;;  %v9299_v55 = vadd.f32 %v19394_v20, %v9164_v32  ;;  %v8662_v11 = vpop.f32.mrf.mxu0 }
 0x49e   : > { %9810 = vst.msk [vmem:[%s19411_s19 + $0xf8] sm:$0xff] %vm9778_vm4, %v9681_v9  ;;  %v9163_v39 = vadd.f32 %v8652_v18, %v8310_v25  ;;  %v8313_v43 = vadd.f32 %v13750_v8, %v18733_v27  ;;  %v7809_v22 = vpop.f32.mrf.mxu1 }
 0x49f   : > { %v9680_v34 = vsel %vm9424_vm9, %v9296_v41, %v9552_v47  ;;  %vm9427_vm10 = vcmp.ge.f32.partialorder %v9299_v55, 0.0  ;;  %v9555_v2 = vmul.f32 0.01, %v9299_v55  ;;  %v8312_v7 = vadd.f32 %v7809_v22, %v18742_v14  ;;  %v13947_v15 = vpop.f32.mrf.mxu0 }
 0x4a0   : > { %9809 = vst.msk [vmem:[%s19411_s19 + $0xf0] sm:$0xff] %vm9778_vm4, %v9680_v34  ;;  %v9298_v24 = vadd.f32 %v19394_v20, %v9163_v39  ;;  %v9166_v12 = vadd.f32 %v13944_v63, %v8313_v43  ;;  %v13753_v16 = vpop.f32.mrf.mxu1 }
 0x4a1   : > { %v9683_v31 = vsel %vm9427_vm10, %v9299_v55, %v9555_v2  ;;  %v9165_v17 = vadd.f32 %v8662_v11, %v8312_v7  ;;  %v8315_v28 = vadd.f32 %v13753_v16, %v18747_v62  ;;  %v8672_v45 = vpop.f32.mrf.mxu0 }
 0x4a2   : > { %9812 = vst.msk [vmem:[%s19411_s19 + $0x108] sm:$0xff] %vm9778_vm4, %v9683_v31  ;;  %vm9426_vm11 = vcmp.ge.f32.partialorder %v9298_v24, 0.0  ;;  %v9554_v27 = vmul.f32 0.01, %v9298_v24  ;;  %v9301_v37 = vadd.f32 %v19394_v20, %v9166_v12  ;;  %v7819_v14 = vpop.f32.mrf.mxu1 }
 0x4a3   : > { %v9300_v0 = vadd.f32 %v19394_v20, %v9165_v17  ;;  %v9168_v57 = vadd.f32 %v13947_v15, %v8315_v28  ;;  %v8314_v19 = vadd.f32 %v7819_v14, %v18756_v48  ;;  %v13950_v1 = vpop.f32.mrf.mxu0 }
 0x4a4   : > { %v9682_v61 = vsel %vm9426_vm11, %v9298_v24, %v9554_v27  ;;  %vm9429_vm12 = vcmp.ge.f32.partialorder %v9301_v37, 0.0  ;;  %v9557_v56 = vmul.f32 0.01, %v9301_v37  ;;  %v13756_v36 = vpop.f32.mrf.mxu1 }
 0x4a5   : > { %9811 = vst.msk [vmem:[%s19411_s19 + $0x100] sm:$0xff] %vm9778_vm4, %v9682_v61  ;;  %vm9428_vm13 = vcmp.ge.f32.partialorder %v9300_v0, 0.0  ;;  %v9556_v62 = vmul.f32 0.01, %v9300_v0  ;;  %v9303_v51 = vadd.f32 %v19394_v20, %v9168_v57  ;;  %v9167_v38 = vadd.f32 %v8672_v45, %v8314_v19  ;;  %v8682_v26 = vpop.f32.mrf.mxu0 }
 0x4a6   : > { %v9685_v18 = vsel %vm9429_vm12, %v9301_v37, %v9557_v56  ;;  %v8317_v30 = vadd.f32 %v13756_v36, %v18761_v33  ;;  %v7829_v13 = vpop.f32.mrf.mxu1 }
 0x4a7   : > { %9814 = vst.msk [vmem:[%s19411_s19 + $0x118] sm:$0xff] %vm9778_vm4, %v9685_v18  ;;  %v9684_v48 = vsel %vm9428_vm13, %v9300_v0, %v9556_v62  ;;  %vm9431_vm14 = vcmp.ge.f32.partialorder %v9303_v51, 0.0  ;;  %v9559_v44 = vmul.f32 0.01, %v9303_v51  ;;  %v9302_v5 = vadd.f32 %v19394_v20, %v9167_v38  ;;  %v13953_v41 = vpop.f32.mrf.mxu0 }
 0x4a8   : > { %9813 = vst.msk [vmem:[%s19411_s19 + $0x110] sm:$0xff] %vm9778_vm4, %v9684_v48  ;;  %v9170_v32 = vadd.f32 %v13950_v1, %v8317_v30  ;;  %v8316_v63 = vadd.f32 %v7829_v13, %v18770_v59  ;;  %v13759_v10 = vpop.f32.mrf.mxu1 }
 0x4a9   : > { %v9687_v25 = vsel %vm9431_vm14, %v9303_v51, %v9559_v44  ;;  %vm9430_vm15 = vcmp.ge.f32.partialorder %v9302_v5, 0.0  ;;  %v9558_v33 = vmul.f32 0.01, %v9302_v5  ;;  %v8319_v8 = vadd.f32 %v13759_v10, %v18775_v54  ;;  %v8692_v9 = vpop.f32.mrf.mxu0 }
 0x4aa   : > { %9816 = vst.msk [vmem:[%s19411_s19 + $0x128] sm:$0xff] %vm9778_vm4, %v9687_v25  ;;  %v9305_v47 = vadd.f32 %v19394_v20, %v9170_v32  ;;  %v9169_v55 = vadd.f32 %v8682_v26, %v8316_v63  ;;  %v7839_v11 = vpop.f32.mrf.mxu1 }
 0x4ab   : > { %v9686_v39 = vsel %vm9430_vm15, %v9302_v5, %v9558_v33  ;;  %v9172_v43 = vadd.f32 %v13953_v41, %v8319_v8  ;;  %v8318_v22 = vadd.f32 %v7839_v11, %v18784_v21  ;;  %v13956_v34 = vpop.f32.mrf.mxu0 }
 0x4ac   : > { %9815 = vst.msk [vmem:[%s19411_s19 + $0x120] sm:$0xff] %vm9778_vm4, %v9686_v39  ;;  %vm9433_vm0 = vcmp.ge.f32.partialorder %v9305_v47, 0.0  ;;  %v9561_v59 = vmul.f32 0.01, %v9305_v47  ;;  %v9304_v2 = vadd.f32 %v19394_v20, %v9169_v55  ;;  %v13762_v54 = vpop.f32.mrf.mxu1 }
 0x4ad   : > { %v9307_v7 = vadd.f32 %v19394_v20, %v9172_v43  ;;  %v9171_v15 = vadd.f32 %v8692_v9, %v8318_v22  ;;  %v8321_v24 = vadd.f32 %v13762_v54, %v18789_v23  ;;  %v8702_v12 = vpop.f32.mrf.mxu0  ;;  %v21988_v43 = vld [vmem:[#allocation324_spill] sm:$0xff] }
 0x4ae   : > { %v9689_v16 = vsel %vm9433_vm0, %v9305_v47, %v9561_v59  ;;  %vm9432_vm5 = vcmp.ge.f32.partialorder %v9304_v2, 0.0  ;;  %v9560_v31 = vmul.f32 0.01, %v9304_v2  ;;  %v7849_v17 = vpop.f32.mrf.mxu1 }
 0x4af   : > { %9818 = vst.msk [vmem:[%s19411_s19 + $0x138] sm:$0xff] %vm9778_vm4, %v9689_v16  ;;  %vm9435_vm6 = vcmp.ge.f32.partialorder %v9307_v7, 0.0  ;;  %v9563_v21 = vmul.f32 0.01, %v9307_v7  ;;  %v9306_v28 = vadd.f32 %v19394_v20, %v9171_v15  ;;  %v9174_v45 = vadd.f32 %v13956_v34, %v8321_v24  ;;  %v13959_v27 = vpop.f32.mrf.mxu0  ;;  %v21989_v15 = vld [vmem:[#allocation274_spill] sm:$0xff] }
 0x4b0   : > { %v9688_v37 = vsel %vm9432_vm5, %v9304_v2, %v9560_v31  ;;  %v8320_v14 = vadd.f32 %v7849_v17, %v18798_v46  ;;  %v13765_v0 = vpop.f32.mrf.mxu1  ;;  %v21990_v17 = vld [vmem:[#allocation278_spill] sm:$0xff] }
 0x4b1   : > { %9817 = vst.msk [vmem:[%s19411_s19 + $0x130] sm:$0xff] %vm9778_vm4, %v9688_v37  ;;  %v9691_v23 = vsel %vm9435_vm6, %v9307_v7, %v9563_v21  ;;  %vm9434_vm1 = vcmp.ge.f32.partialorder %v9306_v28, 0.0  ;;  %v9562_v57 = vmul.f32 0.01, %v9306_v28  ;;  %v9309_v19 = vadd.f32 %v19394_v20, %v9174_v45  ;;  %v8712_v1 = vpop.f32.mrf.mxu0 }
 0x4b2   : > { %9820 = vst.msk [vmem:[%s19411_s19 + $0x148] sm:$0xff] %vm9778_vm4, %v9691_v23  ;;  %v9173_v61 = vadd.f32 %v8702_v12, %v8320_v14  ;;  %v8323_v56 = vadd.f32 %v13765_v0, %v18803_v50  ;;  %v7859_v36 = vpop.f32.mrf.mxu1  ;;  %v21991_v23 = vld [vmem:[#allocation280_spill] sm:$0xff] }
 0x4b3   : > { %v9690_v62 = vsel %vm9434_vm1, %v9306_v28, %v9562_v57  ;;  %vm9437_vm3 = vcmp.ge.f32.partialorder %v9309_v19, 0.0  ;;  %v9565_v46 = vmul.f32 0.01, %v9309_v19  ;;  %v8322_v51 = vadd.f32 %v7859_v36, %v18812_v4  ;;  %v13962_v38 = vpop.f32.mrf.mxu0 }
 0x4b4   : > { %9819 = vst.msk [vmem:[%s19411_s19 + $0x140] sm:$0xff] %vm9778_vm4, %v9690_v62  ;;  %v9308_v26 = vadd.f32 %v19394_v20, %v9173_v61  ;;  %v9176_v18 = vadd.f32 %v13959_v27, %v8323_v56  ;;  %v13768_v30 = vpop.f32.mrf.mxu1 }
 0x4b5   : > { %v9693_v13 = vsel %vm9437_vm3, %v9309_v19, %v9565_v46  ;;  %v9175_v48 = vadd.f32 %v8712_v1, %v8322_v51  ;;  %v8325_v44 = vadd.f32 %v13768_v30, %v18817_v6  ;;  %v8722_v5 = vpop.f32.mrf.mxu0  ;;  %v21992_v46 = vld [vmem:[#allocation284_spill] sm:$0xff] }
 0x4b6   : > { %9822 = vst.msk [vmem:[%s19411_s19 + $0x158] sm:$0xff] %vm9778_vm4, %v9693_v13  ;;  %vm9436_vm2 = vcmp.ge.f32.partialorder %v9308_v26, 0.0  ;;  %v9564_v50 = vmul.f32 0.01, %v9308_v26  ;;  %v9311_v41 = vadd.f32 %v19394_v20, %v9176_v18  ;;  %v7869_v4 = vpop.f32.mrf.mxu1 }
 0x4b7   : > { %v9310_v32 = vadd.f32 %v19394_v20, %v9175_v48  ;;  %v9178_v63 = vadd.f32 %v13962_v38, %v8325_v44  ;;  %v8324_v10 = vadd.f32 %v7869_v4, %v18826_v40  ;;  %v13965_v25 = vpop.f32.mrf.mxu0 }
 0x4b8   : > { %v9692_v33 = vsel %vm9436_vm2, %v9308_v26, %v9564_v50  ;;  %vm9439_vm7 = vcmp.ge.f32.partialorder %v9311_v41, 0.0  ;;  %v9567_v8 = vmul.f32 0.01, %v9311_v41  ;;  %v13771_v9 = vpop.f32.mrf.mxu1 }
 0x4b9   : > { %9821 = vst.msk [vmem:[%s19411_s19 + $0x150] sm:$0xff] %vm9778_vm4, %v9692_v33  ;;  %vm9438_vm8 = vcmp.ge.f32.partialorder %v9310_v32, 0.0  ;;  %v9566_v6 = vmul.f32 0.01, %v9310_v32  ;;  %v9313_v47 = vadd.f32 %v19394_v20, %v9178_v63  ;;  %v9177_v55 = vadd.f32 %v8722_v5, %v8324_v10  ;;  %v8732_v11 = vpop.f32.mrf.mxu0 }
 0x4ba   : > { %v9695_v39 = vsel %vm9439_vm7, %v9311_v41, %v9567_v8  ;;  %v8327_v22 = vadd.f32 %v13771_v9, %v21988_v43  ;;  %v7879_v34 = vpop.f32.mrf.mxu1  ;;  %v21993_v41 = vld [vmem:[#allocation286_spill] sm:$0xff] }
 0x4bb   : > { %9824 = vst.msk [vmem:[%s19411_s19 + $0x168] sm:$0xff] %vm9778_vm4, %v9695_v39  ;;  %v9694_v40 = vsel %vm9438_vm8, %v9310_v32, %v9566_v6  ;;  %vm9441_vm9 = vcmp.ge.f32.partialorder %v9313_v47, 0.0  ;;  %v9569_v59 = vmul.f32 0.01, %v9313_v47  ;;  %v9312_v2 = vadd.f32 %v19394_v20, %v9177_v55  ;;  %v13968_v54 = vpop.f32.mrf.mxu0  ;;  %v19739_v20 = vld [vmem:[%s20076_s2] ss:$0 sm:$0xff] }
 0x4bc   : > { %9823 = vst.msk [vmem:[%s19411_s19 + $0x160] sm:$0xff] %vm9778_vm4, %v9694_v40  ;;  %v9180_v7 = vadd.f32 %v13965_v25, %v8327_v22  ;;  %v8326_v24 = vadd.f32 %v7879_v34, %v21989_v15  ;;  %v13774_v12 = vpop.f32.mrf.mxu1  ;;  %v21994_v9 = vld [vmem:[#allocation290_spill] sm:$0xff]  ;;  %v21995_v39 = vld [vmem:[#allocation292_spill] sm:$0xff] }
 0x4bd   : > { %v9697_v16 = vsel %vm9441_vm9, %v9313_v47, %v9569_v59  ;;  %vm9440_vm10 = vcmp.ge.f32.partialorder %v9312_v2, 0.0  ;;  %v9568_v31 = vmul.f32 0.01, %v9312_v2  ;;  %v8329_v21 = vadd.f32 %v13774_v12, %v21990_v17  ;;  %v8742_v28 = vpop.f32.mrf.mxu0 }
 0x4be   : > { %9826 = vst.msk [vmem:[%s19411_s19 + $0x178] sm:$0xff] %vm9778_vm4, %v9697_v16  ;;  %v9315_v45 = vadd.f32 %v19739_v20, %v9180_v7  ;;  %v9179_v27 = vadd.f32 %v8732_v11, %v8326_v24  ;;  %v7889_v37 = vpop.f32.mrf.mxu1  ;;  %v21996_v7 = vld [vmem:[#allocation296_spill] sm:$0xff] }
 0x4bf   : > { %v9696_v14 = vsel %vm9440_vm10, %v9312_v2, %v9568_v31  ;;  %v9182_v0 = vadd.f32 %v13968_v54, %v8329_v21  ;;  %v8328_v57 = vadd.f32 %v7889_v37, %v21991_v23  ;;  %v13971_v19 = vpop.f32.mrf.mxu0 }
 0x4c0   : > { %9825 = vst.msk [vmem:[%s19411_s19 + $0x170] sm:$0xff] %vm9778_vm4, %v9696_v14  ;;  %vm9443_vm11 = vcmp.ge.f32.partialorder %v9315_v45, 0.0  ;;  %v9571_v1 = vmul.f32 0.01, %v9315_v45  ;;  %v9314_v61 = vadd.f32 %v19739_v20, %v9179_v27  ;;  %v13777_v56 = vpop.f32.mrf.mxu1 }
 0x4c1   : > { %v9317_v36 = vadd.f32 %v19739_v20, %v9182_v0  ;;  %v9181_v62 = vadd.f32 %v8742_v28, %v8328_v57  ;;  %v8331_v51 = vadd.f32 %v13777_v56, %v21992_v46  ;;  %v8752_v38 = vpop.f32.mrf.mxu0  ;;  %v21997_v28 = vld [vmem:[#allocation337_spill] sm:$0xff]  ;;  %v21998_v56 = vld [vmem:[#allocation14_spill] sm:$0xff] }
 0x4c2   : > { %v9699_v26 = vsel %vm9443_vm11, %v9315_v45, %v9571_v1  ;;  %vm9442_vm12 = vcmp.ge.f32.partialorder %v9314_v61, 0.0  ;;  %v9570_v18 = vmul.f32 0.01, %v9314_v61  ;;  %v7899_v30 = vpop.f32.mrf.mxu1 }
 0x4c3   : > { %9828 = vst.msk [vmem:[%s19411_s19 + $0x188] sm:$0xff] %vm9778_vm4, %v9699_v26  ;;  %vm9445_vm13 = vcmp.ge.f32.partialorder %v9317_v36, 0.0  ;;  %v9573_v13 = vmul.f32 0.01, %v9317_v36  ;;  %v9316_v48 = vadd.f32 %v19739_v20, %v9181_v62  ;;  %v9184_v44 = vadd.f32 %v13971_v19, %v8331_v51  ;;  %v13974_v5 = vpop.f32.mrf.mxu0 }
 0x4c4   : > { %v9698_v50 = vsel %vm9442_vm12, %v9314_v61, %v9570_v18  ;;  %v8330_v4 = vadd.f32 %v7899_v30, %v21993_v41  ;;  %v13780_v32 = vpop.f32.mrf.mxu1  ;;  %v21999_v30 = vld [vmem:[#allocation16_spill] sm:$0xff] }
 0x4c5   : > { %9827 = vst.msk [vmem:[%s19411_s19 + $0x180] sm:$0xff] %vm9778_vm4, %v9698_v50  ;;  %v9701_v63 = vsel %vm9445_vm13, %v9317_v36, %v9573_v13  ;;  %vm9444_vm14 = vcmp.ge.f32.partialorder %v9316_v48, 0.0  ;;  %v9572_v10 = vmul.f32 0.01, %v9316_v48  ;;  %v9319_v25 = vadd.f32 %v19739_v20, %v9184_v44  ;;  %v8762_v33 = vpop.f32.mrf.mxu0  ;;  %v22000_v50 = vld [vmem:[#allocation18_spill] sm:$0xff] }
 0x4c6   : > { %9830 = vst.msk [vmem:[%s19411_s19 + $0x198] sm:$0xff] %vm9778_vm4, %v9701_v63  ;;  %v9183_v8 = vadd.f32 %v8752_v38, %v8330_v4  ;;  %v8333_v6 = vadd.f32 %v13780_v32, %v21994_v9  ;;  %v7909_v47 = vpop.f32.mrf.mxu1 }
 0x4c7   : > { %v9700_v55 = vsel %vm9444_vm14, %v9316_v48, %v9572_v10  ;;  %vm9447_vm15 = vcmp.ge.f32.partialorder %v9319_v25, 0.0  ;;  %v9575_v11 = vmul.f32 0.01, %v9319_v25  ;;  %v8332_v43 = vadd.f32 %v7909_v47, %v21995_v39  ;;  %v13977_v22 = vpop.f32.mrf.mxu0 }
 0x4c8   : > { %9829 = vst.msk [vmem:[%s19411_s19 + $0x190] sm:$0xff] %vm9778_vm4, %v9700_v55  ;;  %v9318_v34 = vadd.f32 %v19739_v20, %v9183_v8  ;;  %v9186_v40 = vadd.f32 %v13974_v5, %v8333_v6  ;;  %v13783_v59 = vpop.f32.mrf.mxu1  ;;  %v22001_v8 = vld [vmem:[#allocation20_spill] sm:$0xff] }
 0x4c9   : > { %v9703_v2 = vsel %vm9447_vm15, %v9319_v25, %v9575_v11  ;;  %v9185_v54 = vadd.f32 %v8762_v33, %v8332_v43  ;;  %v8335_v15 = vadd.f32 %v13783_v59, %v21996_v7  ;;  %v8772_v24 = vpop.f32.mrf.mxu0 }
 0x4ca   : > { %9832 = vst.msk [vmem:[%s19411_s19 + $0x1a8] sm:$0xff] %vm9778_vm4, %v9703_v2  ;;  %vm9446_vm0 = vcmp.ge.f32.partialorder %v9318_v34, 0.0  ;;  %v9574_v12 = vmul.f32 0.01, %v9318_v34  ;;  %v9321_v16 = vadd.f32 %v19739_v20, %v9186_v40  ;;  %v7919_v31 = vpop.f32.mrf.mxu1 }
 0x4cb   : > { %v9320_v17 = vadd.f32 %v19739_v20, %v9185_v54  ;;  %v9188_v21 = vadd.f32 %v13977_v22, %v8335_v15  ;;  %v8334_v45 = vadd.f32 %v7919_v31, %v21997_v28  ;;  %v13980_v27 = vpop.f32.mrf.mxu0  ;;  %v22002_v22 = vld [vmem:[#allocation22_spill] sm:$0xff]  ;;  %v22003_v31 = vld [vmem:[#allocation24_spill] sm:$0xff] }
 0x4cc   : > { %v9702_v37 = vsel %vm9446_vm0, %v9318_v34, %v9574_v12  ;;  %vm9449_vm5 = vcmp.ge.f32.partialorder %v9321_v16, 0.0  ;;  %v9577_v14 = vmul.f32 0.01, %v9321_v16  ;;  %v13786_v0 = vpop.f32.mrf.mxu1 }
 0x4cd   : > { %9831 = vst.msk [vmem:[%s19411_s19 + $0x1a0] sm:$0xff] %vm9778_vm4, %v9702_v37  ;;  %vm9448_vm6 = vcmp.ge.f32.partialorder %v9320_v17, 0.0  ;;  %v9576_v23 = vmul.f32 0.01, %v9320_v17  ;;  %v9323_v57 = vadd.f32 %v19739_v20, %v9188_v21  ;;  %v9187_v19 = vadd.f32 %v8772_v24, %v8334_v45  ;;  %v8782_v1 = vpop.f32.mrf.mxu0 }
 0x4ce   : > { %v9705_v61 = vsel %vm9449_vm5, %v9321_v16, %v9577_v14  ;;  %v8337_v36 = vadd.f32 %v13786_v0, %v21998_v56  ;;  %v7929_v62 = vpop.f32.mrf.mxu1  ;;  %v22004_v0 = vld [vmem:[#allocation26_spill] sm:$0xff] }
 0x4cf   : > { %9834 = vst.msk [vmem:[%s19411_s19 + $0x1b8] sm:$0xff] %vm9778_vm4, %v9705_v61  ;;  %v9704_v46 = vsel %vm9448_vm6, %v9320_v17, %v9576_v23  ;;  %vm9451_vm1 = vcmp.ge.f32.partialorder %v9323_v57, 0.0  ;;  %v9579_v51 = vmul.f32 0.01, %v9323_v57  ;;  %v9322_v38 = vadd.f32 %v19739_v20, %v9187_v19  ;;  %v13983_v26 = vpop.f32.mrf.mxu0  ;;  %v22005_v61 = vld [vmem:[#allocation28_spill] sm:$0xff] }
 0x4d0   : > { %9833 = vst.msk [vmem:[%s19411_s19 + $0x1b0] sm:$0xff] %vm9778_vm4, %v9704_v46  ;;  %v9190_v18 = vadd.f32 %v13980_v27, %v8337_v36  ;;  %v8336_v13 = vadd.f32 %v7929_v62, %v21999_v30  ;;  %v13789_v48 = vpop.f32.mrf.mxu1 }
 0x4d1   : > { %v9707_v44 = vsel %vm9451_vm1, %v9323_v57, %v9579_v51  ;;  %vm9450_vm3 = vcmp.ge.f32.partialorder %v9322_v38, 0.0  ;;  %v9578_v5 = vmul.f32 0.01, %v9322_v38  ;;  %v8339_v41 = vadd.f32 %v13789_v48, %v22000_v50  ;;  %v8792_v4 = vpop.f32.mrf.mxu0 }
 0x4d2   : > { %9836 = vst.msk [vmem:[%s19411_s19 + $0x1c8] sm:$0xff] %vm9778_vm4, %v9707_v44  ;;  %v9325_v32 = vadd.f32 %v19739_v20, %v9190_v18  ;;  %v9189_v63 = vadd.f32 %v8782_v1, %v8336_v13  ;;  %v7939_v10 = vpop.f32.mrf.mxu1  ;;  %v22006_v18 = vld [vmem:[#allocation30_spill] sm:$0xff] }
 0x4d3   : > { %v9706_v25 = vsel %vm9450_vm3, %v9322_v38, %v9578_v5  ;;  %v9192_v33 = vadd.f32 %v13983_v26, %v8339_v41  ;;  %v8338_v9 = vadd.f32 %v7939_v10, %v22001_v8  ;;  %v13986_v6 = vpop.f32.mrf.mxu0 }
 0x4d4   : > { %9835 = vst.msk [vmem:[%s19411_s19 + $0x1c0] sm:$0xff] %vm9778_vm4, %v9706_v25  ;;  %vm9453_vm2 = vcmp.ge.f32.partialorder %v9325_v32, 0.0  ;;  %v9581_v47 = vmul.f32 0.01, %v9325_v32  ;;  %v9324_v55 = vadd.f32 %v19739_v20, %v9189_v63  ;;  %v13792_v11 = vpop.f32.mrf.mxu1 }
 0x4d5   : > { %v9327_v39 = vadd.f32 %v19739_v20, %v9192_v33  ;;  %v9191_v43 = vadd.f32 %v8792_v4, %v8338_v9  ;;  %v8341_v34 = vadd.f32 %v13792_v11, %v22002_v22  ;;  %v8802_v40 = vpop.f32.mrf.mxu0  ;;  %v22007_v4 = vld [vmem:[#allocation32_spill] sm:$0xff]  ;;  %v22008_v11 = vld [vmem:[#allocation34_spill] sm:$0xff] }
 0x4d6   : > { %v9709_v59 = vsel %vm9453_vm2, %v9325_v32, %v9581_v47  ;;  %vm9452_vm7 = vcmp.ge.f32.partialorder %v9324_v55, 0.0  ;;  %v9580_v2 = vmul.f32 0.01, %v9324_v55  ;;  %v7949_v54 = vpop.f32.mrf.mxu1 }
 0x4d7   : > { %9838 = vst.msk [vmem:[%s19411_s19 + $0x1d8] sm:$0xff] %vm9778_vm4, %v9709_v59  ;;  %vm9455_vm8 = vcmp.ge.f32.partialorder %v9327_v39, 0.0  ;;  %v9583_v7 = vmul.f32 0.01, %v9327_v39  ;;  %v9326_v15 = vadd.f32 %v19739_v20, %v9191_v43  ;;  %v9194_v24 = vadd.f32 %v13986_v6, %v8341_v34  ;;  %v13989_v12 = vpop.f32.mrf.mxu0 }
 0x4d8   : > { %v9708_v16 = vsel %vm9452_vm7, %v9324_v55, %v9580_v2  ;;  %v8340_v17 = vadd.f32 %v7949_v54, %v22003_v31  ;;  %v13795_v21 = vpop.f32.mrf.mxu1  ;;  %v22009_v54 = vld [vmem:[#allocation140_spill] sm:$0xff] }
 0x4d9   : > { %9837 = vst.msk [vmem:[%s19411_s19 + $0x1d0] sm:$0xff] %vm9778_vm4, %v9708_v16  ;;  %v9711_v28 = vsel %vm9455_vm8, %v9327_v39, %v9583_v7  ;;  %vm9454_vm9 = vcmp.ge.f32.partialorder %v9326_v15, 0.0  ;;  %v9582_v45 = vmul.f32 0.01, %v9326_v15  ;;  %v9329_v27 = vadd.f32 %v19739_v20, %v9194_v24  ;;  %v8812_v37 = vpop.f32.mrf.mxu0  ;;  %v22010_v16 = vld [vmem:[#allocation155_spill] sm:$0xff] }
 0x4da   : > { %9840 = vst.msk [vmem:[%s19411_s19 + $0x1e8] sm:$0xff] %vm9778_vm4, %v9711_v28  ;;  %v9193_v14 = vadd.f32 %v8802_v40, %v8340_v17  ;;  %v8343_v23 = vadd.f32 %v13795_v21, %v22004_v0  ;;  %v7959_v57 = vpop.f32.mrf.mxu1 }
 0x4db   : > { %v9710_v19 = vsel %vm9454_vm9, %v9326_v15, %v9582_v45  ;;  %vm9457_vm10 = vcmp.ge.f32.partialorder %v9329_v27, 0.0  ;;  %v9585_v1 = vmul.f32 0.01, %v9329_v27  ;;  %v8342_v56 = vadd.f32 %v7959_v57, %v22005_v61  ;;  %v13992_v36 = vpop.f32.mrf.mxu0 }
 0x4dc   : > { %9839 = vst.msk [vmem:[%s19411_s19 + $0x1e0] sm:$0xff] %vm9778_vm4, %v9710_v19  ;;  %v9328_v62 = vadd.f32 %v19739_v20, %v9193_v14  ;;  %v9196_v46 = vadd.f32 %v13989_v12, %v8343_v23  ;;  %v13798_v51 = vpop.f32.mrf.mxu1  ;;  %v22011_v14 = vld [vmem:[#allocation36_spill] sm:$0xff] }
 0x4dd   : > { %v9713_v38 = vsel %vm9457_vm10, %v9329_v27, %v9585_v1  ;;  %v9195_v26 = vadd.f32 %v8812_v37, %v8342_v56  ;;  %v8345_v30 = vadd.f32 %v13798_v51, %v22006_v18  ;;  %v8822_v13 = vpop.f32.mrf.mxu0 }
 0x4de   : > { %9842 = vst.msk [vmem:[%s19411_s19 + $0x1f8] sm:$0xff] %vm9778_vm4, %v9713_v38  ;;  %vm9456_vm11 = vcmp.ge.f32.partialorder %v9328_v62, 0.0  ;;  %v9584_v48 = vmul.f32 0.01, %v9328_v62  ;;  %v9331_v44 = vadd.f32 %v19739_v20, %v9196_v46  ;;  %v7969_v5 = vpop.f32.mrf.mxu1 }
 0x4df   : > { %v9330_v50 = vadd.f32 %v19739_v20, %v9195_v26  ;;  %v9198_v41 = vadd.f32 %v13992_v36, %v8345_v30  ;;  %v8344_v32 = vadd.f32 %v7969_v5, %v22007_v4  ;;  %v13995_v63 = vpop.f32.mrf.mxu0  ;;  %v22012_v36 = vld [vmem:[#allocation156_spill] sm:$0xff]  ;;  %v22013_v5 = vld [vmem:[#allocation141_spill] sm:$0xff] }
 0x4e0   : > { %v9712_v10 = vsel %vm9456_vm11, %v9328_v62, %v9584_v48  ;;  %vm9459_vm12 = vcmp.ge.f32.partialorder %v9331_v44, 0.0  ;;  %v9587_v25 = vmul.f32 0.01, %v9331_v44  ;;  %v13801_v33 = vpop.f32.mrf.mxu1 }
 0x4e1   : > { %9841 = vst.msk [vmem:[%s19411_s19 + $0x1f0] sm:$0xff] %vm9778_vm4, %v9712_v10  ;;  %vm9458_vm13 = vcmp.ge.f32.partialorder %v9330_v50, 0.0  ;;  %v9586_v8 = vmul.f32 0.01, %v9330_v50  ;;  %v9333_v9 = vadd.f32 %v19739_v20, %v9198_v41  ;;  %v9197_v6 = vadd.f32 %v8822_v13, %v8344_v32  ;;  %v8832_v47 = vpop.f32.mrf.mxu0 }
 0x4e2   : > { %v9715_v55 = vsel %vm9459_vm12, %v9331_v44, %v9587_v25  ;;  %v8347_v39 = vadd.f32 %v13801_v33, %v22008_v11  ;;  %v7979_v43 = vpop.f32.mrf.mxu1  ;;  %v22014_v33 = vld [vmem:[#allocation38_spill] sm:$0xff] }
 0x4e3   : > { %9844 = vst.msk [vmem:[%s19411_s19 + $0x208] sm:$0xff] %vm9778_vm4, %v9715_v55  ;;  %v9714_v22 = vsel %vm9458_vm13, %v9330_v50, %v9586_v8  ;;  %vm9461_vm14 = vcmp.ge.f32.partialorder %v9333_v9, 0.0  ;;  %v9589_v34 = vmul.f32 0.01, %v9333_v9  ;;  %v9332_v40 = vadd.f32 %v19739_v20, %v9197_v6  ;;  %v13998_v59 = vpop.f32.mrf.mxu0  ;;  %v22015_v55 = vld [vmem:[#allocation142_spill] sm:$0xff] }
 0x4e4   : > { %9843 = vst.msk [vmem:[%s19411_s19 + $0x200] sm:$0xff] %vm9778_vm4, %v9714_v22  ;;  %v9200_v2 = vadd.f32 %v13995_v63, %v8347_v39  ;;  %v8346_v7 = vadd.f32 %v7979_v43, %v22009_v54  ;;  %v13804_v15 = vpop.f32.mrf.mxu1 }
 0x4e5   : > { %v9717_v24 = vsel %vm9461_vm14, %v9333_v9, %v9589_v34  ;;  %vm9460_vm15 = vcmp.ge.f32.partialorder %v9332_v40, 0.0  ;;  %v9588_v12 = vmul.f32 0.01, %v9332_v40  ;;  %v8349_v31 = vadd.f32 %v13804_v15, %v22010_v16  ;;  %v8842_v17 = vpop.f32.mrf.mxu0 }
 0x4e6   : > { %9846 = vst.msk [vmem:[%s19411_s19 + $0x218] sm:$0xff] %vm9778_vm4, %v9717_v24  ;;  %v9335_v21 = vadd.f32 %v19739_v20, %v9200_v2  ;;  %v9199_v28 = vadd.f32 %v8832_v47, %v8346_v7  ;;  %v7989_v45 = vpop.f32.mrf.mxu1  ;;  %v22016_v2 = vld [vmem:[#allocation157_spill] sm:$0xff] }
 0x4e7   : > { %v9716_v27 = vsel %vm9460_vm15, %v9332_v40, %v9588_v12  ;;  %v9202_v37 = vadd.f32 %v13998_v59, %v8349_v31  ;;  %v8348_v0 = vadd.f32 %v7989_v45, %v22011_v14  ;;  %v14001_v23 = vpop.f32.mrf.mxu0 }
 0x4e8   : > { %9845 = vst.msk [vmem:[%s19411_s19 + $0x210] sm:$0xff] %vm9778_vm4, %v9716_v27  ;;  %vm9463_vm0 = vcmp.ge.f32.partialorder %v9335_v21, 0.0  ;;  %v9591_v57 = vmul.f32 0.01, %v9335_v21  ;;  %v9334_v19 = vadd.f32 %v19739_v20, %v9199_v28  ;;  %v13807_v1 = vpop.f32.mrf.mxu1 }
 0x4e9   : > { %v9337_v61 = vadd.f32 %v19739_v20, %v9202_v37  ;;  %v9201_v56 = vadd.f32 %v8842_v17, %v8348_v0  ;;  %v8351_v62 = vadd.f32 %v13807_v1, %v22012_v36  ;;  %v8852_v46 = vpop.f32.mrf.mxu0  ;;  %v22017_v17 = vld [vmem:[#allocation40_spill] sm:$0xff]  ;;  %v22018_v1 = vld [vmem:[#allocation158_spill] sm:$0xff] }
 0x4ea   : > { %v9719_v51 = vsel %vm9463_vm0, %v9335_v21, %v9591_v57  ;;  %vm9462_vm5 = vcmp.ge.f32.partialorder %v9334_v19, 0.0  ;;  %v9590_v38 = vmul.f32 0.01, %v9334_v19  ;;  %v7999_v26 = vpop.f32.mrf.mxu1 }
 0x4eb   : > { %9848 = vst.msk [vmem:[%s19411_s19 + $0x228] sm:$0xff] %vm9778_vm4, %v9719_v51  ;;  %vm9465_vm6 = vcmp.ge.f32.partialorder %v9337_v61, 0.0  ;;  %v9593_v18 = vmul.f32 0.01, %v9337_v61  ;;  %v9336_v30 = vadd.f32 %v19739_v20, %v9201_v56  ;;  %v9204_v13 = vadd.f32 %v14001_v23, %v8351_v62  ;;  %v14004_v48 = vpop.f32.mrf.mxu0 }
 0x4ec   : > { %v9718_v44 = vsel %vm9462_vm5, %v9334_v19, %v9590_v38  ;;  %v8350_v50 = vadd.f32 %v7999_v26, %v22013_v5  ;;  %v13810_v41 = vpop.f32.mrf.mxu1  ;;  %v22019_v26 = vld [vmem:[#allocation143_spill] sm:$0xff] }
 0x4ed   : > { %9847 = vst.msk [vmem:[%s19411_s19 + $0x220] sm:$0xff] %vm9778_vm4, %v9718_v44  ;;  %v9721_v4 = vsel %vm9465_vm6, %v9337_v61, %v9593_v18  ;;  %vm9464_vm1 = vcmp.ge.f32.partialorder %v9336_v30, 0.0  ;;  %v9592_v32 = vmul.f32 0.01, %v9336_v30  ;;  %v9339_v63 = vadd.f32 %v19739_v20, %v9204_v13  ;;  %v8862_v10 = vpop.f32.mrf.mxu0  ;;  %v22020_v44 = vld [vmem:[#allocation42_spill] sm:$0xff] }
 0x4ee   : > { %9850 = vst.msk [vmem:[%s19411_s19 + $0x238] sm:$0xff] %vm9778_vm4, %v9721_v4  ;;  %v9203_v25 = vadd.f32 %v8852_v46, %v8350_v50  ;;  %v8353_v8 = vadd.f32 %v13810_v41, %v22014_v33  ;;  %v8009_v9 = vpop.f32.mrf.mxu1 }
 0x4ef   : > { %v9720_v6 = vsel %vm9464_vm1, %v9336_v30, %v9592_v32  ;;  %vm9467_vm3 = vcmp.ge.f32.partialorder %v9339_v63, 0.0  ;;  %v9595_v47 = vmul.f32 0.01, %v9339_v63  ;;  %v8352_v11 = vadd.f32 %v8009_v9, %v22015_v55  ;;  %v14007_v39 = vpop.f32.mrf.mxu0 }
 0x4f0   : > { %9849 = vst.msk [vmem:[%s19411_s19 + $0x230] sm:$0xff] %vm9778_vm4, %v9720_v6  ;;  %v9338_v43 = vadd.f32 %v19739_v20, %v9203_v25  ;;  %v9206_v22 = vadd.f32 %v14004_v48, %v8353_v8  ;;  %v13813_v34 = vpop.f32.mrf.mxu1  ;;  %v22021_v25 = vld [vmem:[#allocation144_spill] sm:$0xff] }
 0x4f1   : > { %v9723_v40 = vsel %vm9467_vm3, %v9339_v63, %v9595_v47  ;;  %v9205_v59 = vadd.f32 %v8862_v10, %v8352_v11  ;;  %v8355_v54 = vadd.f32 %v13813_v34, %v22016_v2  ;;  %v8872_v7 = vpop.f32.mrf.mxu0 }
 0x4f2   : > { %9852 = vst.msk [vmem:[%s19411_s19 + $0x248] sm:$0xff] %vm9778_vm4, %v9723_v40  ;;  %vm9466_vm2 = vcmp.ge.f32.partialorder %v9338_v43, 0.0  ;;  %v9594_v15 = vmul.f32 0.01, %v9338_v43  ;;  %v9341_v24 = vadd.f32 %v19739_v20, %v9206_v22  ;;  %v8019_v12 = vpop.f32.mrf.mxu1 }
 0x4f3   : > { %v9340_v16 = vadd.f32 %v19739_v20, %v9205_v59  ;;  %v9208_v31 = vadd.f32 %v14007_v39, %v8355_v54  ;;  %v8354_v21 = vadd.f32 %v8019_v12, %v22017_v17  ;;  %v14010_v28 = vpop.f32.mrf.mxu0  ;;  %v22022_v39 = vld [vmem:[#allocation159_spill] sm:$0xff]  ;;  %v22023_v12 = vld [vmem:[#allocation44_spill] sm:$0xff] }
 0x4f4   : > { %v9722_v45 = vsel %vm9466_vm2, %v9338_v43, %v9594_v15  ;;  %vm9469_vm7 = vcmp.ge.f32.partialorder %v9341_v24, 0.0  ;;  %v9597_v27 = vmul.f32 0.01, %v9341_v24  ;;  %v13816_v37 = vpop.f32.mrf.mxu1 }
 0x4f5   : > { %9851 = vst.msk [vmem:[%s19411_s19 + $0x240] sm:$0xff] %vm9778_vm4, %v9722_v45  ;;  %vm9468_vm8 = vcmp.ge.f32.partialorder %v9340_v16, 0.0  ;;  %v9596_v14 = vmul.f32 0.01, %v9340_v16  ;;  %v9343_v0 = vadd.f32 %v19739_v20, %v9208_v31  ;;  %v9207_v23 = vadd.f32 %v8872_v7, %v8354_v21  ;;  %v8882_v57 = vpop.f32.mrf.mxu0 }
 0x4f6   : > { %v9725_v19 = vsel %vm9469_vm7, %v9341_v24, %v9597_v27  ;;  %v8357_v61 = vadd.f32 %v13816_v37, %v22018_v1  ;;  %v8029_v56 = vpop.f32.mrf.mxu1  ;;  %v22024_v37 = vld [vmem:[#allocation160_spill] sm:$0xff] }
 0x4f7   : > { %9854 = vst.msk [vmem:[%s19411_s19 + $0x258] sm:$0xff] %vm9778_vm4, %v9725_v19  ;;  %v9724_v36 = vsel %vm9468_vm8, %v9340_v16, %v9596_v14  ;;  %vm9471_vm9 = vcmp.ge.f32.partialorder %v9343_v0, 0.0  ;;  %v9599_v62 = vmul.f32 0.01, %v9343_v0  ;;  %v9342_v46 = vadd.f32 %v19739_v20, %v9207_v23  ;;  %v14013_v51 = vpop.f32.mrf.mxu0  ;;  %v22025_v19 = vld [vmem:[#allocation145_spill] sm:$0xff] }
 0x4f8   : > { %9853 = vst.msk [vmem:[%s19411_s19 + $0x250] sm:$0xff] %vm9778_vm4, %v9724_v36  ;;  %v9210_v38 = vadd.f32 %v14010_v28, %v8357_v61  ;;  %v8356_v18 = vadd.f32 %v8029_v56, %v22019_v26  ;;  %v13819_v30 = vpop.f32.mrf.mxu1 }
 0x4f9   : > { %v9727_v13 = vsel %vm9471_vm9, %v9343_v0, %v9599_v62  ;;  %vm9470_vm10 = vcmp.ge.f32.partialorder %v9342_v46, 0.0  ;;  %v9598_v48 = vmul.f32 0.01, %v9342_v46  ;;  %v8359_v5 = vadd.f32 %v13819_v30, %v22020_v44  ;;  %v8892_v50 = vpop.f32.mrf.mxu0 }
 0x4fa   : > { %9856 = vst.msk [vmem:[%s19411_s19 + $0x268] sm:$0xff] %vm9778_vm4, %v9727_v13  ;;  %v9345_v41 = vadd.f32 %v19739_v20, %v9210_v38  ;;  %v9209_v4 = vadd.f32 %v8882_v57, %v8356_v18  ;;  %v8039_v32 = vpop.f32.mrf.mxu1  ;;  %v22026_v38 = vld [vmem:[#allocation46_spill] sm:$0xff] }
 0x4fb   : > { %v9726_v63 = vsel %vm9470_vm10, %v9342_v46, %v9598_v48  ;;  %v9212_v10 = vadd.f32 %v14013_v51, %v8359_v5  ;;  %v8358_v33 = vadd.f32 %v8039_v32, %v22021_v25  ;;  %v14016_v8 = vpop.f32.mrf.mxu0 }
 0x4fc   : > { %9855 = vst.msk [vmem:[%s19411_s19 + $0x260] sm:$0xff] %vm9778_vm4, %v9726_v63  ;;  %vm9473_vm11 = vcmp.ge.f32.partialorder %v9345_v41, 0.0  ;;  %v9601_v9 = vmul.f32 0.01, %v9345_v41  ;;  %v9344_v6 = vadd.f32 %v19739_v20, %v9209_v4  ;;  %v13822_v47 = vpop.f32.mrf.mxu1 }
 0x4fd   : > { %v9347_v55 = vadd.f32 %v19739_v20, %v9212_v10  ;;  %v9211_v11 = vadd.f32 %v8892_v50, %v8358_v33  ;;  %v8361_v43 = vadd.f32 %v13822_v47, %v22022_v39  ;;  %v8902_v22 = vpop.f32.mrf.mxu0  ;;  %v22027_v50 = vld [vmem:[#allocation146_spill] sm:$0xff]  ;;  %v22028_v47 = vld [vmem:[#allocation161_spill] sm:$0xff] }
 0x4fe   : > { %v9729_v34 = vsel %vm9473_vm11, %v9345_v41, %v9601_v9  ;;  %vm9472_vm12 = vcmp.ge.f32.partialorder %v9344_v6, 0.0  ;;  %v9600_v40 = vmul.f32 0.01, %v9344_v6  ;;  %v8049_v59 = vpop.f32.mrf.mxu1 }
 0x4ff   : > { %9858 = vst.msk [vmem:[%s19411_s19 + $0x278] sm:$0xff] %vm9778_vm4, %v9729_v34  ;;  %vm9475_vm13 = vcmp.ge.f32.partialorder %v9347_v55, 0.0  ;;  %v9603_v2 = vmul.f32 0.01, %v9347_v55  ;;  %v9346_v54 = vadd.f32 %v19739_v20, %v9211_v11  ;;  %v9214_v7 = vadd.f32 %v14016_v8, %v8361_v43  ;;  %v14019_v15 = vpop.f32.mrf.mxu0 }
 0x500   : > { %v9728_v24 = vsel %vm9472_vm12, %v9344_v6, %v9600_v40  ;;  %v8360_v16 = vadd.f32 %v8049_v59, %v22023_v12  ;;  %v13825_v31 = vpop.f32.mrf.mxu1  ;;  %v22029_v59 = vld [vmem:[#allocation48_spill] sm:$0xff] }
 0x501   : > { %9857 = vst.msk [vmem:[%s19411_s19 + $0x270] sm:$0xff] %vm9778_vm4, %v9728_v24  ;;  %v9731_v17 = vsel %vm9475_vm13, %v9347_v55, %v9603_v2  ;;  %vm9474_vm14 = vcmp.ge.f32.partialorder %v9346_v54, 0.0  ;;  %v9602_v21 = vmul.f32 0.01, %v9346_v54  ;;  %v9349_v28 = vadd.f32 %v19739_v20, %v9214_v7  ;;  %v8912_v45 = vpop.f32.mrf.mxu0  ;;  %v22030_v24 = vld [vmem:[#allocation162_spill] sm:$0xff] }
 0x502   : > { %9860 = vst.msk [vmem:[%s19411_s19 + $0x288] sm:$0xff] %vm9778_vm4, %v9731_v17  ;;  %v9213_v27 = vadd.f32 %v8902_v22, %v8360_v16  ;;  %v8363_v14 = vadd.f32 %v13825_v31, %v22024_v37  ;;  %v8059_v0 = vpop.f32.mrf.mxu1 }
 0x503   : > { %v9730_v23 = vsel %vm9474_vm14, %v9346_v54, %v9602_v21  ;;  %vm9477_vm15 = vcmp.ge.f32.partialorder %v9349_v28, 0.0  ;;  %v9605_v57 = vmul.f32 0.01, %v9349_v28  ;;  %v8362_v1 = vadd.f32 %v8059_v0, %v22025_v19  ;;  %v14022_v61 = vpop.f32.mrf.mxu0 }
 0x504   : > { %9859 = vst.msk [vmem:[%s19411_s19 + $0x280] sm:$0xff] %vm9778_vm4, %v9730_v23  ;;  %v9348_v56 = vadd.f32 %v19739_v20, %v9213_v27  ;;  %v9216_v36 = vadd.f32 %v14019_v15, %v8363_v14  ;;  %v13828_v62 = vpop.f32.mrf.mxu1  ;;  %v22031_v27 = vld [vmem:[#allocation147_spill] sm:$0xff] }
 0x505   : > { %v9733_v46 = vsel %vm9477_vm15, %v9349_v28, %v9605_v57  ;;  %v9215_v51 = vadd.f32 %v8912_v45, %v8362_v1  ;;  %v8365_v26 = vadd.f32 %v13828_v62, %v22026_v38  ;;  %v8922_v18 = vpop.f32.mrf.mxu0 }
 0x506   : > { %9862 = vst.msk [vmem:[%s19411_s19 + $0x298] sm:$0xff] %vm9778_vm4, %v9733_v46  ;;  %vm9476_vm0 = vcmp.ge.f32.partialorder %v9348_v56, 0.0  ;;  %v9604_v30 = vmul.f32 0.01, %v9348_v56  ;;  %v9351_v13 = vadd.f32 %v19739_v20, %v9216_v36  ;;  %v8069_v48 = vpop.f32.mrf.mxu1 }
 0x507   : > { %v9350_v44 = vadd.f32 %v19739_v20, %v9215_v51  ;;  %v9218_v5 = vadd.f32 %v14022_v61, %v8365_v26  ;;  %v8364_v41 = vadd.f32 %v8069_v48, %v22027_v50  ;;  %v14025_v4 = vpop.f32.mrf.mxu0  ;;  %v22032_v61 = vld [vmem:[#allocation50_spill] sm:$0xff]  ;;  %v22033_v48 = vld [vmem:[#allocation148_spill] sm:$0xff] }
 0x508   : > { %v9732_v32 = vsel %vm9476_vm0, %v9348_v56, %v9604_v30  ;;  %vm9479_vm5 = vcmp.ge.f32.partialorder %v9351_v13, 0.0  ;;  %v9607_v63 = vmul.f32 0.01, %v9351_v13  ;;  %v13831_v10 = vpop.f32.mrf.mxu1 }
 0x509   : > { %9861 = vst.msk [vmem:[%s19411_s19 + $0x290] sm:$0xff] %vm9778_vm4, %v9732_v32  ;;  %vm9478_vm6 = vcmp.ge.f32.partialorder %v9350_v44, 0.0  ;;  %v9606_v25 = vmul.f32 0.01, %v9350_v44  ;;  %v9353_v33 = vadd.f32 %v19739_v20, %v9218_v5  ;;  %v9217_v8 = vadd.f32 %v8922_v18, %v8364_v41  ;;  %v8932_v9 = vpop.f32.mrf.mxu0 }
 0x50a   : > { %v9735_v6 = vsel %vm9479_vm5, %v9351_v13, %v9607_v63  ;;  %v8367_v55 = vadd.f32 %v13831_v10, %v22028_v47  ;;  %v8079_v11 = vpop.f32.mrf.mxu1  ;;  %v22034_v10 = vld [vmem:[#allocation163_spill] sm:$0xff] }
 0x50b   : > { %9864 = vst.msk [vmem:[%s19411_s19 + $0x2a8] sm:$0xff] %vm9778_vm4, %v9735_v6  ;;  %v9734_v39 = vsel %vm9478_vm6, %v9350_v44, %v9606_v25  ;;  %vm9481_vm1 = vcmp.ge.f32.partialorder %v9353_v33, 0.0  ;;  %v9609_v43 = vmul.f32 0.01, %v9353_v33  ;;  %v9352_v22 = vadd.f32 %v19739_v20, %v9217_v8  ;;  %v14028_v34 = vpop.f32.mrf.mxu0  ;;  %v22035_v6 = vld [vmem:[#allocation52_spill] sm:$0xff] }
 0x50c   : > { %9863 = vst.msk [vmem:[%s19411_s19 + $0x2a0] sm:$0xff] %vm9778_vm4, %v9734_v39  ;;  %v9220_v40 = vadd.f32 %v14025_v4, %v8367_v55  ;;  %v8366_v2 = vadd.f32 %v8079_v11, %v22029_v59  ;;  %v13834_v54 = vpop.f32.mrf.mxu1 }
 0x50d   : > { %v9737_v7 = vsel %vm9481_vm1, %v9353_v33, %v9609_v43  ;;  %vm9480_vm3 = vcmp.ge.f32.partialorder %v9352_v22, 0.0  ;;  %v9608_v15 = vmul.f32 0.01, %v9352_v22  ;;  %v8369_v12 = vadd.f32 %v13834_v54, %v22030_v24  ;;  %v8942_v16 = vpop.f32.mrf.mxu0 }
 0x50e   : > { %9866 = vst.msk [vmem:[%s19411_s19 + $0x2b8] sm:$0xff] %vm9778_vm4, %v9737_v7  ;;  %v9355_v31 = vadd.f32 %v19739_v20, %v9220_v40  ;;  %v9219_v17 = vadd.f32 %v8932_v9, %v8366_v2  ;;  %v8089_v21 = vpop.f32.mrf.mxu1  ;;  %v22036_v40 = vld [vmem:[#allocation164_spill] sm:$0xff] }
 0x50f   : > { %v9736_v28 = vsel %vm9480_vm3, %v9352_v22, %v9608_v15  ;;  %v9222_v45 = vadd.f32 %v14028_v34, %v8369_v12  ;;  %v8368_v37 = vadd.f32 %v8089_v21, %v22031_v27  ;;  %v14031_v14 = vpop.f32.mrf.mxu0 }
 0x510   : > { %9865 = vst.msk [vmem:[%s19411_s19 + $0x2b0] sm:$0xff] %vm9778_vm4, %v9736_v28  ;;  %vm9483_vm2 = vcmp.ge.f32.partialorder %v9355_v31, 0.0  ;;  %v9611_v0 = vmul.f32 0.01, %v9355_v31  ;;  %v9354_v23 = vadd.f32 %v19739_v20, %v9219_v17  ;;  %v13837_v57 = vpop.f32.mrf.mxu1 }
 0x511   : > { %v9357_v19 = vadd.f32 %v19739_v20, %v9222_v45  ;;  %v9221_v1 = vadd.f32 %v8942_v16, %v8368_v37  ;;  %v8371_v56 = vadd.f32 %v13837_v57, %v22032_v61  ;;  %v8952_v36 = vpop.f32.mrf.mxu0  ;;  %v22037_v16 = vld [vmem:[#allocation149_spill] sm:$0xff]  ;;  %v22038_v57 = vld [vmem:[#allocation54_spill] sm:$0xff] }
 0x512   : > { %v9739_v62 = vsel %vm9483_vm2, %v9355_v31, %v9611_v0  ;;  %vm9482_vm7 = vcmp.ge.f32.partialorder %v9354_v23, 0.0  ;;  %v9610_v46 = vmul.f32 0.01, %v9354_v23  ;;  %v8099_v51 = vpop.f32.mrf.mxu1 }
 0x513   : > { %9868 = vst.msk [vmem:[%s19411_s19 + $0x2c8] sm:$0xff] %vm9778_vm4, %v9739_v62  ;;  %vm9485_vm8 = vcmp.ge.f32.partialorder %v9357_v19, 0.0  ;;  %v9613_v38 = vmul.f32 0.01, %v9357_v19  ;;  %v9356_v26 = vadd.f32 %v19739_v20, %v9221_v1  ;;  %v9224_v18 = vadd.f32 %v14031_v14, %v8371_v56  ;;  %v14034_v30 = vpop.f32.mrf.mxu0 }
 0x514   : > { %v9738_v13 = vsel %vm9482_vm7, %v9354_v23, %v9610_v46  ;;  %v8370_v44 = vadd.f32 %v8099_v51, %v22033_v48  ;;  %v13840_v5 = vpop.f32.mrf.mxu1  ;;  %v22039_v51 = vld [vmem:[#allocation150_spill] sm:$0xff] }
 0x515   : > { %9867 = vst.msk [vmem:[%s19411_s19 + $0x2c0] sm:$0xff] %vm9778_vm4, %v9738_v13  ;;  %v9741_v50 = vsel %vm9485_vm8, %v9357_v19, %v9613_v38  ;;  %vm9484_vm9 = vcmp.ge.f32.partialorder %v9356_v26, 0.0  ;;  %v9612_v41 = vmul.f32 0.01, %v9356_v26  ;;  %v9359_v4 = vadd.f32 %v19739_v20, %v9224_v18  ;;  %v8962_v32 = vpop.f32.mrf.mxu0  ;;  %v22040_v13 = vld [vmem:[#allocation165_spill] sm:$0xff] }
 0x516   : > { %9870 = vst.msk [vmem:[%s19411_s19 + $0x2d8] sm:$0xff] %vm9778_vm4, %v9741_v50  ;;  %v9223_v63 = vadd.f32 %v8952_v36, %v8370_v44  ;;  %v8373_v25 = vadd.f32 %v13840_v5, %v22034_v10  ;;  %v8109_v33 = vpop.f32.mrf.mxu1 }
 0x517   : > { %v9740_v8 = vsel %vm9484_vm9, %v9356_v26, %v9612_v41  ;;  %vm9487_vm10 = vcmp.ge.f32.partialorder %v9359_v4, 0.0  ;;  %v9615_v9 = vmul.f32 0.01, %v9359_v4  ;;  %v8372_v47 = vadd.f32 %v8109_v33, %v22035_v6  ;;  %v14037_v55 = vpop.f32.mrf.mxu0 }
 0x518   : > { %9869 = vst.msk [vmem:[%s19411_s19 + $0x2d0] sm:$0xff] %vm9778_vm4, %v9740_v8  ;;  %v9358_v11 = vadd.f32 %v19739_v20, %v9223_v63  ;;  %v9226_v39 = vadd.f32 %v14034_v30, %v8373_v25  ;;  %v13843_v43 = vpop.f32.mrf.mxu1  ;;  %v22041_v63 = vld [vmem:[#allocation56_spill] sm:$0xff] }
 0x519   : > { %v9743_v22 = vsel %vm9487_vm10, %v9359_v4, %v9615_v9  ;;  %v9225_v34 = vadd.f32 %v8962_v32, %v8372_v47  ;;  %v8375_v59 = vadd.f32 %v13843_v43, %v22036_v40  ;;  %v8972_v2 = vpop.f32.mrf.mxu0 }
 0x51a   : > { %9872 = vst.msk [vmem:[%s19411_s19 + $0x2e8] sm:$0xff] %vm9778_vm4, %v9743_v22  ;;  %vm9486_vm11 = vcmp.ge.f32.partialorder %v9358_v11, 0.0  ;;  %v9614_v54 = vmul.f32 0.01, %v9358_v11  ;;  %v9361_v7 = vadd.f32 %v19739_v20, %v9226_v39  ;;  %v8119_v15 = vpop.f32.mrf.mxu1 }
 0x51b   : > { %v9360_v24 = vadd.f32 %v19739_v20, %v9225_v34  ;;  %v9228_v12 = vadd.f32 %v14037_v55, %v8375_v59  ;;  %v8374_v31 = vadd.f32 %v8119_v15, %v22037_v16  ;;  %v14040_v17 = vpop.f32.mrf.mxu0  ;;  %v22042_v55 = vld [vmem:[#allocation166_spill] sm:$0xff]  ;;  %v22043_v15 = vld [vmem:[#allocation151_spill] sm:$0xff] }
 0x51c   : > { %v9742_v21 = vsel %vm9486_vm11, %v9358_v11, %v9614_v54  ;;  %vm9489_vm12 = vcmp.ge.f32.partialorder %v9361_v7, 0.0  ;;  %v9617_v28 = vmul.f32 0.01, %v9361_v7  ;;  %v13846_v45 = vpop.f32.mrf.mxu1 }
 0x51d   : > { %9871 = vst.msk [vmem:[%s19411_s19 + $0x2e0] sm:$0xff] %vm9778_vm4, %v9742_v21  ;;  %vm9488_vm13 = vcmp.ge.f32.partialorder %v9360_v24, 0.0  ;;  %v9616_v27 = vmul.f32 0.01, %v9360_v24  ;;  %v9363_v37 = vadd.f32 %v19739_v20, %v9228_v12  ;;  %v9227_v14 = vadd.f32 %v8972_v2, %v8374_v31  ;;  %v8982_v0 = vpop.f32.mrf.mxu0 }
 0x51e   : > { %v9745_v23 = vsel %vm9489_vm12, %v9361_v7, %v9617_v28  ;;  %v8377_v19 = vadd.f32 %v13846_v45, %v22038_v57  ;;  %v8129_v1 = vpop.f32.mrf.mxu1  ;;  %v22044_v45 = vld [vmem:[#allocation58_spill] sm:$0xff] }
 0x51f   : > { %9874 = vst.msk [vmem:[%s19411_s19 + $0x2f8] sm:$0xff] %vm9778_vm4, %v9745_v23  ;;  %v9744_v61 = vsel %vm9488_vm13, %v9360_v24, %v9616_v27  ;;  %vm9491_vm14 = vcmp.ge.f32.partialorder %v9363_v37, 0.0  ;;  %v9619_v56 = vmul.f32 0.01, %v9363_v37  ;;  %v9362_v36 = vadd.f32 %v19739_v20, %v9227_v14  ;;  %v14043_v62 = vpop.f32.mrf.mxu0  ;;  %v22045_v23 = vld [vmem:[#allocation152_spill] sm:$0xff] }
 0x520   : > { %9873 = vst.msk [vmem:[%s19411_s19 + $0x2f0] sm:$0xff] %vm9778_vm4, %v9744_v61  ;;  %v9230_v46 = vadd.f32 %v14040_v17, %v8377_v19  ;;  %v8376_v38 = vadd.f32 %v8129_v1, %v22039_v51  ;;  %v13849_v26 = vpop.f32.mrf.mxu1 }
 0x521   : > { %v9747_v18 = vsel %vm9491_vm14, %v9363_v37, %v9619_v56  ;;  %vm9490_vm15 = vcmp.ge.f32.partialorder %v9362_v36, 0.0  ;;  %v9618_v30 = vmul.f32 0.01, %v9362_v36  ;;  %v8379_v48 = vadd.f32 %v13849_v26, %v22040_v13  ;;  %v8992_v44 = vpop.f32.mrf.mxu0 }
 0x522   : > { %9876 = vst.msk [vmem:[%s19411_s19 + $0x308] sm:$0xff] %vm9778_vm4, %v9747_v18  ;;  %v9365_v5 = vadd.f32 %v19739_v20, %v9230_v46  ;;  %v9229_v50 = vadd.f32 %v8982_v0, %v8376_v38  ;;  %v8139_v41 = vpop.f32.mrf.mxu1  ;;  %v22046_v46 = vld [vmem:[#allocation167_spill] sm:$0xff] }
 0x523   : > { %v9746_v4 = vsel %vm9490_vm15, %v9362_v36, %v9618_v30  ;;  %v9232_v32 = vadd.f32 %v14043_v62, %v8379_v48  ;;  %v8378_v10 = vadd.f32 %v8139_v41, %v22041_v63  ;;  %v14046_v25 = vpop.f32.mrf.mxu0 }
 0x524   : > { %9875 = vst.msk [vmem:[%s19411_s19 + $0x300] sm:$0xff] %vm9778_vm4, %v9746_v4  ;;  %vm9493_vm0 = vcmp.ge.f32.partialorder %v9365_v5, 0.0  ;;  %v9621_v33 = vmul.f32 0.01, %v9365_v5  ;;  %v9364_v8 = vadd.f32 %v19739_v20, %v9229_v50  ;;  %v13852_v9 = vpop.f32.mrf.mxu1 }
 0x525   : > { %v9367_v6 = vadd.f32 %v19739_v20, %v9232_v32  ;;  %v9231_v47 = vadd.f32 %v8992_v44, %v8378_v10  ;;  %v8381_v11 = vadd.f32 %v13852_v9, %v22042_v55  ;;  %v9002_v39 = vpop.f32.mrf.mxu0  ;;  %v22047_v44 = vld [vmem:[#allocation60_spill] sm:$0xff]  ;;  %v19973_v10 = vld [vmem:[%s20076_s2] ss:$0 sm:$0xff] }
 0x526   : > { %v9749_v43 = vsel %vm9493_vm0, %v9365_v5, %v9621_v33  ;;  %vm9492_vm5 = vcmp.ge.f32.partialorder %v9364_v8, 0.0  ;;  %v9620_v22 = vmul.f32 0.01, %v9364_v8  ;;  %v8149_v34 = vpop.f32.mrf.mxu1  ;;  %v22048_v9 = vld [vmem:[#allocation168_spill] sm:$0xff] }
 0x527   : > { %9878 = vst.msk [vmem:[%s19411_s19 + $0x318] sm:$0xff] %vm9778_vm4, %v9749_v43  ;;  %vm9495_vm6 = vcmp.ge.f32.partialorder %v9367_v6, 0.0  ;;  %v9623_v40 = vmul.f32 0.01, %v9367_v6  ;;  %v9366_v59 = vadd.f32 %v19739_v20, %v9231_v47  ;;  %v9234_v2 = vadd.f32 %v14046_v25, %v8381_v11  ;;  %v14049_v54 = vpop.f32.mrf.mxu0 }
 0x528   : > { %v9748_v7 = vsel %vm9492_vm5, %v9364_v8, %v9620_v22  ;;  %v8380_v24 = vadd.f32 %v8149_v34, %v22043_v15  ;;  %v13855_v12 = vpop.f32.mrf.mxu1  ;;  %v22049_v34 = vld [vmem:[#allocation153_spill] sm:$0xff] }
 0x529   : > { %9877 = vst.msk [vmem:[%s19411_s19 + $0x310] sm:$0xff] %vm9778_vm4, %v9748_v7  ;;  %v9751_v16 = vsel %vm9495_vm6, %v9367_v6, %v9623_v40  ;;  %vm9494_vm1 = vcmp.ge.f32.partialorder %v9366_v59, 0.0  ;;  %v9622_v31 = vmul.f32 0.01, %v9366_v59  ;;  %v9369_v17 = vadd.f32 %v19739_v20, %v9234_v2  ;;  %v9012_v21 = vpop.f32.mrf.mxu0  ;;  %v22050_v7 = vld [vmem:[#allocation62_spill] sm:$0xff] }
 0x52a   : > { %9880 = vst.msk [vmem:[%s19411_s19 + $0x328] sm:$0xff] %vm9778_vm4, %v9751_v16  ;;  %v9233_v28 = vadd.f32 %v9002_v39, %v8380_v24  ;;  %v8383_v27 = vadd.f32 %v13855_v12, %v22044_v45  ;;  %v8159_v37 = vpop.f32.mrf.mxu1 }
 0x52b   : > { %v9750_v14 = vsel %vm9494_vm1, %v9366_v59, %v9622_v31  ;;  %vm9497_vm3 = vcmp.ge.f32.partialorder %v9369_v17, 0.0  ;;  %v9625_v0 = vmul.f32 0.01, %v9369_v17  ;;  %v8382_v57 = vadd.f32 %v8159_v37, %v22045_v23  ;;  %v14052_v19 = vpop.f32.mrf.mxu0 }
 0x52c   : > { %9879 = vst.msk [vmem:[%s19411_s19 + $0x320] sm:$0xff] %vm9778_vm4, %v9750_v14  ;;  %v9368_v1 = vadd.f32 %v19739_v20, %v9233_v28  ;;  %v9236_v61 = vadd.f32 %v14049_v54, %v8383_v27  ;;  %v13858_v56 = vpop.f32.mrf.mxu1  ;;  %v22051_v28 = vld [vmem:[#allocation154_spill] sm:$0xff] }
 0x52d   : > { %v9753_v36 = vsel %vm9497_vm3, %v9369_v17, %v9625_v0  ;;  %v9235_v62 = vadd.f32 %v9012_v21, %v8382_v57  ;;  %v8385_v51 = vadd.f32 %v13858_v56, %v22046_v46  ;;  %v9022_v38 = vpop.f32.mrf.mxu0 }
 0x52e   : > { %9882 = vst.msk [vmem:[%s19411_s19 + $0x338] sm:$0xff] %vm9778_vm4, %v9753_v36  ;;  %vm9496_vm2 = vcmp.ge.f32.partialorder %v9368_v1, 0.0  ;;  %v9624_v26 = vmul.f32 0.01, %v9368_v1  ;;  %v9371_v18 = vadd.f32 %v19739_v20, %v9236_v61  ;;  %v8169_v30 = vpop.f32.mrf.mxu1 }
 0x52f   : > { %v9370_v13 = vadd.f32 %v19739_v20, %v9235_v62  ;;  %v9238_v48 = vadd.f32 %v14052_v19, %v8385_v51  ;;  %v8384_v5 = vadd.f32 %v8169_v30, %v22047_v44  ;;  %v14055_v50 = vpop.f32.mrf.mxu0  ;;  %v22052_v19 = vld [vmem:[#allocation169_spill] sm:$0xff]  ;;  %v22053_v30 = vld [vmem:[#allocation64_spill] sm:$0xff] }
 0x530   : > { %v9752_v41 = vsel %vm9496_vm2, %v9368_v1, %v9624_v26  ;;  %vm9499_vm7 = vcmp.ge.f32.partialorder %v9371_v18, 0.0  ;;  %v9627_v4 = vmul.f32 0.01, %v9371_v18  ;;  %v13861_v32 = vpop.f32.mrf.mxu1 }
 0x531   : > { %9881 = vst.msk [vmem:[%s19411_s19 + $0x330] sm:$0xff] %vm9778_vm4, %v9752_v41  ;;  %vm9498_vm8 = vcmp.ge.f32.partialorder %v9370_v13, 0.0  ;;  %v9626_v63 = vmul.f32 0.01, %v9370_v13  ;;  %v9373_v20 = vadd.f32 %v19973_v10, %v9238_v48  ;;  %v9237_v25 = vadd.f32 %v9022_v38, %v8384_v5  ;;  %v9032_v33 = vpop.f32.mrf.mxu0 }
 0x532   : > { %v9755_v8 = vsel %vm9499_vm7, %v9371_v18, %v9627_v4  ;;  %v8387_v6 = vadd.f32 %v13861_v32, %v22048_v9  ;;  %v8179_v47 = vpop.f32.mrf.mxu1  ;;  %v22054_v32 = vld [vmem:[#allocation170_spill] sm:$0xff] }
 0x533   : > { %9884 = vst.msk [vmem:[%s19411_s19 + $0x348] sm:$0xff] %vm9778_vm4, %v9755_v8  ;;  %v9754_v55 = vsel %vm9498_vm8, %v9370_v13, %v9626_v63  ;;  %vm9501_vm9 = vcmp.ge.f32.partialorder %v9373_v20, 0.0  ;;  %v9629_v11 = vmul.f32 0.01, %v9373_v20  ;;  %v9372_v39 = vadd.f32 %v19973_v10, %v9237_v25  ;;  %v14058_v43 = vpop.f32.mrf.mxu0 }
 0x534   : > { %9883 = vst.msk [vmem:[%s19411_s19 + $0x340] sm:$0xff] %vm9778_vm4, %v9754_v55  ;;  %v9240_v22 = vadd.f32 %v14055_v50, %v8387_v6  ;;  %v8386_v40 = vadd.f32 %v8179_v47, %v22049_v34  ;;  %v13864_v59 = vpop.f32.mrf.mxu1 }
 0x535   : > { %v9757_v2 = vsel %vm9501_vm9, %v9373_v20, %v9629_v11  ;;  %vm9500_vm10 = vcmp.ge.f32.partialorder %v9372_v39, 0.0  ;;  %v9628_v54 = vmul.f32 0.01, %v9372_v39  ;;  %v8389_v15 = vadd.f32 %v13864_v59, %v22050_v7  ;;  %v9042_v24 = vpop.f32.mrf.mxu0 }
 0x536   : > { %9886 = vst.msk [vmem:[%s19411_s19 + $0x358] sm:$0xff] %vm9778_vm4, %v9757_v2  ;;  %v9375_v12 = vadd.f32 %v19973_v10, %v9240_v22  ;;  %v9239_v16 = vadd.f32 %v9032_v33, %v8386_v40  ;;  %v8189_v31 = vpop.f32.mrf.mxu1 }
 0x537   : > { %v9756_v17 = vsel %vm9500_vm10, %v9372_v39, %v9628_v54  ;;  %v9242_v21 = vadd.f32 %v14058_v43, %v8389_v15  ;;  %v8388_v45 = vadd.f32 %v8189_v31, %v22051_v28  ;;  %v14061_v27 = vpop.f32.mrf.mxu0  ;;  %v22055_v43 = vld [vmem:[#allocation6_spill] sm:$0xff] }
 0x538   : > { %9885 = vst.msk [vmem:[%s19411_s19 + $0x350] sm:$0xff] %vm9778_vm4, %v9756_v17  ;;  %vm9503_vm11 = vcmp.ge.f32.partialorder %v9375_v12, 0.0  ;;  %v9631_v37 = vmul.f32 0.01, %v9375_v12  ;;  %v9374_v14 = vadd.f32 %v19973_v10, %v9239_v16  ;;  %v13867_v0 = vpop.f32.mrf.mxu1 }
 0x539   : > { %v9377_v23 = vadd.f32 %v19973_v10, %v9242_v21  ;;  %v9241_v57 = vadd.f32 %v9042_v24, %v8388_v45  ;;  %v8391_v1 = vadd.f32 %v13867_v0, %v22052_v19  ;;  %v9052_v61 = vpop.f32.mrf.mxu0 }
 0x53a   : > { %v9759_v56 = vsel %vm9503_vm11, %v9375_v12, %v9631_v37  ;;  %vm9502_vm12 = vcmp.ge.f32.partialorder %v9374_v14, 0.0  ;;  %v9630_v36 = vmul.f32 0.01, %v9374_v14  ;;  %v8199_v62 = vpop.f32.mrf.mxu1 }
 0x53b   : > { %9888 = vst.msk [vmem:[%s19411_s19 + $0x368] sm:$0xff] %vm9778_vm4, %v9759_v56  ;;  %vm9505_vm13 = vcmp.ge.f32.partialorder %v9377_v23, 0.0  ;;  %v9633_v46 = vmul.f32 0.01, %v9377_v23  ;;  %v9376_v51 = vadd.f32 %v19973_v10, %v9241_v57  ;;  %v9244_v38 = vadd.f32 %v14061_v27, %v8391_v1  ;;  %v14064_v26 = vpop.f32.mrf.mxu0 }
 0x53c   : > { %v9758_v18 = vsel %vm9502_vm12, %v9374_v14, %v9630_v36  ;;  %v8390_v13 = vadd.f32 %v8199_v62, %v22053_v30  ;;  %v13870_v48 = vpop.f32.mrf.mxu1 }
 0x53d   : > { %9887 = vst.msk [vmem:[%s19411_s19 + $0x360] sm:$0xff] %vm9778_vm4, %v9758_v18  ;;  %v9761_v44 = vsel %vm9505_vm13, %v9377_v23, %v9633_v46  ;;  %vm9504_vm14 = vcmp.ge.f32.partialorder %v9376_v51, 0.0  ;;  %v9632_v5 = vmul.f32 0.01, %v9376_v51  ;;  %v9379_v50 = vadd.f32 %v19973_v10, %v9244_v38  ;;  %v9062_v41 = vpop.f32.mrf.mxu0 }
 0x53e   : > { %9890 = vst.msk [vmem:[%s19411_s19 + $0x378] sm:$0xff] %vm9778_vm4, %v9761_v44  ;;  %v9243_v4 = vadd.f32 %v9052_v61, %v8390_v13  ;;  %v8393_v63 = vadd.f32 %v13870_v48, %v22054_v32  ;;  %v8209_v20 = vpop.f32.mrf.mxu1 }
 0x53f   : > { %v9760_v25 = vsel %vm9504_vm14, %v9376_v51, %v9632_v5  ;;  %vm9507_vm15 = vcmp.ge.f32.partialorder %v9379_v50, 0.0  ;;  %v9635_v33 = vmul.f32 0.01, %v9379_v50  ;;  %v8392_v8 = vadd.f32 %v8209_v20, %v19302_v60  ;;  %v14067_v9 = vpop.f32.mrf.mxu0 }
 0x540   : > { %9889 = vst.msk [vmem:[%s19411_s19 + $0x370] sm:$0xff] %vm9778_vm4, %v9760_v25  ;;  %v9378_v6 = vadd.f32 %v19973_v10, %v9243_v4  ;;  %v9246_v47 = vadd.f32 %v14064_v26, %v8393_v63  ;;  %v13873_v55 = vpop.f32.mrf.mxu1 }
 0x541   : > { %v9763_v11 = vsel %vm9507_vm15, %v9379_v50, %v9635_v33  ;;  %v9245_v39 = vadd.f32 %v9062_v41, %v8392_v8  ;;  %v8395_v22 = vadd.f32 %v13873_v55, %v22055_v43  ;;  %v9072_v34 = vpop.f32.mrf.mxu0 }
 0x542   : > { %9892 = vst.msk [vmem:[%s19411_s19 + $0x388] sm:$0xff] %vm9778_vm4, %v9763_v11  ;;  %vm9506_vm0 = vcmp.ge.f32.partialorder %v9378_v6, 0.0  ;;  %v9634_v40 = vmul.f32 0.01, %v9378_v6  ;;  %v9381_v59 = vadd.f32 %v19973_v10, %v9246_v47  ;;  %v8219_v60 = vpop.f32.mrf.mxu1 }
 0x543   : > { %v9380_v2 = vadd.f32 %v19973_v10, %v9245_v39  ;;  %v9248_v54 = vadd.f32 %v14067_v9, %v8395_v22  ;;  %v8394_v7 = vadd.f32 %v8219_v60, %v19316_v42  ;;  %v14070_v15 = vpop.f32.mrf.mxu0 }
 0x544   : > { %v9762_v24 = vsel %vm9506_vm0, %v9378_v6, %v9634_v40  ;;  %vm9509_vm5 = vcmp.ge.f32.partialorder %v9381_v59, 0.0  ;;  %v9637_v12 = vmul.f32 0.01, %v9381_v59  ;;  %v13876_v16 = vpop.f32.mrf.mxu1 }
 0x545   : > { %9891 = vst.msk [vmem:[%s19411_s19 + $0x380] sm:$0xff] %vm9778_vm4, %v9762_v24  ;;  %vm9508_vm6 = vcmp.ge.f32.partialorder %v9380_v2, 0.0  ;;  %v9636_v31 = vmul.f32 0.01, %v9380_v2  ;;  %v9383_v17 = vadd.f32 %v19973_v10, %v9248_v54  ;;  %v9247_v21 = vadd.f32 %v9072_v34, %v8394_v7  ;;  %v9082_v28 = vpop.f32.mrf.mxu0  ;;  %v22056_v34 = vld [vmem:[#allocation66_spill] sm:$0xff]  ;;  %v22057_v24 = vld [vmem:[#allocation8_spill] sm:$0xff] }
 0x546   : > { %v9765_v45 = vsel %vm9509_vm5, %v9381_v59, %v9637_v12  ;;  %v8397_v27 = vadd.f32 %v13876_v16, %v19321_v29  ;;  %v8229_v37 = vpop.f32.mrf.mxu1 }
 0x547   : > { %9894 = vst.msk [vmem:[%s19411_s19 + $0x398] sm:$0xff] %vm9778_vm4, %v9765_v45  ;;  %v9764_v42 = vsel %vm9508_vm6, %v9380_v2, %v9636_v31  ;;  %vm9511_vm1 = vcmp.ge.f32.partialorder %v9383_v17, 0.0  ;;  %v9639_v14 = vmul.f32 0.01, %v9383_v17  ;;  %v9382_v0 = vadd.f32 %v19973_v10, %v9247_v21  ;;  %v14073_v23 = vpop.f32.mrf.mxu0 }
 0x548   : > { %9893 = vst.msk [vmem:[%s19411_s19 + $0x390] sm:$0xff] %vm9778_vm4, %v9764_v42  ;;  %v9250_v57 = vadd.f32 %v14070_v15, %v8397_v27  ;;  %v8396_v19 = vadd.f32 %v8229_v37, %v19330_v49  ;;  %v13879_v1 = vpop.f32.mrf.mxu1 }
 0x549   : > { %v9767_v61 = vsel %vm9511_vm1, %v9383_v17, %v9639_v14  ;;  %vm9510_vm3 = vcmp.ge.f32.partialorder %v9382_v0, 0.0  ;;  %v9638_v29 = vmul.f32 0.01, %v9382_v0  ;;  %v8399_v56 = vadd.f32 %v13879_v1, %v19335_v53  ;;  %v9092_v36 = vpop.f32.mrf.mxu0 }
 0x54a   : > { %9896 = vst.msk [vmem:[%s19411_s19 + $0x3a8] sm:$0xff] %vm9778_vm4, %v9767_v61  ;;  %v9385_v62 = vadd.f32 %v19973_v10, %v9250_v57  ;;  %v9249_v46 = vadd.f32 %v9082_v28, %v8396_v19  ;;  %v8239_v51 = vpop.f32.mrf.mxu1  ;;  %v22058_v28 = vld [vmem:[#allocation172_spill] sm:$0xff] }
 0x54b   : > { %v9766_v38 = vsel %vm9510_vm3, %v9382_v0, %v9638_v29  ;;  %v9252_v26 = vadd.f32 %v14073_v23, %v8399_v56  ;;  %v8398_v18 = vadd.f32 %v8239_v51, %v19344_v52  ;;  %v14076_v30 = vpop.f32.mrf.mxu0 }
 0x54c   : > { %9895 = vst.msk [vmem:[%s19411_s19 + $0x3a0] sm:$0xff] %vm9778_vm4, %v9766_v38  ;;  %vm9513_vm2 = vcmp.ge.f32.partialorder %v9385_v62, 0.0  ;;  %v9641_v49 = vmul.f32 0.01, %v9385_v62  ;;  %v9384_v13 = vadd.f32 %v19973_v10, %v9249_v46  ;;  %v13882_v53 = vpop.f32.mrf.mxu1 }
 0x54d   : > { %v9387_v48 = vadd.f32 %v19973_v10, %v9252_v26  ;;  %v9251_v44 = vadd.f32 %v9092_v36, %v8398_v18  ;;  %v8401_v5 = vadd.f32 %v13882_v53, %v19349_v35  ;;  %v9102_v50 = vpop.f32.mrf.mxu0 }
 0x54e   : > { %v9769_v41 = vsel %vm9513_vm2, %v9385_v62, %v9641_v49  ;;  %vm9512_vm7 = vcmp.ge.f32.partialorder %v9384_v13, 0.0  ;;  %v9640_v4 = vmul.f32 0.01, %v9384_v13  ;;  %v8249_v32 = vpop.f32.mrf.mxu1 }
 0x54f   : > { %9898 = vst.msk [vmem:[%s19411_s19 + $0x3b8] sm:$0xff] %vm9778_vm4, %v9769_v41  ;;  %vm9515_vm8 = vcmp.ge.f32.partialorder %v9387_v48, 0.0  ;;  %v9643_v52 = vmul.f32 0.01, %v9387_v48  ;;  %v9386_v63 = vadd.f32 %v19973_v10, %v9251_v44  ;;  %v9254_v20 = vadd.f32 %v14076_v30, %v8401_v5  ;;  %v14079_v25 = vpop.f32.mrf.mxu0 }
 0x550   : > { %v9768_v33 = vsel %vm9512_vm7, %v9384_v13, %v9640_v4  ;;  %v8400_v8 = vadd.f32 %v8249_v32, %v19358_v58  ;;  %v13885_v9 = vpop.f32.mrf.mxu1 }
 0x551   : > { %9897 = vst.msk [vmem:[%s19411_s19 + $0x3b0] sm:$0xff] %vm9778_vm4, %v9768_v33  ;;  %v9771_v35 = vsel %vm9515_vm8, %v9387_v48, %v9643_v52  ;;  %vm9514_vm9 = vcmp.ge.f32.partialorder %v9386_v63, 0.0  ;;  %v9642_v6 = vmul.f32 0.01, %v9386_v63  ;;  %v9389_v47 = vadd.f32 %v19973_v10, %v9254_v20  ;;  %v9112_v55 = vpop.f32.mrf.mxu0 }
 0x552   : > { %9900 = vst.msk [vmem:[%s19411_s19 + $0x3c8] sm:$0xff] %vm9778_vm4, %v9771_v35  ;;  %v9253_v11 = vadd.f32 %v9102_v50, %v8400_v8  ;;  %v8403_v39 = vadd.f32 %v13885_v9, %v19363_v3  ;;  %v8259_v43 = vpop.f32.mrf.mxu1 }
 0x553   : > { %v9770_v22 = vsel %vm9514_vm9, %v9386_v63, %v9642_v6  ;;  %vm9517_vm10 = vcmp.ge.f32.partialorder %v9389_v47, 0.0  ;;  %v9645_v58 = vmul.f32 0.01, %v9389_v47  ;;  %v8402_v40 = vadd.f32 %v8259_v43, %v22056_v34  ;;  %v14082_v54 = vpop.f32.mrf.mxu0 }
 0x554   : > { %9899 = vst.msk [vmem:[%s19411_s19 + $0x3c0] sm:$0xff] %vm9778_vm4, %v9770_v22  ;;  %v9388_v59 = vadd.f32 %v19973_v10, %v9253_v11  ;;  %v9256_v60 = vadd.f32 %v14079_v25, %v8403_v39  ;;  %v13888_v2 = vpop.f32.mrf.mxu1 }
 0x555   : > { %v9773_v7 = vsel %vm9517_vm10, %v9389_v47, %v9645_v58  ;;  %v9255_v15 = vadd.f32 %v9112_v55, %v8402_v40  ;;  %v8405_v12 = vadd.f32 %v13888_v2, %v22057_v24  ;;  %v9122_v42 = vpop.f32.mrf.mxu0 }
 0x556   : > { %9902 = vst.msk [vmem:[%s19411_s19 + $0x3d8] sm:$0xff] %vm9778_vm4, %v9773_v7  ;;  %vm9516_vm11 = vcmp.ge.f32.partialorder %v9388_v59, 0.0  ;;  %v9644_v3 = vmul.f32 0.01, %v9388_v59  ;;  %v9391_v16 = vadd.f32 %v19973_v10, %v9256_v60  ;;  %v8269_v31 = vpop.f32.mrf.mxu1 }
 0x557   : > { %v9390_v17 = vadd.f32 %v19973_v10, %v9255_v15  ;;  %v9258_v21 = vadd.f32 %v14082_v54, %v8405_v12  ;;  %v8404_v45 = vadd.f32 %v8269_v31, %v22058_v28 }
 0x558   : > { %v9772_v27 = vsel %vm9516_vm11, %v9388_v59, %v9644_v3  ;;  %vm9519_vm12 = vcmp.ge.f32.partialorder %v9391_v16, 0.0  ;;  %v9647_v37 = vmul.f32 0.01, %v9391_v16 }
 0x559   : > { %9901 = vst.msk [vmem:[%s19411_s19 + $0x3d0] sm:$0xff] %vm9778_vm4, %v9772_v27  ;;  %vm9518_vm13 = vcmp.ge.f32.partialorder %v9390_v17, 0.0  ;;  %v9646_v14 = vmul.f32 0.01, %v9390_v17  ;;  %v9393_v0 = vadd.f32 %v19973_v10, %v9258_v21  ;;  %v9257_v23 = vadd.f32 %v9122_v42, %v8404_v45 }
 0x55a   : > { %v9775_v57 = vsel %vm9519_vm12, %v9391_v16, %v9647_v37 }
 0x55b   : > { %9904 = vst.msk [vmem:[%s19411_s19 + $0x3e8] sm:$0xff] %vm9778_vm4, %v9775_v57  ;;  %v9774_v19 = vsel %vm9518_vm13, %v9390_v17, %v9646_v14  ;;  %vm9521_vm14 = vcmp.ge.f32.partialorder %v9393_v0, 0.0  ;;  %v9649_v1 = vmul.f32 0.01, %v9393_v0  ;;  %v9392_v61 = vadd.f32 %v19973_v10, %v9257_v23 }
 0x55c   : > { %9903 = vst.msk [vmem:[%s19411_s19 + $0x3e0] sm:$0xff] %vm9778_vm4, %v9774_v19 }
 0x55d   : > { %v9777_v29 = vsel %vm9521_vm14, %v9393_v0, %v9649_v1  ;;  %vm9520_vm15 = vcmp.ge.f32.partialorder %v9392_v61, 0.0  ;;  %v9648_v56 = vmul.f32 0.01, %v9392_v61 }
 0x55e   : > { %9906 = vst.msk [vmem:[%s19411_s19 + $0x3f8] sm:$0xff] %vm9778_vm4, %v9777_v29 }
 0x55f   : > { %v9776_v36 = vsel %vm9520_vm15, %v9392_v61, %v9648_v56 }
 0x560   : > { %9905 = vst.msk [vmem:[%s19411_s19 + $0x3f0] sm:$0xff] %vm9778_vm4, %v9776_v36 }
 0x561 PF: > { %s13_s14 = sadd.s32 1, %s14493_s14   ;;  %s22059_s12 = smov %s14489_s13 }
 0x562   : > { %p10_p5 = scmp.ge.s32.totalorder %s13_s14, 4   ;;  %s22060_s13 = smov %s22062_s15 }
 0x564   :  { %12 = sbr.rel (!%p10_p5) target bundleno = 2 (0x2), region = 62 }

</bundles_post_ra>
